<compile_context>
chip_gen: v7x
topology: tpu7x:2x2x1
jax: 0.10.0
libtpu: 0.0.40
codegen_flags: <defaults>
</compile_context>

<pallas_src>
import functools
import math

import jax
import jax.numpy as jnp
from jax import lax
from jax.experimental import pallas as pl
from jax.experimental.pallas import tpu as pltpu


def _residual_mlp_kernel(x_ref, w1_ref, w2_ref, params_ref, o_ref, *,
                         eps, matmul_dtype, approx_gelu):
    # x_ref: (tm, H) token tile; w1/w2: resident (H, H); params: (4, H) packed
    # [b1; b2; gamma; beta].  Elementwise math in f32, MXU operands in
    # `matmul_dtype` (bf16 by default) with f32 accumulation.
    x = x_ref[...].astype(jnp.float32)
    params = params_ref[...].astype(jnp.float32)
    b1 = params[0:1, :]
    b2 = params[1:2, :]
    gamma = params[2:3, :]
    beta = params[3:4, :]

    # ---- Linear 1 (MXU, f32 accumulate) ----
    h = jnp.dot(x.astype(matmul_dtype), w1_ref[...],
                preferred_element_type=jnp.float32) + b1

    # ---- GELU ----
    if approx_gelu:
        # tanh approximation (EUP slot); slightly different numerics vs erf.
        c = math.sqrt(2.0 / math.pi)
        h = 0.5 * h * (1.0 + jnp.tanh(c * (h + 0.044715 * (h * h * h))))
    else:
        # exact erf form: matches nn.GELU() default.
        h = 0.5 * h * (1.0 + lax.erf(h * (1.0 / math.sqrt(2.0))))

    # ---- Linear 2 (MXU, f32 accumulate) ----
    h = jnp.dot(h.astype(matmul_dtype), w2_ref[...],
                preferred_element_type=jnp.float32) + b2

    # ---- Dropout: identity in eval mode ----
    # TODO(synk): training-mode dropout needs pltpu.prng_seed / prng_random_bits.

    # ---- LayerNorm over the feature axis: one-pass statistics ----
    mean = jnp.mean(h, axis=-1, keepdims=True)
    mean_sq = jnp.mean(h * h, axis=-1, keepdims=True)
    var = mean_sq - mean * mean
    y = (h - mean) * lax.rsqrt(var + eps) * gamma + beta

    # ---- Residual ----
    o_ref[...] = (x + y).astype(o_ref.dtype)


def _round_up(v, m):
    return -(-v // m) * m


def _device_info():
    """(per-core VMEM capacity bytes, has-2-TensorCores)."""
    vmem_cap = None
    try:
        info = pltpu.get_tpu_info()
        cap = int(getattr(info, "vmem_capacity_bytes", 0))
        vmem_cap = cap if cap > 0 else None
    except Exception:
        vmem_cap = None
    kind = ""
    try:
        kind = jax.devices()[0].device_kind.lower()
    except Exception:
        kind = ""
    two_cores = ("v7" in kind) or ("tpu7" in kind)
    if vmem_cap is None:
        vmem_cap = (64 if two_cores else 128) * 1024 * 1024
    return vmem_cap, two_cores


def _choose_tm(n, tm_req, two_cores):
    """Token tile: multiple of 8, as large as requested (never larger than the
    padded input).  Only on 2-TensorCore chips (v7x) cap so the grid keeps
    >= 4 steps (>= 2 per core) when N allows, so each core still overlaps its
    double-buffered DMA with compute.  Single-core v5e/v6e keep the full tile."""
    tm = max(8, (int(tm_req) // 8) * 8)
    tm = min(tm, _round_up(n, 8))
    if two_cores and n > 4 * 8:
        cap = max(8, _round_up(pl.cdiv(n, 4), 8))
        tm = min(tm, cap)
    return max(8, tm)


# Flipped to False (once) if the installed JAX rejects single-buffered specs.
_STATE = {"single_buffer_ok": True}


def residual_block(x, w1, b1, w2, b2, gamma, beta, *, eps=1e-5, tm=None,
                   matmul_dtype=jnp.bfloat16, approx_gelu=False,
                   out_dtype=None):
    """x: (batch, seq, H).  w1/w2 are stored (in, out), i.e. transposed relative
    to PyTorch nn.Linear's (out, in).  matmul_dtype=None -> pure-f32 MXU path
    (bit-closer to the reference).  out_dtype=jnp.bfloat16 halves writeback
    bytes if downstream accepts it."""
    batch, seq, H = x.shape
    assert w1.shape == (H, H) and w2.shape == (H, H), \
        "residual add requires in_features == out_features"
    N = batch * seq
    if tm is None:
        tm = 2048 if H <= 512 else 1024

    vmem_cap, two_cores = _device_info()
    tm = _choose_tm(N, tm, two_cores)
    grid = pl.cdiv(N, tm)
    n_pad = grid * tm

    x2 = x.reshape(N, H)
    if n_pad != N:
        # Padded (zero) rows flow through GELU/LayerNorm harmlessly (eps keeps
        # rsqrt finite) and are sliced off below -- do not remove the slice.
        x2 = jnp.pad(x2, ((0, n_pad - N), (0, 0)))

    if matmul_dtype is None:
        matmul_dtype = x.dtype
    if out_dtype is None:
        out_dtype = x.dtype
    w1_c = w1.astype(matmul_dtype)
    w2_c = w2.astype(matmul_dtype)

    # Pack the four per-feature vectors into one (4, H) slab -> single BlockSpec.
    params = jnp.stack([b1, b2, gamma, beta], axis=0).astype(jnp.float32)

    xsize = jnp.dtype(x.dtype).itemsize
    osize = jnp.dtype(out_dtype).itemsize
    wsize = jnp.dtype(matmul_dtype).itemsize
    cost = pl.CostEstimate(
        flops=4 * n_pad * H * H,             # two (n_pad,H)x(H,H) matmuls
        transcendentals=n_pad * H,           # one erf/tanh per element in GELU
        bytes_accessed=(n_pad * H * (xsize + osize)
                        + 2 * H * H * wsize + 4 * H * 4))

    kernel = functools.partial(_residual_mlp_kernel, eps=eps,
                               matmul_dtype=matmul_dtype,
                               approx_gelu=approx_gelu)
    full = lambda i: (0, 0)

    def run(single_buffer_weights):
        wbuf = 1 if single_buffer_weights else 2
        # VMEM budget: double-buffered x/out tiles, weights (single- or
        # double-buffered), packed params, + f32 intermediates headroom.
        vmem_need = (2 * tm * H * (xsize + osize)
                     + wbuf * 2 * H * H * wsize
                     + wbuf * 4 * H * 4
                     + 4 * tm * H * 4)
        vmem_ceiling = int(0.75 * vmem_cap)   # ~48 MiB v7x, ~96 MiB v5e/v6e
        vmem_limit = max(2 * vmem_need, 32 * 1024 * 1024)
        vmem_limit = int(max(min(vmem_limit, vmem_ceiling), vmem_need))

        if single_buffer_weights:
            w_spec = lambda shape: pl.BlockSpec(shape, full,
                                                pipeline_mode=pl.Buffered(1))
        else:
            w_spec = lambda shape: pl.BlockSpec(shape, full)

        return pl.pallas_call(
            kernel,
            out_shape=jax.ShapeDtypeStruct((n_pad, H), out_dtype),
            grid_spec=pltpu.PrefetchScalarGridSpec(
                num_scalar_prefetch=0,
                grid=(grid,),
                in_specs=[
                    pl.BlockSpec((tm, H), lambda i: (i, 0)),  # x tile
                    w_spec((H, H)),                           # w1 (resident)
                    w_spec((H, H)),                           # w2 (resident)
                    w_spec((4, H)),                           # b1/b2/gamma/beta
                ],
                out_specs=pl.BlockSpec((tm, H), lambda i: (i, 0)),
            ),
            compiler_params=pltpu.CompilerParams(
                dimension_semantics=("parallel",),
                vmem_limit_bytes=vmem_limit),
            cost_estimate=cost,
        )(x2, w1_c, w2_c, params)

    if _STATE["single_buffer_ok"]:
        try:
            out2 = run(True)
        except Exception:
            # Installed JAX rejected Buffered(1); fall back to default
            # double-buffered weight specs (costs a little extra VMEM only).
            _STATE["single_buffer_ok"] = False
            out2 = run(False)
    else:
        out2 = run(False)

    if n_pad != N:
        out2 = out2[:N]
    return out2.reshape(batch, seq, H)


def _reference(x, w1, b1, w2, b2, gamma, beta, eps=1e-5):
    h = x @ w1 + b1
    h = jax.nn.gelu(h, approximate=False)
    h = h @ w2 + b2
    mean = h.mean(-1, keepdims=True)
    var = ((h - mean) ** 2).mean(-1, keepdims=True)
    y = (h - mean) / jnp.sqrt(var + eps) * gamma + beta
    return x + y


if __name__ == "__main__":
    H = 128  # in_features == out_features (required by the residual add)
    key = jax.random.PRNGKey(0)
    kx, k1, k2, k3, k4, k5, k6, kx2 = jax.random.split(key, 8)

    bound = 1.0 / math.sqrt(H)
    w1 = jax.random.uniform(k1, (H, H), minval=-bound, maxval=bound, dtype=jnp.float32)
    b1 = jax.random.uniform(k2, (H,), minval=-bound, maxval=bound, dtype=jnp.float32)
    w2 = jax.random.uniform(k3, (H, H), minval=-bound, maxval=bound, dtype=jnp.float32)
    b2 = jax.random.uniform(k4, (H,), minval=-bound, maxval=bound, dtype=jnp.float32)
    gamma = 1.0 + 0.1 * jax.random.normal(k5, (H,), dtype=jnp.float32)
    beta = 0.1 * jax.random.normal(k6, (H,), dtype=jnp.float32)

    # Case 1: aligned token count (N = 512).
    x = jax.random.normal(kx, (2, 256, H), dtype=jnp.float32)
    out = jax.block_until_ready(residual_block(x, w1, b1, w2, b2, gamma, beta))
    ref = _reference(x, w1, b1, w2, b2, gamma, beta)
    assert out.shape == x.shape
    assert jnp.allclose(out, ref, atol=5e-2, rtol=5e-2), "mismatch (aligned, bf16 MXU)"

    # Case 2: ragged token count (N = 154) -> exercises padding + output slice.
    x_r = jax.random.normal(kx2, (2, 77, H), dtype=jnp.float32)
    out_r = jax.block_until_ready(residual_block(x_r, w1, b1, w2, b2, gamma, beta))
    ref_r = _reference(x_r, w1, b1, w2, b2, gamma, beta)
    assert out_r.shape == x_r.shape
    assert jnp.allclose(out_r, ref_r, atol=5e-2, rtol=5e-2), "mismatch (ragged, bf16 MXU)"

    # Case 3: pure-f32 MXU path (bit-closer to the reference).
    out_f = jax.block_until_ready(
        residual_block(x_r, w1, b1, w2, b2, gamma, beta, matmul_dtype=None))
    assert jnp.allclose(out_f, ref_r, atol=5e-3, rtol=5e-3), "mismatch (f32 MXU)"

    # Case 4: bf16 output path (halves writeback bytes for downstream bf16).
    out_b = jax.block_until_ready(
        residual_block(x, w1, b1, w2, b2, gamma, beta, out_dtype=jnp.bfloat16))
    assert out_b.dtype == jnp.bfloat16
    assert jnp.allclose(out_b.astype(jnp.float32), ref, atol=1e-1, rtol=1e-1), \
        "mismatch (bf16 out)"

    print("KERNEL_OK")
</pallas_src>

<mosaic_0001>
module attributes {stable_mosaic.version = 11 : i64} {
  func.func @_residual_mlp_kernel(%arg0: i32, %arg1: memref<512x128xf32, #tpu.memory_space<vmem>>, %arg2: memref<128x128xbf16, #tpu.memory_space<vmem>>, %arg3: memref<128x128xbf16, #tpu.memory_space<vmem>>, %arg4: memref<4x128xf32, #tpu.memory_space<vmem>>, %arg5: memref<512x128xf32, #tpu.memory_space<vmem>>) attributes {dimension_semantics = [#tpu.dimension_semantics<parallel>], iteration_bounds = array<i64: 1>, scalar_prefetch = 0 : i64, scratch_operands = 0 : i64, tpu.core_type = #tpu.core_type<tc>, window_params = [{transform_indices = @transform_0, window_bounds = array<i64: 512, 128>}, {pipeline_mode = #tpu.pipeline_mode<synchronous>, transform_indices = @transform_1, window_bounds = array<i64: 128, 128>}, {pipeline_mode = #tpu.pipeline_mode<synchronous>, transform_indices = @transform_2, window_bounds = array<i64: 128, 128>}, {pipeline_mode = #tpu.pipeline_mode<synchronous>, transform_indices = @transform_3, window_bounds = array<i64: 4, 128>}, {transform_indices = @transform_4, window_bounds = array<i64: 512, 128>}]} {
    %c0 = arith.constant 0 : index
    %c0_0 = arith.constant 0 : index
    %0 = vector.load %arg1[%c0, %c0_0] : memref<512x128xf32, #tpu.memory_space<vmem>>, vector<512x128xf32>
    %c0_1 = arith.constant 0 : index
    %c0_2 = arith.constant 0 : index
    %1 = vector.load %arg4[%c0_1, %c0_2] : memref<4x128xf32, #tpu.memory_space<vmem>>, vector<4x128xf32>
    %2 = vector.extract_strided_slice %1 {offsets = [0, 0], sizes = [1, 128], strides = [1, 1]} : vector<4x128xf32> to vector<1x128xf32>
    %3 = vector.extract_strided_slice %1 {offsets = [1, 0], sizes = [1, 128], strides = [1, 1]} : vector<4x128xf32> to vector<1x128xf32>
    %4 = vector.extract_strided_slice %1 {offsets = [2, 0], sizes = [1, 128], strides = [1, 1]} : vector<4x128xf32> to vector<1x128xf32>
    %5 = vector.extract_strided_slice %1 {offsets = [3, 0], sizes = [1, 128], strides = [1, 1]} : vector<4x128xf32> to vector<1x128xf32>
    %6 = arith.truncf %0 : vector<512x128xf32> to vector<512x128xbf16>
    %c0_3 = arith.constant 0 : index
    %c0_4 = arith.constant 0 : index
    %7 = vector.load %arg2[%c0_3, %c0_4] : memref<128x128xbf16, #tpu.memory_space<vmem>>, vector<128x128xbf16>
    %cst = arith.constant dense<0.000000e+00> : vector<512x128xf32>
    %8 = tpu.matmul %6, %7, %cst {dimension_numbers = #tpu.dot_dimension_numbers<[1], [0], [0], [1], [0, 0, 1, 1], [], []>} : vector<512x128xbf16>, vector<128x128xbf16>, vector<512x128xf32> -> vector<512x128xf32>
    %9 = vector.broadcast %2 : vector<1x128xf32> to vector<512x128xf32>
    %10 = arith.addf %8, %9 : vector<512x128xf32>
    %cst_5 = arith.constant 5.000000e-01 : f32
    %11 = vector.broadcast %cst_5 : f32 to vector<512x128xf32>
    %12 = arith.mulf %11, %10 : vector<512x128xf32>
    %cst_6 = arith.constant 0.707106769 : f32
    %13 = vector.broadcast %cst_6 : f32 to vector<512x128xf32>
    %14 = arith.mulf %10, %13 : vector<512x128xf32>
    %15 = math.erf %14 : vector<512x128xf32>
    %cst_7 = arith.constant 1.000000e+00 : f32
    %16 = vector.broadcast %cst_7 : f32 to vector<512x128xf32>
    %17 = arith.addf %16, %15 : vector<512x128xf32>
    %18 = arith.mulf %12, %17 : vector<512x128xf32>
    %19 = arith.truncf %18 : vector<512x128xf32> to vector<512x128xbf16>
    %c0_8 = arith.constant 0 : index
    %c0_9 = arith.constant 0 : index
    %20 = vector.load %arg3[%c0_8, %c0_9] : memref<128x128xbf16, #tpu.memory_space<vmem>>, vector<128x128xbf16>
    %cst_10 = arith.constant dense<0.000000e+00> : vector<512x128xf32>
    %21 = tpu.matmul %19, %20, %cst_10 {dimension_numbers = #tpu.dot_dimension_numbers<[1], [0], [0], [1], [0, 0, 1, 1], [], []>} : vector<512x128xbf16>, vector<128x128xbf16>, vector<512x128xf32> -> vector<512x128xf32>
    %22 = vector.broadcast %3 : vector<1x128xf32> to vector<512x128xf32>
    %23 = arith.addf %21, %22 : vector<512x128xf32>
    %cst_11 = arith.constant dense<0.000000e+00> : vector<512xf32>
    %24 = vector.multi_reduction <add>, %23, %cst_11 [1] : vector<512x128xf32> to vector<512xf32>
    %25 = vector.shape_cast %24 : vector<512xf32> to vector<512x1xf32>
    %cst_12 = arith.constant 1.280000e+02 : f32
    %26 = vector.broadcast %cst_12 : f32 to vector<512x1xf32>
    %27 = arith.divf %25, %26 : vector<512x1xf32>
    %28 = arith.mulf %23, %23 : vector<512x128xf32>
    %cst_13 = arith.constant dense<0.000000e+00> : vector<512xf32>
    %29 = vector.multi_reduction <add>, %28, %cst_13 [1] : vector<512x128xf32> to vector<512xf32>
    %30 = vector.shape_cast %29 : vector<512xf32> to vector<512x1xf32>
    %cst_14 = arith.constant 1.280000e+02 : f32
    %31 = vector.broadcast %cst_14 : f32 to vector<512x1xf32>
    %32 = arith.divf %30, %31 : vector<512x1xf32>
    %33 = arith.mulf %27, %27 : vector<512x1xf32>
    %34 = arith.subf %32, %33 : vector<512x1xf32>
    %35 = vector.broadcast %27 : vector<512x1xf32> to vector<512x128xf32>
    %36 = arith.subf %23, %35 : vector<512x128xf32>
    %cst_15 = arith.constant 9.99999974E-6 : f32
    %37 = vector.broadcast %cst_15 : f32 to vector<512x1xf32>
    %38 = arith.addf %34, %37 : vector<512x1xf32>
    %39 = math.rsqrt %38 : vector<512x1xf32>
    %40 = vector.broadcast %39 : vector<512x1xf32> to vector<512x128xf32>
    %41 = arith.mulf %36, %40 : vector<512x128xf32>
    %42 = vector.broadcast %4 : vector<1x128xf32> to vector<512x128xf32>
    %43 = arith.mulf %41, %42 : vector<512x128xf32>
    %44 = vector.broadcast %5 : vector<1x128xf32> to vector<512x128xf32>
    %45 = arith.addf %43, %44 : vector<512x128xf32>
    %46 = arith.addf %0, %45 : vector<512x128xf32>
    %c0_16 = arith.constant 0 : index
    %c0_17 = arith.constant 0 : index
    %47 = vector.load %arg5[%c0_16, %c0_17] : memref<512x128xf32, #tpu.memory_space<vmem>>, vector<512x128xf32>
    tpu.vector_store %arg5[%c0_16, %c0_17], %46 {strides = array<i32>} : memref<512x128xf32, #tpu.memory_space<vmem>>, vector<512x128xf32>,
    return
  }
  func.func @transform_0(%arg0: i32) -> (i32, i32) {
    %c0_i32 = arith.constant 0 : i32
    %c0_i32_0 = arith.constant 0 : i32
    return %arg0, %c0_i32 : i32, i32
  }
  func.func @transform_1(%arg0: i32) -> (i32, i32) {
    %c0_i32 = arith.constant 0 : i32
    %c0_i32_0 = arith.constant 0 : i32
    %c0_i32_1 = arith.constant 0 : i32
    return %c0_i32, %c0_i32_0 : i32, i32
  }
  func.func @transform_2(%arg0: i32) -> (i32, i32) {
    %c0_i32 = arith.constant 0 : i32
    %c0_i32_0 = arith.constant 0 : i32
    %c0_i32_1 = arith.constant 0 : i32
    return %c0_i32, %c0_i32_0 : i32, i32
  }
  func.func @transform_3(%arg0: i32) -> (i32, i32) {
    %c0_i32 = arith.constant 0 : i32
    %c0_i32_0 = arith.constant 0 : i32
    %c0_i32_1 = arith.constant 0 : i32
    return %c0_i32, %c0_i32_0 : i32, i32
  }
  func.func @transform_4(%arg0: i32) -> (i32, i32) {
    %c0_i32 = arith.constant 0 : i32
    %c0_i32_0 = arith.constant 0 : i32
    return %arg0, %c0_i32 : i32, i32
  }
}

module attributes {stable_mosaic.version = 11 : i64} {
  func.func @_residual_mlp_kernel(%arg0: i32, %arg1: memref<512x128xf32, #tpu.memory_space<vmem>>, %arg2: memref<128x128xbf16, #tpu.memory_space<vmem>>, %arg3: memref<128x128xbf16, #tpu.memory_space<vmem>>, %arg4: memref<4x128xf32, #tpu.memory_space<vmem>>, %arg5: memref<512x128xf32, #tpu.memory_space<vmem>>) attributes {dimension_semantics = [#tpu.dimension_semantics<parallel>], iteration_bounds = array<i64: 1>, scalar_prefetch = 0 : i64, scratch_operands = 0 : i64, tpu.core_type = #tpu.core_type<tc>, window_params = [{transform_indices = @transform_0, window_bounds = array<i64: 512, 128>}, {pipeline_mode = #tpu.pipeline_mode<synchronous>, transform_indices = @transform_1, window_bounds = array<i64: 128, 128>}, {pipeline_mode = #tpu.pipeline_mode<synchronous>, transform_indices = @transform_2, window_bounds = array<i64: 128, 128>}, {pipeline_mode = #tpu.pipeline_mode<synchronous>, transform_indices = @transform_3, window_bounds = array<i64: 4, 128>}, {transform_indices = @transform_4, window_bounds = array<i64: 512, 128>}]} {
    %c0 = arith.constant 0 : index
    %c0_0 = arith.constant 0 : index
    %0 = vector.load %arg1[%c0, %c0_0] : memref<512x128xf32, #tpu.memory_space<vmem>>, vector<512x128xf32>
    %c0_1 = arith.constant 0 : index
    %c0_2 = arith.constant 0 : index
    %1 = vector.load %arg4[%c0_1, %c0_2] : memref<4x128xf32, #tpu.memory_space<vmem>>, vector<4x128xf32>
    %2 = vector.extract_strided_slice %1 {offsets = [0, 0], sizes = [1, 128], strides = [1, 1]} : vector<4x128xf32> to vector<1x128xf32>
    %3 = vector.extract_strided_slice %1 {offsets = [1, 0], sizes = [1, 128], strides = [1, 1]} : vector<4x128xf32> to vector<1x128xf32>
    %4 = vector.extract_strided_slice %1 {offsets = [2, 0], sizes = [1, 128], strides = [1, 1]} : vector<4x128xf32> to vector<1x128xf32>
    %5 = vector.extract_strided_slice %1 {offsets = [3, 0], sizes = [1, 128], strides = [1, 1]} : vector<4x128xf32> to vector<1x128xf32>
    %6 = arith.truncf %0 : vector<512x128xf32> to vector<512x128xbf16>
    %c0_3 = arith.constant 0 : index
    %c0_4 = arith.constant 0 : index
    %7 = vector.load %arg2[%c0_3, %c0_4] : memref<128x128xbf16, #tpu.memory_space<vmem>>, vector<128x128xbf16>
    %cst = arith.constant dense<0.000000e+00> : vector<512x128xf32>
    %8 = tpu.matmul %6, %7, %cst {dimension_numbers = #tpu.dot_dimension_numbers<[1], [0], [0], [1], [0, 0, 1, 1], [], []>} : vector<512x128xbf16>, vector<128x128xbf16>, vector<512x128xf32> -> vector<512x128xf32>
    %9 = vector.broadcast %2 : vector<1x128xf32> to vector<512x128xf32>
    %10 = arith.addf %8, %9 : vector<512x128xf32>
    %cst_5 = arith.constant 5.000000e-01 : f32
    %11 = vector.broadcast %cst_5 : f32 to vector<512x128xf32>
    %12 = arith.mulf %11, %10 : vector<512x128xf32>
    %cst_6 = arith.constant 0.707106769 : f32
    %13 = vector.broadcast %cst_6 : f32 to vector<512x128xf32>
    %14 = arith.mulf %10, %13 : vector<512x128xf32>
    %15 = math.erf %14 : vector<512x128xf32>
    %cst_7 = arith.constant 1.000000e+00 : f32
    %16 = vector.broadcast %cst_7 : f32 to vector<512x128xf32>
    %17 = arith.addf %16, %15 : vector<512x128xf32>
    %18 = arith.mulf %12, %17 : vector<512x128xf32>
    %19 = arith.truncf %18 : vector<512x128xf32> to vector<512x128xbf16>
    %c0_8 = arith.constant 0 : index
    %c0_9 = arith.constant 0 : index
    %20 = vector.load %arg3[%c0_8, %c0_9] : memref<128x128xbf16, #tpu.memory_space<vmem>>, vector<128x128xbf16>
    %cst_10 = arith.constant dense<0.000000e+00> : vector<512x128xf32>
    %21 = tpu.matmul %19, %20, %cst_10 {dimension_numbers = #tpu.dot_dimension_numbers<[1], [0], [0], [1], [0, 0, 1, 1], [], []>} : vector<512x128xbf16>, vector<128x128xbf16>, vector<512x128xf32> -> vector<512x128xf32>
    %22 = vector.broadcast %3 : vector<1x128xf32> to vector<512x128xf32>
    %23 = arith.addf %21, %22 : vector<512x128xf32>
    %cst_11 = arith.constant dense<0.000000e+00> : vector<512xf32>
    %24 = vector.multi_reduction <add>, %23, %cst_11 [1] : vector<512x128xf32> to vector<512xf32>
    %25 = vector.shape_cast %24 : vector<512xf32> to vector<512x1xf32>
    %cst_12 = arith.constant 1.280000e+02 : f32
    %26 = vector.broadcast %cst_12 : f32 to vector<512x1xf32>
    %27 = arith.divf %25, %26 : vector<512x1xf32>
    %28 = arith.mulf %23, %23 : vector<512x128xf32>
    %cst_13 = arith.constant dense<0.000000e+00> : vector<512xf32>
    %29 = vector.multi_reduction <add>, %28, %cst_13 [1] : vector<512x128xf32> to vector<512xf32>
    %30 = vector.shape_cast %29 : vector<512xf32> to vector<512x1xf32>
    %cst_14 = arith.constant 1.280000e+02 : f32
    %31 = vector.broadcast %cst_14 : f32 to vector<512x1xf32>
    %32 = arith.divf %30, %31 : vector<512x1xf32>
    %33 = arith.mulf %27, %27 : vector<512x1xf32>
    %34 = arith.subf %32, %33 : vector<512x1xf32>
    %35 = vector.broadcast %27 : vector<512x1xf32> to vector<512x128xf32>
    %36 = arith.subf %23, %35 : vector<512x128xf32>
    %cst_15 = arith.constant 9.99999974E-6 : f32
    %37 = vector.broadcast %cst_15 : f32 to vector<512x1xf32>
    %38 = arith.addf %34, %37 : vector<512x1xf32>
    %39 = math.rsqrt %38 : vector<512x1xf32>
    %40 = vector.broadcast %39 : vector<512x1xf32> to vector<512x128xf32>
    %41 = arith.mulf %36, %40 : vector<512x128xf32>
    %42 = vector.broadcast %4 : vector<1x128xf32> to vector<512x128xf32>
    %43 = arith.mulf %41, %42 : vector<512x128xf32>
    %44 = vector.broadcast %5 : vector<1x128xf32> to vector<512x128xf32>
    %45 = arith.addf %43, %44 : vector<512x128xf32>
    %46 = arith.addf %0, %45 : vector<512x128xf32>
    %c0_16 = arith.constant 0 : index
    %c0_17 = arith.constant 0 : index
    %47 = vector.load %arg5[%c0_16, %c0_17] : memref<512x128xf32, #tpu.memory_space<vmem>>, vector<512x128xf32>
    tpu.vector_store %arg5[%c0_16, %c0_17], %46 {strides = array<i32>} : memref<512x128xf32, #tpu.memory_space<vmem>>, vector<512x128xf32>,
    return
  }
  func.func @transform_0(%arg0: i32) -> (i32, i32) {
    %c0_i32 = arith.constant 0 : i32
    %c0_i32_0 = arith.constant 0 : i32
    return %arg0, %c0_i32 : i32, i32
  }
  func.func @transform_1(%arg0: i32) -> (i32, i32) {
    %c0_i32 = arith.constant 0 : i32
    %c0_i32_0 = arith.constant 0 : i32
    %c0_i32_1 = arith.constant 0 : i32
    return %c0_i32, %c0_i32_0 : i32, i32
  }
  func.func @transform_2(%arg0: i32) -> (i32, i32) {
    %c0_i32 = arith.constant 0 : i32
    %c0_i32_0 = arith.constant 0 : i32
    %c0_i32_1 = arith.constant 0 : i32
    return %c0_i32, %c0_i32_0 : i32, i32
  }
  func.func @transform_3(%arg0: i32) -> (i32, i32) {
    %c0_i32 = arith.constant 0 : i32
    %c0_i32_0 = arith.constant 0 : i32
    %c0_i32_1 = arith.constant 0 : i32
    return %c0_i32, %c0_i32_0 : i32, i32
  }
  func.func @transform_4(%arg0: i32) -> (i32, i32) {
    %c0_i32 = arith.constant 0 : i32
    %c0_i32_0 = arith.constant 0 : i32
    return %arg0, %c0_i32 : i32, i32
  }
}

</mosaic_0001>

<bundles_post_ra>
// kernel: tpu_custom_call.1
= control target key start
LH: loop header
LB: loop body
LE: loop exit
PB: predicated region body
PF: predicated region fallthrough
CT: control target
= control target key end

     0   :  { %9 = vsyncpa [#allocation3], 0  ;;  %s4237_s0 = inlined_call_operand.hbm [shape: f32[512,128], index: 0, kind: input, shape index: {}]   ;;  %s4238_s1 = inlined_call_operand.hbm [shape: bf16[128,128], index: 1, kind: input, shape index: {}]   ;;  %s4239_s2 = inlined_call_operand.hbm [shape: bf16[128,128], index: 2, kind: input, shape index: {}]   ;;  %s4240_s3 = inlined_call_operand.vmem [shape: f32[4,128], index: 3, kind: input, shape index: {}]   ;;  %s4241_s4 = inlined_call_operand.hbm [shape: f32[512,128], index: 4, kind: output, shape index: {}]  }
   0x1   :  { %10 = vsyncpa [#allocation6], 0 }
   0x2   :  { %11 = vsyncpa [#allocation4], 0  ;;  %s3033_s15 = smov [#allocation5]   ;;  %s2939_s19 = scalar_lea.hbm %s4238_s1, 1024 }
   0x3   :  { %s29_s16 = sshll.u32 %s3033_s15, 4  ;;  %p2940_p0 = scmp.ne.s32.totalorder %s4238_s1, %s2939_s19  ;;  %s30_s16 = int_to_ptr.vmem [resolvable:$true] %s29_s16 }
   0x4   :  { %p2943_p1 = scmp.lt.u32.totalorder %s2939_s19, %s4238_s1 }
   0x6   :  { %p2945_p2 = pnand %p2943_p1, %p2940_p0 }
   0x8   :  { %2948 = shalt.err (!%p2945_p2)
}
   0x9   :  { %s2949_s24 = scalar_lea.vmem %s30_s16, 1024  ;;  %p2954_p4 = scmp.lt.s32.totalorder %s30_s16, %s30_s16 }
   0xa   :  { %p2950_p3 = scmp.ne.s32.totalorder %s30_s16, %s2949_s24  ;;  %p2955_p5 = scmp.lt.s32.totalorder %s2949_s24, %s2949_s24 }
   0xc   :  { %p2956_p6 = por %p2955_p5, %p2954_p4 }
   0xe   :  { %p2957_p7 = pnand %p2956_p6, %p2950_p3 }
  0x10   :  { %2960 = shalt.err (!%p2957_p7)
}
  0x11   :  { %s3034_s25 = smov 64   ;;  %s3035_s26 = smov 4  }
  0x12   :  { %35 = dma.hbm_to_vmem [thread:$0]  %s4238_s1, 1024, %s30_s16, [#allocation6], %s3034_s25, %s3034_s25, %s3035_s26  }
  0x13   :  { %s3036_s29 = smov [#allocation2]   ;;  %s2961_s7 = scalar_lea.hbm %s4237_s0, 8192 }
  0x14   :  { %s17_s30 = sshll.u32 %s3036_s29, 4  ;;  %p2962_p8 = scmp.ne.s32.totalorder %s4237_s0, %s2961_s7  ;;  %s18_s30 = int_to_ptr.vmem [resolvable:$true] %s17_s30 }
  0x15   :  { %p2965_p9 = scmp.lt.u32.totalorder %s2961_s7, %s4237_s0 }
  0x17   :  { %p2967_p10 = pnand %p2965_p9, %p2962_p8 }
  0x19   :  { %2970 = shalt.err (!%p2967_p10)
}
  0x1a   :  { %s2971_s12 = scalar_lea.vmem %s18_s30, 8192  ;;  %p2976_p12 = scmp.lt.s32.totalorder %s18_s30, %s18_s30 }
  0x1b   :  { %p2972_p11 = scmp.ne.s32.totalorder %s18_s30, %s2971_s12  ;;  %p2977_p13 = scmp.lt.s32.totalorder %s2971_s12, %s2971_s12 }
  0x1d   :  { %p2978_p0 = por %p2977_p13, %p2976_p12 }
  0x1f   :  { %p2979_p1 = pnand %p2978_p0, %p2972_p11 }
  0x21   :  { %2982 = shalt.err (!%p2979_p1)
}
  0x22   :  { %s3037_s1 = smov 128   ;;  %s3038_s13 = smov 8  }
  0x23   :  { %23 = dma.hbm_to_vmem [thread:$0]  %s4237_s0, 8192, %s18_s30, [#allocation3], %s3037_s1, %s3037_s1, %s3038_s13  }
  0x24   :  { %s3039_s16 = smov [#allocation7]   ;;  %s2983_s20 = scalar_lea.hbm %s4239_s2, 1024 }
  0x25   :  { %s41_s17 = sshll.u32 %s3039_s16, 4  ;;  %p2984_p2 = scmp.ne.s32.totalorder %s4239_s2, %s2983_s20  ;;  %s42_s17 = int_to_ptr.vmem [resolvable:$true] %s41_s17 }
  0x26   :  { %p2987_p3 = scmp.lt.u32.totalorder %s2983_s20, %s4239_s2 }
  0x28   :  { %p2989_p4 = pnand %p2987_p3, %p2984_p2 }
  0x2a   :  { %2992 = shalt.err (!%p2989_p4)
}
  0x2b   :  { %s2993_s27 = scalar_lea.vmem %s42_s17, 1024  ;;  %p2998_p6 = scmp.lt.s32.totalorder %s42_s17, %s42_s17 }
  0x2c   :  { %p2994_p5 = scmp.ne.s32.totalorder %s42_s17, %s2993_s27  ;;  %p2999_p7 = scmp.lt.s32.totalorder %s2993_s27, %s2993_s27 }
  0x2e   :  { %p3000_p8 = por %p2999_p7, %p2998_p6 }
  0x30   :  { %p3001_p9 = pnand %p3000_p8, %p2994_p5 }
  0x32   :  { %3004 = shalt.err (!%p3001_p9)
}
  0x33   :  { %47 = dma.hbm_to_vmem [thread:$0]  %s4239_s2, 1024, %s42_s17, [#allocation6], %s3034_s25, %s3034_s25, %s3035_s26  }
  0x34   :  { %3027 = dma.done.wait [#allocation3], 8192  }
  0x35   :  { %3028 = vsyncadd [#allocation3], 4294959104 }
  0x36   :  { %3029 = dma.done.wait [#allocation6], 2048  }
  0x37   :  { %3030 = vsyncadd [#allocation6], 4294965248  ;;  %v2602_v0 = vld [vmem:[#allocation5] sm:$0xff]   ;;  %v2603_v1 = vld [vmem:[#allocation5 + $0x8] sm:$0xff]  }
  0x38   :  { %2434 = vmatprep.subr.bf16.mxu0 %v2602_v0  ;;  %v2604_v2 = vld [vmem:[#allocation5 + $0x10] sm:$0xff]   ;;  %v2605_v3 = vld [vmem:[#allocation5 + $0x18] sm:$0xff]   ;;  %v60_v4 = vld [vmem:[#allocation2] sm:$0xff] }
  0x39   :  { %2435 = vmatpush3.bf16.msra.mxu0 %v2602_v0  ;;  %v61_v5 = vld [vmem:[#allocation2 + $0x8] sm:$0xff]  ;;  %v2606_v7 = vld [vmem:[#allocation5 + $0x20] sm:$0xff]   ;;  %v2608_v9 = vld [vmem:[#allocation5 + $0x30] sm:$0xff]  }
  0x3a   :  { %2436 = vmatprep.subr.bf16.mxu0 %v2603_v1  ;;  %v125_v6 = vpack.c.bf16 %v61_v5, %v60_v4  ;;  %v2607_v8 = vld [vmem:[#allocation5 + $0x28] sm:$0xff]   ;;  %v2609_v10 = vld [vmem:[#allocation5 + $0x38] sm:$0xff]   ;;  %v62_v11 = vld [vmem:[#allocation2 + $0x10] sm:$0xff] }
  0x3b   :  { %v63_v12 = vld [vmem:[#allocation2 + $0x18] sm:$0xff]  ;;  %v64_v13 = vld [vmem:[#allocation2 + $0x20] sm:$0xff]  ;;  %v65_v14 = vld [vmem:[#allocation2 + $0x28] sm:$0xff] }
  0x3c   :  { %2450 = vmatprep.mubr.bf16.mxu0 %v125_v6  ;;  %v2610_v15 = vld [vmem:[#allocation7] sm:$0xff]   ;;  %v2611_v16 = vld [vmem:[#allocation7 + $0x8] sm:$0xff]   ;;  %v126_v17 = vpack.c.bf16 %v63_v12, %v62_v11  ;;  %v127_v18 = vpack.c.bf16 %v65_v14, %v64_v13  ;;  %v66_v19 = vld [vmem:[#allocation2 + $0x30] sm:$0xff] }
  0x3d   :  { %2437 = vmatpush3.bf16.msra.mxu0 %v2603_v1  ;;  %2514 = vmatprep.subr.bf16.mxu1 %v2610_v15  ;;  %v67_v20 = vld [vmem:[#allocation2 + $0x38] sm:$0xff]  ;;  %v68_v21 = vld [vmem:[#allocation2 + $0x40] sm:$0xff]  ;;  %v69_v22 = vld [vmem:[#allocation2 + $0x48] sm:$0xff] }
  0x3e   :  { %2438 = vmatprep.subr.bf16.mxu0 %v2604_v2  ;;  %2515 = vmatpush3.bf16.msra.mxu1 %v2610_v15  ;;  %v128_v23 = vpack.c.bf16 %v67_v20, %v66_v19  ;;  %v129_v24 = vpack.c.bf16 %v69_v22, %v68_v21  ;;  %v70_v25 = vld [vmem:[#allocation2 + $0x50] sm:$0xff]  ;;  %v71_v26 = vld [vmem:[#allocation2 + $0x58] sm:$0xff]  ;;  %v72_v27 = vld [vmem:[#allocation2 + $0x60] sm:$0xff] }
  0x3f   :  { %2516 = vmatprep.subr.bf16.mxu1 %v2611_v16  ;;  %v73_v28 = vld [vmem:[#allocation2 + $0x68] sm:$0xff]  ;;  %v130_v29 = vpack.c.bf16 %v71_v26, %v70_v25  ;;  %v74_v31 = vld [vmem:[#allocation2 + $0x70] sm:$0xff]  ;;  %v75_v32 = vld [vmem:[#allocation2 + $0x78] sm:$0xff] }
  0x40   :  { %v131_v30 = vpack.c.bf16 %v73_v28, %v72_v27  ;;  %v76_v33 = vld [vmem:[#allocation2 + $0x80] sm:$0xff]  ;;  %v77_v34 = vld [vmem:[#allocation2 + $0x88] sm:$0xff]  ;;  %v132_v35 = vpack.c.bf16 %v75_v32, %v74_v31  ;;  %v78_v37 = vld [vmem:[#allocation2 + $0x90] sm:$0xff] }
  0x41   :  { %2439 = vmatpush3.bf16.msra.mxu0 %v2604_v2  ;;  %v133_v36 = vpack.c.bf16 %v77_v34, %v76_v33  ;;  %v79_v38 = vld [vmem:[#allocation2 + $0x98] sm:$0xff]  ;;  %v80_v39 = vld [vmem:[#allocation2 + $0xa0] sm:$0xff]  ;;  %v81_v40 = vld [vmem:[#allocation2 + $0xa8] sm:$0xff] }
  0x42   :  { %2440 = vmatprep.subr.bf16.mxu0 %v2605_v3  ;;  %2517 = vmatpush3.bf16.msra.mxu1 %v2611_v16  ;;  %v134_v41 = vpack.c.bf16 %v79_v38, %v78_v37  ;;  %v135_v42 = vpack.c.bf16 %v81_v40, %v80_v39  ;;  %v82_v43 = vld [vmem:[#allocation2 + $0xb0] sm:$0xff]  ;;  %v83_v44 = vld [vmem:[#allocation2 + $0xb8] sm:$0xff]  ;;  %v84_v45 = vld [vmem:[#allocation2 + $0xc0] sm:$0xff] }
  0x43   :  { %v85_v46 = vld [vmem:[#allocation2 + $0xc8] sm:$0xff]  ;;  %v136_v47 = vpack.c.bf16 %v83_v44, %v82_v43  ;;  %v86_v49 = vld [vmem:[#allocation2 + $0xd0] sm:$0xff]  ;;  %v87_v50 = vld [vmem:[#allocation2 + $0xd8] sm:$0xff] }
  0x44   :  { %v137_v48 = vpack.c.bf16 %v85_v46, %v84_v45  ;;  %v88_v51 = vld [vmem:[#allocation2 + $0xe0] sm:$0xff]  ;;  %v89_v52 = vld [vmem:[#allocation2 + $0xe8] sm:$0xff]  ;;  %v138_v53 = vpack.c.bf16 %v87_v50, %v86_v49  ;;  %v90_v55 = vld [vmem:[#allocation2 + $0xf0] sm:$0xff] }
  0x45   :  { %2441 = vmatpush3.bf16.msra.mxu0 %v2605_v3  ;;  %v139_v54 = vpack.c.bf16 %v89_v52, %v88_v51  ;;  %v91_v56 = vld [vmem:[#allocation2 + $0xf8] sm:$0xff]  ;;  %v92_v57 = vld [vmem:[#allocation2 + $0x100] sm:$0xff]  ;;  %v93_v58 = vld [vmem:[#allocation2 + $0x108] sm:$0xff] }
  0x46   :  { %2442 = vmatprep.subr.bf16.mxu0 %v2606_v7  ;;  %v140_v59 = vpack.c.bf16 %v91_v56, %v90_v55  ;;  %v141_v60 = vpack.c.bf16 %v93_v58, %v92_v57  ;;  %v94_v61 = vld [vmem:[#allocation2 + $0x110] sm:$0xff]  ;;  %v95_v62 = vld [vmem:[#allocation2 + $0x118] sm:$0xff]  ;;  %v96_v63 = vld [vmem:[#allocation2 + $0x120] sm:$0xff] }
  0x47   :  { %v97_v0 = vld [vmem:[#allocation2 + $0x128] sm:$0xff]  ;;  %v142_v1 = vpack.c.bf16 %v95_v62, %v94_v61  ;;  %v98_v3 = vld [vmem:[#allocation2 + $0x130] sm:$0xff]  ;;  %v99_v4 = vld [vmem:[#allocation2 + $0x138] sm:$0xff] }
  0x48   :  { %v143_v2 = vpack.c.bf16 %v97_v0, %v96_v63  ;;  %v100_v5 = vld [vmem:[#allocation2 + $0x140] sm:$0xff]  ;;  %v101_v6 = vld [vmem:[#allocation2 + $0x148] sm:$0xff]  ;;  %v106_v15 = vld [vmem:[#allocation2 + $0x170] sm:$0xff] }
  0x49   :  { %2443 = vmatpush3.bf16.msra.mxu0 %v2606_v7  ;;  %v144_v7 = vpack.c.bf16 %v99_v4, %v98_v3  ;;  %v104_v11 = vld [vmem:[#allocation2 + $0x160] sm:$0xff]  ;;  %v105_v12 = vld [vmem:[#allocation2 + $0x168] sm:$0xff]  ;;  %v107_v16 = vld [vmem:[#allocation2 + $0x178] sm:$0xff] }
  0x4a   :  { %2444 = vmatprep.subr.bf16.mxu0 %v2607_v8  ;;  %v147_v14 = vpack.c.bf16 %v105_v12, %v104_v11  ;;  %v2612_v19 = vld [vmem:[#allocation7 + $0x10] sm:$0xff]   ;;  %v148_v20 = vpack.c.bf16 %v107_v16, %v106_v15  ;;  %v2613_v22 = vld [vmem:[#allocation7 + $0x18] sm:$0xff]   ;;  %v112_v25 = vld [vmem:[#allocation2 + $0x1a0] sm:$0xff] }
  0x4b   :  { %2518 = vmatprep.subr.bf16.mxu1 %v2612_v19  ;;  %v113_v26 = vld [vmem:[#allocation2 + $0x1a8] sm:$0xff]  ;;  %v2614_v27 = vld [vmem:[#allocation7 + $0x20] sm:$0xff]   ;;  %v114_v31 = vld [vmem:[#allocation2 + $0x1b0] sm:$0xff] }
  0x4c   :  { %2519 = vmatpush3.bf16.msra.mxu1 %v2612_v19  ;;  %v115_v32 = vld [vmem:[#allocation2 + $0x1b8] sm:$0xff]  ;;  %v116_v33 = vld [vmem:[#allocation2 + $0x1c0] sm:$0xff]  ;;  %v117_v34 = vld [vmem:[#allocation2 + $0x1c8] sm:$0xff] }
  0x4d   :  { %2445 = vmatpush3.bf16.msra.mxu0 %v2607_v8  ;;  %v145_v8 = vpack.c.bf16 %v101_v6, %v100_v5  ;;  %2520 = vmatprep.subr.bf16.mxu1 %v2613_v22  ;;  %v153_v37 = vpack.c.bf16 %v117_v34, %v116_v33  ;;  %v2617_v38 = vld [vmem:[#allocation7 + $0x38] sm:$0xff]   ;;  %v118_v39 = vld [vmem:[#allocation2 + $0x1d0] sm:$0xff]  ;;  %v124_v51 = vld [vmem:[%s4240_s3] sm:$0xf] }
  0x4e   :  { %2446 = vmatprep.subr.bf16.mxu0 %v2608_v9  ;;  %v119_v40 = vld [vmem:[#allocation2 + $0x1d8] sm:$0xff]  ;;  %v122_v45 = vld [vmem:[#allocation2 + $0x1f0] sm:$0xff] }
  0x4f   :  { %v154_v43 = vpack.c.bf16 %v119_v40, %v118_v39  ;;  %v123_v46 = vld [vmem:[#allocation2 + $0x1f8] sm:$0xff] }
  0x50   :  { %2521 = vmatpush3.bf16.msra.mxu1 %v2613_v22 }
  0x51   :  { %2447 = vmatpush3.bf16.msra.mxu0 %v2608_v9  ;;  %v102_v9 = vld [vmem:[#allocation2 + $0x150] sm:$0xff]  ;;  %2522 = vmatprep.subr.bf16.mxu1 %v2614_v27 }
  0x52   :  { %2448 = vmatprep.subr.bf16.mxu0 %v2609_v10 }
  0x54   :  { %2523 = vmatpush3.bf16.msra.mxu1 %v2614_v27 }
  0x55   :  { %2449 = vmatpush3.bf16.msra.mxu0 %v2609_v10  ;;  %v103_v10 = vld [vmem:[#allocation2 + $0x158] sm:$0xff] }
  0x56   :  { %v146_v13 = vpack.c.bf16 %v103_v10, %v102_v9 }
  0x58   :  { %2451 = vmatmul.mubr.bf16.vlgmr.msra.gmra.mrb[0].mxu0 %v126_v17  ;;  %v108_v17 = vld [vmem:[#allocation2 + $0x180] sm:$0xff] }
  0x59   :  { %2454 = vmatprep.mubr.bf16.mxu0 %v127_v18  ;;  %v109_v18 = vld [vmem:[#allocation2 + $0x188] sm:$0xff] }
  0x5a   :  { %v149_v21 = vpack.c.bf16 %v109_v18, %v108_v17 }
  0x60   :  { %2455 = vmatmul.mubr.bf16.gmra.mrb[4].mxu0 %v128_v23  ;;  %v110_v23 = vld [vmem:[#allocation2 + $0x190] sm:$0xff] }
  0x61   :  { %2458 = vmatprep.mubr.bf16.mxu0 %v129_v24  ;;  %v111_v24 = vld [vmem:[#allocation2 + $0x198] sm:$0xff] }
  0x62   :  { %v150_v28 = vpack.c.bf16 %v111_v24, %v110_v23 }
  0x68   :  { %2459 = vmatmul.mubr.bf16.gmra.mrb[8].mxu0 %v130_v29  ;;  %v151_v29 = vpack.c.bf16 %v113_v26, %v112_v25 }
  0x69   :  { %2462 = vmatprep.mubr.bf16.mxu0 %v131_v30  ;;  %v2615_v30 = vld [vmem:[#allocation7 + $0x28] sm:$0xff]  }
  0x6a   :  { %2524 = vmatprep.subr.bf16.mxu1 %v2615_v30 }
  0x6b   :  { %2525 = vmatpush3.bf16.msra.mxu1 %v2615_v30 }
  0x70   :  { %2463 = vmatmul.mubr.bf16.gmra.mrb[12].mxu0 %v132_v35  ;;  %v2616_v35 = vld [vmem:[#allocation7 + $0x30] sm:$0xff]  }
  0x71   :  { %2466 = vmatprep.mubr.bf16.mxu0 %v133_v36  ;;  %v152_v36 = vpack.c.bf16 %v115_v32, %v114_v31  ;;  %2526 = vmatprep.subr.bf16.mxu1 %v2616_v35 }
  0x72   :  { %2527 = vmatpush3.bf16.msra.mxu1 %v2616_v35 }
  0x73   :  { %2528 = vmatprep.subr.bf16.mxu1 %v2617_v38 }
  0x76   :  { %2529 = vmatpush3.bf16.msra.mxu1 %v2617_v38 }
  0x78   :  { %2467 = vmatmul.mubr.bf16.gmra.mrb[16].mxu0 %v134_v41  ;;  %v120_v41 = vld [vmem:[#allocation2 + $0x1e0] sm:$0xff] }
  0x79   :  { %2470 = vmatprep.mubr.bf16.mxu0 %v135_v42  ;;  %v121_v42 = vld [vmem:[#allocation2 + $0x1e8] sm:$0xff] }
  0x7a   :  { %v155_v44 = vpack.c.bf16 %v121_v42, %v120_v41 }
  0x80   :  { %2471 = vmatmul.mubr.bf16.gmra.mrb[20].mxu0 %v136_v47  ;;  %v156_v47 = vpack.c.bf16 %v123_v46, %v122_v45 }
  0x81   :  { %2474 = vmatprep.mubr.bf16.mxu0 %v137_v48  ;;  %v173_v48 = vlaneseq }
  0x83   :  { %v3111_v49 = vshrl.u32 %v173_v48, 7 }
  0x85   :  { %v175_v50 = vsub.s32 0, %v3111_v49 }
  0x87   :  { %v3117_v52 = vrot.slane %v124_v51, %v175_v50 }
  0x88   :  { %2475 = vmatmul.mubr.bf16.gmra.mrb[24].mxu0 %v138_v53 }
  0x89   :  { %2478 = vmatprep.mubr.bf16.mxu0 %v139_v54 }
  0x90   :  { %2479 = vmatmul.mubr.bf16.gmra.mrb[28].mxu0 %v140_v59 }
  0x91   :  { %2482 = vmatprep.mubr.bf16.mxu0 %v141_v60 }
  0x98   :  { %2483 = vmatmul.mubr.bf16.gmra.mrb[32].mxu0 %v142_v1 }
  0x99   :  { %2486 = vmatprep.mubr.bf16.mxu0 %v143_v2 }
  0xa0   :  { %2487 = vmatmul.mubr.bf16.gmra.mrb[36].mxu0 %v144_v7 }
  0xa1   :  { %2490 = vmatprep.mubr.bf16.mxu0 %v145_v8 }
  0xa8   :  { %2491 = vmatmul.mubr.bf16.gmra.mrb[40].mxu0 %v146_v13 }
  0xa9   :  { %2494 = vmatprep.mubr.bf16.mxu0 %v147_v14 }
  0xb0   :  { %2495 = vmatmul.mubr.bf16.gmra.mrb[44].mxu0 %v148_v20 }
  0xb1   :  { %2498 = vmatprep.mubr.bf16.mxu0 %v149_v21 }
  0xb8   :  { %2499 = vmatmul.mubr.bf16.gmra.mrb[48].mxu0 %v150_v28 }
  0xb9   :  { %2502 = vmatprep.mubr.bf16.mxu0 %v151_v29 }
  0xc0   :  { %2503 = vmatmul.mubr.bf16.gmra.mrb[52].mxu0 %v152_v36 }
  0xc1   :  { %2506 = vmatprep.mubr.bf16.mxu0 %v153_v37 }
  0xc8   :  { %2507 = vmatmul.mubr.bf16.gmra.mrb[56].mxu0 %v154_v43 }
  0xc9   :  { %2510 = vmatprep.mubr.bf16.mxu0 %v155_v44 }
  0xd0   :  { %2511 = vmatmul.mubr.bf16.gmra.mrb[60].mxu0 %v156_v47 }
 0x12b   :  { %v2452_v53 = vpop.f32.mrb[0].mxu0 }
 0x12c   :  { %v268_v54 = vadd.f32 %v2452_v53, %v3117_v52  ;;  %v259_v55 = vpop.f32.mrb[1].mxu0 }
 0x12d   :  { %v260_v56 = vadd.f32 %v259_v55, %v3117_v52  ;;  %v2453_v57 = vpop.f32.mrb[2].mxu0 }
 0x12e   :  { %v580_v58 = vmul.f32 0.70710677, %v268_v54  ;;  %v271_v59 = vadd.f32 %v2453_v57, %v3117_v52  ;;  %v262_v60 = vpop.f32.mrb[3].mxu0  ;;  %v516_v17 = vmul.f32 0.5, %v268_v54 }
 0x12f   :  { %v578_v61 = vmul.f32 0.70710677, %v260_v56  ;;  %v263_v62 = vadd.f32 %v262_v60, %v3117_v52  ;;  %v514_v27 = vmul.f32 0.5, %v260_v56 }
 0x130   :  { %2618 = verf.f32 %v580_v58  ;;  %v581_v63 = vmul.f32 0.70710677, %v271_v59  ;;  %v517_v22 = vmul.f32 0.5, %v271_v59 }
 0x131   :  { %2620 = verf.f32 %v578_v61  ;;  %v579_v0 = vmul.f32 0.70710677, %v263_v62  ;;  %v515_v33 = vmul.f32 0.5, %v263_v62 }
 0x132   :  { %2622 = verf.f32 %v581_v63 }
 0x133   :  { %2624 = verf.f32 %v579_v0  ;;  %v2456_v1 = vpop.f32.mrb[4].mxu0 }
 0x134   :  { %v284_v2 = vadd.f32 %v2456_v1, %v3117_v52  ;;  %v275_v3 = vpop.f32.mrb[5].mxu0 }
 0x135   :  { %v276_v4 = vadd.f32 %v275_v3, %v3117_v52  ;;  %v2457_v5 = vpop.f32.mrb[6].mxu0 }
 0x136   :  { %v584_v6 = vmul.f32 0.70710677, %v284_v2  ;;  %v287_v7 = vadd.f32 %v2457_v5, %v3117_v52  ;;  %v278_v8 = vpop.f32.mrb[7].mxu0  ;;  %v520_v54 = vmul.f32 0.5, %v284_v2 }
 0x137   :  { %v582_v9 = vmul.f32 0.70710677, %v276_v4  ;;  %v279_v10 = vadd.f32 %v278_v8, %v3117_v52  ;;  %v518_v59 = vmul.f32 0.5, %v276_v4 }
 0x138   :  { %2626 = verf.f32 %v584_v6  ;;  %v585_v11 = vmul.f32 0.70710677, %v287_v7  ;;  %v521_v55 = vmul.f32 0.5, %v287_v7 }
 0x139   :  { %2628 = verf.f32 %v582_v9  ;;  %v583_v12 = vmul.f32 0.70710677, %v279_v10  ;;  %v519_v60 = vmul.f32 0.5, %v279_v10 }
 0x13a   :  { %v2619_v13 = vpop.eup %2618  ;;  %2630 = verf.f32 %v585_v11 }
 0x13b   :  { %v2621_v14 = vpop.eup %2620  ;;  %2632 = verf.f32 %v583_v12  ;;  %v2460_v15 = vpop.f32.mrb[8].mxu0  ;;  %v708_v18 = vadd.f32 1.0, %v2619_v13 }
 0x13c   :  { %v2623_v16 = vpop.eup %2622  ;;  %v300_v19 = vadd.f32 %v2460_v15, %v3117_v52  ;;  %v291_v20 = vpop.f32.mrb[9].mxu0  ;;  %v706_v26 = vadd.f32 1.0, %v2621_v14 }
 0x13d   :  { %v2625_v21 = vpop.eup %2624  ;;  %v709_v23 = vadd.f32 1.0, %v2623_v16  ;;  %v292_v24 = vadd.f32 %v291_v20, %v3117_v52  ;;  %v2461_v25 = vpop.f32.mrb[10].mxu0  ;;  %v772_v36 = vmul.f32 %v708_v18, %v516_v17 }
 0x13e   :  { %v588_v28 = vmul.f32 0.70710677, %v300_v19  ;;  %v303_v29 = vadd.f32 %v2461_v25, %v3117_v52  ;;  %v294_v30 = vpop.f32.mrb[11].mxu0  ;;  %v707_v31 = vadd.f32 1.0, %v2625_v21  ;;  %v770_v39 = vmul.f32 %v706_v26, %v514_v27 }
 0x13f   :  { %v773_v32 = vmul.f32 %v709_v23, %v517_v22  ;;  %v586_v34 = vmul.f32 0.70710677, %v292_v24  ;;  %v295_v35 = vadd.f32 %v294_v30, %v3117_v52  ;;  %v524_v7 = vmul.f32 0.5, %v300_v19 }
 0x140   :  { %2634 = verf.f32 %v588_v28  ;;  %v589_v37 = vmul.f32 0.70710677, %v303_v29  ;;  %v771_v40 = vmul.f32 %v707_v31, %v515_v33  ;;  %v522_v10 = vmul.f32 0.5, %v292_v24 }
 0x141   :  { %2636 = verf.f32 %v586_v34  ;;  %v587_v38 = vmul.f32 0.70710677, %v295_v35  ;;  %v835_v42 = vpack.c.bf16 %v773_v32, %v772_v36  ;;  %v525_v16 = vmul.f32 0.5, %v303_v29 }
 0x142   :  { %v2627_v41 = vpop.eup %2626  ;;  %2638 = verf.f32 %v589_v37  ;;  %v834_v45 = vpack.c.bf16 %v771_v40, %v770_v39  ;;  %v523_v21 = vmul.f32 0.5, %v295_v35 }
 0x143   :  { %v2629_v43 = vpop.eup %2628  ;;  %v712_v44 = vadd.f32 1.0, %v2627_v41  ;;  %2640 = verf.f32 %v587_v38  ;;  %v2464_v46 = vpop.f32.mrb[12].mxu0 }
 0x144   :  { %v2631_v47 = vpop.eup %2630  ;;  %v710_v48 = vadd.f32 1.0, %v2629_v43  ;;  %v316_v50 = vadd.f32 %v2464_v46, %v3117_v52  ;;  %v307_v51 = vpop.f32.mrb[13].mxu0  ;;  %2530 = vmatprep.mubr.bf16.mxu1 %v834_v45 }
 0x145   :  { %v2633_v53 = vpop.eup %2632  ;;  %v713_v56 = vadd.f32 1.0, %v2631_v47  ;;  %v308_v57 = vadd.f32 %v307_v51, %v3117_v52  ;;  %v2465_v58 = vpop.f32.mrb[14].mxu0  ;;  %2531 = vmatmul.mubr.bf16.vlgmr.msra.gmra.mrb[0].mxu1 %v835_v42  ;;  %v776_v0 = vmul.f32 %v712_v44, %v520_v54 }
 0x146   :  { %v711_v61 = vadd.f32 1.0, %v2633_v53  ;;  %v592_v62 = vmul.f32 0.70710677, %v316_v50  ;;  %v310_v63 = vpop.f32.mrb[15].mxu0  ;;  %v319_v5 = vadd.f32 %v2465_v58, %v3117_v52  ;;  %v774_v6 = vmul.f32 %v710_v48, %v518_v59 }
 0x147   :  { %v777_v1 = vmul.f32 %v713_v56, %v521_v55  ;;  %v590_v3 = vmul.f32 0.70710677, %v308_v57  ;;  %v311_v2 = vadd.f32 %v310_v63, %v3117_v52  ;;  %v528_v40 = vmul.f32 0.5, %v316_v50 }
 0x148   :  { %v775_v8 = vmul.f32 %v711_v61, %v519_v60  ;;  %2642 = verf.f32 %v592_v62  ;;  %v593_v9 = vmul.f32 0.70710677, %v319_v5  ;;  %v526_v45 = vmul.f32 0.5, %v308_v57 }
 0x149   :  { %2644 = verf.f32 %v590_v3  ;;  %v837_v11 = vpack.c.bf16 %v777_v1, %v776_v0  ;;  %v591_v12 = vmul.f32 0.70710677, %v311_v2  ;;  %v529_v48 = vmul.f32 0.5, %v319_v5 }
 0x14a   :  { %v2635_v4 = vpop.eup %2634  ;;  %v836_v13 = vpack.c.bf16 %v775_v8, %v774_v6  ;;  %2646 = verf.f32 %v593_v9  ;;  %v527_v55 = vmul.f32 0.5, %v311_v2 }
 0x14b   :  { %v2637_v14 = vpop.eup %2636  ;;  %v716_v15 = vadd.f32 1.0, %v2635_v4  ;;  %v2468_v17 = vpop.f32.mrb[16].mxu0  ;;  %2648 = verf.f32 %v591_v12 }
 0x14c   :  { %v2639_v18 = vpop.eup %2638  ;;  %v714_v20 = vadd.f32 1.0, %v2637_v14  ;;  %2534 = vmatprep.mubr.bf16.mxu1 %v836_v13  ;;  %v332_v22 = vadd.f32 %v2468_v17, %v3117_v52  ;;  %v323_v19 = vpop.f32.mrb[17].mxu0 }
 0x14d   :  { %v2641_v23 = vpop.eup %2640  ;;  %v780_v25 = vmul.f32 %v716_v15, %v524_v7  ;;  %v717_v26 = vadd.f32 1.0, %v2639_v18  ;;  %v324_v24 = vadd.f32 %v323_v19, %v3117_v52  ;;  %v2469_v27 = vpop.f32.mrb[18].mxu0  ;;  %2535 = vmatmul.mubr.bf16.gmra.mrb[4].mxu1 %v837_v11 }
 0x14e   :  { %v778_v28 = vmul.f32 %v714_v20, %v522_v10  ;;  %v715_v30 = vadd.f32 1.0, %v2641_v23  ;;  %v596_v29 = vmul.f32 0.70710677, %v332_v22  ;;  %v326_v31 = vpop.f32.mrb[19].mxu0  ;;  %v335_v34 = vadd.f32 %v2469_v27, %v3117_v52 }
 0x14f   :  { %v781_v32 = vmul.f32 %v717_v26, %v525_v16  ;;  %v594_v33 = vmul.f32 0.70710677, %v324_v24  ;;  %v327_v36 = vadd.f32 %v326_v31, %v3117_v52  ;;  %v532_v7 = vmul.f32 0.5, %v332_v22 }
 0x150   :  { %v779_v35 = vmul.f32 %v715_v30, %v523_v21  ;;  %2650 = verf.f32 %v596_v29  ;;  %v597_v38 = vmul.f32 0.70710677, %v335_v34  ;;  %v530_v12 = vmul.f32 0.5, %v324_v24 }
 0x151   :  { %v839_v37 = vpack.c.bf16 %v781_v32, %v780_v25  ;;  %2652 = verf.f32 %v594_v33  ;;  %v595_v42 = vmul.f32 0.70710677, %v327_v36  ;;  %v533_v16 = vmul.f32 0.5, %v335_v34 }
 0x152   :  { %v2643_v39 = vpop.eup %2642  ;;  %v838_v41 = vpack.c.bf16 %v779_v35, %v778_v28  ;;  %2654 = verf.f32 %v597_v38  ;;  %v531_v21 = vmul.f32 0.5, %v327_v36 }
 0x153   :  { %v2645_v43 = vpop.eup %2644  ;;  %v720_v44 = vadd.f32 1.0, %v2643_v39  ;;  %v2472_v46 = vpop.f32.mrb[20].mxu0  ;;  %2656 = verf.f32 %v595_v42 }
 0x154   :  { %v718_v47 = vadd.f32 1.0, %v2645_v43  ;;  %2538 = vmatprep.mubr.bf16.mxu1 %v838_v41  ;;  %v348_v51 = vadd.f32 %v2472_v46, %v3117_v52  ;;  %v339_v53 = vpop.f32.mrb[21].mxu0  ;;  %v2647_v54 = vpop.eup %2646 }
 0x155   :  { %v340_v56 = vadd.f32 %v339_v53, %v3117_v52  ;;  %v2473_v58 = vpop.f32.mrb[22].mxu0  ;;  %v2649_v50 = vpop.eup %2648  ;;  %v784_v59 = vmul.f32 %v720_v44, %v528_v40  ;;  %v721_v60 = vadd.f32 1.0, %v2647_v54  ;;  %2539 = vmatmul.mubr.bf16.gmra.mrb[8].mxu1 %v839_v37 }
 0x156   :  { %v600_v61 = vmul.f32 0.70710677, %v348_v51  ;;  %v342_v57 = vpop.f32.mrb[23].mxu0  ;;  %v782_v62 = vmul.f32 %v718_v47, %v526_v45  ;;  %v719_v63 = vadd.f32 1.0, %v2649_v50  ;;  %v351_v1 = vadd.f32 %v2473_v58, %v3117_v52 }
 0x157   :  { %v598_v0 = vmul.f32 0.70710677, %v340_v56  ;;  %v785_v3 = vmul.f32 %v721_v60, %v529_v48  ;;  %v343_v5 = vadd.f32 %v342_v57, %v3117_v52  ;;  %v536_v37 = vmul.f32 0.5, %v348_v51 }
 0x158   :  { %2658 = verf.f32 %v600_v61  ;;  %v783_v6 = vmul.f32 %v719_v63, %v527_v55  ;;  %v601_v8 = vmul.f32 0.70710677, %v351_v1  ;;  %v534_v42 = vmul.f32 0.5, %v340_v56 }
 0x159   :  { %2660 = verf.f32 %v598_v0  ;;  %v841_v9 = vpack.c.bf16 %v785_v3, %v784_v59  ;;  %v599_v11 = vmul.f32 0.70710677, %v343_v5  ;;  %v537_v46 = vmul.f32 0.5, %v351_v1 }
 0x15a   :  { %v2651_v2 = vpop.eup %2650  ;;  %v840_v13 = vpack.c.bf16 %v783_v6, %v782_v62  ;;  %2662 = verf.f32 %v601_v8  ;;  %v535_v54 = vmul.f32 0.5, %v343_v5 }
 0x15b   :  { %v2653_v4 = vpop.eup %2652  ;;  %v724_v10 = vadd.f32 1.0, %v2651_v2  ;;  %v2476_v14 = vpop.f32.mrb[24].mxu0  ;;  %2664 = verf.f32 %v599_v11 }
 0x15c   :  { %v722_v15 = vadd.f32 1.0, %v2653_v4  ;;  %v364_v17 = vadd.f32 %v2476_v14, %v3117_v52  ;;  %v355_v18 = vpop.f32.mrb[25].mxu0  ;;  %v2655_v20 = vpop.eup %2654  ;;  %2542 = vmatprep.mubr.bf16.mxu1 %v840_v13 }
 0x15d   :  { %v356_v19 = vadd.f32 %v355_v18, %v3117_v52  ;;  %v2477_v22 = vpop.f32.mrb[26].mxu0  ;;  %v2657_v23 = vpop.eup %2656  ;;  %v788_v25 = vmul.f32 %v724_v10, %v532_v7  ;;  %v725_v26 = vadd.f32 1.0, %v2655_v20  ;;  %2543 = vmatmul.mubr.bf16.gmra.mrb[12].mxu1 %v841_v9 }
 0x15e   :  { %v604_v24 = vmul.f32 0.70710677, %v364_v17  ;;  %v358_v27 = vpop.f32.mrb[27].mxu0  ;;  %v786_v28 = vmul.f32 %v722_v15, %v530_v12  ;;  %v723_v30 = vadd.f32 1.0, %v2657_v23  ;;  %v367_v31 = vadd.f32 %v2477_v22, %v3117_v52 }
 0x15f   :  { %v602_v29 = vmul.f32 0.70710677, %v356_v19  ;;  %v789_v32 = vmul.f32 %v725_v26, %v533_v16  ;;  %v359_v33 = vadd.f32 %v358_v27, %v3117_v52  ;;  %v540_v8 = vmul.f32 0.5, %v364_v17 }
 0x160   :  { %2666 = verf.f32 %v604_v24  ;;  %v787_v34 = vmul.f32 %v723_v30, %v531_v21  ;;  %v605_v35 = vmul.f32 0.70710677, %v367_v31  ;;  %v538_v4 = vmul.f32 0.5, %v356_v19 }
 0x161   :  { %2668 = verf.f32 %v602_v29  ;;  %v843_v38 = vpack.c.bf16 %v789_v32, %v788_v25  ;;  %v603_v39 = vmul.f32 0.70710677, %v359_v33  ;;  %v541_v14 = vmul.f32 0.5, %v367_v31 }
 0x162   :  { %v2659_v36 = vpop.eup %2658  ;;  %v842_v43 = vpack.c.bf16 %v787_v34, %v786_v28  ;;  %2670 = verf.f32 %v605_v35  ;;  %v539_v20 = vmul.f32 0.5, %v359_v33 }
 0x163   :  { %v2661_v40 = vpop.eup %2660  ;;  %v728_v41 = vadd.f32 1.0, %v2659_v36  ;;  %v2480_v44 = vpop.f32.mrb[28].mxu0  ;;  %2672 = verf.f32 %v603_v39 }
 0x164   :  { %v726_v45 = vadd.f32 1.0, %v2661_v40  ;;  %v380_v47 = vadd.f32 %v2480_v44, %v3117_v52  ;;  %v371_v48 = vpop.f32.mrb[29].mxu0  ;;  %v2663_v53 = vpop.eup %2662  ;;  %2546 = vmatprep.mubr.bf16.mxu1 %v842_v43 }
 0x165   :  { %v372_v55 = vadd.f32 %v371_v48, %v3117_v52  ;;  %v2481_v51 = vpop.f32.mrb[30].mxu0  ;;  %v2665_v58 = vpop.eup %2664  ;;  %v792_v50 = vmul.f32 %v728_v41, %v536_v37  ;;  %v729_v59 = vadd.f32 1.0, %v2663_v53  ;;  %2547 = vmatmul.mubr.bf16.gmra.mrb[16].mxu1 %v843_v38 }
 0x166   :  { %v608_v56 = vmul.f32 0.70710677, %v380_v47  ;;  %v374_v60 = vpop.f32.mrb[31].mxu0  ;;  %v790_v61 = vmul.f32 %v726_v45, %v534_v42  ;;  %v727_v57 = vadd.f32 1.0, %v2665_v58  ;;  %v383_v63 = vadd.f32 %v2481_v51, %v3117_v52 }
 0x167   :  { %v606_v62 = vmul.f32 0.70710677, %v372_v55  ;;  %v793_v0 = vmul.f32 %v729_v59, %v537_v46  ;;  %v375_v1 = vadd.f32 %v374_v60, %v3117_v52  ;;  %v544_v35 = vmul.f32 0.5, %v380_v47 }
 0x168   :  { %2674 = verf.f32 %v608_v56  ;;  %v791_v3 = vmul.f32 %v727_v57, %v535_v54  ;;  %v609_v5 = vmul.f32 0.70710677, %v383_v63  ;;  %v542_v40 = vmul.f32 0.5, %v372_v55 }
 0x169   :  { %2676 = verf.f32 %v606_v62  ;;  %v845_v2 = vpack.c.bf16 %v793_v0, %v792_v50  ;;  %v607_v7 = vmul.f32 0.70710677, %v375_v1  ;;  %v545_v44 = vmul.f32 0.5, %v383_v63 }
 0x16a   :  { %v2667_v6 = vpop.eup %2666  ;;  %v844_v10 = vpack.c.bf16 %v791_v3, %v790_v61  ;;  %2678 = verf.f32 %v609_v5  ;;  %v543_v53 = vmul.f32 0.5, %v375_v1 }
 0x16b   :  { %v2669_v9 = vpop.eup %2668  ;;  %v732_v11 = vadd.f32 1.0, %v2667_v6  ;;  %v2484_v12 = vpop.f32.mrb[32].mxu0  ;;  %2680 = verf.f32 %v607_v7 }
 0x16c   :  { %v730_v13 = vadd.f32 1.0, %v2669_v9  ;;  %v396_v15 = vadd.f32 %v2484_v12, %v3117_v52  ;;  %v387_v16 = vpop.f32.mrb[33].mxu0  ;;  %v2671_v18 = vpop.eup %2670  ;;  %2550 = vmatprep.mubr.bf16.mxu1 %v844_v10 }
 0x16d   :  { %v388_v21 = vadd.f32 %v387_v16, %v3117_v52  ;;  %v2485_v17 = vpop.f32.mrb[34].mxu0  ;;  %v2673_v22 = vpop.eup %2672  ;;  %v796_v23 = vmul.f32 %v732_v11, %v540_v8  ;;  %v733_v25 = vadd.f32 1.0, %v2671_v18  ;;  %2551 = vmatmul.mubr.bf16.gmra.mrb[20].mxu1 %v845_v2 }
 0x16e   :  { %v612_v19 = vmul.f32 0.70710677, %v396_v15  ;;  %v390_v26 = vpop.f32.mrb[35].mxu0  ;;  %v794_v24 = vmul.f32 %v730_v13, %v538_v4  ;;  %v731_v27 = vadd.f32 1.0, %v2673_v22  ;;  %v399_v30 = vadd.f32 %v2485_v17, %v3117_v52 }
 0x16f   :  { %v610_v28 = vmul.f32 0.70710677, %v388_v21  ;;  %v797_v29 = vmul.f32 %v733_v25, %v541_v14  ;;  %v391_v31 = vadd.f32 %v390_v26, %v3117_v52  ;;  %v548_v5 = vmul.f32 0.5, %v396_v15 }
 0x170   :  { %2682 = verf.f32 %v612_v19  ;;  %v795_v32 = vmul.f32 %v731_v27, %v539_v20  ;;  %v613_v33 = vmul.f32 0.70710677, %v399_v30  ;;  %v546_v9 = vmul.f32 0.5, %v388_v21 }
 0x171   :  { %2684 = verf.f32 %v610_v28  ;;  %v847_v36 = vpack.c.bf16 %v797_v29, %v796_v23  ;;  %v611_v37 = vmul.f32 0.70710677, %v391_v31  ;;  %v549_v12 = vmul.f32 0.5, %v399_v30 }
 0x172   :  { %v2675_v34 = vpop.eup %2674  ;;  %v846_v41 = vpack.c.bf16 %v795_v32, %v794_v24  ;;  %2686 = verf.f32 %v613_v33  ;;  %v547_v18 = vmul.f32 0.5, %v391_v31 }
 0x173   :  { %v2677_v38 = vpop.eup %2676  ;;  %v736_v39 = vadd.f32 1.0, %v2675_v34  ;;  %v2488_v42 = vpop.f32.mrb[36].mxu0  ;;  %2688 = verf.f32 %v611_v37 }
 0x174   :  { %v734_v43 = vadd.f32 1.0, %v2677_v38  ;;  %v412_v45 = vadd.f32 %v2488_v42, %v3117_v52  ;;  %v403_v46 = vpop.f32.mrb[37].mxu0  ;;  %v2679_v48 = vpop.eup %2678  ;;  %2554 = vmatprep.mubr.bf16.mxu1 %v846_v41 }
 0x175   :  { %v404_v54 = vadd.f32 %v403_v46, %v3117_v52  ;;  %v2489_v47 = vpop.f32.mrb[38].mxu0  ;;  %v2681_v51 = vpop.eup %2680  ;;  %v800_v58 = vmul.f32 %v736_v39, %v544_v35  ;;  %v737_v50 = vadd.f32 1.0, %v2679_v48  ;;  %2555 = vmatmul.mubr.bf16.gmra.mrb[24].mxu1 %v847_v36 }
 0x176   :  { %v616_v55 = vmul.f32 0.70710677, %v412_v45  ;;  %v406_v59 = vpop.f32.mrb[39].mxu0  ;;  %v798_v56 = vmul.f32 %v734_v43, %v542_v40  ;;  %v735_v60 = vadd.f32 1.0, %v2681_v51  ;;  %v415_v57 = vadd.f32 %v2489_v47, %v3117_v52 }
 0x177   :  { %v614_v61 = vmul.f32 0.70710677, %v404_v54  ;;  %v801_v62 = vmul.f32 %v737_v50, %v545_v44  ;;  %v407_v63 = vadd.f32 %v406_v59, %v3117_v52  ;;  %v552_v33 = vmul.f32 0.5, %v412_v45 }
 0x178   :  { %2690 = verf.f32 %v616_v55  ;;  %v799_v0 = vmul.f32 %v735_v60, %v543_v53  ;;  %v617_v1 = vmul.f32 0.70710677, %v415_v57  ;;  %v550_v38 = vmul.f32 0.5, %v404_v54 }
 0x179   :  { %2692 = verf.f32 %v614_v61  ;;  %v849_v6 = vpack.c.bf16 %v801_v62, %v800_v58  ;;  %v615_v8 = vmul.f32 0.70710677, %v407_v63  ;;  %v553_v42 = vmul.f32 0.5, %v415_v57 }
 0x17a   :  { %v2683_v3 = vpop.eup %2682  ;;  %v848_v11 = vpack.c.bf16 %v799_v0, %v798_v56  ;;  %2694 = verf.f32 %v617_v1  ;;  %v551_v48 = vmul.f32 0.5, %v407_v63 }
 0x17b   :  { %v2685_v2 = vpop.eup %2684  ;;  %v740_v7 = vadd.f32 1.0, %v2683_v3  ;;  %v2492_v4 = vpop.f32.mrb[40].mxu0  ;;  %2696 = verf.f32 %v615_v8 }
 0x17c   :  { %v738_v10 = vadd.f32 1.0, %v2685_v2  ;;  %v428_v13 = vadd.f32 %v2492_v4, %v3117_v52  ;;  %v419_v14 = vpop.f32.mrb[41].mxu0  ;;  %v2687_v16 = vpop.eup %2686  ;;  %2558 = vmatprep.mubr.bf16.mxu1 %v848_v11 }
 0x17d   :  { %v420_v20 = vadd.f32 %v419_v14, %v3117_v52  ;;  %v2493_v15 = vpop.f32.mrb[42].mxu0  ;;  %v2689_v17 = vpop.eup %2688  ;;  %v804_v22 = vmul.f32 %v740_v7, %v548_v5  ;;  %v741_v23 = vadd.f32 1.0, %v2687_v16  ;;  %2559 = vmatmul.mubr.bf16.gmra.mrb[28].mxu1 %v849_v6 }
 0x17e   :  { %v620_v21 = vmul.f32 0.70710677, %v428_v13  ;;  %v422_v25 = vpop.f32.mrb[43].mxu0  ;;  %v802_v19 = vmul.f32 %v738_v10, %v546_v9  ;;  %v739_v26 = vadd.f32 1.0, %v2689_v17  ;;  %v431_v27 = vadd.f32 %v2493_v15, %v3117_v52 }
 0x17f   :  { %v618_v24 = vmul.f32 0.70710677, %v420_v20  ;;  %v805_v28 = vmul.f32 %v741_v23, %v549_v12  ;;  %v423_v30 = vadd.f32 %v422_v25, %v3117_v52  ;;  %v556_v1 = vmul.f32 0.5, %v428_v13 }
 0x180   :  { %2698 = verf.f32 %v620_v21  ;;  %v803_v29 = vmul.f32 %v739_v26, %v547_v18  ;;  %v621_v31 = vmul.f32 0.70710677, %v431_v27  ;;  %v554_v2 = vmul.f32 0.5, %v420_v20 }
 0x181   :  { %2700 = verf.f32 %v618_v24  ;;  %v851_v34 = vpack.c.bf16 %v805_v28, %v804_v22  ;;  %v619_v35 = vmul.f32 0.70710677, %v423_v30  ;;  %v557_v4 = vmul.f32 0.5, %v431_v27 }
 0x182   :  { %v2691_v32 = vpop.eup %2690  ;;  %v850_v39 = vpack.c.bf16 %v803_v29, %v802_v19  ;;  %2702 = verf.f32 %v621_v31  ;;  %v555_v16 = vmul.f32 0.5, %v423_v30 }
 0x183   :  { %v2693_v36 = vpop.eup %2692  ;;  %v744_v37 = vadd.f32 1.0, %v2691_v32  ;;  %v2496_v40 = vpop.f32.mrb[44].mxu0  ;;  %2704 = verf.f32 %v619_v35 }
 0x184   :  { %v742_v41 = vadd.f32 1.0, %v2693_v36  ;;  %v444_v43 = vadd.f32 %v2496_v40, %v3117_v52  ;;  %v435_v44 = vpop.f32.mrb[45].mxu0  ;;  %v2695_v46 = vpop.eup %2694  ;;  %2562 = vmatprep.mubr.bf16.mxu1 %v850_v39 }
 0x185   :  { %v436_v53 = vadd.f32 %v435_v44, %v3117_v52  ;;  %v2497_v45 = vpop.f32.mrb[46].mxu0  ;;  %v2697_v47 = vpop.eup %2696  ;;  %v808_v51 = vmul.f32 %v744_v37, %v552_v33  ;;  %v745_v58 = vadd.f32 1.0, %v2695_v46  ;;  %2563 = vmatmul.mubr.bf16.gmra.mrb[32].mxu1 %v851_v34 }
 0x186   :  { %v624_v54 = vmul.f32 0.70710677, %v444_v43  ;;  %v438_v50 = vpop.f32.mrb[47].mxu0  ;;  %v806_v55 = vmul.f32 %v742_v41, %v550_v38  ;;  %v743_v59 = vadd.f32 1.0, %v2697_v47  ;;  %v447_v60 = vadd.f32 %v2497_v45, %v3117_v52 }
 0x187   :  { %v622_v56 = vmul.f32 0.70710677, %v436_v53  ;;  %v809_v61 = vmul.f32 %v745_v58, %v553_v42  ;;  %v439_v57 = vadd.f32 %v438_v50, %v3117_v52  ;;  %v560_v31 = vmul.f32 0.5, %v444_v43 }
 0x188   :  { %2706 = verf.f32 %v624_v54  ;;  %v807_v62 = vmul.f32 %v743_v59, %v551_v48  ;;  %v625_v63 = vmul.f32 0.70710677, %v447_v60  ;;  %v558_v36 = vmul.f32 0.5, %v436_v53 }
 0x189   :  { %2708 = verf.f32 %v622_v56  ;;  %v853_v3 = vpack.c.bf16 %v809_v61, %v808_v51  ;;  %v623_v5 = vmul.f32 0.70710677, %v439_v57  ;;  %v561_v40 = vmul.f32 0.5, %v447_v60 }
 0x18a   :  { %v2699_v0 = vpop.eup %2698  ;;  %v852_v7 = vpack.c.bf16 %v807_v62, %v806_v55  ;;  %2710 = verf.f32 %v625_v63  ;;  %v559_v46 = vmul.f32 0.5, %v439_v57 }
 0x18b   :  { %v2701_v6 = vpop.eup %2700  ;;  %v748_v8 = vadd.f32 1.0, %v2699_v0  ;;  %v2500_v9 = vpop.f32.mrb[48].mxu0  ;;  %2712 = verf.f32 %v623_v5 }
 0x18c   :  { %v746_v11 = vadd.f32 1.0, %v2701_v6  ;;  %v460_v10 = vadd.f32 %v2500_v9, %v3117_v52  ;;  %v451_v12 = vpop.f32.mrb[49].mxu0  ;;  %v2703_v14 = vpop.eup %2702  ;;  %2566 = vmatprep.mubr.bf16.mxu1 %v852_v7 }
 0x18d   :  { %v452_v18 = vadd.f32 %v451_v12, %v3117_v52  ;;  %v2501_v13 = vpop.f32.mrb[50].mxu0  ;;  %v2705_v15 = vpop.eup %2704  ;;  %v812_v17 = vmul.f32 %v748_v8, %v556_v1  ;;  %v749_v22 = vadd.f32 1.0, %v2703_v14  ;;  %2567 = vmatmul.mubr.bf16.gmra.mrb[36].mxu1 %v853_v3 }
 0x18e   :  { %v628_v20 = vmul.f32 0.70710677, %v460_v10  ;;  %v454_v23 = vpop.f32.mrb[51].mxu0  ;;  %v810_v21 = vmul.f32 %v746_v11, %v554_v2  ;;  %v747_v25 = vadd.f32 1.0, %v2705_v15  ;;  %v463_v26 = vadd.f32 %v2501_v13, %v3117_v52 }
 0x18f   :  { %v626_v19 = vmul.f32 0.70710677, %v452_v18  ;;  %v813_v24 = vmul.f32 %v749_v22, %v557_v4  ;;  %v455_v27 = vadd.f32 %v454_v23, %v3117_v52  ;;  %v564_v63 = vmul.f32 0.5, %v460_v10 }
 0x190   :  { %2714 = verf.f32 %v628_v20  ;;  %v811_v28 = vmul.f32 %v747_v25, %v555_v16  ;;  %v629_v30 = vmul.f32 0.70710677, %v463_v26  ;;  %v562_v6 = vmul.f32 0.5, %v452_v18 }
 0x191   :  { %2716 = verf.f32 %v626_v19  ;;  %v855_v32 = vpack.c.bf16 %v813_v24, %v812_v17  ;;  %v627_v33 = vmul.f32 0.70710677, %v455_v27  ;;  %v565_v9 = vmul.f32 0.5, %v463_v26 }
 0x192   :  { %v2707_v29 = vpop.eup %2706  ;;  %v854_v37 = vpack.c.bf16 %v811_v28, %v810_v21  ;;  %2718 = verf.f32 %v629_v30  ;;  %v563_v14 = vmul.f32 0.5, %v455_v27 }
 0x193   :  { %v2709_v34 = vpop.eup %2708  ;;  %v752_v35 = vadd.f32 1.0, %v2707_v29  ;;  %v2504_v38 = vpop.f32.mrb[52].mxu0  ;;  %2720 = verf.f32 %v627_v33 }
 0x194   :  { %v750_v39 = vadd.f32 1.0, %v2709_v34  ;;  %v476_v41 = vadd.f32 %v2504_v38, %v3117_v52  ;;  %v467_v42 = vpop.f32.mrb[53].mxu0  ;;  %v2711_v44 = vpop.eup %2710  ;;  %2570 = vmatprep.mubr.bf16.mxu1 %v854_v37 }
 0x195   :  { %v468_v48 = vadd.f32 %v467_v42, %v3117_v52  ;;  %v2505_v43 = vpop.f32.mrb[54].mxu0  ;;  %v2713_v45 = vpop.eup %2712  ;;  %v816_v47 = vmul.f32 %v752_v35, %v560_v31  ;;  %v753_v51 = vadd.f32 1.0, %v2711_v44  ;;  %2571 = vmatmul.mubr.bf16.gmra.mrb[40].mxu1 %v855_v32 }
 0x196   :  { %v632_v53 = vmul.f32 0.70710677, %v476_v41  ;;  %v470_v58 = vpop.f32.mrb[55].mxu0  ;;  %v814_v54 = vmul.f32 %v750_v39, %v558_v36  ;;  %v751_v50 = vadd.f32 1.0, %v2713_v45  ;;  %v479_v59 = vadd.f32 %v2505_v43, %v3117_v52 }
 0x197   :  { %v630_v55 = vmul.f32 0.70710677, %v468_v48  ;;  %v817_v56 = vmul.f32 %v753_v51, %v561_v40  ;;  %v471_v60 = vadd.f32 %v470_v58, %v3117_v52  ;;  %v568_v30 = vmul.f32 0.5, %v476_v41 }
 0x198   :  { %2722 = verf.f32 %v632_v53  ;;  %v815_v61 = vmul.f32 %v751_v50, %v559_v46  ;;  %v633_v57 = vmul.f32 0.70710677, %v479_v59  ;;  %v566_v34 = vmul.f32 0.5, %v468_v48 }
 0x199   :  { %2724 = verf.f32 %v630_v55  ;;  %v857_v0 = vpack.c.bf16 %v817_v56, %v816_v47  ;;  %v631_v1 = vmul.f32 0.70710677, %v471_v60  ;;  %v569_v38 = vmul.f32 0.5, %v479_v59 }
 0x19a   :  { %v2715_v62 = vpop.eup %2714  ;;  %v856_v8 = vpack.c.bf16 %v815_v61, %v814_v54  ;;  %2726 = verf.f32 %v633_v57  ;;  %v567_v44 = vmul.f32 0.5, %v471_v60 }
 0x19b   :  { %v2717_v3 = vpop.eup %2716  ;;  %v756_v5 = vadd.f32 1.0, %v2715_v62  ;;  %v2508_v2 = vpop.f32.mrb[56].mxu0  ;;  %2728 = verf.f32 %v631_v1 }
 0x19c   :  { %v754_v7 = vadd.f32 1.0, %v2717_v3  ;;  %v492_v11 = vadd.f32 %v2508_v2, %v3117_v52  ;;  %v483_v4 = vpop.f32.mrb[57].mxu0  ;;  %v2719_v12 = vpop.eup %2718  ;;  %2574 = vmatprep.mubr.bf16.mxu1 %v856_v8 }
 0x19d   :  { %v484_v16 = vadd.f32 %v483_v4, %v3117_v52  ;;  %v2509_v10 = vpop.f32.mrb[58].mxu0  ;;  %v2721_v13 = vpop.eup %2720  ;;  %v820_v15 = vmul.f32 %v756_v5, %v564_v63  ;;  %v757_v17 = vadd.f32 1.0, %v2719_v12  ;;  %2575 = vmatmul.mubr.bf16.gmra.mrb[44].mxu1 %v857_v0 }
 0x19e   :  { %v636_v18 = vmul.f32 0.70710677, %v492_v11  ;;  %v486_v22 = vpop.f32.mrb[59].mxu0  ;;  %v818_v20 = vmul.f32 %v754_v7, %v562_v6  ;;  %v755_v23 = vadd.f32 1.0, %v2721_v13  ;;  %v495_v25 = vadd.f32 %v2509_v10, %v3117_v52 }
 0x19f   :  { %v634_v21 = vmul.f32 0.70710677, %v484_v16  ;;  %v821_v19 = vmul.f32 %v757_v17, %v565_v9  ;;  %v487_v26 = vadd.f32 %v486_v22, %v3117_v52  ;;  %v572_v57 = vmul.f32 0.5, %v492_v11 }
 0x1a0   :  { %2730 = verf.f32 %v636_v18  ;;  %v819_v24 = vmul.f32 %v755_v23, %v563_v14  ;;  %v637_v27 = vmul.f32 0.70710677, %v495_v25  ;;  %v570_v3 = vmul.f32 0.5, %v484_v16 }
 0x1a1   :  { %2732 = verf.f32 %v634_v21  ;;  %v859_v29 = vpack.c.bf16 %v821_v19, %v820_v15  ;;  %v635_v31 = vmul.f32 0.70710677, %v487_v26  ;;  %v573_v8 = vmul.f32 0.5, %v495_v25 }
 0x1a2   :  { %v2723_v28 = vpop.eup %2722  ;;  %v858_v35 = vpack.c.bf16 %v819_v24, %v818_v20  ;;  %2734 = verf.f32 %v637_v27  ;;  %v571_v7 = vmul.f32 0.5, %v487_v26 }
 0x1a3   :  { %v2725_v32 = vpop.eup %2724  ;;  %v760_v33 = vadd.f32 1.0, %v2723_v28  ;;  %v2512_v36 = vpop.f32.mrb[60].mxu0  ;;  %2736 = verf.f32 %v635_v31 }
 0x1a4   :  { %v758_v37 = vadd.f32 1.0, %v2725_v32  ;;  %v508_v39 = vadd.f32 %v2512_v36, %v3117_v52  ;;  %v499_v40 = vpop.f32.mrb[61].mxu0  ;;  %v2727_v42 = vpop.eup %2726  ;;  %2578 = vmatprep.mubr.bf16.mxu1 %v858_v35  ;;  %v3187_v35 = vld [vmem:[%s4240_s3] sm:$0xf]  ;;  %s3040_s3 = smov [#allocation8]  }
 0x1a5   :  { %v500_v46 = vadd.f32 %v499_v40, %v3117_v52  ;;  %v2513_v41 = vpop.f32.mrb[62].mxu0  ;;  %v2729_v43 = vpop.eup %2728  ;;  %v824_v45 = vmul.f32 %v760_v33, %v568_v30  ;;  %v761_v47 = vadd.f32 1.0, %v2727_v42  ;;  %2579 = vmatmul.mubr.bf16.gmra.mrb[48].mxu1 %v859_v29  ;;  %s2325_s30 = sshll.u32 %s3040_s3, 4  ;;  %s2326_s30 = int_to_ptr.vmem [resolvable:$true] %s2325_s30 }
 0x1a6   :  { %v640_v48 = vmul.f32 0.70710677, %v508_v39  ;;  %v502_v51 = vpop.f32.mrb[63].mxu0  ;;  %v822_v53 = vmul.f32 %v758_v37, %v566_v34  ;;  %v759_v58 = vadd.f32 1.0, %v2729_v43  ;;  %v511_v50 = vadd.f32 %v2513_v41, %v3117_v52  ;;  %s3005_s5 = scalar_lea.vmem %s2326_s30, 8192  ;;  %p3010_p11 = scmp.lt.s32.totalorder %s2326_s30, %s2326_s30 }
 0x1a7   :  { %v638_v54 = vmul.f32 0.70710677, %v500_v46  ;;  %v825_v55 = vmul.f32 %v761_v47, %v569_v38  ;;  %v503_v59 = vadd.f32 %v502_v51, %v3117_v52  ;;  %v576_v15 = vmul.f32 0.5, %v508_v39  ;;  %p3006_p10 = scmp.ne.s32.totalorder %s2326_s30, %s3005_s5  ;;  %p3011_p12 = scmp.lt.s32.totalorder %s3005_s5, %s3005_s5 }
 0x1a8   :  { %2738 = verf.f32 %v640_v48  ;;  %v823_v56 = vmul.f32 %v759_v58, %v567_v44  ;;  %v641_v60 = vmul.f32 0.70710677, %v511_v50  ;;  %v574_v22 = vmul.f32 0.5, %v500_v46 }
 0x1a9   :  { %2740 = verf.f32 %v638_v54  ;;  %v861_v62 = vpack.c.bf16 %v825_v55, %v824_v45  ;;  %v639_v63 = vmul.f32 0.70710677, %v503_v59  ;;  %v577_v21 = vmul.f32 0.5, %v511_v50  ;;  %p3012_p13 = por %p3011_p12, %p3010_p11 }
 0x1aa   :  { %v2731_v61 = vpop.eup %2730  ;;  %v860_v5 = vpack.c.bf16 %v823_v56, %v822_v53  ;;  %2742 = verf.f32 %v641_v60  ;;  %v575_v19 = vmul.f32 0.5, %v503_v59  ;;  %v884_v34 = vsub.s32 1, %v3111_v49 }
 0x1ab   :  { %v2733_v0 = vpop.eup %2732  ;;  %v764_v1 = vadd.f32 1.0, %v2731_v61  ;;  %2744 = verf.f32 %v639_v63  ;;  %p3013_p0 = pnand %p3012_p13, %p3006_p10 }
 0x1ac   :  { %v762_v6 = vadd.f32 1.0, %v2733_v0  ;;  %v2735_v2 = vpop.eup %2734  ;;  %2582 = vmatprep.mubr.bf16.mxu1 %v860_v5  ;;  %v3190_v36 = vrot.slane %v3187_v35, %v884_v34 }
 0x1ad   :  { %v2737_v9 = vpop.eup %2736  ;;  %v828_v52 = vmul.f32 %v764_v1, %v572_v57  ;;  %v765_v4 = vadd.f32 1.0, %v2735_v2  ;;  %2583 = vmatmul.mubr.bf16.gmra.mrb[52].mxu1 %v861_v62 }
 0x1ae   :  { %v826_v12 = vmul.f32 %v762_v6, %v570_v3  ;;  %v763_v14 = vadd.f32 1.0, %v2737_v9 }
 0x1af   :  { %v829_v11 = vmul.f32 %v765_v4, %v573_v8 }
 0x1b0   :  { %v827_v10 = vmul.f32 %v763_v14, %v571_v7 }
 0x1b1   :  { %v863_v17 = vpack.c.bf16 %v829_v11, %v828_v52 }
 0x1b2   :  { %v2739_v13 = vpop.eup %2738  ;;  %v862_v20 = vpack.c.bf16 %v827_v10, %v826_v12 }
 0x1b3   :  { %v2741_v16 = vpop.eup %2740  ;;  %v768_v18 = vadd.f32 1.0, %v2739_v13 }
 0x1b4   :  { %v766_v23 = vadd.f32 1.0, %v2741_v16  ;;  %v2743_v25 = vpop.eup %2742  ;;  %2586 = vmatprep.mubr.bf16.mxu1 %v862_v20 }
 0x1b5   :  { %v2745_v26 = vpop.eup %2744  ;;  %v832_v24 = vmul.f32 %v768_v18, %v576_v15  ;;  %v769_v27 = vadd.f32 1.0, %v2743_v25  ;;  %2587 = vmatmul.mubr.bf16.gmra.mrb[56].mxu1 %v863_v17 }
 0x1b6   :  { %v830_v28 = vmul.f32 %v766_v23, %v574_v22  ;;  %v767_v30 = vadd.f32 1.0, %v2745_v26 }
 0x1b7   :  { %v833_v29 = vmul.f32 %v769_v27, %v577_v21 }
 0x1b8   :  { %v831_v31 = vmul.f32 %v767_v30, %v575_v19 }
 0x1b9   :  { %v865_v32 = vpack.c.bf16 %v833_v29, %v832_v24 }
 0x1ba   :  { %v864_v33 = vpack.c.bf16 %v831_v31, %v830_v28 }
 0x1bc   :  { %2590 = vmatprep.mubr.bf16.mxu1 %v864_v33 }
 0x1bd   :  { %2591 = vmatmul.mubr.bf16.gmra.mrb[60].mxu1 %v865_v32 }
 0x218   :  { %v2532_v37 = vpop.f32.mrb[0].mxu1 }
 0x219   :  { %v3193_v38 = vadd.f32 %v2532_v37, %v3190_v36  ;;  %v968_v39 = vpop.f32.mrb[1].mxu1 }
 0x21a   :  { %v3196_v40 = vadd.f32 %v968_v39, %v3190_v36  ;;  %v2533_v42 = vpop.f32.mrb[2].mxu1 }
 0x21b   :  { %1227 = vadd.xlane.f32.xlu1 %v3193_v38  ;;  %v971_v44 = vpop.f32.mrb[3].mxu1  ;;  %v3201_v46 = vadd.f32 %v2533_v42, %v3190_v36  ;;  %v1418_v41 = vmul.f32 %v3193_v38, %v3193_v38 }
 0x21c   :  { %1223 = vadd.xlane.f32.xlu0 %v3196_v40  ;;  %v3207_v45 = vadd.f32 %v971_v44, %v3190_v36  ;;  %v1416_v54 = vmul.f32 %v3196_v40, %v3196_v40 }
 0x21d   :  { %v1419_v48 = vmul.f32 %v3201_v46, %v3201_v46 }
 0x21e   :  { %v1417_v58 = vmul.f32 %v3207_v45, %v3207_v45 }
 0x21f   :  { %1229 = vadd.xlane.f32.xlu1 %v3201_v46 }
 0x220   :  { %v2536_v43 = vpop.f32.mrb[4].mxu1  ;;  %1484 = vadd.xlane.f32.xlu0 %v1418_v41 }
 0x221   :  { %v984_v47 = vpop.f32.mrb[5].mxu1  ;;  %v3220_v56 = vadd.f32 %v2536_v43, %v3190_v36 }
 0x222   :  { %v2537_v51 = vpop.f32.mrb[6].mxu1  ;;  %v3228_v62 = vadd.f32 %v984_v47, %v3190_v36 }
 0x223   :  { %1486 = vadd.xlane.f32.xlu1 %v1419_v48  ;;  %v987_v53 = vpop.f32.mrb[7].mxu1  ;;  %v3217_v55 = vadd.f32 %v2537_v51, %v3190_v36  ;;  %v1422_v3 = vmul.f32 %v3220_v56, %v3220_v56 }
 0x224   :  { %1225 = vadd.xlane.f32.xlu0 %v3207_v45  ;;  %v3225_v57 = vadd.f32 %v987_v53, %v3190_v36  ;;  %v1420_v2 = vmul.f32 %v3228_v62, %v3228_v62 }
 0x225   :  { %v1423_v0 = vmul.f32 %v3217_v55, %v3217_v55 }
 0x226   :  { %v1421_v8 = vmul.f32 %v3225_v57, %v3225_v57 }
 0x227   :  { %1482 = vadd.xlane.f32.xlu1 %v1417_v58 }
 0x228   :  { %v2540_v50 = vpop.f32.mrb[8].mxu1  ;;  %1480 = vadd.xlane.f32.xlu0 %v1416_v54 }
 0x229   :  { %v1000_v59 = vpop.f32.mrb[9].mxu1  ;;  %v3244_v4 = vadd.f32 %v2540_v50, %v3190_v36 }
 0x22a   :  { %v2541_v60 = vpop.f32.mrb[10].mxu1  ;;  %v3252_v10 = vadd.f32 %v1000_v59, %v3190_v36 }
 0x22b   :  { %v1003_v61 = vpop.f32.mrb[11].mxu1  ;;  %1237 = vadd.xlane.f32.xlu1 %v3217_v55  ;;  %v3241_v9 = vadd.f32 %v2541_v60, %v3190_v36  ;;  %v1426_v16 = vmul.f32 %v3244_v4, %v3244_v4 }
 0x22c   :  { %1235 = vadd.xlane.f32.xlu0 %v3220_v56  ;;  %v3249_v11 = vadd.f32 %v1003_v61, %v3190_v36  ;;  %v1424_v23 = vmul.f32 %v3252_v10, %v3252_v10 }
 0x22d   :  { %v1427_v15 = vmul.f32 %v3241_v9, %v3241_v9 }
 0x22e   :  { %v1425_v20 = vmul.f32 %v3249_v11, %v3249_v11 }
 0x22f   :  { %1233 = vadd.xlane.f32.xlu1 %v3225_v57 }
 0x230   :  { %1231 = vadd.xlane.f32.xlu0 %v3228_v62  ;;  %v2544_v63 = vpop.f32.mrb[12].mxu1 }
 0x231   :  { %v1016_v1 = vpop.f32.mrb[13].mxu1  ;;  %v3276_v26 = vadd.f32 %v2544_v63, %v3190_v36 }
 0x232   :  { %v2545_v5 = vpop.f32.mrb[14].mxu1  ;;  %v3288_v30 = vadd.f32 %v1016_v1, %v3190_v36 }
 0x233   :  { %1494 = vadd.xlane.f32.xlu1 %v1423_v0  ;;  %v1019_v6 = vpop.f32.mrb[15].mxu1  ;;  %v3271_v25 = vadd.f32 %v2545_v5, %v3190_v36  ;;  %v1430_v33 = vmul.f32 %v3276_v26, %v3276_v26 }
 0x234   :  { %1492 = vadd.xlane.f32.xlu0 %v1422_v3  ;;  %v3285_v28 = vadd.f32 %v1019_v6, %v3190_v36  ;;  %v1428_v42 = vmul.f32 %v3288_v30, %v3288_v30 }
 0x235   :  { %v1431_v31 = vmul.f32 %v3271_v25, %v3271_v25 }
 0x236   :  { %v1429_v39 = vmul.f32 %v3285_v28, %v3285_v28 }
 0x237   :  { %1490 = vadd.xlane.f32.xlu1 %v1421_v8 }
 0x238   :  { %1488 = vadd.xlane.f32.xlu0 %v1420_v2  ;;  %v2548_v7 = vpop.f32.mrb[16].mxu1 }
 0x239   :  { %v1032_v52 = vpop.f32.mrb[17].mxu1  ;;  %v3316_v47 = vadd.f32 %v2548_v7, %v3190_v36 }
 0x23a   :  { %v2549_v12 = vpop.f32.mrb[18].mxu1  ;;  %v3328_v58 = vadd.f32 %v1032_v52, %v3190_v36 }
 0x23b   :  { %1245 = vadd.xlane.f32.xlu1 %v3241_v9  ;;  %v1035_v14 = vpop.f32.mrb[19].mxu1  ;;  %v3311_v41 = vadd.f32 %v2549_v12, %v3190_v36  ;;  %v1434_v60 = vmul.f32 %v3316_v47, %v3316_v47 }
 0x23c   :  { %1243 = vadd.xlane.f32.xlu0 %v3244_v4  ;;  %v3325_v53 = vadd.f32 %v1035_v14, %v3190_v36  ;;  %4267 = vst [vmem:[#allocation12_spill] sm:$0xff] %v3328_v58  ;;  %v1432_v1 = vmul.f32 %v3328_v58, %v3328_v58 }
 0x23d   :  { %v1435_v50 = vmul.f32 %v3311_v41, %v3311_v41 }
 0x23e   :  { %v1433_v0 = vmul.f32 %v3325_v53, %v3325_v53 }
 0x23f   :  { %1241 = vadd.xlane.f32.xlu1 %v3249_v11 }
 0x240   :  { %1239 = vadd.xlane.f32.xlu0 %v3252_v10  ;;  %v3256_v13 = vpop.f32.mrb[20].mxu1 }
 0x241   :  { %v3260_v17 = vpop.f32.mrb[21].mxu1  ;;  %v3357_v8 = vadd.f32 %v3256_v13, %v3190_v36 }
 0x242   :  { %v2553_v18 = vpop.f32.mrb[22].mxu1  ;;  %v3370_v12 = vadd.f32 %v3260_v17, %v3190_v36 }
 0x243   :  { %1502 = vadd.xlane.f32.xlu1 %v1427_v15  ;;  %v1051_v22 = vpop.f32.mrb[23].mxu1  ;;  %v3351_v5 = vadd.f32 %v2553_v18, %v3190_v36  ;;  %4269 = vst [vmem:[#allocation14_spill] sm:$0xff] %v3357_v8 }
 0x244   :  { %1500 = vadd.xlane.f32.xlu0 %v1426_v16  ;;  %v3366_v52 = vadd.f32 %v1051_v22, %v3190_v36  ;;  %4271 = vst [vmem:[#allocation16_spill] sm:$0xff] %v3370_v12  ;;  %v1438_v16 = vmul.f32 %v3357_v8, %v3357_v8 }
 0x245   :  { %4268 = vst [vmem:[#allocation13_spill] sm:$0xff] %v3351_v5  ;;  %v1439_v13 = vmul.f32 %v3351_v5, %v3351_v5 }
 0x246   :  { %4270 = vst [vmem:[#allocation15_spill] sm:$0xff] %v3366_v52  ;;  %v1437_v17 = vmul.f32 %v3366_v52, %v3366_v52 }
 0x247   :  { %1498 = vadd.xlane.f32.xlu1 %v1425_v20  ;;  %v1436_v20 = vmul.f32 %v3370_v12, %v3370_v12 }
 0x248   :  { %1496 = vadd.xlane.f32.xlu0 %v1424_v23  ;;  %v3268_v21 = vpop.f32.mrb[24].mxu1 }
 0x249   :  { %v3273_v19 = vpop.f32.mrb[25].mxu1 }
 0x24a   :  { %v3278_v24 = vpop.f32.mrb[26].mxu1 }
 0x24b   :  { %1253 = vadd.xlane.f32.xlu1 %v3271_v25  ;;  %v3281_v27 = vpop.f32.mrb[27].mxu1 }
 0x24c   :  { %1251 = vadd.xlane.f32.xlu0 %v3276_v26 }
 0x24f   :  { %1249 = vadd.xlane.f32.xlu1 %v3285_v28 }
 0x250   :  { %1247 = vadd.xlane.f32.xlu0 %v3288_v30  ;;  %v3292_v29 = vpop.f32.mrb[28].mxu1 }
 0x251   :  { %v3296_v32 = vpop.f32.mrb[29].mxu1 }
 0x252   :  { %v3300_v34 = vpop.f32.mrb[30].mxu1 }
 0x253   :  { %1510 = vadd.xlane.f32.xlu1 %v1431_v31  ;;  %v3302_v37 = vpop.f32.mrb[31].mxu1  ;;  %v3394_v31 = vadd.f32 %v3278_v24, %v3190_v36  ;;  %v3414_v24 = vadd.f32 %v3273_v19, %v3190_v36 }
 0x254   :  { %1508 = vadd.xlane.f32.xlu0 %v1430_v33 }
 0x255   :  { %4272 = vst [vmem:[#allocation17_spill] sm:$0xff] %v3394_v31  ;;  %4275 = vst [vmem:[#allocation20_spill] sm:$0xff] %v3414_v24 }
 0x257   :  { %1506 = vadd.xlane.f32.xlu1 %v1429_v39  ;;  %v3400_v39 = vadd.f32 %v3268_v21, %v3190_v36 }
 0x258   :  { %1504 = vadd.xlane.f32.xlu0 %v1428_v42  ;;  %v3308_v44 = vpop.f32.mrb[32].mxu1 }
 0x259   :  { %v3313_v43 = vpop.f32.mrb[33].mxu1  ;;  %4273 = vst [vmem:[#allocation18_spill] sm:$0xff] %v3400_v39 }
 0x25a   :  { %v3318_v48 = vpop.f32.mrb[34].mxu1 }
 0x25b   :  { %1261 = vadd.xlane.f32.xlu1 %v3311_v41  ;;  %v3321_v51 = vpop.f32.mrb[35].mxu1 }
 0x25c   :  { %1259 = vadd.xlane.f32.xlu0 %v3316_v47 }
 0x25f   :  { %1257 = vadd.xlane.f32.xlu1 %v3325_v53 }
 0x260   :  { %1255 = vadd.xlane.f32.xlu0 %v3328_v58  ;;  %v3332_v54 = vpop.f32.mrb[36].mxu1 }
 0x261   :  { %v3336_v59 = vpop.f32.mrb[37].mxu1 }
 0x262   :  { %v3340_v61 = vpop.f32.mrb[38].mxu1 }
 0x263   :  { %1518 = vadd.xlane.f32.xlu1 %v1435_v50  ;;  %v3342_v63 = vpop.f32.mrb[39].mxu1 }
 0x264   :  { %1516 = vadd.xlane.f32.xlu0 %v1434_v60  ;;  %v3410_v60 = vadd.f32 %v3281_v27, %v3190_v36 }
 0x266   :  { %4274 = vst [vmem:[#allocation19_spill] sm:$0xff] %v3410_v60  ;;  %v1441_v19 = vmul.f32 %v3410_v60, %v3410_v60 }
 0x267   :  { %1514 = vadd.xlane.f32.xlu1 %v1433_v0  ;;  %v1443_v0 = vmul.f32 %v3394_v31, %v3394_v31 }
 0x268   :  { %1512 = vadd.xlane.f32.xlu0 %v1432_v1  ;;  %v3348_v3 = vpop.f32.mrb[40].mxu1 }
 0x269   :  { %v3353_v6 = vpop.f32.mrb[41].mxu1 }
 0x26a   :  { %v3359_v2 = vpop.f32.mrb[42].mxu1 }
 0x26b   :  { %1269 = vadd.xlane.f32.xlu1 %v3351_v5  ;;  %v3362_v7 = vpop.f32.mrb[43].mxu1 }
 0x26c   :  { %1267 = vadd.xlane.f32.xlu0 %v3357_v8 }
 0x26f   :  { %1265 = vadd.xlane.f32.xlu1 %v3366_v52 }
 0x270   :  { %1263 = vadd.xlane.f32.xlu0 %v3370_v12  ;;  %v3374_v14 = vpop.f32.mrb[44].mxu1 }
 0x271   :  { %v3378_v15 = vpop.f32.mrb[45].mxu1 }
 0x272   :  { %v3382_v18 = vpop.f32.mrb[46].mxu1 }
 0x273   :  { %1526 = vadd.xlane.f32.xlu1 %v1439_v13  ;;  %v3384_v22 = vpop.f32.mrb[47].mxu1  ;;  %v1442_v13 = vmul.f32 %v3400_v39, %v3400_v39 }
 0x274   :  { %1524 = vadd.xlane.f32.xlu0 %v1438_v16 }
 0x277   :  { %1522 = vadd.xlane.f32.xlu1 %v1437_v17  ;;  %v1440_v17 = vmul.f32 %v3414_v24, %v3414_v24 }
 0x278   :  { %1520 = vadd.xlane.f32.xlu0 %v1436_v20  ;;  %v3390_v23 = vpop.f32.mrb[48].mxu1 }
 0x279   :  { %v3396_v33 = vpop.f32.mrb[49].mxu1 }
 0x27a   :  { %v3402_v42 = vpop.f32.mrb[50].mxu1 }
 0x27b   :  { %1277 = vadd.xlane.f32.xlu1 %v3394_v31  ;;  %v3405_v50 = vpop.f32.mrb[51].mxu1  ;;  %v3438_v31 = vadd.f32 %v3300_v34, %v3190_v36  ;;  %v3458_v34 = vadd.f32 %v3296_v32, %v3190_v36 }
 0x27c   :  { %1275 = vadd.xlane.f32.xlu0 %v3400_v39 }
 0x27d   :  { %4276 = vst [vmem:[#allocation21_spill] sm:$0xff] %v3438_v31  ;;  %4279 = vst [vmem:[#allocation24_spill] sm:$0xff] %v3458_v34  ;;  %v1444_v8 = vmul.f32 %v3458_v34, %v3458_v34 }
 0x27f   :  { %1273 = vadd.xlane.f32.xlu1 %v3410_v60 }
 0x280   :  { %1271 = vadd.xlane.f32.xlu0 %v3414_v24  ;;  %v3418_v21 = vpop.f32.mrb[52].mxu1 }
 0x281   :  { %v3422_v1 = vpop.f32.mrb[53].mxu1 }
 0x282   :  { %v3426_v27 = vpop.f32.mrb[54].mxu1 }
 0x283   :  { %1534 = vadd.xlane.f32.xlu1 %v1443_v0  ;;  %v3428_v16 = vpop.f32.mrb[55].mxu1  ;;  %v3444_v0 = vadd.f32 %v3292_v29, %v3190_v36 }
 0x284   :  { %1532 = vadd.xlane.f32.xlu0 %v1442_v13 }
 0x285   :  { %4277 = vst [vmem:[#allocation22_spill] sm:$0xff] %v3444_v0  ;;  %v1446_v12 = vmul.f32 %v3444_v0, %v3444_v0 }
 0x287   :  { %1530 = vadd.xlane.f32.xlu1 %v1441_v19  ;;  %v3454_v19 = vadd.f32 %v3302_v37, %v3190_v36 }
 0x288   :  { %1528 = vadd.xlane.f32.xlu0 %v1440_v17  ;;  %v3434_v20 = vpop.f32.mrb[56].mxu1  ;;  %v1447_v17 = vmul.f32 %v3438_v31, %v3438_v31 }
 0x289   :  { %v3440_v39 = vpop.f32.mrb[57].mxu1  ;;  %4278 = vst [vmem:[#allocation23_spill] sm:$0xff] %v3454_v19  ;;  %v1445_v32 = vmul.f32 %v3454_v19, %v3454_v19 }
 0x28a   :  { %v3446_v13 = vpop.f32.mrb[58].mxu1 }
 0x28b   :  { %1285 = vadd.xlane.f32.xlu1 %v3438_v31  ;;  %v3449_v60 = vpop.f32.mrb[59].mxu1  ;;  %v3480_v31 = vadd.f32 %v3318_v48, %v3190_v36 }
 0x28c   :  { %1283 = vadd.xlane.f32.xlu0 %v3444_v0  ;;  %v3484_v0 = vadd.f32 %v3308_v44, %v3190_v36 }
 0x28d   :  { %4284 = vst [vmem:[#allocation29_spill] sm:$0xff] %v3480_v31  ;;  %v1451_v44 = vmul.f32 %v3480_v31, %v3480_v31 }
 0x28e   :  { %4285 = vst [vmem:[#allocation30_spill] sm:$0xff] %v3484_v0  ;;  %v1450_v48 = vmul.f32 %v3484_v0, %v3484_v0 }
 0x28f   :  { %1281 = vadd.xlane.f32.xlu1 %v3454_v19 }
 0x290   :  { %1279 = vadd.xlane.f32.xlu0 %v3458_v34  ;;  %v3462_v29 = vpop.f32.mrb[60].mxu1 }
 0x291   :  { %4280 = vst [vmem:[#allocation25_spill] sm:$0xff] %v3462_v29  ;;  %v3466_v24 = vpop.f32.mrb[61].mxu1 }
 0x292   :  { %4281 = vst [vmem:[#allocation26_spill] sm:$0xff] %v3466_v24  ;;  %v3470_v37 = vpop.f32.mrb[62].mxu1 }
 0x293   :  { %4282 = vst [vmem:[#allocation27_spill] sm:$0xff] %v3470_v37  ;;  %1542 = vadd.xlane.f32.xlu1 %v1447_v17  ;;  %v3472_v52 = vpop.f32.mrb[63].mxu1  ;;  %v3494_v17 = vadd.f32 %v3313_v43, %v3190_v36 }
 0x294   :  { %4283 = vst [vmem:[#allocation28_spill] sm:$0xff] %v3472_v52  ;;  %1540 = vadd.xlane.f32.xlu0 %v1446_v12  ;;  %v3490_v12 = vadd.f32 %v3321_v51, %v3190_v36 }
 0x295   :  { %4287 = vst [vmem:[#allocation32_spill] sm:$0xff] %v3494_v17 }
 0x296   :  { %4286 = vst [vmem:[#allocation31_spill] sm:$0xff] %v3490_v12  ;;  %v1449_v51 = vmul.f32 %v3490_v12, %v3490_v12 }
 0x297   :  { %1538 = vadd.xlane.f32.xlu1 %v1445_v32  ;;  %v3508_v32 = vadd.f32 %v3340_v61, %v3190_v36 }
 0x298   :  { %1536 = vadd.xlane.f32.xlu0 %v1444_v8  ;;  %v1448_v8 = vmul.f32 %v3494_v17, %v3494_v17 }
 0x299   :  { %4288 = vst [vmem:[#allocation33_spill] sm:$0xff] %v3508_v32  ;;  %v1455_v5 = vmul.f32 %v3508_v32, %v3508_v32 }
 0x29b   :  { %1293 = vadd.xlane.f32.xlu1 %v3480_v31  ;;  %v3512_v31 = vadd.f32 %v3332_v54, %v3190_v36 }
 0x29c   :  { %1291 = vadd.xlane.f32.xlu0 %v3484_v0 }
 0x29d   :  { %4289 = vst [vmem:[#allocation34_spill] sm:$0xff] %v3512_v31 }
 0x29f   :  { %1289 = vadd.xlane.f32.xlu1 %v3490_v12 }
 0x2a0   :  { %1287 = vadd.xlane.f32.xlu0 %v3494_v17  ;;  %v3526_v17 = vadd.f32 %v3336_v59, %v3190_v36 }
 0x2a2   :  { %4291 = vst [vmem:[#allocation36_spill] sm:$0xff] %v3526_v17 }
 0x2a3   :  { %1550 = vadd.xlane.f32.xlu1 %v1451_v44 }
 0x2a4   :  { %1548 = vadd.xlane.f32.xlu0 %v1450_v48 }
 0x2a7   :  { %1546 = vadd.xlane.f32.xlu1 %v1449_v51  ;;  %v3520_v51 = vadd.f32 %v3342_v63, %v3190_v36 }
 0x2a8   :  { %v1228_v43 = vpop.xlane.xlu1 %1227  ;;  %1544 = vadd.xlane.f32.xlu0 %v1448_v8 }
 0x2a9   :  { %v1224_v34 = vpop.xlane.xlu0 %1223  ;;  %v3514_v44 = vmul.f32 0.0078125, %v1228_v43  ;;  %4290 = vst [vmem:[#allocation35_spill] sm:$0xff] %v3520_v51 }
 0x2aa   :  { %v3536_v59 = vmul.f32 0.0078125, %v1224_v34  ;;  %v1453_v34 = vmul.f32 %v3520_v51, %v3520_v51 }
 0x2ab   :  { %1301 = vadd.xlane.f32.xlu1 %v3508_v32  ;;  %v1674_v54 = vmul.f32 %v3514_v44, %v3514_v44 }
 0x2ac   :  { %v1230_v48 = vpop.xlane.xlu1 %1229  ;;  %1299 = vadd.xlane.f32.xlu0 %v3512_v31 }
 0x2ad   :  { %v3522_v8 = vmul.f32 0.0078125, %v1230_v48  ;;  %v1485_v61 = vpop.xlane.xlu0 %1484 }
 0x2ae   :  { %v1610_v43 = vmul.f32 0.0078125, %v1485_v61  ;;  %v1454_v61 = vmul.f32 %v3512_v31, %v3512_v31 }
 0x2af   :  { %1297 = vadd.xlane.f32.xlu1 %v3520_v51  ;;  %v1675_v63 = vmul.f32 %v3522_v8, %v3522_v8 }
 0x2b0   :  { %v1738_v12 = vsub.f32 %v1610_v43, %v1674_v54  ;;  %v1487_v0 = vpop.xlane.xlu1 %1486  ;;  %1295 = vadd.xlane.f32.xlu0 %v3526_v17 }
 0x2b1   :  { %v1611_v48 = vmul.f32 0.0078125, %v1487_v0  ;;  %v1226_v19 = vpop.xlane.xlu0 %1225 }
 0x2b2   :  { %v1866_v24 = vadd.f32 1e-05, %v1738_v12  ;;  %v3538_v52 = vmul.f32 0.0078125, %v1226_v19  ;;  %v1672_v19 = vmul.f32 %v3536_v59, %v3536_v59 }
 0x2b3   :  { %v1739_v54 = vsub.f32 %v1611_v48, %v1675_v63  ;;  %1558 = vadd.xlane.f32.xlu1 %v1455_v5  ;;  %v1452_v63 = vmul.f32 %v3526_v17, %v3526_v17 }
 0x2b4   :  { %2746 = vrsqrt.f32 %v1866_v24  ;;  %v1673_v43 = vmul.f32 %v3538_v52, %v3538_v52  ;;  %v1483_v29 = vpop.xlane.xlu1 %1482  ;;  %1556 = vadd.xlane.f32.xlu0 %v1454_v61  ;;  %v2058_v61 = vsub.s32 2, %v3111_v49 }
 0x2b5   :  { %v1867_v0 = vadd.f32 1e-05, %v1739_v54  ;;  %v1609_v37 = vmul.f32 0.0078125, %v1483_v29  ;;  %v1481_v58 = vpop.xlane.xlu0 %1480  ;;  %v3553_v29 = vadd.f32 %v3359_v2, %v3190_v36  ;;  %v3567_v2 = vadd.f32 %v3362_v7, %v3190_v36 }
 0x2b6   :  { %v1608_v12 = vmul.f32 0.0078125, %v1481_v58  ;;  %v3557_v58 = vadd.f32 %v3348_v3, %v3190_v36  ;;  %v1802_v3 = vsub.f32 %v3193_v38, %v3514_v44  ;;  %v1803_v7 = vsub.f32 %v3201_v46, %v3522_v8 }
 0x2b7   :  { %2748 = vrsqrt.f32 %v1867_v0  ;;  %v1737_v5 = vsub.f32 %v1609_v37, %v1673_v43  ;;  %1554 = vadd.xlane.f32.xlu1 %v1453_v34  ;;  %4292 = vst [vmem:[#allocation37_spill] sm:$0xff] %v3553_v29  ;;  %v2126_v0 = vsub.s32 3, %v3111_v49  ;;  %v3563_v43 = vrot.slane %v3187_v35, %v2058_v61  ;;  %4294 = vst [vmem:[#allocation39_spill] sm:$0xff] %v3567_v2 }
 0x2b8   :  { %v1736_v24 = vsub.f32 %v1608_v12, %v1672_v19  ;;  %v1238_v48 = vpop.xlane.xlu1 %1237  ;;  %1552 = vadd.xlane.f32.xlu0 %v1452_v63  ;;  %4293 = vst [vmem:[#allocation38_spill] sm:$0xff] %v3557_v58 }
 0x2b9   :  { %v1865_v54 = vadd.f32 1e-05, %v1737_v5  ;;  %v1236_v51 = vpop.xlane.xlu0 %1235  ;;  %v3571_v34 = vmul.f32 0.0078125, %v1238_v48  ;;  %v3580_v63 = vrot.slane %v3187_v35, %v2126_v0 }
 0x2ba   :  { %v1864_v31 = vadd.f32 1e-05, %v1736_v24  ;;  %v3577_v12 = vmul.f32 0.0078125, %v1236_v51  ;;  %v1458_v51 = vmul.f32 %v3557_v58, %v3557_v58 }
 0x2bb   :  { %2750 = vrsqrt.f32 %v1865_v54  ;;  %1309 = vadd.xlane.f32.xlu1 %v3553_v29  ;;  %v1679_v48 = vmul.f32 %v3571_v34, %v3571_v34 }
 0x2bc   :  { %2752 = vrsqrt.f32 %v1864_v31  ;;  %v1234_v37 = vpop.xlane.xlu1 %1233  ;;  %1307 = vadd.xlane.f32.xlu0 %v3557_v58  ;;  %v3575_v31 = vadd.f32 %v3353_v6, %v3190_v36  ;;  %v1459_v6 = vmul.f32 %v3553_v29, %v3553_v29  ;;  %v1678_v0 = vmul.f32 %v3577_v12, %v3577_v12 }
 0x2bd   :  { %v1232_v49 = vpop.xlane.xlu0 %1231  ;;  %v3585_v38 = vmul.f32 0.0078125, %v1234_v37 }
 0x2be   :  { %v2747_v19 = vpop.eup %2746  ;;  %4295 = vst [vmem:[#allocation40_spill] sm:$0xff] %v3575_v31  ;;  %v3595_v61 = vmul.f32 0.0078125, %v1232_v49  ;;  %v1457_v49 = vmul.f32 %v3567_v2, %v3567_v2 }
 0x2bf   :  { %v1994_v5 = vmul.f32 %v2747_v19, %v1802_v3  ;;  %1305 = vadd.xlane.f32.xlu1 %v3567_v2  ;;  %v1456_v3 = vmul.f32 %v3575_v31, %v3575_v31  ;;  %v1800_v19 = vsub.f32 %v3196_v40, %v3536_v59  ;;  %v2875_v40 = vld [vmem:[#allocation2 + $0x10] sm:$0xff] }
 0x2c0   :  { %v1495_v44 = vpop.xlane.xlu1 %1494  ;;  %1303 = vadd.xlane.f32.xlu0 %v3575_v31 }
 0x2c1   :  { %v2749_v24 = vpop.eup %2748  ;;  %v2062_v35 = vmul.f32 %v3563_v43, %v1994_v5  ;;  %v1615_v46 = vmul.f32 0.0078125, %v1495_v44  ;;  %v1493_v8 = vpop.xlane.xlu0 %1492 }
 0x2c2   :  { %v1995_v54 = vmul.f32 %v2749_v24, %v1803_v7  ;;  %v1614_v37 = vmul.f32 0.0078125, %v1493_v8  ;;  %v1801_v7 = vsub.f32 %v3207_v45, %v3538_v52  ;;  %v1677_v24 = vmul.f32 %v3585_v38, %v3585_v38 }
 0x2c3   :  { %v2130_v5 = vadd.f32 %v3580_v63, %v2062_v35  ;;  %v1743_v58 = vsub.f32 %v1615_v46, %v1679_v48  ;;  %1566 = vadd.xlane.f32.xlu1 %v1459_v6  ;;  %v1676_v6 = vmul.f32 %v3595_v61, %v3595_v61 }
 0x2c4   :  { %v2063_v44 = vmul.f32 %v3563_v43, %v1995_v54  ;;  %v1742_v8 = vsub.f32 %v1614_v37, %v1678_v0  ;;  %v1491_v31 = vpop.xlane.xlu1 %1490  ;;  %1564 = vadd.xlane.f32.xlu0 %v1458_v51  ;;  %v2876_v51 = vld [vmem:[#allocation2 + $0x18] sm:$0xff] }
 0x2c5   :  { %v2751_v29 = vpop.eup %2750  ;;  %v2194_v59 = vadd.f32 %v2875_v40, %v2130_v5  ;;  %v1871_v35 = vadd.f32 1e-05, %v1743_v58  ;;  %v1613_v48 = vmul.f32 0.0078125, %v1491_v31  ;;  %v1489_v46 = vpop.xlane.xlu0 %1488  ;;  %v3617_v31 = vadd.f32 %v3382_v18, %v3190_v36 }
 0x2c6   :  { %v2753_v2 = vpop.eup %2752  ;;  %v2131_v54 = vadd.f32 %v3580_v63, %v2063_v44  ;;  %v1993_v17 = vmul.f32 %v2751_v29, %v1801_v7  ;;  %v1870_v45 = vadd.f32 1e-05, %v1742_v8  ;;  %v1612_v52 = vmul.f32 0.0078125, %v1489_v46 }
 0x2c7   :  { %2258 = vst [vmem:[#allocation8 + $0x10] sm:$0xff] %v2194_v59  ;;  %v1992_v32 = vmul.f32 %v2753_v2, %v1800_v19  ;;  %2754 = vrsqrt.f32 %v1871_v35  ;;  %v1741_v0 = vsub.f32 %v1613_v48, %v1677_v24  ;;  %1562 = vadd.xlane.f32.xlu1 %v1457_v49  ;;  %v3622_v2 = vadd.f32 %v3374_v14, %v3190_v36 }
 0x2c8   :  { %v2195_v37 = vadd.f32 %v2876_v51, %v2131_v54  ;;  %v2061_v5 = vmul.f32 %v3563_v43, %v1993_v17  ;;  %2756 = vrsqrt.f32 %v1870_v45  ;;  %v1740_v40 = vsub.f32 %v1612_v52, %v1676_v6  ;;  %v1246_v58 = vpop.xlane.xlu1 %1245  ;;  %1560 = vadd.xlane.f32.xlu0 %v1456_v3  ;;  %v2877_v3 = vld [vmem:[#allocation2 + $0x8] sm:$0xff] }
 0x2c9   :  { %v2060_v29 = vmul.f32 %v3563_v43, %v1992_v32  ;;  %v1869_v44 = vadd.f32 1e-05, %v1741_v0  ;;  %v1244_v7 = vpop.xlane.xlu0 %1243  ;;  %v2878_v32 = vld [vmem:[#allocation2] sm:$0xff]  ;;  %v3630_v14 = vadd.f32 %v3384_v22, %v3190_v36  ;;  %v3632_v59 = vmul.f32 0.0078125, %v1246_v58 }
 0x2ca   :  { %2259 = vst [vmem:[#allocation8 + $0x18] sm:$0xff] %v2195_v37  ;;  %v2129_v19 = vadd.f32 %v3580_v63, %v2061_v5  ;;  %v1868_v17 = vadd.f32 1e-05, %v1740_v40  ;;  %v3636_v35 = vadd.f32 %v3378_v15, %v3190_v36  ;;  %v3638_v48 = vmul.f32 0.0078125, %v1244_v7 }
 0x2cb   :  { %v2128_v49 = vadd.f32 %v3580_v63, %v2060_v29  ;;  %2758 = vrsqrt.f32 %v1869_v44  ;;  %1317 = vadd.xlane.f32.xlu1 %v3617_v31  ;;  %v1807_v46 = vsub.f32 %v3217_v55, %v3571_v34  ;;  %v1463_v45 = vmul.f32 %v3617_v31, %v3617_v31 }
 0x2cc   :  { %v2193_v18 = vadd.f32 %v2877_v3, %v2129_v19  ;;  %2760 = vrsqrt.f32 %v1868_v17  ;;  %v1242_v24 = vpop.xlane.xlu1 %1241  ;;  %1315 = vadd.xlane.f32.xlu0 %v3622_v2  ;;  %v1462_v15 = vmul.f32 %v3622_v2, %v3622_v2  ;;  %v1806_v0 = vsub.f32 %v3220_v56, %v3577_v12 }
 0x2cd   :  { %v2192_v8 = vadd.f32 %v2878_v32, %v2128_v49  ;;  %v1240_v6 = vpop.xlane.xlu0 %1239  ;;  %v3643_v54 = vmul.f32 0.0078125, %v1242_v24  ;;  %v1683_v51 = vmul.f32 %v3632_v59, %v3632_v59  ;;  %v1682_v58 = vmul.f32 %v3638_v48, %v3638_v48 }
 0x2ce   :  { %2257 = vst [vmem:[#allocation8 + $0x8] sm:$0xff] %v2193_v18  ;;  %v3654_v37 = vmul.f32 0.0078125, %v1240_v6  ;;  %v1460_v44 = vmul.f32 %v3636_v35, %v3636_v35  ;;  %v1805_v7 = vsub.f32 %v3225_v57, %v3585_v38  ;;  %v1461_v19 = vmul.f32 %v3630_v14, %v3630_v14 }
 0x2cf   :  { %2256 = vst [vmem:[#allocation8] sm:$0xff] %v2192_v8  ;;  %1313 = vadd.xlane.f32.xlu1 %v3630_v14  ;;  %v1804_v17 = vsub.f32 %v3228_v62, %v3595_v61  ;;  %v1681_v3 = vmul.f32 %v3643_v54, %v3643_v54 }
 0x2d0   :  { %v1503_v22 = vpop.xlane.xlu1 %1502  ;;  %1311 = vadd.xlane.f32.xlu0 %v3636_v35  ;;  %v1680_v38 = vmul.f32 %v3654_v37, %v3654_v37 }
 0x2d1   :  { %v2755_v52 = vpop.eup %2754  ;;  %v1619_v55 = vmul.f32 0.0078125, %v1503_v22  ;;  %v1501_v34 = vpop.xlane.xlu0 %1500 }
 0x2d2   :  { %v2757_v5 = vpop.eup %2756  ;;  %v1999_v40 = vmul.f32 %v2755_v52, %v1807_v46  ;;  %v1618_v29 = vmul.f32 0.0078125, %v1501_v34 }
 0x2d3   :  { %v1998_v56 = vmul.f32 %v2757_v5, %v1806_v0  ;;  %v1747_v12 = vsub.f32 %v1619_v55, %v1683_v51  ;;  %1574 = vadd.xlane.f32.xlu1 %v1463_v45  ;;  %v2879_v55 = vld [vmem:[#allocation2 + $0x38] sm:$0xff] }
 0x2d4   :  { %v2067_v49 = vmul.f32 %v3563_v43, %v1999_v40  ;;  %v1746_v18 = vsub.f32 %v1618_v29, %v1682_v58  ;;  %v1499_v24 = vpop.xlane.xlu1 %1498  ;;  %1572 = vadd.xlane.f32.xlu0 %v1462_v15  ;;  %v2880_v29 = vld [vmem:[#allocation2 + $0x30] sm:$0xff] }
 0x2d5   :  { %v2759_v32 = vpop.eup %2758  ;;  %v2066_v57 = vmul.f32 %v3563_v43, %v1998_v56  ;;  %v1875_v8 = vadd.f32 1e-05, %v1747_v12  ;;  %v1617_v6 = vmul.f32 0.0078125, %v1499_v24  ;;  %v1497_v46 = vpop.xlane.xlu0 %1496 }
 0x2d6   :  { %v2761_v22 = vpop.eup %2760  ;;  %v2135_v62 = vadd.f32 %v3580_v63, %v2067_v49  ;;  %v1997_v61 = vmul.f32 %v2759_v32, %v1805_v7  ;;  %v1874_v45 = vadd.f32 1e-05, %v1746_v18  ;;  %v1616_v52 = vmul.f32 0.0078125, %v1497_v46 }
 0x2d7   :  { %v2134_v0 = vadd.f32 %v3580_v63, %v2066_v57  ;;  %v1996_v51 = vmul.f32 %v2761_v22, %v1804_v17  ;;  %2762 = vrsqrt.f32 %v1875_v8  ;;  %v1745_v15 = vsub.f32 %v1617_v6, %v1681_v3  ;;  %1570 = vadd.xlane.f32.xlu1 %v1461_v19  ;;  %v2882_v57 = vld [vmem:[#allocation2 + $0x20] sm:$0xff] }
 0x2d8   :  { %v2199_v34 = vadd.f32 %v2879_v55, %v2135_v62  ;;  %v2065_v5 = vmul.f32 %v3563_v43, %v1997_v61  ;;  %2764 = vrsqrt.f32 %v1874_v45  ;;  %v1744_v40 = vsub.f32 %v1616_v52, %v1680_v38  ;;  %v1254_v58 = vpop.xlane.xlu1 %1253  ;;  %1568 = vadd.xlane.f32.xlu0 %v1460_v44 }
 0x2d9   :  { %v2198_v56 = vadd.f32 %v2880_v29, %v2134_v0  ;;  %v3677_v7 = vadd.f32 %v3402_v42, %v3190_v36  ;;  %v2064_v12 = vmul.f32 %v3563_v43, %v1996_v51  ;;  %v1873_v17 = vadd.f32 1e-05, %v1745_v15  ;;  %v1252_v49 = vpop.xlane.xlu0 %1251  ;;  %v2881_v42 = vld [vmem:[#allocation2 + $0x28] sm:$0xff] }
 0x2da   :  { %2263 = vst [vmem:[#allocation8 + $0x38] sm:$0xff] %v2199_v34  ;;  %v3682_v19 = vadd.f32 %v3390_v23, %v3190_v36  ;;  %v2133_v3 = vadd.f32 %v3580_v63, %v2065_v5  ;;  %v1872_v18 = vadd.f32 1e-05, %v1744_v40  ;;  %v3690_v23 = vadd.f32 %v3405_v50, %v3190_v36 }
 0x2db   :  { %2262 = vst [vmem:[#allocation8 + $0x30] sm:$0xff] %v2198_v56  ;;  %v2132_v44 = vadd.f32 %v3580_v63, %v2064_v12  ;;  %2766 = vrsqrt.f32 %v1873_v17  ;;  %1325 = vadd.xlane.f32.xlu1 %v3677_v7  ;;  %v3692_v8 = vmul.f32 0.0078125, %v1254_v58  ;;  %v3696_v46 = vadd.f32 %v3396_v33, %v3190_v36 }
 0x2dc   :  { %v2197_v24 = vadd.f32 %v2881_v42, %v2133_v3  ;;  %2768 = vrsqrt.f32 %v1872_v18  ;;  %v1250_v32 = vpop.xlane.xlu1 %1249  ;;  %1323 = vadd.xlane.f32.xlu0 %v3682_v19  ;;  %v3698_v22 = vmul.f32 0.0078125, %v1252_v49  ;;  %v1811_v62 = vsub.f32 %v3241_v9, %v3632_v59 }
 0x2dd   :  { %v2196_v38 = vadd.f32 %v2882_v57, %v2132_v44  ;;  %v1248_v6 = vpop.xlane.xlu0 %1247  ;;  %v3703_v61 = vmul.f32 0.0078125, %v1250_v32  ;;  %v1467_v45 = vmul.f32 %v3677_v7, %v3677_v7  ;;  %v1466_v33 = vmul.f32 %v3682_v19, %v3682_v19 }
 0x2de   :  { %2261 = vst [vmem:[#allocation8 + $0x28] sm:$0xff] %v2197_v24  ;;  %v1810_v0 = vsub.f32 %v3244_v4, %v3638_v48  ;;  %v1687_v51 = vmul.f32 %v3692_v8, %v3692_v8  ;;  %v3714_v15 = vmul.f32 0.0078125, %v1248_v6  ;;  %v1686_v5 = vmul.f32 %v3698_v22, %v3698_v22 }
 0x2df   :  { %2260 = vst [vmem:[#allocation8 + $0x20] sm:$0xff] %v2196_v38  ;;  %1321 = vadd.xlane.f32.xlu1 %v3690_v23  ;;  %v1464_v58 = vmul.f32 %v3696_v46, %v3696_v46  ;;  %v1809_v29 = vsub.f32 %v3249_v11, %v3643_v54  ;;  %v1465_v56 = vmul.f32 %v3690_v23, %v3690_v23 }
 0x2e0   :  { %v1511_v50 = vpop.xlane.xlu1 %1510  ;;  %1319 = vadd.xlane.f32.xlu0 %v3696_v46  ;;  %v1808_v12 = vsub.f32 %v3252_v10, %v3654_v37  ;;  %v1685_v49 = vmul.f32 %v3703_v61, %v3703_v61  ;;  %v1684_v54 = vmul.f32 %v3714_v15, %v3714_v15 }
 0x2e1   :  { %v2763_v52 = vpop.eup %2762  ;;  %v1623_v9 = vmul.f32 0.0078125, %v1511_v50  ;;  %v1509_v59 = vpop.xlane.xlu0 %1508 }
 0x2e2   :  { %v2765_v55 = vpop.eup %2764  ;;  %v2003_v34 = vmul.f32 %v2763_v52, %v1811_v62  ;;  %v1622_v40 = vmul.f32 0.0078125, %v1509_v59  ;;  %v2884_v59 = vld [vmem:[#allocation2 + $0x50] sm:$0xff] }
 0x2e3   :  { %v2002_v4 = vmul.f32 %v2765_v55, %v1810_v0  ;;  %v1751_v48 = vsub.f32 %v1623_v9, %v1687_v51  ;;  %1582 = vadd.xlane.f32.xlu1 %v1467_v45 }
 0x2e4   :  { %v2071_v17 = vmul.f32 %v3563_v43, %v2003_v34  ;;  %v1750_v3 = vsub.f32 %v1622_v40, %v1686_v5  ;;  %v1507_v18 = vpop.xlane.xlu1 %1506  ;;  %1580 = vadd.xlane.f32.xlu0 %v1466_v33  ;;  %v2883_v33 = vld [vmem:[#allocation2 + $0x58] sm:$0xff]  ;;  %v3737_v34 = vadd.f32 %v3426_v27, %v3190_v36  ;;  %v2885_v27 = vld [vmem:[#allocation2 + $0x48] sm:$0xff] }
 0x2e5   :  { %v2767_v44 = vpop.eup %2766  ;;  %v2070_v11 = vmul.f32 %v3563_v43, %v2002_v4  ;;  %v1879_v42 = vadd.f32 1e-05, %v1751_v48  ;;  %v1621_v24 = vmul.f32 0.0078125, %v1507_v18  ;;  %v1505_v32 = vpop.xlane.xlu0 %1504  ;;  %v3742_v4 = vadd.f32 %v3418_v21, %v3190_v36 }
 0x2e6   :  { %v2769_v57 = vpop.eup %2768  ;;  %v2139_v10 = vadd.f32 %v3580_v63, %v2071_v17  ;;  %v2001_v37 = vmul.f32 %v2767_v44, %v1809_v29  ;;  %v1878_v38 = vadd.f32 1e-05, %v1750_v3  ;;  %v1620_v6 = vmul.f32 0.0078125, %v1505_v32 }
 0x2e7   :  { %v2138_v62 = vadd.f32 %v3580_v63, %v2070_v11  ;;  %v2000_v50 = vmul.f32 %v2769_v57, %v1808_v12  ;;  %2770 = vrsqrt.f32 %v1879_v42  ;;  %v1749_v45 = vsub.f32 %v1621_v24, %v1685_v49  ;;  %1578 = vadd.xlane.f32.xlu1 %v1465_v56  ;;  %v2886_v49 = vld [vmem:[#allocation2 + $0x40] sm:$0xff] }
 0x2e8   :  { %v2203_v52 = vadd.f32 %v2883_v33, %v2139_v10  ;;  %v2069_v0 = vmul.f32 %v3563_v43, %v2001_v37  ;;  %2772 = vrsqrt.f32 %v1878_v38  ;;  %v1748_v51 = vsub.f32 %v1620_v6, %v1684_v54  ;;  %v1262_v9 = vpop.xlane.xlu1 %1261  ;;  %1576 = vadd.xlane.f32.xlu0 %v1464_v58 }
 0x2e9   :  { %v2202_v55 = vadd.f32 %v2884_v59, %v2138_v62  ;;  %v2068_v5 = vmul.f32 %v3563_v43, %v2000_v50  ;;  %v1877_v40 = vadd.f32 1e-05, %v1749_v45  ;;  %v1260_v29 = vpop.xlane.xlu0 %1259  ;;  %v3750_v21 = vadd.f32 %v3428_v16, %v3190_v36 }
 0x2ea   :  { %2267 = vst [vmem:[#allocation8 + $0x58] sm:$0xff] %v2203_v52  ;;  %v2137_v48 = vadd.f32 %v3580_v63, %v2069_v0  ;;  %v1876_v56 = vadd.f32 1e-05, %v1748_v51  ;;  %v3752_v18 = vmul.f32 0.0078125, %v1262_v9  ;;  %v3756_v11 = vadd.f32 %v3422_v1, %v3190_v36 }
 0x2eb   :  { %2266 = vst [vmem:[#allocation8 + $0x50] sm:$0xff] %v2202_v55  ;;  %v2136_v58 = vadd.f32 %v3580_v63, %v2068_v5  ;;  %2774 = vrsqrt.f32 %v1877_v40  ;;  %1333 = vadd.xlane.f32.xlu1 %v3737_v34  ;;  %v3758_v54 = vmul.f32 0.0078125, %v1260_v29  ;;  %v1815_v42 = vsub.f32 %v3271_v25, %v3692_v8 }
 0x2ec   :  { %v2201_v12 = vadd.f32 %v2885_v27, %v2137_v48  ;;  %2776 = vrsqrt.f32 %v1876_v56  ;;  %v1258_v17 = vpop.xlane.xlu1 %1257  ;;  %1331 = vadd.xlane.f32.xlu0 %v3742_v4  ;;  %v1471_v32 = vmul.f32 %v3737_v34, %v3737_v34  ;;  %v1470_v1 = vmul.f32 %v3742_v4, %v3742_v4 }
 0x2ed   :  { %v2200_v3 = vadd.f32 %v2886_v49, %v2136_v58  ;;  %v1256_v44 = vpop.xlane.xlu0 %1255  ;;  %v3763_v24 = vmul.f32 0.0078125, %v1258_v17  ;;  %v1814_v10 = vsub.f32 %v3276_v26, %v3698_v22  ;;  %v1691_v37 = vmul.f32 %v3752_v18, %v3752_v18 }
 0x2ee   :  { %2265 = vst [vmem:[#allocation8 + $0x48] sm:$0xff] %v2201_v12  ;;  %v3774_v38 = vmul.f32 0.0078125, %v1256_v44  ;;  %v1690_v50 = vmul.f32 %v3758_v54, %v3758_v54  ;;  %v1468_v33 = vmul.f32 %v3756_v11, %v3756_v11  ;;  %v1813_v52 = vsub.f32 %v3285_v28, %v3703_v61  ;;  %v2887_v44 = vld [vmem:[#allocation2 + $0x78] sm:$0xff] }
 0x2ef   :  { %2264 = vst [vmem:[#allocation8 + $0x40] sm:$0xff] %v2200_v3  ;;  %1329 = vadd.xlane.f32.xlu1 %v3750_v21  ;;  %v1469_v0 = vmul.f32 %v3750_v21, %v3750_v21  ;;  %v1812_v51 = vsub.f32 %v3288_v30, %v3714_v15  ;;  %v1689_v59 = vmul.f32 %v3763_v24, %v3763_v24 }
 0x2f0   :  { %v1519_v16 = vpop.xlane.xlu1 %1518  ;;  %1327 = vadd.xlane.f32.xlu0 %v3756_v11  ;;  %v1688_v61 = vmul.f32 %v3774_v38, %v3774_v38 }
 0x2f1   :  { %v2771_v57 = vpop.eup %2770  ;;  %v1627_v25 = vmul.f32 0.0078125, %v1519_v16  ;;  %v1517_v8 = vpop.xlane.xlu0 %1516 }
 0x2f2   :  { %v2773_v6 = vpop.eup %2772  ;;  %v2007_v62 = vmul.f32 %v2771_v57, %v1815_v42  ;;  %v1626_v45 = vmul.f32 0.0078125, %v1517_v8  ;;  %v2888_v57 = vld [vmem:[#allocation2 + $0x70] sm:$0xff] }
 0x2f3   :  { %v2006_v26 = vmul.f32 %v2773_v6, %v1814_v10  ;;  %v1755_v22 = vsub.f32 %v1627_v25, %v1691_v37  ;;  %1590 = vadd.xlane.f32.xlu1 %v1471_v32  ;;  %v3797_v37 = vadd.f32 %v3446_v13, %v3190_v36  ;;  %v2889_v13 = vld [vmem:[#allocation2 + $0x68] sm:$0xff] }
 0x2f4   :  { %v2075_v9 = vmul.f32 %v3563_v43, %v2007_v62  ;;  %v1754_v55 = vsub.f32 %v1626_v45, %v1690_v50  ;;  %v1515_v5 = vpop.xlane.xlu1 %1514  ;;  %1588 = vadd.xlane.f32.xlu0 %v1470_v1  ;;  %v3802_v62 = vadd.f32 %v3434_v20, %v3190_v36  ;;  %v3810_v20 = vadd.f32 %v3449_v60, %v3190_v36 }
 0x2f5   :  { %v2775_v40 = vpop.eup %2774  ;;  %v2074_v28 = vmul.f32 %v3563_v43, %v2006_v26  ;;  %v1883_v29 = vadd.f32 1e-05, %v1755_v22  ;;  %v1625_v48 = vmul.f32 0.0078125, %v1515_v5  ;;  %v1513_v56 = vpop.xlane.xlu0 %1512  ;;  %v2890_v22 = vld [vmem:[#allocation2 + $0x60] sm:$0xff]  ;;  %v1819_v5 = vsub.f32 %v3311_v41, %v3752_v18 }
 0x2f6   :  { %v2777_v58 = vpop.eup %2776  ;;  %v2143_v30 = vadd.f32 %v3580_v63, %v2075_v9  ;;  %v2005_v15 = vmul.f32 %v2775_v40, %v1813_v52  ;;  %v1882_v27 = vadd.f32 1e-05, %v1754_v55  ;;  %v1624_v12 = vmul.f32 0.0078125, %v1513_v56 }
 0x2f7   :  { %v2142_v17 = vadd.f32 %v3580_v63, %v2074_v28  ;;  %v2004_v49 = vmul.f32 %v2777_v58, %v1812_v51  ;;  %2778 = vrsqrt.f32 %v1883_v29  ;;  %v1753_v3 = vsub.f32 %v1625_v48, %v1689_v59  ;;  %1586 = vadd.xlane.f32.xlu1 %v1469_v0 }
 0x2f8   :  { %v2207_v42 = vadd.f32 %v2887_v44, %v2143_v30  ;;  %v2073_v16 = vmul.f32 %v3563_v43, %v2005_v15  ;;  %2780 = vrsqrt.f32 %v1882_v27  ;;  %v1752_v32 = vsub.f32 %v1624_v12, %v1688_v61  ;;  %v1270_v1 = vpop.xlane.xlu1 %1269  ;;  %1584 = vadd.xlane.f32.xlu0 %v1468_v33 }
 0x2f9   :  { %v2206_v10 = vadd.f32 %v2888_v57, %v2142_v17  ;;  %v2072_v25 = vmul.f32 %v3563_v43, %v2004_v49  ;;  %v1881_v8 = vadd.f32 1e-05, %v1753_v3  ;;  %v1268_v6 = vpop.xlane.xlu0 %1267  ;;  %v3812_v51 = vmul.f32 0.0078125, %v1270_v1  ;;  %v4296_v3 = vld [vmem:[#allocation12_spill] sm:$0xff] }
 0x2fa   :  { %2271 = vst [vmem:[#allocation8 + $0x78] sm:$0xff] %v2207_v42  ;;  %v2141_v50 = vadd.f32 %v3580_v63, %v2073_v16  ;;  %v1880_v45 = vadd.f32 1e-05, %v1752_v32  ;;  %v3816_v59 = vadd.f32 %v3440_v39, %v3190_v36  ;;  %v3818_v55 = vmul.f32 0.0078125, %v1268_v6 }
 0x2fb   :  { %2270 = vst [vmem:[#allocation8 + $0x70] sm:$0xff] %v2206_v10  ;;  %v2140_v33 = vadd.f32 %v3580_v63, %v2072_v25  ;;  %2782 = vrsqrt.f32 %v1881_v8  ;;  %1341 = vadd.xlane.f32.xlu1 %v3797_v37  ;;  %v1475_v28 = vmul.f32 %v3797_v37, %v3797_v37  ;;  %v1474_v39 = vmul.f32 %v3802_v62, %v3802_v62 }
 0x2fc   :  { %v2205_v52 = vadd.f32 %v2889_v13, %v2141_v50  ;;  %2784 = vrsqrt.f32 %v1880_v45  ;;  %v1266_v26 = vpop.xlane.xlu1 %1265  ;;  %1339 = vadd.xlane.f32.xlu0 %v3802_v62  ;;  %v1818_v29 = vsub.f32 %v3316_v47, %v3758_v54  ;;  %v1695_v48 = vmul.f32 %v3812_v51, %v3812_v51 }
 0x2fd   :  { %v2204_v0 = vadd.f32 %v2890_v22, %v2140_v33  ;;  %v1264_v9 = vpop.xlane.xlu0 %1263  ;;  %v3823_v40 = vmul.f32 0.0078125, %v1266_v26  ;;  %v1694_v15 = vmul.f32 %v3818_v55, %v3818_v55  ;;  %v1472_v12 = vmul.f32 %v3816_v59, %v3816_v59  ;;  %v2891_v22 = vld [vmem:[#allocation2 + $0x98] sm:$0xff] }
 0x2fe   :  { %2269 = vst [vmem:[#allocation8 + $0x68] sm:$0xff] %v2205_v52  ;;  %v3834_v56 = vmul.f32 0.0078125, %v1264_v9  ;;  %v1817_v17 = vsub.f32 %v3325_v53, %v3763_v24  ;;  %v1473_v49 = vmul.f32 %v3810_v20, %v3810_v20  ;;  %v1816_v44 = vsub.f32 %v4296_v3, %v3774_v38 }
 0x2ff   :  { %2268 = vst [vmem:[#allocation8 + $0x60] sm:$0xff] %v2204_v0  ;;  %1337 = vadd.xlane.f32.xlu1 %v3810_v20  ;;  %v1693_v16 = vmul.f32 %v3823_v40, %v3823_v40 }
 0x300   :  { %v1527_v60 = vpop.xlane.xlu1 %1526  ;;  %1335 = vadd.xlane.f32.xlu0 %v3816_v59  ;;  %v1692_v24 = vmul.f32 %v3834_v56, %v3834_v56 }
 0x301   :  { %v2779_v61 = vpop.eup %2778  ;;  %v1631_v41 = vmul.f32 0.0078125, %v1527_v60  ;;  %v1525_v18 = vpop.xlane.xlu0 %1524 }
 0x302   :  { %v2781_v58 = vpop.eup %2780  ;;  %v2011_v30 = vmul.f32 %v2779_v61, %v1819_v5  ;;  %v1630_v27 = vmul.f32 0.0078125, %v1525_v18  ;;  %v4297_v61 = vld [vmem:[#allocation27_spill] sm:$0xff] }
 0x303   :  { %v2010_v47 = vmul.f32 %v2781_v58, %v1818_v29  ;;  %v1759_v54 = vsub.f32 %v1631_v41, %v1695_v48  ;;  %1598 = vadd.xlane.f32.xlu1 %v1475_v28  ;;  %v2892_v28 = vld [vmem:[#allocation2 + $0x90] sm:$0xff]  ;;  %v3857_v29 = vadd.f32 %v4297_v61, %v3190_v36  ;;  %v4298_v58 = vld [vmem:[#allocation25_spill] sm:$0xff] }
 0x304   :  { %v2079_v42 = vmul.f32 %v3563_v43, %v2011_v30  ;;  %v1758_v32 = vsub.f32 %v1630_v27, %v1694_v15  ;;  %v1523_v1 = vpop.xlane.xlu1 %1522  ;;  %1596 = vadd.xlane.f32.xlu0 %v1474_v39  ;;  %v3862_v30 = vadd.f32 %v4298_v58, %v3190_v36 }
 0x305   :  { %v2783_v57 = vpop.eup %2782  ;;  %v2078_v53 = vmul.f32 %v3563_v43, %v2010_v47  ;;  %v1887_v10 = vadd.f32 1e-05, %v1759_v54  ;;  %v1629_v25 = vmul.f32 0.0078125, %v1523_v1  ;;  %v1521_v8 = vpop.xlane.xlu0 %1520  ;;  %v4299_v54 = vld [vmem:[#allocation28_spill] sm:$0xff]  ;;  %v4300_v1 = vld [vmem:[#allocation26_spill] sm:$0xff]  ;;  %v1479_v61 = vmul.f32 %v3857_v29, %v3857_v29 }
 0x306   :  { %v2785_v6 = vpop.eup %2784  ;;  %v2147_v38 = vadd.f32 %v3580_v63, %v2079_v42  ;;  %v2009_v50 = vmul.f32 %v2783_v57, %v1817_v17  ;;  %v1886_v45 = vadd.f32 1e-05, %v1758_v32  ;;  %v1628_v33 = vmul.f32 0.0078125, %v1521_v8  ;;  %v2893_v17 = vld [vmem:[#allocation2 + $0x88] sm:$0xff] }
 0x307   :  { %v2146_v13 = vadd.f32 %v3580_v63, %v2078_v53  ;;  %v2008_v52 = vmul.f32 %v2785_v6, %v1816_v44  ;;  %2786 = vrsqrt.f32 %v1887_v10  ;;  %v1757_v26 = vsub.f32 %v1629_v25, %v1693_v16  ;;  %1594 = vadd.xlane.f32.xlu1 %v1473_v49  ;;  %v2894_v44 = vld [vmem:[#allocation2 + $0x80] sm:$0xff] }
 0x308   :  { %v2211_v0 = vadd.f32 %v2891_v22, %v2147_v38  ;;  %v2077_v9 = vmul.f32 %v3563_v43, %v2009_v50  ;;  %2788 = vrsqrt.f32 %v1886_v45  ;;  %v1756_v5 = vsub.f32 %v1628_v33, %v1692_v24  ;;  %v1278_v60 = vpop.xlane.xlu1 %1277  ;;  %1592 = vadd.xlane.f32.xlu0 %v1472_v12  ;;  %v4301_v24 = vld [vmem:[#allocation13_spill] sm:$0xff]  ;;  %v4302_v50 = vld [vmem:[#allocation14_spill] sm:$0xff] }
 0x309   :  { %v2210_v39 = vadd.f32 %v2892_v28, %v2146_v13  ;;  %v2076_v48 = vmul.f32 %v3563_v43, %v2008_v52  ;;  %v1885_v41 = vadd.f32 1e-05, %v1757_v26  ;;  %v1276_v18 = vpop.xlane.xlu0 %1275  ;;  %v3869_v49 = vadd.f32 %v4299_v54, %v3190_v36 }
 0x30a   :  { %2275 = vst [vmem:[#allocation8 + $0x98] sm:$0xff] %v2211_v0  ;;  %v2145_v15 = vadd.f32 %v3580_v63, %v2077_v9  ;;  %v1884_v27 = vadd.f32 1e-05, %v1756_v5  ;;  %v3872_v16 = vmul.f32 0.0078125, %v1278_v60  ;;  %v3876_v57 = vadd.f32 %v4300_v1, %v3190_v36  ;;  %v4303_v60 = vld [vmem:[#allocation15_spill] sm:$0xff] }
 0x30b   :  { %2274 = vst [vmem:[#allocation8 + $0x90] sm:$0xff] %v2210_v39  ;;  %v2144_v12 = vadd.f32 %v3580_v63, %v2076_v48  ;;  %2790 = vrsqrt.f32 %v1885_v41  ;;  %1349 = vadd.xlane.f32.xlu1 %v3857_v29  ;;  %v3878_v53 = vmul.f32 0.0078125, %v1276_v18  ;;  %v1823_v10 = vsub.f32 %v4301_v24, %v3812_v51  ;;  %v4304_v48 = vld [vmem:[#allocation16_spill] sm:$0xff] }
 0x30c   :  { %v2209_v47 = vadd.f32 %v2893_v17, %v2145_v15  ;;  %2792 = vrsqrt.f32 %v1884_v27  ;;  %v1274_v3 = vpop.xlane.xlu1 %1273  ;;  %1347 = vadd.xlane.f32.xlu0 %v3862_v30  ;;  %v1477_v6 = vmul.f32 %v3869_v49, %v3869_v49  ;;  %v1478_v36 = vmul.f32 %v3862_v30, %v3862_v30 }
 0x30d   :  { %v2208_v42 = vadd.f32 %v2894_v44, %v2144_v12  ;;  %v1272_v32 = vpop.xlane.xlu0 %1271  ;;  %v3883_v25 = vmul.f32 0.0078125, %v1274_v3  ;;  %v1822_v45 = vsub.f32 %v4302_v50, %v3818_v55  ;;  %v1699_v33 = vmul.f32 %v3872_v16, %v3872_v16 }
 0x30e   :  { %2273 = vst [vmem:[#allocation8 + $0x88] sm:$0xff] %v2209_v47  ;;  %v3894_v13 = vmul.f32 0.0078125, %v1272_v32  ;;  %v1698_v0 = vmul.f32 %v3878_v53, %v3878_v53  ;;  %v1476_v5 = vmul.f32 %v3876_v57, %v3876_v57  ;;  %v1821_v28 = vsub.f32 %v4303_v60, %v3823_v40 }
 0x30f   :  { %2272 = vst [vmem:[#allocation8 + $0x80] sm:$0xff] %v2208_v42  ;;  %1345 = vadd.xlane.f32.xlu1 %v3869_v49  ;;  %v1820_v41 = vsub.f32 %v4304_v48, %v3834_v56  ;;  %v1697_v58 = vmul.f32 %v3883_v25, %v3883_v25 }
 0x310   :  { %v1535_v8 = vpop.xlane.xlu1 %1534  ;;  %1343 = vadd.xlane.f32.xlu0 %v3876_v57  ;;  %v1696_v17 = vmul.f32 %v3894_v13, %v3894_v13 }
 0x311   :  { %v2787_v38 = vpop.eup %2786  ;;  %v1635_v51 = vmul.f32 0.0078125, %v1535_v8  ;;  %v1533_v52 = vpop.xlane.xlu0 %1532 }
 0x312   :  { %v2789_v26 = vpop.eup %2788  ;;  %v2015_v22 = vmul.f32 %v2787_v38, %v1823_v10  ;;  %v1634_v9 = vmul.f32 0.0078125, %v1533_v52 }
 0x313   :  { %v2014_v55 = vmul.f32 %v2789_v26, %v1822_v45  ;;  %v1763_v39 = vsub.f32 %v1635_v51, %v1699_v33  ;;  %1602 = vadd.xlane.f32.xlu1 %v1477_v6  ;;  %v2895_v6 = vld [vmem:[#allocation2 + $0xb8] sm:$0xff]  ;;  %v2896_v51 = vld [vmem:[#allocation2 + $0xb0] sm:$0xff] }
 0x314   :  { %v2083_v18 = vmul.f32 %v3563_v43, %v2015_v22  ;;  %v1762_v15 = vsub.f32 %v1634_v9, %v1698_v0  ;;  %v1531_v27 = vpop.xlane.xlu1 %1530  ;;  %1600 = vadd.xlane.f32.xlu0 %v1476_v5 }
 0x315   :  { %v2791_v12 = vpop.eup %2790  ;;  %v2082_v40 = vmul.f32 %v3563_v43, %v2014_v55  ;;  %v1891_v47 = vadd.f32 1e-05, %v1763_v39  ;;  %v1633_v54 = vmul.f32 0.0078125, %v1531_v27  ;;  %v1529_v3 = vpop.xlane.xlu0 %1528 }
 0x316   :  { %v2793_v44 = vpop.eup %2792  ;;  %v2151_v56 = vadd.f32 %v3580_v63, %v2083_v18  ;;  %v2013_v42 = vmul.f32 %v2791_v12, %v1821_v28  ;;  %v1890_v32 = vadd.f32 1e-05, %v1762_v15  ;;  %v1632_v1 = vmul.f32 0.0078125, %v1529_v3  ;;  %v2897_v28 = vld [vmem:[#allocation2 + $0xa8] sm:$0xff] }
 0x317   :  { %v2150_v24 = vadd.f32 %v3580_v63, %v2082_v40  ;;  %v2012_v10 = vmul.f32 %v2793_v44, %v1820_v41  ;;  %2794 = vrsqrt.f32 %v1891_v47  ;;  %v1761_v8 = vsub.f32 %v1633_v54, %v1697_v58  ;;  %1606 = vadd.xlane.f32.xlu1 %v1479_v61  ;;  %v2898_v61 = vld [vmem:[#allocation2 + $0xa0] sm:$0xff]  ;;  %v4305_v58 = vld [vmem:[#allocation17_spill] sm:$0xff] }
 0x318   :  { %v2215_v38 = vadd.f32 %v2895_v6, %v2151_v56  ;;  %v2081_v50 = vmul.f32 %v3563_v43, %v2013_v42  ;;  %2796 = vrsqrt.f32 %v1890_v32  ;;  %v1760_v45 = vsub.f32 %v1632_v1, %v1696_v17  ;;  %v1286_v33 = vpop.xlane.xlu1 %1285  ;;  %1604 = vadd.xlane.f32.xlu0 %v1478_v36  ;;  %v4306_v17 = vld [vmem:[#allocation18_spill] sm:$0xff] }
 0x319   :  { %v2214_v52 = vadd.f32 %v2896_v51, %v2150_v24  ;;  %v2080_v26 = vmul.f32 %v3563_v43, %v2012_v10  ;;  %v1889_v22 = vadd.f32 1e-05, %v1761_v8  ;;  %v1284_v0 = vpop.xlane.xlu0 %1283  ;;  %v3918_v48 = vmul.f32 0.0078125, %v1286_v33  ;;  %v4307_v24 = vld [vmem:[#allocation19_spill] sm:$0xff] }
 0x31a   :  { %2279 = vst [vmem:[#allocation8 + $0xb8] sm:$0xff] %v2215_v38  ;;  %v2149_v9 = vadd.f32 %v3580_v63, %v2081_v50  ;;  %v1888_v5 = vadd.f32 1e-05, %v1760_v45  ;;  %v3920_v18 = vmul.f32 0.0078125, %v1284_v0  ;;  %v1827_v15 = vsub.f32 %v4305_v58, %v3872_v16 }
 0x31b   :  { %2278 = vst [vmem:[#allocation8 + $0xb0] sm:$0xff] %v2214_v52  ;;  %v2148_v60 = vadd.f32 %v3580_v63, %v2080_v26  ;;  %2798 = vrsqrt.f32 %v1889_v22  ;;  %v1826_v47 = vsub.f32 %v4306_v17, %v3878_v53  ;;  %v1703_v54 = vmul.f32 %v3918_v48, %v3918_v48  ;;  %v4308_v53 = vld [vmem:[#allocation20_spill] sm:$0xff]  ;;  %v2900_v17 = vld [vmem:[#allocation2 + $0xd0] sm:$0xff] }
 0x31c   :  { %v2213_v55 = vadd.f32 %v2897_v28, %v2149_v9  ;;  %2800 = vrsqrt.f32 %v1888_v5  ;;  %v1282_v39 = vpop.xlane.xlu1 %1281  ;;  %v1702_v1 = vmul.f32 %v3920_v18, %v3920_v18  ;;  %v1825_v10 = vsub.f32 %v4307_v24, %v3883_v25 }
 0x31d   :  { %v2212_v36 = vadd.f32 %v2898_v61, %v2148_v60  ;;  %v1280_v41 = vpop.xlane.xlu0 %1279  ;;  %v3924_v27 = vmul.f32 0.0078125, %v1282_v39  ;;  %v1824_v38 = vsub.f32 %v4308_v53, %v3894_v13 }
 0x31e   :  { %2277 = vst [vmem:[#allocation8 + $0xa8] sm:$0xff] %v2213_v55  ;;  %v3930_v3 = vmul.f32 0.0078125, %v1280_v41  ;;  %v2899_v41 = vld [vmem:[#allocation2 + $0xd8] sm:$0xff] }
 0x31f   :  { %2276 = vst [vmem:[#allocation8 + $0xa0] sm:$0xff] %v2212_v36  ;;  %v1701_v45 = vmul.f32 %v3924_v27, %v3924_v27 }
 0x320   :  { %v1543_v12 = vpop.xlane.xlu1 %1542  ;;  %v1700_v22 = vmul.f32 %v3930_v3, %v3930_v3 }
 0x321   :  { %v2795_v40 = vpop.eup %2794  ;;  %v1639_v44 = vmul.f32 0.0078125, %v1543_v12  ;;  %v1541_v56 = vpop.xlane.xlu0 %1540 }
 0x322   :  { %v2797_v42 = vpop.eup %2796  ;;  %v2019_v32 = vmul.f32 %v2795_v40, %v1827_v15  ;;  %v1638_v16 = vmul.f32 0.0078125, %v1541_v56 }
 0x323   :  { %v2018_v8 = vmul.f32 %v2797_v42, %v1826_v47  ;;  %v1767_v6 = vsub.f32 %v1639_v44, %v1703_v54 }
 0x324   :  { %v2087_v50 = vmul.f32 %v3563_v43, %v2019_v32  ;;  %v1766_v33 = vsub.f32 %v1638_v16, %v1702_v1  ;;  %v1539_v51 = vpop.xlane.xlu1 %1538  ;;  %v2901_v16 = vld [vmem:[#allocation2 + $0xc8] sm:$0xff] }
 0x325   :  { %v2799_v52 = vpop.eup %2798  ;;  %v2086_v26 = vmul.f32 %v3563_v43, %v2018_v8  ;;  %v1895_v0 = vadd.f32 1e-05, %v1767_v6  ;;  %v1637_v25 = vmul.f32 0.0078125, %v1539_v51  ;;  %v1537_v9 = vpop.xlane.xlu0 %1536  ;;  %v2902_v8 = vld [vmem:[#allocation2 + $0xc0] sm:$0xff] }
 0x326   :  { %v2801_v5 = vpop.eup %2800  ;;  %v2155_v60 = vadd.f32 %v3580_v63, %v2087_v50  ;;  %v2017_v13 = vmul.f32 %v2799_v52, %v1825_v10  ;;  %v1894_v28 = vadd.f32 1e-05, %v1766_v33  ;;  %v1636_v55 = vmul.f32 0.0078125, %v1537_v9 }
 0x327   :  { %v2154_v39 = vadd.f32 %v3580_v63, %v2086_v26  ;;  %v2016_v61 = vmul.f32 %v2801_v5, %v1824_v38  ;;  %2802 = vrsqrt.f32 %v1895_v0  ;;  %v1765_v36 = vsub.f32 %v1637_v25, %v1701_v45  ;;  %v4309_v45 = vld [vmem:[#allocation21_spill] sm:$0xff] }
 0x328   :  { %v2219_v58 = vadd.f32 %v2899_v41, %v2155_v60  ;;  %v2085_v15 = vmul.f32 %v3563_v43, %v2017_v13  ;;  %2804 = vrsqrt.f32 %v1894_v28  ;;  %v1764_v12 = vsub.f32 %v1636_v55, %v1700_v22  ;;  %v1294_v40 = vpop.xlane.xlu1 %1293  ;;  %v4310_v22 = vld [vmem:[#allocation22_spill] sm:$0xff] }
 0x329   :  { %v2218_v47 = vadd.f32 %v2900_v17, %v2154_v39  ;;  %v2084_v54 = vmul.f32 %v3563_v43, %v2016_v61  ;;  %v1893_v44 = vadd.f32 1e-05, %v1765_v36  ;;  %v1292_v56 = vpop.xlane.xlu0 %1291  ;;  %v3950_v53 = vmul.f32 0.0078125, %v1294_v40  ;;  %v4311_v39 = vld [vmem:[#allocation23_spill] sm:$0xff] }
 0x32a   :  { %2283 = vst [vmem:[#allocation8 + $0xd8] sm:$0xff] %v2219_v58  ;;  %v2153_v42 = vadd.f32 %v3580_v63, %v2085_v15  ;;  %v1892_v32 = vadd.f32 1e-05, %v1764_v12  ;;  %v3952_v50 = vmul.f32 0.0078125, %v1292_v56  ;;  %v1831_v33 = vsub.f32 %v4309_v45, %v3918_v48 }
 0x32b   :  { %2282 = vst [vmem:[#allocation8 + $0xd0] sm:$0xff] %v2218_v47  ;;  %v2152_v1 = vadd.f32 %v3580_v63, %v2084_v54  ;;  %2806 = vrsqrt.f32 %v1893_v44  ;;  %v1830_v0 = vsub.f32 %v4310_v22, %v3920_v18  ;;  %v1707_v25 = vmul.f32 %v3950_v53, %v3950_v53  ;;  %v4312_v18 = vld [vmem:[#allocation24_spill] sm:$0xff]  ;;  %v2904_v22 = vld [vmem:[#allocation2 + $0xf0] sm:$0xff] }
 0x32c   :  { %v2217_v24 = vadd.f32 %v2901_v16, %v2153_v42  ;;  %2808 = vrsqrt.f32 %v1892_v32  ;;  %v1290_v10 = vpop.xlane.xlu1 %1289  ;;  %v1706_v55 = vmul.f32 %v3952_v50, %v3952_v50  ;;  %v1829_v61 = vsub.f32 %v4311_v39, %v3924_v27 }
 0x32d   :  { %v2216_v6 = vadd.f32 %v2902_v8, %v2152_v1  ;;  %v1288_v38 = vpop.xlane.xlu0 %1287  ;;  %v3956_v51 = vmul.f32 0.0078125, %v1290_v10  ;;  %v1828_v58 = vsub.f32 %v4312_v18, %v3930_v3 }
 0x32e   :  { %2281 = vst [vmem:[#allocation8 + $0xc8] sm:$0xff] %v2217_v24  ;;  %v3962_v9 = vmul.f32 0.0078125, %v1288_v38  ;;  %v2903_v38 = vld [vmem:[#allocation2 + $0xf8] sm:$0xff] }
 0x32f   :  { %2280 = vst [vmem:[#allocation8 + $0xc0] sm:$0xff] %v2216_v6  ;;  %v1705_v12 = vmul.f32 %v3956_v51, %v3956_v51 }
 0x330   :  { %v1551_v52 = vpop.xlane.xlu1 %1550  ;;  %v1704_v44 = vmul.f32 %v3962_v9, %v3962_v9 }
 0x331   :  { %v2803_v26 = vpop.eup %2802  ;;  %v1643_v5 = vmul.f32 0.0078125, %v1551_v52  ;;  %v1549_v60 = vpop.xlane.xlu0 %1548 }
 0x332   :  { %v2805_v13 = vpop.eup %2804  ;;  %v2023_v28 = vmul.f32 %v2803_v26, %v1831_v33  ;;  %v1642_v48 = vmul.f32 0.0078125, %v1549_v60 }
 0x333   :  { %v2022_v36 = vmul.f32 %v2805_v13, %v1830_v0  ;;  %v1771_v41 = vsub.f32 %v1643_v5, %v1707_v25 }
 0x334   :  { %v2091_v15 = vmul.f32 %v3563_v43, %v2023_v28  ;;  %v1770_v40 = vsub.f32 %v1642_v48, %v1706_v55  ;;  %v1547_v17 = vpop.xlane.xlu1 %1546  ;;  %v2905_v48 = vld [vmem:[#allocation2 + $0xe8] sm:$0xff] }
 0x335   :  { %v2807_v47 = vpop.eup %2806  ;;  %v2090_v54 = vmul.f32 %v3563_v43, %v2022_v36  ;;  %v1899_v56 = vadd.f32 1e-05, %v1771_v41  ;;  %v1641_v27 = vmul.f32 0.0078125, %v1547_v17  ;;  %v1545_v42 = vpop.xlane.xlu0 %1544  ;;  %v2906_v36 = vld [vmem:[#allocation2 + $0xe0] sm:$0xff] }
 0x336   :  { %v2809_v32 = vpop.eup %2808  ;;  %v2159_v1 = vadd.f32 %v3580_v63, %v2091_v15  ;;  %v2021_v3 = vmul.f32 %v2807_v47, %v1829_v61  ;;  %v1898_v16 = vadd.f32 1e-05, %v1770_v40  ;;  %v1640_v24 = vmul.f32 0.0078125, %v1545_v42 }
 0x337   :  { %v2158_v10 = vadd.f32 %v3580_v63, %v2090_v54  ;;  %v2020_v8 = vmul.f32 %v2809_v32, %v1828_v58  ;;  %2810 = vrsqrt.f32 %v1899_v56  ;;  %v1769_v6 = vsub.f32 %v1641_v27, %v1705_v12  ;;  %v4313_v12 = vld [vmem:[#allocation29_spill] sm:$0xff] }
 0x338   :  { %v2223_v45 = vadd.f32 %v2903_v38, %v2159_v1  ;;  %v2089_v33 = vmul.f32 %v3563_v43, %v2021_v3  ;;  %2812 = vrsqrt.f32 %v1898_v16  ;;  %v1768_v52 = vsub.f32 %v1640_v24, %v1704_v44  ;;  %v1302_v26 = vpop.xlane.xlu1 %1301  ;;  %v4314_v44 = vld [vmem:[#allocation30_spill] sm:$0xff] }
 0x339   :  { %v2222_v0 = vadd.f32 %v2904_v22, %v2158_v10  ;;  %v2088_v25 = vmul.f32 %v3563_v43, %v2020_v8  ;;  %v1897_v5 = vadd.f32 1e-05, %v1769_v6  ;;  %v1300_v60 = vpop.xlane.xlu0 %1299  ;;  %v3982_v18 = vmul.f32 0.0078125, %v1302_v26  ;;  %v4315_v10 = vld [vmem:[#allocation31_spill] sm:$0xff] }
 0x33a   :  { %2287 = vst [vmem:[#allocation8 + $0xf8] sm:$0xff] %v2223_v45  ;;  %v2157_v13 = vadd.f32 %v3580_v63, %v2089_v33  ;;  %v1896_v28 = vadd.f32 1e-05, %v1768_v52  ;;  %v3984_v15 = vmul.f32 0.0078125, %v1300_v60  ;;  %v1835_v40 = vsub.f32 %v4313_v12, %v3950_v53 }
 0x33b   :  { %2286 = vst [vmem:[#allocation8 + $0xf0] sm:$0xff] %v2222_v0  ;;  %v2156_v55 = vadd.f32 %v3580_v63, %v2088_v25  ;;  %2814 = vrsqrt.f32 %v1897_v5  ;;  %v1834_v56 = vsub.f32 %v4314_v44, %v3952_v50  ;;  %v1711_v27 = vmul.f32 %v3982_v18, %v3982_v18  ;;  %v4316_v50 = vld [vmem:[#allocation32_spill] sm:$0xff]  ;;  %v2908_v44 = vld [vmem:[#allocation2 + $0x110] sm:$0xff] }
 0x33c   :  { %v2221_v39 = vadd.f32 %v2905_v48, %v2157_v13  ;;  %2816 = vrsqrt.f32 %v1896_v28  ;;  %v1298_v61 = vpop.xlane.xlu1 %1297  ;;  %v1710_v24 = vmul.f32 %v3984_v15, %v3984_v15  ;;  %v1833_v8 = vsub.f32 %v4315_v10, %v3956_v51 }
 0x33d   :  { %v2220_v41 = vadd.f32 %v2906_v36, %v2156_v55  ;;  %v1296_v58 = vpop.xlane.xlu0 %1295  ;;  %v3988_v17 = vmul.f32 0.0078125, %v1298_v61  ;;  %v1832_v45 = vsub.f32 %v4316_v50, %v3962_v9 }
 0x33e   :  { %2285 = vst [vmem:[#allocation8 + $0xe8] sm:$0xff] %v2221_v39  ;;  %v3994_v42 = vmul.f32 0.0078125, %v1296_v58  ;;  %v2907_v58 = vld [vmem:[#allocation2 + $0x118] sm:$0xff] }
 0x33f   :  { %2284 = vst [vmem:[#allocation8 + $0xe0] sm:$0xff] %v2220_v41  ;;  %v1709_v52 = vmul.f32 %v3988_v17, %v3988_v17 }
 0x340   :  { %v1559_v47 = vpop.xlane.xlu1 %1558  ;;  %v1708_v5 = vmul.f32 %v3994_v42, %v3994_v42 }
 0x341   :  { %v2811_v54 = vpop.eup %2810  ;;  %v1647_v32 = vmul.f32 0.0078125, %v1559_v47  ;;  %v1557_v1 = vpop.xlane.xlu0 %1556 }
 0x342   :  { %v2813_v3 = vpop.eup %2812  ;;  %v2027_v16 = vmul.f32 %v2811_v54, %v1835_v40  ;;  %v1646_v53 = vmul.f32 0.0078125, %v1557_v1 }
 0x343   :  { %v2026_v6 = vmul.f32 %v2813_v3, %v1834_v56  ;;  %v1775_v38 = vsub.f32 %v1647_v32, %v1711_v27 }
 0x344   :  { %v2095_v33 = vmul.f32 %v3563_v43, %v2027_v16  ;;  %v1774_v26 = vsub.f32 %v1646_v53, %v1710_v24  ;;  %v1555_v22 = vpop.xlane.xlu1 %1554  ;;  %v2909_v53 = vld [vmem:[#allocation2 + $0x108] sm:$0xff] }
 0x345   :  { %v2815_v0 = vpop.eup %2814  ;;  %v2094_v25 = vmul.f32 %v3563_v43, %v2026_v6  ;;  %v1903_v60 = vadd.f32 1e-05, %v1775_v38  ;;  %v1645_v51 = vmul.f32 0.0078125, %v1555_v22  ;;  %v1553_v13 = vpop.xlane.xlu0 %1552  ;;  %v2910_v6 = vld [vmem:[#allocation2 + $0x100] sm:$0xff] }
 0x346   :  { %v2817_v28 = vpop.eup %2816  ;;  %v2163_v55 = vadd.f32 %v3580_v63, %v2095_v33  ;;  %v2025_v9 = vmul.f32 %v2815_v0, %v1833_v8  ;;  %v1902_v48 = vadd.f32 1e-05, %v1774_v26  ;;  %v1644_v39 = vmul.f32 0.0078125, %v1553_v13 }
 0x347   :  { %v2162_v61 = vadd.f32 %v3580_v63, %v2094_v25  ;;  %v2024_v36 = vmul.f32 %v2817_v28, %v1832_v45  ;;  %2818 = vrsqrt.f32 %v1903_v60  ;;  %v1773_v41 = vsub.f32 %v1645_v51, %v1709_v52  ;;  %v4317_v52 = vld [vmem:[#allocation33_spill] sm:$0xff] }
 0x348   :  { %v2227_v12 = vadd.f32 %v2907_v58, %v2163_v55  ;;  %v2093_v40 = vmul.f32 %v3563_v43, %v2025_v9  ;;  %2820 = vrsqrt.f32 %v1902_v48  ;;  %v1772_v47 = vsub.f32 %v1644_v39, %v1708_v5  ;;  %v1310_v54 = vpop.xlane.xlu1 %1309  ;;  %v4318_v5 = vld [vmem:[#allocation34_spill] sm:$0xff] }
 0x349   :  { %v2226_v56 = vadd.f32 %v2908_v44, %v2162_v61  ;;  %v2092_v27 = vmul.f32 %v3563_v43, %v2024_v36  ;;  %v1901_v32 = vadd.f32 1e-05, %v1773_v41  ;;  %v1308_v1 = vpop.xlane.xlu0 %1307  ;;  %v4014_v50 = vmul.f32 0.0078125, %v1310_v54  ;;  %v4319_v61 = vld [vmem:[#allocation35_spill] sm:$0xff] }
 0x34a   :  { %2291 = vst [vmem:[#allocation8 + $0x118] sm:$0xff] %v2227_v12  ;;  %v2161_v3 = vadd.f32 %v3580_v63, %v2093_v40  ;;  %v1900_v16 = vadd.f32 1e-05, %v1772_v47  ;;  %v4016_v33 = vmul.f32 0.0078125, %v1308_v1  ;;  %v1839_v26 = vsub.f32 %v4317_v52, %v3982_v18 }
 0x34b   :  { %2290 = vst [vmem:[#allocation8 + $0x110] sm:$0xff] %v2226_v56  ;;  %v2160_v24 = vadd.f32 %v3580_v63, %v2092_v27  ;;  %2822 = vrsqrt.f32 %v1901_v32  ;;  %v1838_v60 = vsub.f32 %v4318_v5, %v3984_v15  ;;  %v1715_v51 = vmul.f32 %v4014_v50, %v4014_v50  ;;  %v4320_v15 = vld [vmem:[#allocation36_spill] sm:$0xff]  ;;  %v2912_v5 = vld [vmem:[#allocation2 + $0x130] sm:$0xff] }
 0x34c   :  { %v2225_v10 = vadd.f32 %v2909_v53, %v2161_v3  ;;  %2824 = vrsqrt.f32 %v1900_v16  ;;  %v1306_v8 = vpop.xlane.xlu1 %1305  ;;  %v1714_v39 = vmul.f32 %v4016_v33, %v4016_v33  ;;  %v1837_v36 = vsub.f32 %v4319_v61, %v3988_v17 }
 0x34d   :  { %v2224_v38 = vadd.f32 %v2910_v6, %v2160_v24  ;;  %v1304_v45 = vpop.xlane.xlu0 %1303  ;;  %v4020_v22 = vmul.f32 0.0078125, %v1306_v8  ;;  %v1836_v12 = vsub.f32 %v4320_v15, %v3994_v42 }
 0x34e   :  { %2289 = vst [vmem:[#allocation8 + $0x108] sm:$0xff] %v2225_v10  ;;  %v4026_v13 = vmul.f32 0.0078125, %v1304_v45  ;;  %v2911_v45 = vld [vmem:[#allocation2 + $0x138] sm:$0xff] }
 0x34f   :  { %2288 = vst [vmem:[#allocation8 + $0x100] sm:$0xff] %v2224_v38  ;;  %v1713_v47 = vmul.f32 %v4020_v22, %v4020_v22 }
 0x350   :  { %v1567_v0 = vpop.xlane.xlu1 %1566  ;;  %v1712_v32 = vmul.f32 %v4026_v13, %v4026_v13 }
 0x351   :  { %v2819_v25 = vpop.eup %2818  ;;  %v1651_v28 = vmul.f32 0.0078125, %v1567_v0  ;;  %v1565_v55 = vpop.xlane.xlu0 %1564 }
 0x352   :  { %v2821_v9 = vpop.eup %2820  ;;  %v2031_v48 = vmul.f32 %v2819_v25, %v1839_v26  ;;  %v1650_v18 = vmul.f32 0.0078125, %v1565_v55 }
 0x353   :  { %v2030_v41 = vmul.f32 %v2821_v9, %v1838_v60  ;;  %v1779_v58 = vsub.f32 %v1651_v28, %v1715_v51 }
 0x354   :  { %v2099_v40 = vmul.f32 %v3563_v43, %v2031_v48  ;;  %v1778_v54 = vsub.f32 %v1650_v18, %v1714_v39  ;;  %v1563_v44 = vpop.xlane.xlu1 %1562  ;;  %v2913_v18 = vld [vmem:[#allocation2 + $0x128] sm:$0xff] }
 0x355   :  { %v2823_v56 = vpop.eup %2822  ;;  %v2098_v27 = vmul.f32 %v3563_v43, %v2030_v41  ;;  %v1907_v1 = vadd.f32 1e-05, %v1779_v58  ;;  %v1649_v17 = vmul.f32 0.0078125, %v1563_v44  ;;  %v1561_v3 = vpop.xlane.xlu0 %1560  ;;  %v2914_v41 = vld [vmem:[#allocation2 + $0x120] sm:$0xff] }
 0x356   :  { %v2825_v16 = vpop.eup %2824  ;;  %v2167_v24 = vadd.f32 %v3580_v63, %v2099_v40  ;;  %v2029_v42 = vmul.f32 %v2823_v56, %v1837_v36  ;;  %v1906_v53 = vadd.f32 1e-05, %v1778_v54  ;;  %v1648_v10 = vmul.f32 0.0078125, %v1561_v3 }
 0x357   :  { %v2166_v8 = vadd.f32 %v3580_v63, %v2098_v27  ;;  %v2028_v6 = vmul.f32 %v2825_v16, %v1836_v12  ;;  %2826 = vrsqrt.f32 %v1907_v1  ;;  %v1777_v38 = vsub.f32 %v1649_v17, %v1713_v47  ;;  %v4321_v47 = vld [vmem:[#allocation37_spill] sm:$0xff] }
 0x358   :  { %v2231_v52 = vadd.f32 %v2911_v45, %v2167_v24  ;;  %v2097_v26 = vmul.f32 %v3563_v43, %v2029_v42  ;;  %2828 = vrsqrt.f32 %v1906_v53  ;;  %v1776_v0 = vsub.f32 %v1648_v10, %v1712_v32  ;;  %v1318_v25 = vpop.xlane.xlu1 %1317  ;;  %v4322_v32 = vld [vmem:[#allocation38_spill] sm:$0xff] }
 0x359   :  { %v2230_v60 = vadd.f32 %v2912_v5, %v2166_v8  ;;  %v2096_v51 = vmul.f32 %v3563_v43, %v2028_v6  ;;  %v1905_v28 = vadd.f32 1e-05, %v1777_v38  ;;  %v1316_v55 = vpop.xlane.xlu0 %1315  ;;  %v4046_v15 = vmul.f32 0.0078125, %v1318_v25  ;;  %v4323_v8 = vld [vmem:[#allocation39_spill] sm:$0xff] }
 0x35a   :  { %2295 = vst [vmem:[#allocation8 + $0x138] sm:$0xff] %v2231_v52  ;;  %v2165_v9 = vadd.f32 %v3580_v63, %v2097_v26  ;;  %v1904_v48 = vadd.f32 1e-05, %v1776_v0  ;;  %v4048_v40 = vmul.f32 0.0078125, %v1316_v55  ;;  %v1843_v54 = vsub.f32 %v4321_v47, %v4014_v50 }
 0x35b   :  { %2294 = vst [vmem:[#allocation8 + $0x130] sm:$0xff] %v2230_v60  ;;  %v2164_v39 = vadd.f32 %v3580_v63, %v2096_v51  ;;  %2830 = vrsqrt.f32 %v1905_v28  ;;  %v1842_v1 = vsub.f32 %v4322_v32, %v4016_v33  ;;  %v1719_v17 = vmul.f32 %v4046_v15, %v4046_v15  ;;  %v4324_v33 = vld [vmem:[#allocation40_spill] sm:$0xff]  ;;  %v2916_v32 = vld [vmem:[#allocation2 + $0x150] sm:$0xff] }
 0x35c   :  { %v2229_v61 = vadd.f32 %v2913_v18, %v2165_v9  ;;  %2832 = vrsqrt.f32 %v1904_v48  ;;  %v1314_v36 = vpop.xlane.xlu1 %1313  ;;  %v1718_v10 = vmul.f32 %v4048_v40, %v4048_v40  ;;  %v1841_v6 = vsub.f32 %v4323_v8, %v4020_v22 }
 0x35d   :  { %v2228_v58 = vadd.f32 %v2914_v41, %v2164_v39  ;;  %v1312_v12 = vpop.xlane.xlu0 %1311  ;;  %v4052_v44 = vmul.f32 0.0078125, %v1314_v36  ;;  %v1840_v52 = vsub.f32 %v4324_v33, %v4026_v13 }
 0x35e   :  { %2293 = vst [vmem:[#allocation8 + $0x128] sm:$0xff] %v2229_v61  ;;  %v4058_v3 = vmul.f32 0.0078125, %v1312_v12  ;;  %v2915_v12 = vld [vmem:[#allocation2 + $0x158] sm:$0xff] }
 0x35f   :  { %2292 = vst [vmem:[#allocation8 + $0x120] sm:$0xff] %v2228_v58  ;;  %v1717_v0 = vmul.f32 %v4052_v44, %v4052_v44 }
 0x360   :  { %v1575_v56 = vpop.xlane.xlu1 %1574  ;;  %v1716_v28 = vmul.f32 %v4058_v3, %v4058_v3 }
 0x361   :  { %v2827_v27 = vpop.eup %2826  ;;  %v1655_v16 = vmul.f32 0.0078125, %v1575_v56  ;;  %v1573_v24 = vpop.xlane.xlu0 %1572 }
 0x362   :  { %v2829_v42 = vpop.eup %2828  ;;  %v2035_v53 = vmul.f32 %v2827_v27, %v1843_v54  ;;  %v1654_v50 = vmul.f32 0.0078125, %v1573_v24 }
 0x363   :  { %v2034_v38 = vmul.f32 %v2829_v42, %v1842_v1  ;;  %v1783_v45 = vsub.f32 %v1655_v16, %v1719_v17 }
 0x364   :  { %v2103_v26 = vmul.f32 %v3563_v43, %v2035_v53  ;;  %v1782_v25 = vsub.f32 %v1654_v50, %v1718_v10  ;;  %v1571_v5 = vpop.xlane.xlu1 %1570  ;;  %v2917_v50 = vld [vmem:[#allocation2 + $0x148] sm:$0xff] }
 0x365   :  { %v2831_v60 = vpop.eup %2830  ;;  %v2102_v51 = vmul.f32 %v3563_v43, %v2034_v38  ;;  %v1911_v55 = vadd.f32 1e-05, %v1783_v45  ;;  %v1653_v22 = vmul.f32 0.0078125, %v1571_v5  ;;  %v1569_v9 = vpop.xlane.xlu0 %1568  ;;  %v2918_v38 = vld [vmem:[#allocation2 + $0x140] sm:$0xff] }
 0x366   :  { %v2833_v48 = vpop.eup %2832  ;;  %v2171_v39 = vadd.f32 %v3580_v63, %v2103_v26  ;;  %v2033_v13 = vmul.f32 %v2831_v60, %v1841_v6  ;;  %v1910_v18 = vadd.f32 1e-05, %v1782_v25  ;;  %v1652_v61 = vmul.f32 0.0078125, %v1569_v9 }
 0x367   :  { %v2170_v36 = vadd.f32 %v3580_v63, %v2102_v51  ;;  %v2032_v41 = vmul.f32 %v2833_v48, %v1840_v52  ;;  %2834 = vrsqrt.f32 %v1911_v55  ;;  %v1781_v58 = vsub.f32 %v1653_v22, %v1717_v0 }
 0x368   :  { %v2235_v47 = vadd.f32 %v2915_v12, %v2171_v39  ;;  %v2101_v54 = vmul.f32 %v3563_v43, %v2033_v13  ;;  %2836 = vrsqrt.f32 %v1910_v18  ;;  %v1780_v56 = vsub.f32 %v1652_v61, %v1716_v28  ;;  %v1326_v27 = vpop.xlane.xlu1 %1325 }
 0x369   :  { %v2234_v1 = vadd.f32 %v2916_v32, %v2170_v36  ;;  %v2100_v17 = vmul.f32 %v3563_v43, %v2032_v41  ;;  %v1909_v16 = vadd.f32 1e-05, %v1781_v58  ;;  %v1324_v24 = vpop.xlane.xlu0 %1323  ;;  %v4078_v33 = vmul.f32 0.0078125, %v1326_v27 }
 0x36a   :  { %2299 = vst [vmem:[#allocation8 + $0x158] sm:$0xff] %v2235_v47  ;;  %v2169_v42 = vadd.f32 %v3580_v63, %v2101_v54  ;;  %v1908_v53 = vadd.f32 1e-05, %v1780_v56  ;;  %v4080_v26 = vmul.f32 0.0078125, %v1324_v24  ;;  %v1847_v0 = vsub.f32 %v3617_v31, %v4046_v15 }
 0x36b   :  { %2298 = vst [vmem:[#allocation8 + $0x150] sm:$0xff] %v2234_v1  ;;  %v2168_v10 = vadd.f32 %v3580_v63, %v2100_v17  ;;  %2838 = vrsqrt.f32 %v1909_v16  ;;  %v1846_v51 = vsub.f32 %v3622_v2, %v4048_v40  ;;  %v1723_v28 = vmul.f32 %v4078_v33, %v4078_v33 }
 0x36c   :  { %v2233_v8 = vadd.f32 %v2917_v50, %v2169_v42  ;;  %2840 = vrsqrt.f32 %v1908_v53  ;;  %v1322_v6 = vpop.xlane.xlu1 %1321  ;;  %v1722_v13 = vmul.f32 %v4080_v26, %v4080_v26  ;;  %v1845_v15 = vsub.f32 %v3630_v14, %v4052_v44  ;;  %v2919_v42 = vld [vmem:[#allocation2 + $0x178] sm:$0xff] }
 0x36d   :  { %v2232_v45 = vadd.f32 %v2918_v38, %v2168_v10  ;;  %v1320_v52 = vpop.xlane.xlu0 %1319  ;;  %v4084_v25 = vmul.f32 0.0078125, %v1322_v6  ;;  %v1844_v2 = vsub.f32 %v3636_v35, %v4058_v3  ;;  %v2920_v6 = vld [vmem:[#allocation2 + $0x170] sm:$0xff] }
 0x36e   :  { %2297 = vst [vmem:[#allocation8 + $0x148] sm:$0xff] %v2233_v8  ;;  %v4090_v55 = vmul.f32 0.0078125, %v1320_v52 }
 0x36f   :  { %2296 = vst [vmem:[#allocation8 + $0x140] sm:$0xff] %v2232_v45  ;;  %v1721_v36 = vmul.f32 %v4084_v25, %v4084_v25 }
 0x370   :  { %v1583_v5 = vpop.xlane.xlu1 %1582  ;;  %v1720_v54 = vmul.f32 %v4090_v55, %v4090_v55 }
 0x371   :  { %v2835_v60 = vpop.eup %2834  ;;  %v1659_v22 = vmul.f32 0.0078125, %v1583_v5  ;;  %v1581_v9 = vpop.xlane.xlu0 %1580 }
 0x372   :  { %v2837_v48 = vpop.eup %2836  ;;  %v2039_v39 = vmul.f32 %v2835_v60, %v1847_v0  ;;  %v1658_v31 = vmul.f32 0.0078125, %v1581_v9 }
 0x373   :  { %v2038_v18 = vmul.f32 %v2837_v48, %v1846_v51  ;;  %v1787_v61 = vsub.f32 %v1659_v22, %v1723_v28  ;;  %v2921_v28 = vld [vmem:[#allocation2 + $0x168] sm:$0xff]  ;;  %v2922_v48 = vld [vmem:[#allocation2 + $0x160] sm:$0xff] }
 0x374   :  { %v2107_v40 = vmul.f32 %v3563_v43, %v2039_v39  ;;  %v1786_v41 = vsub.f32 %v1658_v31, %v1722_v13  ;;  %v1579_v58 = vpop.xlane.xlu1 %1578 }
 0x375   :  { %v2839_v12 = vpop.eup %2838  ;;  %v2106_v47 = vmul.f32 %v3563_v43, %v2038_v18  ;;  %v1915_v56 = vadd.f32 1e-05, %v1787_v61  ;;  %v1657_v14 = vmul.f32 0.0078125, %v1579_v58  ;;  %v1577_v44 = vpop.xlane.xlu0 %1576  ;;  %v1851_v18 = vsub.f32 %v3677_v7, %v4078_v33 }
 0x376   :  { %v2841_v27 = vpop.eup %2840  ;;  %v2175_v32 = vadd.f32 %v3580_v63, %v2107_v40  ;;  %v2037_v35 = vmul.f32 %v2839_v12, %v1845_v15  ;;  %v1914_v3 = vadd.f32 1e-05, %v1786_v41  ;;  %v1656_v1 = vmul.f32 0.0078125, %v1577_v44 }
 0x377   :  { %v2174_v17 = vadd.f32 %v3580_v63, %v2106_v47  ;;  %v2036_v16 = vmul.f32 %v2841_v27, %v1844_v2  ;;  %2842 = vrsqrt.f32 %v1915_v56  ;;  %v1785_v24 = vsub.f32 %v1657_v14, %v1721_v36 }
 0x378   :  { %v2239_v53 = vadd.f32 %v2919_v42, %v2175_v32  ;;  %v2105_v10 = vmul.f32 %v3563_v43, %v2037_v35  ;;  %2844 = vrsqrt.f32 %v1914_v3  ;;  %v1784_v50 = vsub.f32 %v1656_v1, %v1720_v54  ;;  %v1334_v8 = vpop.xlane.xlu1 %1333 }
 0x379   :  { %v2238_v38 = vadd.f32 %v2920_v6, %v2174_v17  ;;  %v2104_v45 = vmul.f32 %v3563_v43, %v2036_v16  ;;  %v1913_v52 = vadd.f32 1e-05, %v1785_v24  ;;  %v1332_v0 = vpop.xlane.xlu0 %1331  ;;  %v4110_v13 = vmul.f32 0.0078125, %v1334_v8 }
 0x37a   :  { %2303 = vst [vmem:[#allocation8 + $0x178] sm:$0xff] %v2239_v53  ;;  %v2173_v5 = vadd.f32 %v3580_v63, %v2105_v10  ;;  %v1912_v60 = vadd.f32 1e-05, %v1784_v50  ;;  %v4112_v15 = vmul.f32 0.0078125, %v1332_v0  ;;  %v1850_v36 = vsub.f32 %v3682_v19, %v4080_v26 }
 0x37b   :  { %2302 = vst [vmem:[#allocation8 + $0x170] sm:$0xff] %v2238_v38  ;;  %v2172_v51 = vadd.f32 %v3580_v63, %v2104_v45  ;;  %2846 = vrsqrt.f32 %v1913_v52  ;;  %v1727_v41 = vmul.f32 %v4110_v13, %v4110_v13  ;;  %v1849_v33 = vsub.f32 %v3690_v23, %v4084_v25  ;;  %v2923_v38 = vld [vmem:[#allocation2 + $0x198] sm:$0xff] }
 0x37c   :  { %v2237_v22 = vadd.f32 %v2921_v28, %v2173_v5  ;;  %2848 = vrsqrt.f32 %v1912_v60  ;;  %v1330_v9 = vpop.xlane.xlu1 %1329  ;;  %v1726_v14 = vmul.f32 %v4112_v15, %v4112_v15  ;;  %v1848_v19 = vsub.f32 %v3696_v46, %v4090_v55  ;;  %v2924_v60 = vld [vmem:[#allocation2 + $0x190] sm:$0xff] }
 0x37d   :  { %v2236_v39 = vadd.f32 %v2922_v48, %v2172_v51  ;;  %v1328_v31 = vpop.xlane.xlu0 %1327  ;;  %v4116_v61 = vmul.f32 0.0078125, %v1330_v9 }
 0x37e   :  { %2301 = vst [vmem:[#allocation8 + $0x168] sm:$0xff] %v2237_v22  ;;  %v4122_v58 = vmul.f32 0.0078125, %v1328_v31 }
 0x37f   :  { %2300 = vst [vmem:[#allocation8 + $0x160] sm:$0xff] %v2236_v39  ;;  %v1725_v32 = vmul.f32 %v4116_v61, %v4116_v61 }
 0x380   :  { %v1591_v2 = vpop.xlane.xlu1 %1590  ;;  %v1724_v16 = vmul.f32 %v4122_v58, %v4122_v58 }
 0x381   :  { %v2843_v40 = vpop.eup %2842  ;;  %v1663_v12 = vmul.f32 0.0078125, %v1591_v2  ;;  %v1589_v47 = vpop.xlane.xlu0 %1588 }
 0x382   :  { %v2845_v54 = vpop.eup %2844  ;;  %v2043_v56 = vmul.f32 %v2843_v40, %v1851_v18  ;;  %v1662_v7 = vmul.f32 0.0078125, %v1589_v47  ;;  %v2925_v18 = vld [vmem:[#allocation2 + $0x188] sm:$0xff] }
 0x383   :  { %v2042_v44 = vmul.f32 %v2845_v54, %v1850_v36  ;;  %v1791_v27 = vsub.f32 %v1663_v12, %v1727_v41  ;;  %v2926_v36 = vld [vmem:[#allocation2 + $0x180] sm:$0xff] }
 0x384   :  { %v2111_v26 = vmul.f32 %v3563_v43, %v2043_v56  ;;  %v1790_v35 = vsub.f32 %v1662_v7, %v1726_v14  ;;  %v1587_v3 = vpop.xlane.xlu1 %1586  ;;  %v1855_v56 = vsub.f32 %v3737_v34, %v4110_v13  ;;  %v1853_v13 = vsub.f32 %v3750_v21, %v4116_v61 }
 0x385   :  { %v2847_v1 = vpop.eup %2846  ;;  %v2110_v17 = vmul.f32 %v3563_v43, %v2042_v44  ;;  %v1919_v24 = vadd.f32 1e-05, %v1791_v27  ;;  %v1661_v23 = vmul.f32 0.0078125, %v1587_v3  ;;  %v1585_v25 = vpop.xlane.xlu0 %1584  ;;  %v1854_v44 = vsub.f32 %v3742_v4, %v4112_v15 }
 0x386   :  { %v2849_v42 = vpop.eup %2848  ;;  %v2179_v53 = vadd.f32 %v3580_v63, %v2111_v26  ;;  %v2041_v46 = vmul.f32 %v2847_v1, %v1849_v33  ;;  %v1918_v55 = vadd.f32 1e-05, %v1790_v35  ;;  %v1660_v10 = vmul.f32 0.0078125, %v1585_v25 }
 0x387   :  { %v2178_v50 = vadd.f32 %v3580_v63, %v2110_v17  ;;  %v2040_v8 = vmul.f32 %v2849_v42, %v1848_v19  ;;  %2850 = vrsqrt.f32 %v1919_v24  ;;  %v1789_v6 = vsub.f32 %v1661_v23, %v1725_v32 }
 0x388   :  { %v2243_v45 = vadd.f32 %v2923_v38, %v2179_v53  ;;  %v2109_v52 = vmul.f32 %v3563_v43, %v2041_v46  ;;  %2852 = vrsqrt.f32 %v1918_v55  ;;  %v1788_v0 = vsub.f32 %v1660_v10, %v1724_v16  ;;  %v1342_v5 = vpop.xlane.xlu1 %1341 }
 0x389   :  { %v2242_v51 = vadd.f32 %v2924_v60, %v2178_v50  ;;  %v2108_v28 = vmul.f32 %v3563_v43, %v2040_v8  ;;  %v1917_v22 = vadd.f32 1e-05, %v1789_v6  ;;  %v1340_v9 = vpop.xlane.xlu0 %1339  ;;  %v4142_v12 = vmul.f32 0.0078125, %v1342_v5 }
 0x38a   :  { %2307 = vst [vmem:[#allocation8 + $0x198] sm:$0xff] %v2243_v45  ;;  %v2177_v48 = vadd.f32 %v3580_v63, %v2109_v52  ;;  %v1916_v39 = vadd.f32 1e-05, %v1788_v0  ;;  %v4144_v54 = vmul.f32 0.0078125, %v1340_v9  ;;  %v1852_v4 = vsub.f32 %v3756_v11, %v4122_v58  ;;  %v2927_v52 = vld [vmem:[#allocation2 + $0x1b8] sm:$0xff] }
 0x38b   :  { %2306 = vst [vmem:[#allocation8 + $0x190] sm:$0xff] %v2242_v51  ;;  %v2176_v31 = vadd.f32 %v3580_v63, %v2108_v28  ;;  %2854 = vrsqrt.f32 %v1917_v22  ;;  %v1731_v27 = vmul.f32 %v4142_v12, %v4142_v12  ;;  %v2928_v28 = vld [vmem:[#allocation2 + $0x1b0] sm:$0xff] }
 0x38c   :  { %v2241_v2 = vadd.f32 %v2925_v18, %v2177_v48  ;;  %2856 = vrsqrt.f32 %v1916_v39  ;;  %v1338_v40 = vpop.xlane.xlu1 %1337  ;;  %v1730_v1 = vmul.f32 %v4144_v54, %v4144_v54 }
 0x38d   :  { %v2240_v41 = vadd.f32 %v2926_v36, %v2176_v31  ;;  %v1336_v47 = vpop.xlane.xlu0 %1335  ;;  %v4148_v14 = vmul.f32 0.0078125, %v1338_v40  ;;  %v2929_v40 = vld [vmem:[#allocation2 + $0x1a8] sm:$0xff] }
 0x38e   :  { %2305 = vst [vmem:[#allocation8 + $0x188] sm:$0xff] %v2241_v2  ;;  %v4154_v19 = vmul.f32 0.0078125, %v1336_v47  ;;  %v2930_v47 = vld [vmem:[#allocation2 + $0x1a0] sm:$0xff] }
 0x38f   :  { %2304 = vst [vmem:[#allocation8 + $0x180] sm:$0xff] %v2240_v41  ;;  %v1729_v24 = vmul.f32 %v4148_v14, %v4148_v14 }
 0x390   :  { %v1599_v7 = vpop.xlane.xlu1 %1598  ;;  %v1728_v46 = vmul.f32 %v4154_v19, %v4154_v19 }
 0x391   :  { %v2851_v33 = vpop.eup %2850  ;;  %v1667_v26 = vmul.f32 0.0078125, %v1599_v7  ;;  %v1597_v32 = vpop.xlane.xlu0 %1596 }
 0x392   :  { %v2853_v35 = vpop.eup %2852  ;;  %v2047_v3 = vmul.f32 %v2851_v33, %v1855_v56  ;;  %v1666_v34 = vmul.f32 0.0078125, %v1597_v32 }
 0x393   :  { %v2046_v17 = vmul.f32 %v2853_v35, %v1854_v44  ;;  %v1795_v16 = vsub.f32 %v1667_v26, %v1731_v27  ;;  %v1859_v27 = vsub.f32 %v3797_v37, %v4142_v12  ;;  %v1857_v12 = vsub.f32 %v3810_v20, %v4148_v14 }
 0x394   :  { %v2115_v15 = vmul.f32 %v3563_v43, %v2047_v3  ;;  %v1794_v23 = vsub.f32 %v1666_v34, %v1730_v1  ;;  %v1595_v25 = vpop.xlane.xlu1 %1594  ;;  %v1858_v3 = vsub.f32 %v3802_v62, %v4144_v54  ;;  %v1856_v62 = vsub.f32 %v3816_v59, %v4154_v19 }
 0x395   :  { %v2855_v42 = vpop.eup %2854  ;;  %v2114_v53 = vmul.f32 %v3563_v43, %v2046_v17  ;;  %v1923_v55 = vadd.f32 1e-05, %v1795_v16  ;;  %v1665_v21 = vmul.f32 0.0078125, %v1595_v25  ;;  %v1593_v61 = vpop.xlane.xlu0 %1592 }
 0x396   :  { %v2857_v10 = vpop.eup %2856  ;;  %v2183_v50 = vadd.f32 %v3580_v63, %v2115_v15  ;;  %v2045_v11 = vmul.f32 %v2855_v42, %v1853_v13  ;;  %v1922_v58 = vadd.f32 1e-05, %v1794_v23  ;;  %v1664_v8 = vmul.f32 0.0078125, %v1593_v61 }
 0x397   :  { %v2182_v6 = vadd.f32 %v3580_v63, %v2114_v53  ;;  %v2044_v38 = vmul.f32 %v2857_v10, %v1852_v4  ;;  %2858 = vrsqrt.f32 %v1923_v55  ;;  %v1793_v45 = vsub.f32 %v1665_v21, %v1729_v24 }
 0x398   :  { %v2247_v0 = vadd.f32 %v2927_v52, %v2183_v50  ;;  %v2113_v5 = vmul.f32 %v3563_v43, %v2045_v11  ;;  %2860 = vrsqrt.f32 %v1922_v58  ;;  %v1792_v60 = vsub.f32 %v1664_v8, %v1728_v46  ;;  %v1350_v51 = vpop.xlane.xlu1 %1349 }
 0x399   :  { %v2246_v22 = vadd.f32 %v2928_v28, %v2182_v6  ;;  %v2112_v9 = vmul.f32 %v3563_v43, %v2044_v38  ;;  %v1921_v48 = vadd.f32 1e-05, %v1793_v45  ;;  %v1348_v39 = vpop.xlane.xlu0 %1347  ;;  %v4180_v26 = vmul.f32 0.0078125, %v1350_v51  ;;  %v2931_v38 = vld [vmem:[#allocation2 + $0x1d8] sm:$0xff] }
 0x39a   :  { %2311 = vst [vmem:[#allocation8 + $0x1b8] sm:$0xff] %v2247_v0  ;;  %v2181_v31 = vadd.f32 %v3580_v63, %v2113_v5  ;;  %v1920_v18 = vadd.f32 1e-05, %v1792_v60  ;;  %v4184_v1 = vmul.f32 0.0078125, %v1348_v39  ;;  %v2932_v5 = vld [vmem:[#allocation2 + $0x1d0] sm:$0xff]  ;;  %v2933_v39 = vld [vmem:[#allocation2 + $0x1c8] sm:$0xff] }
 0x39b   :  { %2310 = vst [vmem:[#allocation8 + $0x1b0] sm:$0xff] %v2246_v22  ;;  %v2180_v2 = vadd.f32 %v3580_v63, %v2112_v9  ;;  %2862 = vrsqrt.f32 %v1921_v48  ;;  %v1735_v25 = vmul.f32 %v4180_v26, %v4180_v26 }
 0x39c   :  { %v2245_v36 = vadd.f32 %v2929_v40, %v2181_v31  ;;  %2864 = vrsqrt.f32 %v1920_v18  ;;  %v1346_v41 = vpop.xlane.xlu1 %1345  ;;  %v1734_v21 = vmul.f32 %v4184_v1, %v4184_v1  ;;  %v2934_v18 = vld [vmem:[#allocation2 + $0x1c0] sm:$0xff] }
 0x39d   :  { %v2244_v56 = vadd.f32 %v2930_v47, %v2180_v2  ;;  %v4174_v7 = vmul.f32 0.0078125, %v1346_v41  ;;  %v1344_v33 = vpop.xlane.xlu0 %1343 }
 0x39e   :  { %2309 = vst [vmem:[#allocation8 + $0x1a8] sm:$0xff] %v2245_v36  ;;  %v4176_v44 = vmul.f32 0.0078125, %v1344_v33 }
 0x39f   :  { %2308 = vst [vmem:[#allocation8 + $0x1a0] sm:$0xff] %v2244_v56  ;;  %v1733_v34 = vmul.f32 %v4174_v7, %v4174_v7  ;;  %v1861_v40 = vsub.f32 %v3869_v49, %v4174_v7 }
 0x3a0   :  { %v1603_v32 = vpop.xlane.xlu1 %1602  ;;  %v1732_v15 = vmul.f32 %v4176_v44, %v4176_v44  ;;  %v1860_v41 = vsub.f32 %v3876_v57, %v4176_v44 }
 0x3a1   :  { %v2859_v35 = vpop.eup %2858  ;;  %v1669_v13 = vmul.f32 0.0078125, %v1603_v32  ;;  %v1601_v17 = vpop.xlane.xlu0 %1600 }
 0x3a2   :  { %v2861_v16 = vpop.eup %2860  ;;  %v2051_v4 = vmul.f32 %v2859_v35, %v1859_v27  ;;  %v1668_v37 = vmul.f32 0.0078125, %v1601_v17  ;;  %v1863_v27 = vsub.f32 %v3857_v29, %v4180_v26  ;;  %v2935_v17 = vld [vmem:[#allocation2 + $0x1e8] sm:$0xff]  ;;  %v2936_v29 = vld [vmem:[#allocation2 + $0x1e0] sm:$0xff] }
 0x3a3   :  { %v2050_v24 = vmul.f32 %v2861_v16, %v1858_v3  ;;  %v1797_v23 = vsub.f32 %v1669_v13, %v1733_v34  ;;  %v1862_v3 = vsub.f32 %v3862_v30, %v4184_v1 }
 0x3a4   :  { %v2119_v54 = vmul.f32 %v3563_v43, %v2051_v4  ;;  %v1796_v42 = vsub.f32 %v1668_v37, %v1732_v15  ;;  %v1607_v53 = vpop.xlane.xlu1 %1606  ;;  %v2937_v37 = vld [vmem:[#allocation2 + $0x1f8] sm:$0xff] }
 0x3a5   :  { %v2863_v46 = vpop.eup %2862  ;;  %v2118_v55 = vmul.f32 %v3563_v43, %v2050_v24  ;;  %v1925_v61 = vadd.f32 1e-05, %v1797_v23  ;;  %v1671_v20 = vmul.f32 0.0078125, %v1607_v53  ;;  %v1605_v14 = vpop.xlane.xlu0 %1604  ;;  %v2938_v24 = vld [vmem:[#allocation2 + $0x1f0] sm:$0xff] }
 0x3a6   :  { %v2865_v10 = vpop.eup %2864  ;;  %v2187_v50 = vadd.f32 %v3580_v63, %v2119_v54  ;;  %v2049_v59 = vmul.f32 %v2863_v46, %v1857_v12  ;;  %v1924_v19 = vadd.f32 1e-05, %v1796_v42  ;;  %v1670_v11 = vmul.f32 0.0078125, %v1605_v14 }
 0x3a7   :  { %v2186_v58 = vadd.f32 %v3580_v63, %v2118_v55  ;;  %v2048_v8 = vmul.f32 %v2865_v10, %v1856_v62  ;;  %2866 = vrsqrt.f32 %v1925_v61  ;;  %v1799_v6 = vsub.f32 %v1671_v20, %v1735_v25 }
 0x3a8   :  { %v2251_v45 = vadd.f32 %v2931_v38, %v2187_v50  ;;  %v2117_v52 = vmul.f32 %v3563_v43, %v2049_v59  ;;  %2868 = vrsqrt.f32 %v1924_v19  ;;  %v1798_v0 = vsub.f32 %v1670_v11, %v1734_v21 }
 0x3a9   :  { %v2250_v60 = vadd.f32 %v2932_v5, %v2186_v58  ;;  %v2116_v51 = vmul.f32 %v3563_v43, %v2048_v8  ;;  %v1927_v28 = vadd.f32 1e-05, %v1799_v6 }
 0x3aa   :  { %2315 = vst [vmem:[#allocation8 + $0x1d8] sm:$0xff] %v2251_v45  ;;  %v2185_v22 = vadd.f32 %v3580_v63, %v2117_v52  ;;  %v1926_v9 = vadd.f32 1e-05, %v1798_v0 }
 0x3ab   :  { %2314 = vst [vmem:[#allocation8 + $0x1d0] sm:$0xff] %v2250_v60  ;;  %v2184_v48 = vadd.f32 %v3580_v63, %v2116_v51  ;;  %2870 = vrsqrt.f32 %v1927_v28 }
 0x3ac   :  { %v2249_v31 = vadd.f32 %v2933_v39, %v2185_v22  ;;  %2872 = vrsqrt.f32 %v1926_v9 }
 0x3ad   :  { %v2248_v2 = vadd.f32 %v2934_v18, %v2184_v48 }
 0x3ae   :  { %2313 = vst [vmem:[#allocation8 + $0x1c8] sm:$0xff] %v2249_v31 }
 0x3af   :  { %2312 = vst [vmem:[#allocation8 + $0x1c0] sm:$0xff] %v2248_v2 }
 0x3b1   :  { %v2867_v36 = vpop.eup %2866 }
 0x3b2   :  { %v2869_v47 = vpop.eup %2868  ;;  %v2053_v56 = vmul.f32 %v2867_v36, %v1861_v40 }
 0x3b3   :  { %v2052_v33 = vmul.f32 %v2869_v47, %v1860_v41 }
 0x3b4   :  { %v2121_v32 = vmul.f32 %v3563_v43, %v2053_v56 }
 0x3b5   :  { %v2871_v35 = vpop.eup %2870  ;;  %v2120_v34 = vmul.f32 %v3563_v43, %v2052_v33 }
 0x3b6   :  { %v2873_v13 = vpop.eup %2872  ;;  %v2189_v49 = vadd.f32 %v3580_v63, %v2121_v32  ;;  %v2055_v7 = vmul.f32 %v2871_v35, %v1863_v27 }
 0x3b7   :  { %v2188_v57 = vadd.f32 %v3580_v63, %v2120_v34  ;;  %v2054_v44 = vmul.f32 %v2873_v13, %v1862_v3 }
 0x3b8   :  { %v2253_v16 = vadd.f32 %v2935_v17, %v2189_v49  ;;  %v2123_v4 = vmul.f32 %v3563_v43, %v2055_v7 }
 0x3b9   :  { %v2252_v26 = vadd.f32 %v2936_v29, %v2188_v57  ;;  %v2122_v15 = vmul.f32 %v3563_v43, %v2054_v44 }
 0x3ba   :  { %2317 = vst [vmem:[#allocation8 + $0x1e8] sm:$0xff] %v2253_v16  ;;  %v2191_v30 = vadd.f32 %v3580_v63, %v2123_v4 }
 0x3bb   :  { %2316 = vst [vmem:[#allocation8 + $0x1e0] sm:$0xff] %v2252_v26  ;;  %v2190_v1 = vadd.f32 %v3580_v63, %v2122_v15 }
 0x3bc   :  { %v2255_v12 = vadd.f32 %v2937_v37, %v2191_v30 }
 0x3bd   :  { %v2254_v23 = vadd.f32 %v2938_v24, %v2190_v1 }
 0x3be   :  { %2319 = vst [vmem:[#allocation8 + $0x1f8] sm:$0xff] %v2255_v12 }
 0x3bf   :  { %2318 = vst [vmem:[#allocation8 + $0x1f0] sm:$0xff] %v2254_v23 }
 0x3c0   :  { %3016 = shalt.err (!%p3013_p0)
}
 0x3c1   :  { %s3017_s8 = scalar_lea.hbm %s4241_s4, 8192 }
 0x3c2   :  { %p3018_p1 = scmp.ne.s32.totalorder %s4241_s4, %s3017_s8  ;;  %p3021_p2 = scmp.lt.u32.totalorder %s3017_s8, %s4241_s4 }
 0x3c4   :  { %p3023_p3 = pnand %p3021_p2, %p3018_p1 }
 0x3c6   :  { %3026 = shalt.err (!%p3023_p3)
}
 0x3c7   :  { %2331 = dma.vmem_to_hbm [thread:$0]  %s2326_s30, 8192, %s4241_s4, [#allocation4], %s3037_s1, %s3037_s1, %s3038_s13  }
 0x3c8   :  { %3031 = dma.done.wait [#allocation4], 8192  }
 0x3c9   :  { %3032 = vsyncadd [#allocation4], 4294959104 }
 0x3ca   :  { %2335 = vsyncpa [#allocation3], 1 }
 0x3cb   :  { %2336 = vsyncpa [#allocation6], 1 }
 0x3cc   :  { %2337 = vsyncpa [#allocation4], 1 }

// kernel: tpu_custom_call.1
= control target key start
LH: loop header
LB: loop body
LE: loop exit
PB: predicated region body
PF: predicated region fallthrough
CT: control target
= control target key end

     0   :  { %9 = vsyncpa [#allocation3], 0  ;;  %s4237_s0 = inlined_call_operand.hbm [shape: f32[512,128], index: 0, kind: input, shape index: {}]   ;;  %s4238_s1 = inlined_call_operand.hbm [shape: bf16[128,128], index: 1, kind: input, shape index: {}]   ;;  %s4239_s2 = inlined_call_operand.hbm [shape: bf16[128,128], index: 2, kind: input, shape index: {}]   ;;  %s4240_s3 = inlined_call_operand.vmem [shape: f32[4,128], index: 3, kind: input, shape index: {}]   ;;  %s4241_s4 = inlined_call_operand.hbm [shape: f32[512,128], index: 4, kind: output, shape index: {}]  }
   0x1   :  { %10 = vsyncpa [#allocation6], 0 }
   0x2   :  { %11 = vsyncpa [#allocation4], 0  ;;  %s3033_s15 = smov [#allocation5]   ;;  %s2939_s19 = scalar_lea.hbm %s4238_s1, 1024 }
   0x3   :  { %s29_s16 = sshll.u32 %s3033_s15, 4  ;;  %p2940_p0 = scmp.ne.s32.totalorder %s4238_s1, %s2939_s19  ;;  %s30_s16 = int_to_ptr.vmem [resolvable:$true] %s29_s16 }
   0x4   :  { %p2943_p1 = scmp.lt.u32.totalorder %s2939_s19, %s4238_s1 }
   0x6   :  { %p2945_p2 = pnand %p2943_p1, %p2940_p0 }
   0x8   :  { %2948 = shalt.err (!%p2945_p2)
}
   0x9   :  { %s2949_s24 = scalar_lea.vmem %s30_s16, 1024  ;;  %p2954_p4 = scmp.lt.s32.totalorder %s30_s16, %s30_s16 }
   0xa   :  { %p2950_p3 = scmp.ne.s32.totalorder %s30_s16, %s2949_s24  ;;  %p2955_p5 = scmp.lt.s32.totalorder %s2949_s24, %s2949_s24 }
   0xc   :  { %p2956_p6 = por %p2955_p5, %p2954_p4 }
   0xe   :  { %p2957_p7 = pnand %p2956_p6, %p2950_p3 }
  0x10   :  { %2960 = shalt.err (!%p2957_p7)
}
  0x11   :  { %s3034_s25 = smov 64   ;;  %s3035_s26 = smov 4  }
  0x12   :  { %35 = dma.hbm_to_vmem [thread:$0]  %s4238_s1, 1024, %s30_s16, [#allocation6], %s3034_s25, %s3034_s25, %s3035_s26  }
  0x13   :  { %s3036_s29 = smov [#allocation2]   ;;  %s2961_s7 = scalar_lea.hbm %s4237_s0, 8192 }
  0x14   :  { %s17_s30 = sshll.u32 %s3036_s29, 4  ;;  %p2962_p8 = scmp.ne.s32.totalorder %s4237_s0, %s2961_s7  ;;  %s18_s30 = int_to_ptr.vmem [resolvable:$true] %s17_s30 }
  0x15   :  { %p2965_p9 = scmp.lt.u32.totalorder %s2961_s7, %s4237_s0 }
  0x17   :  { %p2967_p10 = pnand %p2965_p9, %p2962_p8 }
  0x19   :  { %2970 = shalt.err (!%p2967_p10)
}
  0x1a   :  { %s2971_s12 = scalar_lea.vmem %s18_s30, 8192  ;;  %p2976_p12 = scmp.lt.s32.totalorder %s18_s30, %s18_s30 }
  0x1b   :  { %p2972_p11 = scmp.ne.s32.totalorder %s18_s30, %s2971_s12  ;;  %p2977_p13 = scmp.lt.s32.totalorder %s2971_s12, %s2971_s12 }
  0x1d   :  { %p2978_p0 = por %p2977_p13, %p2976_p12 }
  0x1f   :  { %p2979_p1 = pnand %p2978_p0, %p2972_p11 }
  0x21   :  { %2982 = shalt.err (!%p2979_p1)
}
  0x22   :  { %s3037_s1 = smov 128   ;;  %s3038_s13 = smov 8  }
  0x23   :  { %23 = dma.hbm_to_vmem [thread:$0]  %s4237_s0, 8192, %s18_s30, [#allocation3], %s3037_s1, %s3037_s1, %s3038_s13  }
  0x24   :  { %s3039_s16 = smov [#allocation7]   ;;  %s2983_s20 = scalar_lea.hbm %s4239_s2, 1024 }
  0x25   :  { %s41_s17 = sshll.u32 %s3039_s16, 4  ;;  %p2984_p2 = scmp.ne.s32.totalorder %s4239_s2, %s2983_s20  ;;  %s42_s17 = int_to_ptr.vmem [resolvable:$true] %s41_s17 }
  0x26   :  { %p2987_p3 = scmp.lt.u32.totalorder %s2983_s20, %s4239_s2 }
  0x28   :  { %p2989_p4 = pnand %p2987_p3, %p2984_p2 }
  0x2a   :  { %2992 = shalt.err (!%p2989_p4)
}
  0x2b   :  { %s2993_s27 = scalar_lea.vmem %s42_s17, 1024  ;;  %p2998_p6 = scmp.lt.s32.totalorder %s42_s17, %s42_s17 }
  0x2c   :  { %p2994_p5 = scmp.ne.s32.totalorder %s42_s17, %s2993_s27  ;;  %p2999_p7 = scmp.lt.s32.totalorder %s2993_s27, %s2993_s27 }
  0x2e   :  { %p3000_p8 = por %p2999_p7, %p2998_p6 }
  0x30   :  { %p3001_p9 = pnand %p3000_p8, %p2994_p5 }
  0x32   :  { %3004 = shalt.err (!%p3001_p9)
}
  0x33   :  { %47 = dma.hbm_to_vmem [thread:$0]  %s4239_s2, 1024, %s42_s17, [#allocation6], %s3034_s25, %s3034_s25, %s3035_s26  }
  0x34   :  { %3027 = dma.done.wait [#allocation3], 8192  }
  0x35   :  { %3028 = vsyncadd [#allocation3], 4294959104 }
  0x36   :  { %3029 = dma.done.wait [#allocation6], 2048  }
  0x37   :  { %3030 = vsyncadd [#allocation6], 4294965248  ;;  %v2602_v0 = vld [vmem:[#allocation5] sm:$0xff]   ;;  %v2603_v1 = vld [vmem:[#allocation5 + $0x8] sm:$0xff]  }
  0x38   :  { %2434 = vmatprep.subr.bf16.mxu0 %v2602_v0  ;;  %v2604_v2 = vld [vmem:[#allocation5 + $0x10] sm:$0xff]   ;;  %v2605_v3 = vld [vmem:[#allocation5 + $0x18] sm:$0xff]   ;;  %v60_v4 = vld [vmem:[#allocation2] sm:$0xff] }
  0x39   :  { %2435 = vmatpush3.bf16.msra.mxu0 %v2602_v0  ;;  %v61_v5 = vld [vmem:[#allocation2 + $0x8] sm:$0xff]  ;;  %v2606_v7 = vld [vmem:[#allocation5 + $0x20] sm:$0xff]   ;;  %v2608_v9 = vld [vmem:[#allocation5 + $0x30] sm:$0xff]  }
  0x3a   :  { %2436 = vmatprep.subr.bf16.mxu0 %v2603_v1  ;;  %v125_v6 = vpack.c.bf16 %v61_v5, %v60_v4  ;;  %v2607_v8 = vld [vmem:[#allocation5 + $0x28] sm:$0xff]   ;;  %v2609_v10 = vld [vmem:[#allocation5 + $0x38] sm:$0xff]   ;;  %v62_v11 = vld [vmem:[#allocation2 + $0x10] sm:$0xff] }
  0x3b   :  { %v63_v12 = vld [vmem:[#allocation2 + $0x18] sm:$0xff]  ;;  %v64_v13 = vld [vmem:[#allocation2 + $0x20] sm:$0xff]  ;;  %v65_v14 = vld [vmem:[#allocation2 + $0x28] sm:$0xff] }
  0x3c   :  { %2450 = vmatprep.mubr.bf16.mxu0 %v125_v6  ;;  %v2610_v15 = vld [vmem:[#allocation7] sm:$0xff]   ;;  %v2611_v16 = vld [vmem:[#allocation7 + $0x8] sm:$0xff]   ;;  %v126_v17 = vpack.c.bf16 %v63_v12, %v62_v11  ;;  %v127_v18 = vpack.c.bf16 %v65_v14, %v64_v13  ;;  %v66_v19 = vld [vmem:[#allocation2 + $0x30] sm:$0xff] }
  0x3d   :  { %2437 = vmatpush3.bf16.msra.mxu0 %v2603_v1  ;;  %2514 = vmatprep.subr.bf16.mxu1 %v2610_v15  ;;  %v67_v20 = vld [vmem:[#allocation2 + $0x38] sm:$0xff]  ;;  %v68_v21 = vld [vmem:[#allocation2 + $0x40] sm:$0xff]  ;;  %v69_v22 = vld [vmem:[#allocation2 + $0x48] sm:$0xff] }
  0x3e   :  { %2438 = vmatprep.subr.bf16.mxu0 %v2604_v2  ;;  %2515 = vmatpush3.bf16.msra.mxu1 %v2610_v15  ;;  %v128_v23 = vpack.c.bf16 %v67_v20, %v66_v19  ;;  %v129_v24 = vpack.c.bf16 %v69_v22, %v68_v21  ;;  %v70_v25 = vld [vmem:[#allocation2 + $0x50] sm:$0xff]  ;;  %v71_v26 = vld [vmem:[#allocation2 + $0x58] sm:$0xff]  ;;  %v72_v27 = vld [vmem:[#allocation2 + $0x60] sm:$0xff] }
  0x3f   :  { %2516 = vmatprep.subr.bf16.mxu1 %v2611_v16  ;;  %v73_v28 = vld [vmem:[#allocation2 + $0x68] sm:$0xff]  ;;  %v130_v29 = vpack.c.bf16 %v71_v26, %v70_v25  ;;  %v74_v31 = vld [vmem:[#allocation2 + $0x70] sm:$0xff]  ;;  %v75_v32 = vld [vmem:[#allocation2 + $0x78] sm:$0xff] }
  0x40   :  { %v131_v30 = vpack.c.bf16 %v73_v28, %v72_v27  ;;  %v76_v33 = vld [vmem:[#allocation2 + $0x80] sm:$0xff]  ;;  %v77_v34 = vld [vmem:[#allocation2 + $0x88] sm:$0xff]  ;;  %v132_v35 = vpack.c.bf16 %v75_v32, %v74_v31  ;;  %v78_v37 = vld [vmem:[#allocation2 + $0x90] sm:$0xff] }
  0x41   :  { %2439 = vmatpush3.bf16.msra.mxu0 %v2604_v2  ;;  %v133_v36 = vpack.c.bf16 %v77_v34, %v76_v33  ;;  %v79_v38 = vld [vmem:[#allocation2 + $0x98] sm:$0xff]  ;;  %v80_v39 = vld [vmem:[#allocation2 + $0xa0] sm:$0xff]  ;;  %v81_v40 = vld [vmem:[#allocation2 + $0xa8] sm:$0xff] }
  0x42   :  { %2440 = vmatprep.subr.bf16.mxu0 %v2605_v3  ;;  %2517 = vmatpush3.bf16.msra.mxu1 %v2611_v16  ;;  %v134_v41 = vpack.c.bf16 %v79_v38, %v78_v37  ;;  %v135_v42 = vpack.c.bf16 %v81_v40, %v80_v39  ;;  %v82_v43 = vld [vmem:[#allocation2 + $0xb0] sm:$0xff]  ;;  %v83_v44 = vld [vmem:[#allocation2 + $0xb8] sm:$0xff]  ;;  %v84_v45 = vld [vmem:[#allocation2 + $0xc0] sm:$0xff] }
  0x43   :  { %v85_v46 = vld [vmem:[#allocation2 + $0xc8] sm:$0xff]  ;;  %v136_v47 = vpack.c.bf16 %v83_v44, %v82_v43  ;;  %v86_v49 = vld [vmem:[#allocation2 + $0xd0] sm:$0xff]  ;;  %v87_v50 = vld [vmem:[#allocation2 + $0xd8] sm:$0xff] }
  0x44   :  { %v137_v48 = vpack.c.bf16 %v85_v46, %v84_v45  ;;  %v88_v51 = vld [vmem:[#allocation2 + $0xe0] sm:$0xff]  ;;  %v89_v52 = vld [vmem:[#allocation2 + $0xe8] sm:$0xff]  ;;  %v138_v53 = vpack.c.bf16 %v87_v50, %v86_v49  ;;  %v90_v55 = vld [vmem:[#allocation2 + $0xf0] sm:$0xff] }
  0x45   :  { %2441 = vmatpush3.bf16.msra.mxu0 %v2605_v3  ;;  %v139_v54 = vpack.c.bf16 %v89_v52, %v88_v51  ;;  %v91_v56 = vld [vmem:[#allocation2 + $0xf8] sm:$0xff]  ;;  %v92_v57 = vld [vmem:[#allocation2 + $0x100] sm:$0xff]  ;;  %v93_v58 = vld [vmem:[#allocation2 + $0x108] sm:$0xff] }
  0x46   :  { %2442 = vmatprep.subr.bf16.mxu0 %v2606_v7  ;;  %v140_v59 = vpack.c.bf16 %v91_v56, %v90_v55  ;;  %v141_v60 = vpack.c.bf16 %v93_v58, %v92_v57  ;;  %v94_v61 = vld [vmem:[#allocation2 + $0x110] sm:$0xff]  ;;  %v95_v62 = vld [vmem:[#allocation2 + $0x118] sm:$0xff]  ;;  %v96_v63 = vld [vmem:[#allocation2 + $0x120] sm:$0xff] }
  0x47   :  { %v97_v0 = vld [vmem:[#allocation2 + $0x128] sm:$0xff]  ;;  %v142_v1 = vpack.c.bf16 %v95_v62, %v94_v61  ;;  %v98_v3 = vld [vmem:[#allocation2 + $0x130] sm:$0xff]  ;;  %v99_v4 = vld [vmem:[#allocation2 + $0x138] sm:$0xff] }
  0x48   :  { %v143_v2 = vpack.c.bf16 %v97_v0, %v96_v63  ;;  %v100_v5 = vld [vmem:[#allocation2 + $0x140] sm:$0xff]  ;;  %v101_v6 = vld [vmem:[#allocation2 + $0x148] sm:$0xff]  ;;  %v106_v15 = vld [vmem:[#allocation2 + $0x170] sm:$0xff] }
  0x49   :  { %2443 = vmatpush3.bf16.msra.mxu0 %v2606_v7  ;;  %v144_v7 = vpack.c.bf16 %v99_v4, %v98_v3  ;;  %v104_v11 = vld [vmem:[#allocation2 + $0x160] sm:$0xff]  ;;  %v105_v12 = vld [vmem:[#allocation2 + $0x168] sm:$0xff]  ;;  %v107_v16 = vld [vmem:[#allocation2 + $0x178] sm:$0xff] }
  0x4a   :  { %2444 = vmatprep.subr.bf16.mxu0 %v2607_v8  ;;  %v147_v14 = vpack.c.bf16 %v105_v12, %v104_v11  ;;  %v2612_v19 = vld [vmem:[#allocation7 + $0x10] sm:$0xff]   ;;  %v148_v20 = vpack.c.bf16 %v107_v16, %v106_v15  ;;  %v2613_v22 = vld [vmem:[#allocation7 + $0x18] sm:$0xff]   ;;  %v112_v25 = vld [vmem:[#allocation2 + $0x1a0] sm:$0xff] }
  0x4b   :  { %2518 = vmatprep.subr.bf16.mxu1 %v2612_v19  ;;  %v113_v26 = vld [vmem:[#allocation2 + $0x1a8] sm:$0xff]  ;;  %v2614_v27 = vld [vmem:[#allocation7 + $0x20] sm:$0xff]   ;;  %v114_v31 = vld [vmem:[#allocation2 + $0x1b0] sm:$0xff] }
  0x4c   :  { %2519 = vmatpush3.bf16.msra.mxu1 %v2612_v19  ;;  %v115_v32 = vld [vmem:[#allocation2 + $0x1b8] sm:$0xff]  ;;  %v116_v33 = vld [vmem:[#allocation2 + $0x1c0] sm:$0xff]  ;;  %v117_v34 = vld [vmem:[#allocation2 + $0x1c8] sm:$0xff] }
  0x4d   :  { %2445 = vmatpush3.bf16.msra.mxu0 %v2607_v8  ;;  %v145_v8 = vpack.c.bf16 %v101_v6, %v100_v5  ;;  %2520 = vmatprep.subr.bf16.mxu1 %v2613_v22  ;;  %v153_v37 = vpack.c.bf16 %v117_v34, %v116_v33  ;;  %v2617_v38 = vld [vmem:[#allocation7 + $0x38] sm:$0xff]   ;;  %v118_v39 = vld [vmem:[#allocation2 + $0x1d0] sm:$0xff]  ;;  %v124_v51 = vld [vmem:[%s4240_s3] sm:$0xf] }
  0x4e   :  { %2446 = vmatprep.subr.bf16.mxu0 %v2608_v9  ;;  %v119_v40 = vld [vmem:[#allocation2 + $0x1d8] sm:$0xff]  ;;  %v122_v45 = vld [vmem:[#allocation2 + $0x1f0] sm:$0xff] }
  0x4f   :  { %v154_v43 = vpack.c.bf16 %v119_v40, %v118_v39  ;;  %v123_v46 = vld [vmem:[#allocation2 + $0x1f8] sm:$0xff] }
  0x50   :  { %2521 = vmatpush3.bf16.msra.mxu1 %v2613_v22 }
  0x51   :  { %2447 = vmatpush3.bf16.msra.mxu0 %v2608_v9  ;;  %v102_v9 = vld [vmem:[#allocation2 + $0x150] sm:$0xff]  ;;  %2522 = vmatprep.subr.bf16.mxu1 %v2614_v27 }
  0x52   :  { %2448 = vmatprep.subr.bf16.mxu0 %v2609_v10 }
  0x54   :  { %2523 = vmatpush3.bf16.msra.mxu1 %v2614_v27 }
  0x55   :  { %2449 = vmatpush3.bf16.msra.mxu0 %v2609_v10  ;;  %v103_v10 = vld [vmem:[#allocation2 + $0x158] sm:$0xff] }
  0x56   :  { %v146_v13 = vpack.c.bf16 %v103_v10, %v102_v9 }
  0x58   :  { %2451 = vmatmul.mubr.bf16.vlgmr.msra.gmra.mrb[0].mxu0 %v126_v17  ;;  %v108_v17 = vld [vmem:[#allocation2 + $0x180] sm:$0xff] }
  0x59   :  { %2454 = vmatprep.mubr.bf16.mxu0 %v127_v18  ;;  %v109_v18 = vld [vmem:[#allocation2 + $0x188] sm:$0xff] }
  0x5a   :  { %v149_v21 = vpack.c.bf16 %v109_v18, %v108_v17 }
  0x60   :  { %2455 = vmatmul.mubr.bf16.gmra.mrb[4].mxu0 %v128_v23  ;;  %v110_v23 = vld [vmem:[#allocation2 + $0x190] sm:$0xff] }
  0x61   :  { %2458 = vmatprep.mubr.bf16.mxu0 %v129_v24  ;;  %v111_v24 = vld [vmem:[#allocation2 + $0x198] sm:$0xff] }
  0x62   :  { %v150_v28 = vpack.c.bf16 %v111_v24, %v110_v23 }
  0x68   :  { %2459 = vmatmul.mubr.bf16.gmra.mrb[8].mxu0 %v130_v29  ;;  %v151_v29 = vpack.c.bf16 %v113_v26, %v112_v25 }
  0x69   :  { %2462 = vmatprep.mubr.bf16.mxu0 %v131_v30  ;;  %v2615_v30 = vld [vmem:[#allocation7 + $0x28] sm:$0xff]  }
  0x6a   :  { %2524 = vmatprep.subr.bf16.mxu1 %v2615_v30 }
  0x6b   :  { %2525 = vmatpush3.bf16.msra.mxu1 %v2615_v30 }
  0x70   :  { %2463 = vmatmul.mubr.bf16.gmra.mrb[12].mxu0 %v132_v35  ;;  %v2616_v35 = vld [vmem:[#allocation7 + $0x30] sm:$0xff]  }
  0x71   :  { %2466 = vmatprep.mubr.bf16.mxu0 %v133_v36  ;;  %v152_v36 = vpack.c.bf16 %v115_v32, %v114_v31  ;;  %2526 = vmatprep.subr.bf16.mxu1 %v2616_v35 }
  0x72   :  { %2527 = vmatpush3.bf16.msra.mxu1 %v2616_v35 }
  0x73   :  { %2528 = vmatprep.subr.bf16.mxu1 %v2617_v38 }
  0x76   :  { %2529 = vmatpush3.bf16.msra.mxu1 %v2617_v38 }
  0x78   :  { %2467 = vmatmul.mubr.bf16.gmra.mrb[16].mxu0 %v134_v41  ;;  %v120_v41 = vld [vmem:[#allocation2 + $0x1e0] sm:$0xff] }
  0x79   :  { %2470 = vmatprep.mubr.bf16.mxu0 %v135_v42  ;;  %v121_v42 = vld [vmem:[#allocation2 + $0x1e8] sm:$0xff] }
  0x7a   :  { %v155_v44 = vpack.c.bf16 %v121_v42, %v120_v41 }
  0x80   :  { %2471 = vmatmul.mubr.bf16.gmra.mrb[20].mxu0 %v136_v47  ;;  %v156_v47 = vpack.c.bf16 %v123_v46, %v122_v45 }
  0x81   :  { %2474 = vmatprep.mubr.bf16.mxu0 %v137_v48  ;;  %v173_v48 = vlaneseq }
  0x83   :  { %v3111_v49 = vshrl.u32 %v173_v48, 7 }
  0x85   :  { %v175_v50 = vsub.s32 0, %v3111_v49 }
  0x87   :  { %v3117_v52 = vrot.slane %v124_v51, %v175_v50 }
  0x88   :  { %2475 = vmatmul.mubr.bf16.gmra.mrb[24].mxu0 %v138_v53 }
  0x89   :  { %2478 = vmatprep.mubr.bf16.mxu0 %v139_v54 }
  0x90   :  { %2479 = vmatmul.mubr.bf16.gmra.mrb[28].mxu0 %v140_v59 }
  0x91   :  { %2482 = vmatprep.mubr.bf16.mxu0 %v141_v60 }
  0x98   :  { %2483 = vmatmul.mubr.bf16.gmra.mrb[32].mxu0 %v142_v1 }
  0x99   :  { %2486 = vmatprep.mubr.bf16.mxu0 %v143_v2 }
  0xa0   :  { %2487 = vmatmul.mubr.bf16.gmra.mrb[36].mxu0 %v144_v7 }
  0xa1   :  { %2490 = vmatprep.mubr.bf16.mxu0 %v145_v8 }
  0xa8   :  { %2491 = vmatmul.mubr.bf16.gmra.mrb[40].mxu0 %v146_v13 }
  0xa9   :  { %2494 = vmatprep.mubr.bf16.mxu0 %v147_v14 }
  0xb0   :  { %2495 = vmatmul.mubr.bf16.gmra.mrb[44].mxu0 %v148_v20 }
  0xb1   :  { %2498 = vmatprep.mubr.bf16.mxu0 %v149_v21 }
  0xb8   :  { %2499 = vmatmul.mubr.bf16.gmra.mrb[48].mxu0 %v150_v28 }
  0xb9   :  { %2502 = vmatprep.mubr.bf16.mxu0 %v151_v29 }
  0xc0   :  { %2503 = vmatmul.mubr.bf16.gmra.mrb[52].mxu0 %v152_v36 }
  0xc1   :  { %2506 = vmatprep.mubr.bf16.mxu0 %v153_v37 }
  0xc8   :  { %2507 = vmatmul.mubr.bf16.gmra.mrb[56].mxu0 %v154_v43 }
  0xc9   :  { %2510 = vmatprep.mubr.bf16.mxu0 %v155_v44 }
  0xd0   :  { %2511 = vmatmul.mubr.bf16.gmra.mrb[60].mxu0 %v156_v47 }
 0x12b   :  { %v2452_v53 = vpop.f32.mrb[0].mxu0 }
 0x12c   :  { %v268_v54 = vadd.f32 %v2452_v53, %v3117_v52  ;;  %v259_v55 = vpop.f32.mrb[1].mxu0 }
 0x12d   :  { %v260_v56 = vadd.f32 %v259_v55, %v3117_v52  ;;  %v2453_v57 = vpop.f32.mrb[2].mxu0 }
 0x12e   :  { %v580_v58 = vmul.f32 0.70710677, %v268_v54  ;;  %v271_v59 = vadd.f32 %v2453_v57, %v3117_v52  ;;  %v262_v60 = vpop.f32.mrb[3].mxu0  ;;  %v516_v17 = vmul.f32 0.5, %v268_v54 }
 0x12f   :  { %v578_v61 = vmul.f32 0.70710677, %v260_v56  ;;  %v263_v62 = vadd.f32 %v262_v60, %v3117_v52  ;;  %v514_v27 = vmul.f32 0.5, %v260_v56 }
 0x130   :  { %2618 = verf.f32 %v580_v58  ;;  %v581_v63 = vmul.f32 0.70710677, %v271_v59  ;;  %v517_v22 = vmul.f32 0.5, %v271_v59 }
 0x131   :  { %2620 = verf.f32 %v578_v61  ;;  %v579_v0 = vmul.f32 0.70710677, %v263_v62  ;;  %v515_v33 = vmul.f32 0.5, %v263_v62 }
 0x132   :  { %2622 = verf.f32 %v581_v63 }
 0x133   :  { %2624 = verf.f32 %v579_v0  ;;  %v2456_v1 = vpop.f32.mrb[4].mxu0 }
 0x134   :  { %v284_v2 = vadd.f32 %v2456_v1, %v3117_v52  ;;  %v275_v3 = vpop.f32.mrb[5].mxu0 }
 0x135   :  { %v276_v4 = vadd.f32 %v275_v3, %v3117_v52  ;;  %v2457_v5 = vpop.f32.mrb[6].mxu0 }
 0x136   :  { %v584_v6 = vmul.f32 0.70710677, %v284_v2  ;;  %v287_v7 = vadd.f32 %v2457_v5, %v3117_v52  ;;  %v278_v8 = vpop.f32.mrb[7].mxu0  ;;  %v520_v54 = vmul.f32 0.5, %v284_v2 }
 0x137   :  { %v582_v9 = vmul.f32 0.70710677, %v276_v4  ;;  %v279_v10 = vadd.f32 %v278_v8, %v3117_v52  ;;  %v518_v59 = vmul.f32 0.5, %v276_v4 }
 0x138   :  { %2626 = verf.f32 %v584_v6  ;;  %v585_v11 = vmul.f32 0.70710677, %v287_v7  ;;  %v521_v55 = vmul.f32 0.5, %v287_v7 }
 0x139   :  { %2628 = verf.f32 %v582_v9  ;;  %v583_v12 = vmul.f32 0.70710677, %v279_v10  ;;  %v519_v60 = vmul.f32 0.5, %v279_v10 }
 0x13a   :  { %v2619_v13 = vpop.eup %2618  ;;  %2630 = verf.f32 %v585_v11 }
 0x13b   :  { %v2621_v14 = vpop.eup %2620  ;;  %2632 = verf.f32 %v583_v12  ;;  %v2460_v15 = vpop.f32.mrb[8].mxu0  ;;  %v708_v18 = vadd.f32 1.0, %v2619_v13 }
 0x13c   :  { %v2623_v16 = vpop.eup %2622  ;;  %v300_v19 = vadd.f32 %v2460_v15, %v3117_v52  ;;  %v291_v20 = vpop.f32.mrb[9].mxu0  ;;  %v706_v26 = vadd.f32 1.0, %v2621_v14 }
 0x13d   :  { %v2625_v21 = vpop.eup %2624  ;;  %v709_v23 = vadd.f32 1.0, %v2623_v16  ;;  %v292_v24 = vadd.f32 %v291_v20, %v3117_v52  ;;  %v2461_v25 = vpop.f32.mrb[10].mxu0  ;;  %v772_v36 = vmul.f32 %v708_v18, %v516_v17 }
 0x13e   :  { %v588_v28 = vmul.f32 0.70710677, %v300_v19  ;;  %v303_v29 = vadd.f32 %v2461_v25, %v3117_v52  ;;  %v294_v30 = vpop.f32.mrb[11].mxu0  ;;  %v707_v31 = vadd.f32 1.0, %v2625_v21  ;;  %v770_v39 = vmul.f32 %v706_v26, %v514_v27 }
 0x13f   :  { %v773_v32 = vmul.f32 %v709_v23, %v517_v22  ;;  %v586_v34 = vmul.f32 0.70710677, %v292_v24  ;;  %v295_v35 = vadd.f32 %v294_v30, %v3117_v52  ;;  %v524_v7 = vmul.f32 0.5, %v300_v19 }
 0x140   :  { %2634 = verf.f32 %v588_v28  ;;  %v589_v37 = vmul.f32 0.70710677, %v303_v29  ;;  %v771_v40 = vmul.f32 %v707_v31, %v515_v33  ;;  %v522_v10 = vmul.f32 0.5, %v292_v24 }
 0x141   :  { %2636 = verf.f32 %v586_v34  ;;  %v587_v38 = vmul.f32 0.70710677, %v295_v35  ;;  %v835_v42 = vpack.c.bf16 %v773_v32, %v772_v36  ;;  %v525_v16 = vmul.f32 0.5, %v303_v29 }
 0x142   :  { %v2627_v41 = vpop.eup %2626  ;;  %2638 = verf.f32 %v589_v37  ;;  %v834_v45 = vpack.c.bf16 %v771_v40, %v770_v39  ;;  %v523_v21 = vmul.f32 0.5, %v295_v35 }
 0x143   :  { %v2629_v43 = vpop.eup %2628  ;;  %v712_v44 = vadd.f32 1.0, %v2627_v41  ;;  %2640 = verf.f32 %v587_v38  ;;  %v2464_v46 = vpop.f32.mrb[12].mxu0 }
 0x144   :  { %v2631_v47 = vpop.eup %2630  ;;  %v710_v48 = vadd.f32 1.0, %v2629_v43  ;;  %v316_v50 = vadd.f32 %v2464_v46, %v3117_v52  ;;  %v307_v51 = vpop.f32.mrb[13].mxu0  ;;  %2530 = vmatprep.mubr.bf16.mxu1 %v834_v45 }
 0x145   :  { %v2633_v53 = vpop.eup %2632  ;;  %v713_v56 = vadd.f32 1.0, %v2631_v47  ;;  %v308_v57 = vadd.f32 %v307_v51, %v3117_v52  ;;  %v2465_v58 = vpop.f32.mrb[14].mxu0  ;;  %2531 = vmatmul.mubr.bf16.vlgmr.msra.gmra.mrb[0].mxu1 %v835_v42  ;;  %v776_v0 = vmul.f32 %v712_v44, %v520_v54 }
 0x146   :  { %v711_v61 = vadd.f32 1.0, %v2633_v53  ;;  %v592_v62 = vmul.f32 0.70710677, %v316_v50  ;;  %v310_v63 = vpop.f32.mrb[15].mxu0  ;;  %v319_v5 = vadd.f32 %v2465_v58, %v3117_v52  ;;  %v774_v6 = vmul.f32 %v710_v48, %v518_v59 }
 0x147   :  { %v777_v1 = vmul.f32 %v713_v56, %v521_v55  ;;  %v590_v3 = vmul.f32 0.70710677, %v308_v57  ;;  %v311_v2 = vadd.f32 %v310_v63, %v3117_v52  ;;  %v528_v40 = vmul.f32 0.5, %v316_v50 }
 0x148   :  { %v775_v8 = vmul.f32 %v711_v61, %v519_v60  ;;  %2642 = verf.f32 %v592_v62  ;;  %v593_v9 = vmul.f32 0.70710677, %v319_v5  ;;  %v526_v45 = vmul.f32 0.5, %v308_v57 }
 0x149   :  { %2644 = verf.f32 %v590_v3  ;;  %v837_v11 = vpack.c.bf16 %v777_v1, %v776_v0  ;;  %v591_v12 = vmul.f32 0.70710677, %v311_v2  ;;  %v529_v48 = vmul.f32 0.5, %v319_v5 }
 0x14a   :  { %v2635_v4 = vpop.eup %2634  ;;  %v836_v13 = vpack.c.bf16 %v775_v8, %v774_v6  ;;  %2646 = verf.f32 %v593_v9  ;;  %v527_v55 = vmul.f32 0.5, %v311_v2 }
 0x14b   :  { %v2637_v14 = vpop.eup %2636  ;;  %v716_v15 = vadd.f32 1.0, %v2635_v4  ;;  %v2468_v17 = vpop.f32.mrb[16].mxu0  ;;  %2648 = verf.f32 %v591_v12 }
 0x14c   :  { %v2639_v18 = vpop.eup %2638  ;;  %v714_v20 = vadd.f32 1.0, %v2637_v14  ;;  %2534 = vmatprep.mubr.bf16.mxu1 %v836_v13  ;;  %v332_v22 = vadd.f32 %v2468_v17, %v3117_v52  ;;  %v323_v19 = vpop.f32.mrb[17].mxu0 }
 0x14d   :  { %v2641_v23 = vpop.eup %2640  ;;  %v780_v25 = vmul.f32 %v716_v15, %v524_v7  ;;  %v717_v26 = vadd.f32 1.0, %v2639_v18  ;;  %v324_v24 = vadd.f32 %v323_v19, %v3117_v52  ;;  %v2469_v27 = vpop.f32.mrb[18].mxu0  ;;  %2535 = vmatmul.mubr.bf16.gmra.mrb[4].mxu1 %v837_v11 }
 0x14e   :  { %v778_v28 = vmul.f32 %v714_v20, %v522_v10  ;;  %v715_v30 = vadd.f32 1.0, %v2641_v23  ;;  %v596_v29 = vmul.f32 0.70710677, %v332_v22  ;;  %v326_v31 = vpop.f32.mrb[19].mxu0  ;;  %v335_v34 = vadd.f32 %v2469_v27, %v3117_v52 }
 0x14f   :  { %v781_v32 = vmul.f32 %v717_v26, %v525_v16  ;;  %v594_v33 = vmul.f32 0.70710677, %v324_v24  ;;  %v327_v36 = vadd.f32 %v326_v31, %v3117_v52  ;;  %v532_v7 = vmul.f32 0.5, %v332_v22 }
 0x150   :  { %v779_v35 = vmul.f32 %v715_v30, %v523_v21  ;;  %2650 = verf.f32 %v596_v29  ;;  %v597_v38 = vmul.f32 0.70710677, %v335_v34  ;;  %v530_v12 = vmul.f32 0.5, %v324_v24 }
 0x151   :  { %v839_v37 = vpack.c.bf16 %v781_v32, %v780_v25  ;;  %2652 = verf.f32 %v594_v33  ;;  %v595_v42 = vmul.f32 0.70710677, %v327_v36  ;;  %v533_v16 = vmul.f32 0.5, %v335_v34 }
 0x152   :  { %v2643_v39 = vpop.eup %2642  ;;  %v838_v41 = vpack.c.bf16 %v779_v35, %v778_v28  ;;  %2654 = verf.f32 %v597_v38  ;;  %v531_v21 = vmul.f32 0.5, %v327_v36 }
 0x153   :  { %v2645_v43 = vpop.eup %2644  ;;  %v720_v44 = vadd.f32 1.0, %v2643_v39  ;;  %v2472_v46 = vpop.f32.mrb[20].mxu0  ;;  %2656 = verf.f32 %v595_v42 }
 0x154   :  { %v718_v47 = vadd.f32 1.0, %v2645_v43  ;;  %2538 = vmatprep.mubr.bf16.mxu1 %v838_v41  ;;  %v348_v51 = vadd.f32 %v2472_v46, %v3117_v52  ;;  %v339_v53 = vpop.f32.mrb[21].mxu0  ;;  %v2647_v54 = vpop.eup %2646 }
 0x155   :  { %v340_v56 = vadd.f32 %v339_v53, %v3117_v52  ;;  %v2473_v58 = vpop.f32.mrb[22].mxu0  ;;  %v2649_v50 = vpop.eup %2648  ;;  %v784_v59 = vmul.f32 %v720_v44, %v528_v40  ;;  %v721_v60 = vadd.f32 1.0, %v2647_v54  ;;  %2539 = vmatmul.mubr.bf16.gmra.mrb[8].mxu1 %v839_v37 }
 0x156   :  { %v600_v61 = vmul.f32 0.70710677, %v348_v51  ;;  %v342_v57 = vpop.f32.mrb[23].mxu0  ;;  %v782_v62 = vmul.f32 %v718_v47, %v526_v45  ;;  %v719_v63 = vadd.f32 1.0, %v2649_v50  ;;  %v351_v1 = vadd.f32 %v2473_v58, %v3117_v52 }
 0x157   :  { %v598_v0 = vmul.f32 0.70710677, %v340_v56  ;;  %v785_v3 = vmul.f32 %v721_v60, %v529_v48  ;;  %v343_v5 = vadd.f32 %v342_v57, %v3117_v52  ;;  %v536_v37 = vmul.f32 0.5, %v348_v51 }
 0x158   :  { %2658 = verf.f32 %v600_v61  ;;  %v783_v6 = vmul.f32 %v719_v63, %v527_v55  ;;  %v601_v8 = vmul.f32 0.70710677, %v351_v1  ;;  %v534_v42 = vmul.f32 0.5, %v340_v56 }
 0x159   :  { %2660 = verf.f32 %v598_v0  ;;  %v841_v9 = vpack.c.bf16 %v785_v3, %v784_v59  ;;  %v599_v11 = vmul.f32 0.70710677, %v343_v5  ;;  %v537_v46 = vmul.f32 0.5, %v351_v1 }
 0x15a   :  { %v2651_v2 = vpop.eup %2650  ;;  %v840_v13 = vpack.c.bf16 %v783_v6, %v782_v62  ;;  %2662 = verf.f32 %v601_v8  ;;  %v535_v54 = vmul.f32 0.5, %v343_v5 }
 0x15b   :  { %v2653_v4 = vpop.eup %2652  ;;  %v724_v10 = vadd.f32 1.0, %v2651_v2  ;;  %v2476_v14 = vpop.f32.mrb[24].mxu0  ;;  %2664 = verf.f32 %v599_v11 }
 0x15c   :  { %v722_v15 = vadd.f32 1.0, %v2653_v4  ;;  %v364_v17 = vadd.f32 %v2476_v14, %v3117_v52  ;;  %v355_v18 = vpop.f32.mrb[25].mxu0  ;;  %v2655_v20 = vpop.eup %2654  ;;  %2542 = vmatprep.mubr.bf16.mxu1 %v840_v13 }
 0x15d   :  { %v356_v19 = vadd.f32 %v355_v18, %v3117_v52  ;;  %v2477_v22 = vpop.f32.mrb[26].mxu0  ;;  %v2657_v23 = vpop.eup %2656  ;;  %v788_v25 = vmul.f32 %v724_v10, %v532_v7  ;;  %v725_v26 = vadd.f32 1.0, %v2655_v20  ;;  %2543 = vmatmul.mubr.bf16.gmra.mrb[12].mxu1 %v841_v9 }
 0x15e   :  { %v604_v24 = vmul.f32 0.70710677, %v364_v17  ;;  %v358_v27 = vpop.f32.mrb[27].mxu0  ;;  %v786_v28 = vmul.f32 %v722_v15, %v530_v12  ;;  %v723_v30 = vadd.f32 1.0, %v2657_v23  ;;  %v367_v31 = vadd.f32 %v2477_v22, %v3117_v52 }
 0x15f   :  { %v602_v29 = vmul.f32 0.70710677, %v356_v19  ;;  %v789_v32 = vmul.f32 %v725_v26, %v533_v16  ;;  %v359_v33 = vadd.f32 %v358_v27, %v3117_v52  ;;  %v540_v8 = vmul.f32 0.5, %v364_v17 }
 0x160   :  { %2666 = verf.f32 %v604_v24  ;;  %v787_v34 = vmul.f32 %v723_v30, %v531_v21  ;;  %v605_v35 = vmul.f32 0.70710677, %v367_v31  ;;  %v538_v4 = vmul.f32 0.5, %v356_v19 }
 0x161   :  { %2668 = verf.f32 %v602_v29  ;;  %v843_v38 = vpack.c.bf16 %v789_v32, %v788_v25  ;;  %v603_v39 = vmul.f32 0.70710677, %v359_v33  ;;  %v541_v14 = vmul.f32 0.5, %v367_v31 }
 0x162   :  { %v2659_v36 = vpop.eup %2658  ;;  %v842_v43 = vpack.c.bf16 %v787_v34, %v786_v28  ;;  %2670 = verf.f32 %v605_v35  ;;  %v539_v20 = vmul.f32 0.5, %v359_v33 }
 0x163   :  { %v2661_v40 = vpop.eup %2660  ;;  %v728_v41 = vadd.f32 1.0, %v2659_v36  ;;  %v2480_v44 = vpop.f32.mrb[28].mxu0  ;;  %2672 = verf.f32 %v603_v39 }
 0x164   :  { %v726_v45 = vadd.f32 1.0, %v2661_v40  ;;  %v380_v47 = vadd.f32 %v2480_v44, %v3117_v52  ;;  %v371_v48 = vpop.f32.mrb[29].mxu0  ;;  %v2663_v53 = vpop.eup %2662  ;;  %2546 = vmatprep.mubr.bf16.mxu1 %v842_v43 }
 0x165   :  { %v372_v55 = vadd.f32 %v371_v48, %v3117_v52  ;;  %v2481_v51 = vpop.f32.mrb[30].mxu0  ;;  %v2665_v58 = vpop.eup %2664  ;;  %v792_v50 = vmul.f32 %v728_v41, %v536_v37  ;;  %v729_v59 = vadd.f32 1.0, %v2663_v53  ;;  %2547 = vmatmul.mubr.bf16.gmra.mrb[16].mxu1 %v843_v38 }
 0x166   :  { %v608_v56 = vmul.f32 0.70710677, %v380_v47  ;;  %v374_v60 = vpop.f32.mrb[31].mxu0  ;;  %v790_v61 = vmul.f32 %v726_v45, %v534_v42  ;;  %v727_v57 = vadd.f32 1.0, %v2665_v58  ;;  %v383_v63 = vadd.f32 %v2481_v51, %v3117_v52 }
 0x167   :  { %v606_v62 = vmul.f32 0.70710677, %v372_v55  ;;  %v793_v0 = vmul.f32 %v729_v59, %v537_v46  ;;  %v375_v1 = vadd.f32 %v374_v60, %v3117_v52  ;;  %v544_v35 = vmul.f32 0.5, %v380_v47 }
 0x168   :  { %2674 = verf.f32 %v608_v56  ;;  %v791_v3 = vmul.f32 %v727_v57, %v535_v54  ;;  %v609_v5 = vmul.f32 0.70710677, %v383_v63  ;;  %v542_v40 = vmul.f32 0.5, %v372_v55 }
 0x169   :  { %2676 = verf.f32 %v606_v62  ;;  %v845_v2 = vpack.c.bf16 %v793_v0, %v792_v50  ;;  %v607_v7 = vmul.f32 0.70710677, %v375_v1  ;;  %v545_v44 = vmul.f32 0.5, %v383_v63 }
 0x16a   :  { %v2667_v6 = vpop.eup %2666  ;;  %v844_v10 = vpack.c.bf16 %v791_v3, %v790_v61  ;;  %2678 = verf.f32 %v609_v5  ;;  %v543_v53 = vmul.f32 0.5, %v375_v1 }
 0x16b   :  { %v2669_v9 = vpop.eup %2668  ;;  %v732_v11 = vadd.f32 1.0, %v2667_v6  ;;  %v2484_v12 = vpop.f32.mrb[32].mxu0  ;;  %2680 = verf.f32 %v607_v7 }
 0x16c   :  { %v730_v13 = vadd.f32 1.0, %v2669_v9  ;;  %v396_v15 = vadd.f32 %v2484_v12, %v3117_v52  ;;  %v387_v16 = vpop.f32.mrb[33].mxu0  ;;  %v2671_v18 = vpop.eup %2670  ;;  %2550 = vmatprep.mubr.bf16.mxu1 %v844_v10 }
 0x16d   :  { %v388_v21 = vadd.f32 %v387_v16, %v3117_v52  ;;  %v2485_v17 = vpop.f32.mrb[34].mxu0  ;;  %v2673_v22 = vpop.eup %2672  ;;  %v796_v23 = vmul.f32 %v732_v11, %v540_v8  ;;  %v733_v25 = vadd.f32 1.0, %v2671_v18  ;;  %2551 = vmatmul.mubr.bf16.gmra.mrb[20].mxu1 %v845_v2 }
 0x16e   :  { %v612_v19 = vmul.f32 0.70710677, %v396_v15  ;;  %v390_v26 = vpop.f32.mrb[35].mxu0  ;;  %v794_v24 = vmul.f32 %v730_v13, %v538_v4  ;;  %v731_v27 = vadd.f32 1.0, %v2673_v22  ;;  %v399_v30 = vadd.f32 %v2485_v17, %v3117_v52 }
 0x16f   :  { %v610_v28 = vmul.f32 0.70710677, %v388_v21  ;;  %v797_v29 = vmul.f32 %v733_v25, %v541_v14  ;;  %v391_v31 = vadd.f32 %v390_v26, %v3117_v52  ;;  %v548_v5 = vmul.f32 0.5, %v396_v15 }
 0x170   :  { %2682 = verf.f32 %v612_v19  ;;  %v795_v32 = vmul.f32 %v731_v27, %v539_v20  ;;  %v613_v33 = vmul.f32 0.70710677, %v399_v30  ;;  %v546_v9 = vmul.f32 0.5, %v388_v21 }
 0x171   :  { %2684 = verf.f32 %v610_v28  ;;  %v847_v36 = vpack.c.bf16 %v797_v29, %v796_v23  ;;  %v611_v37 = vmul.f32 0.70710677, %v391_v31  ;;  %v549_v12 = vmul.f32 0.5, %v399_v30 }
 0x172   :  { %v2675_v34 = vpop.eup %2674  ;;  %v846_v41 = vpack.c.bf16 %v795_v32, %v794_v24  ;;  %2686 = verf.f32 %v613_v33  ;;  %v547_v18 = vmul.f32 0.5, %v391_v31 }
 0x173   :  { %v2677_v38 = vpop.eup %2676  ;;  %v736_v39 = vadd.f32 1.0, %v2675_v34  ;;  %v2488_v42 = vpop.f32.mrb[36].mxu0  ;;  %2688 = verf.f32 %v611_v37 }
 0x174   :  { %v734_v43 = vadd.f32 1.0, %v2677_v38  ;;  %v412_v45 = vadd.f32 %v2488_v42, %v3117_v52  ;;  %v403_v46 = vpop.f32.mrb[37].mxu0  ;;  %v2679_v48 = vpop.eup %2678  ;;  %2554 = vmatprep.mubr.bf16.mxu1 %v846_v41 }
 0x175   :  { %v404_v54 = vadd.f32 %v403_v46, %v3117_v52  ;;  %v2489_v47 = vpop.f32.mrb[38].mxu0  ;;  %v2681_v51 = vpop.eup %2680  ;;  %v800_v58 = vmul.f32 %v736_v39, %v544_v35  ;;  %v737_v50 = vadd.f32 1.0, %v2679_v48  ;;  %2555 = vmatmul.mubr.bf16.gmra.mrb[24].mxu1 %v847_v36 }
 0x176   :  { %v616_v55 = vmul.f32 0.70710677, %v412_v45  ;;  %v406_v59 = vpop.f32.mrb[39].mxu0  ;;  %v798_v56 = vmul.f32 %v734_v43, %v542_v40  ;;  %v735_v60 = vadd.f32 1.0, %v2681_v51  ;;  %v415_v57 = vadd.f32 %v2489_v47, %v3117_v52 }
 0x177   :  { %v614_v61 = vmul.f32 0.70710677, %v404_v54  ;;  %v801_v62 = vmul.f32 %v737_v50, %v545_v44  ;;  %v407_v63 = vadd.f32 %v406_v59, %v3117_v52  ;;  %v552_v33 = vmul.f32 0.5, %v412_v45 }
 0x178   :  { %2690 = verf.f32 %v616_v55  ;;  %v799_v0 = vmul.f32 %v735_v60, %v543_v53  ;;  %v617_v1 = vmul.f32 0.70710677, %v415_v57  ;;  %v550_v38 = vmul.f32 0.5, %v404_v54 }
 0x179   :  { %2692 = verf.f32 %v614_v61  ;;  %v849_v6 = vpack.c.bf16 %v801_v62, %v800_v58  ;;  %v615_v8 = vmul.f32 0.70710677, %v407_v63  ;;  %v553_v42 = vmul.f32 0.5, %v415_v57 }
 0x17a   :  { %v2683_v3 = vpop.eup %2682  ;;  %v848_v11 = vpack.c.bf16 %v799_v0, %v798_v56  ;;  %2694 = verf.f32 %v617_v1  ;;  %v551_v48 = vmul.f32 0.5, %v407_v63 }
 0x17b   :  { %v2685_v2 = vpop.eup %2684  ;;  %v740_v7 = vadd.f32 1.0, %v2683_v3  ;;  %v2492_v4 = vpop.f32.mrb[40].mxu0  ;;  %2696 = verf.f32 %v615_v8 }
 0x17c   :  { %v738_v10 = vadd.f32 1.0, %v2685_v2  ;;  %v428_v13 = vadd.f32 %v2492_v4, %v3117_v52  ;;  %v419_v14 = vpop.f32.mrb[41].mxu0  ;;  %v2687_v16 = vpop.eup %2686  ;;  %2558 = vmatprep.mubr.bf16.mxu1 %v848_v11 }
 0x17d   :  { %v420_v20 = vadd.f32 %v419_v14, %v3117_v52  ;;  %v2493_v15 = vpop.f32.mrb[42].mxu0  ;;  %v2689_v17 = vpop.eup %2688  ;;  %v804_v22 = vmul.f32 %v740_v7, %v548_v5  ;;  %v741_v23 = vadd.f32 1.0, %v2687_v16  ;;  %2559 = vmatmul.mubr.bf16.gmra.mrb[28].mxu1 %v849_v6 }
 0x17e   :  { %v620_v21 = vmul.f32 0.70710677, %v428_v13  ;;  %v422_v25 = vpop.f32.mrb[43].mxu0  ;;  %v802_v19 = vmul.f32 %v738_v10, %v546_v9  ;;  %v739_v26 = vadd.f32 1.0, %v2689_v17  ;;  %v431_v27 = vadd.f32 %v2493_v15, %v3117_v52 }
 0x17f   :  { %v618_v24 = vmul.f32 0.70710677, %v420_v20  ;;  %v805_v28 = vmul.f32 %v741_v23, %v549_v12  ;;  %v423_v30 = vadd.f32 %v422_v25, %v3117_v52  ;;  %v556_v1 = vmul.f32 0.5, %v428_v13 }
 0x180   :  { %2698 = verf.f32 %v620_v21  ;;  %v803_v29 = vmul.f32 %v739_v26, %v547_v18  ;;  %v621_v31 = vmul.f32 0.70710677, %v431_v27  ;;  %v554_v2 = vmul.f32 0.5, %v420_v20 }
 0x181   :  { %2700 = verf.f32 %v618_v24  ;;  %v851_v34 = vpack.c.bf16 %v805_v28, %v804_v22  ;;  %v619_v35 = vmul.f32 0.70710677, %v423_v30  ;;  %v557_v4 = vmul.f32 0.5, %v431_v27 }
 0x182   :  { %v2691_v32 = vpop.eup %2690  ;;  %v850_v39 = vpack.c.bf16 %v803_v29, %v802_v19  ;;  %2702 = verf.f32 %v621_v31  ;;  %v555_v16 = vmul.f32 0.5, %v423_v30 }
 0x183   :  { %v2693_v36 = vpop.eup %2692  ;;  %v744_v37 = vadd.f32 1.0, %v2691_v32  ;;  %v2496_v40 = vpop.f32.mrb[44].mxu0  ;;  %2704 = verf.f32 %v619_v35 }
 0x184   :  { %v742_v41 = vadd.f32 1.0, %v2693_v36  ;;  %v444_v43 = vadd.f32 %v2496_v40, %v3117_v52  ;;  %v435_v44 = vpop.f32.mrb[45].mxu0  ;;  %v2695_v46 = vpop.eup %2694  ;;  %2562 = vmatprep.mubr.bf16.mxu1 %v850_v39 }
 0x185   :  { %v436_v53 = vadd.f32 %v435_v44, %v3117_v52  ;;  %v2497_v45 = vpop.f32.mrb[46].mxu0  ;;  %v2697_v47 = vpop.eup %2696  ;;  %v808_v51 = vmul.f32 %v744_v37, %v552_v33  ;;  %v745_v58 = vadd.f32 1.0, %v2695_v46  ;;  %2563 = vmatmul.mubr.bf16.gmra.mrb[32].mxu1 %v851_v34 }
 0x186   :  { %v624_v54 = vmul.f32 0.70710677, %v444_v43  ;;  %v438_v50 = vpop.f32.mrb[47].mxu0  ;;  %v806_v55 = vmul.f32 %v742_v41, %v550_v38  ;;  %v743_v59 = vadd.f32 1.0, %v2697_v47  ;;  %v447_v60 = vadd.f32 %v2497_v45, %v3117_v52 }
 0x187   :  { %v622_v56 = vmul.f32 0.70710677, %v436_v53  ;;  %v809_v61 = vmul.f32 %v745_v58, %v553_v42  ;;  %v439_v57 = vadd.f32 %v438_v50, %v3117_v52  ;;  %v560_v31 = vmul.f32 0.5, %v444_v43 }
 0x188   :  { %2706 = verf.f32 %v624_v54  ;;  %v807_v62 = vmul.f32 %v743_v59, %v551_v48  ;;  %v625_v63 = vmul.f32 0.70710677, %v447_v60  ;;  %v558_v36 = vmul.f32 0.5, %v436_v53 }
 0x189   :  { %2708 = verf.f32 %v622_v56  ;;  %v853_v3 = vpack.c.bf16 %v809_v61, %v808_v51  ;;  %v623_v5 = vmul.f32 0.70710677, %v439_v57  ;;  %v561_v40 = vmul.f32 0.5, %v447_v60 }
 0x18a   :  { %v2699_v0 = vpop.eup %2698  ;;  %v852_v7 = vpack.c.bf16 %v807_v62, %v806_v55  ;;  %2710 = verf.f32 %v625_v63  ;;  %v559_v46 = vmul.f32 0.5, %v439_v57 }
 0x18b   :  { %v2701_v6 = vpop.eup %2700  ;;  %v748_v8 = vadd.f32 1.0, %v2699_v0  ;;  %v2500_v9 = vpop.f32.mrb[48].mxu0  ;;  %2712 = verf.f32 %v623_v5 }
 0x18c   :  { %v746_v11 = vadd.f32 1.0, %v2701_v6  ;;  %v460_v10 = vadd.f32 %v2500_v9, %v3117_v52  ;;  %v451_v12 = vpop.f32.mrb[49].mxu0  ;;  %v2703_v14 = vpop.eup %2702  ;;  %2566 = vmatprep.mubr.bf16.mxu1 %v852_v7 }
 0x18d   :  { %v452_v18 = vadd.f32 %v451_v12, %v3117_v52  ;;  %v2501_v13 = vpop.f32.mrb[50].mxu0  ;;  %v2705_v15 = vpop.eup %2704  ;;  %v812_v17 = vmul.f32 %v748_v8, %v556_v1  ;;  %v749_v22 = vadd.f32 1.0, %v2703_v14  ;;  %2567 = vmatmul.mubr.bf16.gmra.mrb[36].mxu1 %v853_v3 }
 0x18e   :  { %v628_v20 = vmul.f32 0.70710677, %v460_v10  ;;  %v454_v23 = vpop.f32.mrb[51].mxu0  ;;  %v810_v21 = vmul.f32 %v746_v11, %v554_v2  ;;  %v747_v25 = vadd.f32 1.0, %v2705_v15  ;;  %v463_v26 = vadd.f32 %v2501_v13, %v3117_v52 }
 0x18f   :  { %v626_v19 = vmul.f32 0.70710677, %v452_v18  ;;  %v813_v24 = vmul.f32 %v749_v22, %v557_v4  ;;  %v455_v27 = vadd.f32 %v454_v23, %v3117_v52  ;;  %v564_v63 = vmul.f32 0.5, %v460_v10 }
 0x190   :  { %2714 = verf.f32 %v628_v20  ;;  %v811_v28 = vmul.f32 %v747_v25, %v555_v16  ;;  %v629_v30 = vmul.f32 0.70710677, %v463_v26  ;;  %v562_v6 = vmul.f32 0.5, %v452_v18 }
 0x191   :  { %2716 = verf.f32 %v626_v19  ;;  %v855_v32 = vpack.c.bf16 %v813_v24, %v812_v17  ;;  %v627_v33 = vmul.f32 0.70710677, %v455_v27  ;;  %v565_v9 = vmul.f32 0.5, %v463_v26 }
 0x192   :  { %v2707_v29 = vpop.eup %2706  ;;  %v854_v37 = vpack.c.bf16 %v811_v28, %v810_v21  ;;  %2718 = verf.f32 %v629_v30  ;;  %v563_v14 = vmul.f32 0.5, %v455_v27 }
 0x193   :  { %v2709_v34 = vpop.eup %2708  ;;  %v752_v35 = vadd.f32 1.0, %v2707_v29  ;;  %v2504_v38 = vpop.f32.mrb[52].mxu0  ;;  %2720 = verf.f32 %v627_v33 }
 0x194   :  { %v750_v39 = vadd.f32 1.0, %v2709_v34  ;;  %v476_v41 = vadd.f32 %v2504_v38, %v3117_v52  ;;  %v467_v42 = vpop.f32.mrb[53].mxu0  ;;  %v2711_v44 = vpop.eup %2710  ;;  %2570 = vmatprep.mubr.bf16.mxu1 %v854_v37 }
 0x195   :  { %v468_v48 = vadd.f32 %v467_v42, %v3117_v52  ;;  %v2505_v43 = vpop.f32.mrb[54].mxu0  ;;  %v2713_v45 = vpop.eup %2712  ;;  %v816_v47 = vmul.f32 %v752_v35, %v560_v31  ;;  %v753_v51 = vadd.f32 1.0, %v2711_v44  ;;  %2571 = vmatmul.mubr.bf16.gmra.mrb[40].mxu1 %v855_v32 }
 0x196   :  { %v632_v53 = vmul.f32 0.70710677, %v476_v41  ;;  %v470_v58 = vpop.f32.mrb[55].mxu0  ;;  %v814_v54 = vmul.f32 %v750_v39, %v558_v36  ;;  %v751_v50 = vadd.f32 1.0, %v2713_v45  ;;  %v479_v59 = vadd.f32 %v2505_v43, %v3117_v52 }
 0x197   :  { %v630_v55 = vmul.f32 0.70710677, %v468_v48  ;;  %v817_v56 = vmul.f32 %v753_v51, %v561_v40  ;;  %v471_v60 = vadd.f32 %v470_v58, %v3117_v52  ;;  %v568_v30 = vmul.f32 0.5, %v476_v41 }
 0x198   :  { %2722 = verf.f32 %v632_v53  ;;  %v815_v61 = vmul.f32 %v751_v50, %v559_v46  ;;  %v633_v57 = vmul.f32 0.70710677, %v479_v59  ;;  %v566_v34 = vmul.f32 0.5, %v468_v48 }
 0x199   :  { %2724 = verf.f32 %v630_v55  ;;  %v857_v0 = vpack.c.bf16 %v817_v56, %v816_v47  ;;  %v631_v1 = vmul.f32 0.70710677, %v471_v60  ;;  %v569_v38 = vmul.f32 0.5, %v479_v59 }
 0x19a   :  { %v2715_v62 = vpop.eup %2714  ;;  %v856_v8 = vpack.c.bf16 %v815_v61, %v814_v54  ;;  %2726 = verf.f32 %v633_v57  ;;  %v567_v44 = vmul.f32 0.5, %v471_v60 }
 0x19b   :  { %v2717_v3 = vpop.eup %2716  ;;  %v756_v5 = vadd.f32 1.0, %v2715_v62  ;;  %v2508_v2 = vpop.f32.mrb[56].mxu0  ;;  %2728 = verf.f32 %v631_v1 }
 0x19c   :  { %v754_v7 = vadd.f32 1.0, %v2717_v3  ;;  %v492_v11 = vadd.f32 %v2508_v2, %v3117_v52  ;;  %v483_v4 = vpop.f32.mrb[57].mxu0  ;;  %v2719_v12 = vpop.eup %2718  ;;  %2574 = vmatprep.mubr.bf16.mxu1 %v856_v8 }
 0x19d   :  { %v484_v16 = vadd.f32 %v483_v4, %v3117_v52  ;;  %v2509_v10 = vpop.f32.mrb[58].mxu0  ;;  %v2721_v13 = vpop.eup %2720  ;;  %v820_v15 = vmul.f32 %v756_v5, %v564_v63  ;;  %v757_v17 = vadd.f32 1.0, %v2719_v12  ;;  %2575 = vmatmul.mubr.bf16.gmra.mrb[44].mxu1 %v857_v0 }
 0x19e   :  { %v636_v18 = vmul.f32 0.70710677, %v492_v11  ;;  %v486_v22 = vpop.f32.mrb[59].mxu0  ;;  %v818_v20 = vmul.f32 %v754_v7, %v562_v6  ;;  %v755_v23 = vadd.f32 1.0, %v2721_v13  ;;  %v495_v25 = vadd.f32 %v2509_v10, %v3117_v52 }
 0x19f   :  { %v634_v21 = vmul.f32 0.70710677, %v484_v16  ;;  %v821_v19 = vmul.f32 %v757_v17, %v565_v9  ;;  %v487_v26 = vadd.f32 %v486_v22, %v3117_v52  ;;  %v572_v57 = vmul.f32 0.5, %v492_v11 }
 0x1a0   :  { %2730 = verf.f32 %v636_v18  ;;  %v819_v24 = vmul.f32 %v755_v23, %v563_v14  ;;  %v637_v27 = vmul.f32 0.70710677, %v495_v25  ;;  %v570_v3 = vmul.f32 0.5, %v484_v16 }
 0x1a1   :  { %2732 = verf.f32 %v634_v21  ;;  %v859_v29 = vpack.c.bf16 %v821_v19, %v820_v15  ;;  %v635_v31 = vmul.f32 0.70710677, %v487_v26  ;;  %v573_v8 = vmul.f32 0.5, %v495_v25 }
 0x1a2   :  { %v2723_v28 = vpop.eup %2722  ;;  %v858_v35 = vpack.c.bf16 %v819_v24, %v818_v20  ;;  %2734 = verf.f32 %v637_v27  ;;  %v571_v7 = vmul.f32 0.5, %v487_v26 }
 0x1a3   :  { %v2725_v32 = vpop.eup %2724  ;;  %v760_v33 = vadd.f32 1.0, %v2723_v28  ;;  %v2512_v36 = vpop.f32.mrb[60].mxu0  ;;  %2736 = verf.f32 %v635_v31 }
 0x1a4   :  { %v758_v37 = vadd.f32 1.0, %v2725_v32  ;;  %v508_v39 = vadd.f32 %v2512_v36, %v3117_v52  ;;  %v499_v40 = vpop.f32.mrb[61].mxu0  ;;  %v2727_v42 = vpop.eup %2726  ;;  %2578 = vmatprep.mubr.bf16.mxu1 %v858_v35  ;;  %v3187_v35 = vld [vmem:[%s4240_s3] sm:$0xf]  ;;  %s3040_s3 = smov [#allocation8]  }
 0x1a5   :  { %v500_v46 = vadd.f32 %v499_v40, %v3117_v52  ;;  %v2513_v41 = vpop.f32.mrb[62].mxu0  ;;  %v2729_v43 = vpop.eup %2728  ;;  %v824_v45 = vmul.f32 %v760_v33, %v568_v30  ;;  %v761_v47 = vadd.f32 1.0, %v2727_v42  ;;  %2579 = vmatmul.mubr.bf16.gmra.mrb[48].mxu1 %v859_v29  ;;  %s2325_s30 = sshll.u32 %s3040_s3, 4  ;;  %s2326_s30 = int_to_ptr.vmem [resolvable:$true] %s2325_s30 }
 0x1a6   :  { %v640_v48 = vmul.f32 0.70710677, %v508_v39  ;;  %v502_v51 = vpop.f32.mrb[63].mxu0  ;;  %v822_v53 = vmul.f32 %v758_v37, %v566_v34  ;;  %v759_v58 = vadd.f32 1.0, %v2729_v43  ;;  %v511_v50 = vadd.f32 %v2513_v41, %v3117_v52  ;;  %s3005_s5 = scalar_lea.vmem %s2326_s30, 8192  ;;  %p3010_p11 = scmp.lt.s32.totalorder %s2326_s30, %s2326_s30 }
 0x1a7   :  { %v638_v54 = vmul.f32 0.70710677, %v500_v46  ;;  %v825_v55 = vmul.f32 %v761_v47, %v569_v38  ;;  %v503_v59 = vadd.f32 %v502_v51, %v3117_v52  ;;  %v576_v15 = vmul.f32 0.5, %v508_v39  ;;  %p3006_p10 = scmp.ne.s32.totalorder %s2326_s30, %s3005_s5  ;;  %p3011_p12 = scmp.lt.s32.totalorder %s3005_s5, %s3005_s5 }
 0x1a8   :  { %2738 = verf.f32 %v640_v48  ;;  %v823_v56 = vmul.f32 %v759_v58, %v567_v44  ;;  %v641_v60 = vmul.f32 0.70710677, %v511_v50  ;;  %v574_v22 = vmul.f32 0.5, %v500_v46 }
 0x1a9   :  { %2740 = verf.f32 %v638_v54  ;;  %v861_v62 = vpack.c.bf16 %v825_v55, %v824_v45  ;;  %v639_v63 = vmul.f32 0.70710677, %v503_v59  ;;  %v577_v21 = vmul.f32 0.5, %v511_v50  ;;  %p3012_p13 = por %p3011_p12, %p3010_p11 }
 0x1aa   :  { %v2731_v61 = vpop.eup %2730  ;;  %v860_v5 = vpack.c.bf16 %v823_v56, %v822_v53  ;;  %2742 = verf.f32 %v641_v60  ;;  %v575_v19 = vmul.f32 0.5, %v503_v59  ;;  %v884_v34 = vsub.s32 1, %v3111_v49 }
 0x1ab   :  { %v2733_v0 = vpop.eup %2732  ;;  %v764_v1 = vadd.f32 1.0, %v2731_v61  ;;  %2744 = verf.f32 %v639_v63  ;;  %p3013_p0 = pnand %p3012_p13, %p3006_p10 }
 0x1ac   :  { %v762_v6 = vadd.f32 1.0, %v2733_v0  ;;  %v2735_v2 = vpop.eup %2734  ;;  %2582 = vmatprep.mubr.bf16.mxu1 %v860_v5  ;;  %v3190_v36 = vrot.slane %v3187_v35, %v884_v34 }
 0x1ad   :  { %v2737_v9 = vpop.eup %2736  ;;  %v828_v52 = vmul.f32 %v764_v1, %v572_v57  ;;  %v765_v4 = vadd.f32 1.0, %v2735_v2  ;;  %2583 = vmatmul.mubr.bf16.gmra.mrb[52].mxu1 %v861_v62 }
 0x1ae   :  { %v826_v12 = vmul.f32 %v762_v6, %v570_v3  ;;  %v763_v14 = vadd.f32 1.0, %v2737_v9 }
 0x1af   :  { %v829_v11 = vmul.f32 %v765_v4, %v573_v8 }
 0x1b0   :  { %v827_v10 = vmul.f32 %v763_v14, %v571_v7 }
 0x1b1   :  { %v863_v17 = vpack.c.bf16 %v829_v11, %v828_v52 }
 0x1b2   :  { %v2739_v13 = vpop.eup %2738  ;;  %v862_v20 = vpack.c.bf16 %v827_v10, %v826_v12 }
 0x1b3   :  { %v2741_v16 = vpop.eup %2740  ;;  %v768_v18 = vadd.f32 1.0, %v2739_v13 }
 0x1b4   :  { %v766_v23 = vadd.f32 1.0, %v2741_v16  ;;  %v2743_v25 = vpop.eup %2742  ;;  %2586 = vmatprep.mubr.bf16.mxu1 %v862_v20 }
 0x1b5   :  { %v2745_v26 = vpop.eup %2744  ;;  %v832_v24 = vmul.f32 %v768_v18, %v576_v15  ;;  %v769_v27 = vadd.f32 1.0, %v2743_v25  ;;  %2587 = vmatmul.mubr.bf16.gmra.mrb[56].mxu1 %v863_v17 }
 0x1b6   :  { %v830_v28 = vmul.f32 %v766_v23, %v574_v22  ;;  %v767_v30 = vadd.f32 1.0, %v2745_v26 }
 0x1b7   :  { %v833_v29 = vmul.f32 %v769_v27, %v577_v21 }
 0x1b8   :  { %v831_v31 = vmul.f32 %v767_v30, %v575_v19 }
 0x1b9   :  { %v865_v32 = vpack.c.bf16 %v833_v29, %v832_v24 }
 0x1ba   :  { %v864_v33 = vpack.c.bf16 %v831_v31, %v830_v28 }
 0x1bc   :  { %2590 = vmatprep.mubr.bf16.mxu1 %v864_v33 }
 0x1bd   :  { %2591 = vmatmul.mubr.bf16.gmra.mrb[60].mxu1 %v865_v32 }
 0x218   :  { %v2532_v37 = vpop.f32.mrb[0].mxu1 }
 0x219   :  { %v3193_v38 = vadd.f32 %v2532_v37, %v3190_v36  ;;  %v968_v39 = vpop.f32.mrb[1].mxu1 }
 0x21a   :  { %v3196_v40 = vadd.f32 %v968_v39, %v3190_v36  ;;  %v2533_v42 = vpop.f32.mrb[2].mxu1 }
 0x21b   :  { %1227 = vadd.xlane.f32.xlu1 %v3193_v38  ;;  %v971_v44 = vpop.f32.mrb[3].mxu1  ;;  %v3201_v46 = vadd.f32 %v2533_v42, %v3190_v36  ;;  %v1418_v41 = vmul.f32 %v3193_v38, %v3193_v38 }
 0x21c   :  { %1223 = vadd.xlane.f32.xlu0 %v3196_v40  ;;  %v3207_v45 = vadd.f32 %v971_v44, %v3190_v36  ;;  %v1416_v54 = vmul.f32 %v3196_v40, %v3196_v40 }
 0x21d   :  { %v1419_v48 = vmul.f32 %v3201_v46, %v3201_v46 }
 0x21e   :  { %v1417_v58 = vmul.f32 %v3207_v45, %v3207_v45 }
 0x21f   :  { %1229 = vadd.xlane.f32.xlu1 %v3201_v46 }
 0x220   :  { %v2536_v43 = vpop.f32.mrb[4].mxu1  ;;  %1484 = vadd.xlane.f32.xlu0 %v1418_v41 }
 0x221   :  { %v984_v47 = vpop.f32.mrb[5].mxu1  ;;  %v3220_v56 = vadd.f32 %v2536_v43, %v3190_v36 }
 0x222   :  { %v2537_v51 = vpop.f32.mrb[6].mxu1  ;;  %v3228_v62 = vadd.f32 %v984_v47, %v3190_v36 }
 0x223   :  { %1486 = vadd.xlane.f32.xlu1 %v1419_v48  ;;  %v987_v53 = vpop.f32.mrb[7].mxu1  ;;  %v3217_v55 = vadd.f32 %v2537_v51, %v3190_v36  ;;  %v1422_v3 = vmul.f32 %v3220_v56, %v3220_v56 }
 0x224   :  { %1225 = vadd.xlane.f32.xlu0 %v3207_v45  ;;  %v3225_v57 = vadd.f32 %v987_v53, %v3190_v36  ;;  %v1420_v2 = vmul.f32 %v3228_v62, %v3228_v62 }
 0x225   :  { %v1423_v0 = vmul.f32 %v3217_v55, %v3217_v55 }
 0x226   :  { %v1421_v8 = vmul.f32 %v3225_v57, %v3225_v57 }
 0x227   :  { %1482 = vadd.xlane.f32.xlu1 %v1417_v58 }
 0x228   :  { %v2540_v50 = vpop.f32.mrb[8].mxu1  ;;  %1480 = vadd.xlane.f32.xlu0 %v1416_v54 }
 0x229   :  { %v1000_v59 = vpop.f32.mrb[9].mxu1  ;;  %v3244_v4 = vadd.f32 %v2540_v50, %v3190_v36 }
 0x22a   :  { %v2541_v60 = vpop.f32.mrb[10].mxu1  ;;  %v3252_v10 = vadd.f32 %v1000_v59, %v3190_v36 }
 0x22b   :  { %v1003_v61 = vpop.f32.mrb[11].mxu1  ;;  %1237 = vadd.xlane.f32.xlu1 %v3217_v55  ;;  %v3241_v9 = vadd.f32 %v2541_v60, %v3190_v36  ;;  %v1426_v16 = vmul.f32 %v3244_v4, %v3244_v4 }
 0x22c   :  { %1235 = vadd.xlane.f32.xlu0 %v3220_v56  ;;  %v3249_v11 = vadd.f32 %v1003_v61, %v3190_v36  ;;  %v1424_v23 = vmul.f32 %v3252_v10, %v3252_v10 }
 0x22d   :  { %v1427_v15 = vmul.f32 %v3241_v9, %v3241_v9 }
 0x22e   :  { %v1425_v20 = vmul.f32 %v3249_v11, %v3249_v11 }
 0x22f   :  { %1233 = vadd.xlane.f32.xlu1 %v3225_v57 }
 0x230   :  { %1231 = vadd.xlane.f32.xlu0 %v3228_v62  ;;  %v2544_v63 = vpop.f32.mrb[12].mxu1 }
 0x231   :  { %v1016_v1 = vpop.f32.mrb[13].mxu1  ;;  %v3276_v26 = vadd.f32 %v2544_v63, %v3190_v36 }
 0x232   :  { %v2545_v5 = vpop.f32.mrb[14].mxu1  ;;  %v3288_v30 = vadd.f32 %v1016_v1, %v3190_v36 }
 0x233   :  { %1494 = vadd.xlane.f32.xlu1 %v1423_v0  ;;  %v1019_v6 = vpop.f32.mrb[15].mxu1  ;;  %v3271_v25 = vadd.f32 %v2545_v5, %v3190_v36  ;;  %v1430_v33 = vmul.f32 %v3276_v26, %v3276_v26 }
 0x234   :  { %1492 = vadd.xlane.f32.xlu0 %v1422_v3  ;;  %v3285_v28 = vadd.f32 %v1019_v6, %v3190_v36  ;;  %v1428_v42 = vmul.f32 %v3288_v30, %v3288_v30 }
 0x235   :  { %v1431_v31 = vmul.f32 %v3271_v25, %v3271_v25 }
 0x236   :  { %v1429_v39 = vmul.f32 %v3285_v28, %v3285_v28 }
 0x237   :  { %1490 = vadd.xlane.f32.xlu1 %v1421_v8 }
 0x238   :  { %1488 = vadd.xlane.f32.xlu0 %v1420_v2  ;;  %v2548_v7 = vpop.f32.mrb[16].mxu1 }
 0x239   :  { %v1032_v52 = vpop.f32.mrb[17].mxu1  ;;  %v3316_v47 = vadd.f32 %v2548_v7, %v3190_v36 }
 0x23a   :  { %v2549_v12 = vpop.f32.mrb[18].mxu1  ;;  %v3328_v58 = vadd.f32 %v1032_v52, %v3190_v36 }
 0x23b   :  { %1245 = vadd.xlane.f32.xlu1 %v3241_v9  ;;  %v1035_v14 = vpop.f32.mrb[19].mxu1  ;;  %v3311_v41 = vadd.f32 %v2549_v12, %v3190_v36  ;;  %v1434_v60 = vmul.f32 %v3316_v47, %v3316_v47 }
 0x23c   :  { %1243 = vadd.xlane.f32.xlu0 %v3244_v4  ;;  %v3325_v53 = vadd.f32 %v1035_v14, %v3190_v36  ;;  %4267 = vst [vmem:[#allocation12_spill] sm:$0xff] %v3328_v58  ;;  %v1432_v1 = vmul.f32 %v3328_v58, %v3328_v58 }
 0x23d   :  { %v1435_v50 = vmul.f32 %v3311_v41, %v3311_v41 }
 0x23e   :  { %v1433_v0 = vmul.f32 %v3325_v53, %v3325_v53 }
 0x23f   :  { %1241 = vadd.xlane.f32.xlu1 %v3249_v11 }
 0x240   :  { %1239 = vadd.xlane.f32.xlu0 %v3252_v10  ;;  %v3256_v13 = vpop.f32.mrb[20].mxu1 }
 0x241   :  { %v3260_v17 = vpop.f32.mrb[21].mxu1  ;;  %v3357_v8 = vadd.f32 %v3256_v13, %v3190_v36 }
 0x242   :  { %v2553_v18 = vpop.f32.mrb[22].mxu1  ;;  %v3370_v12 = vadd.f32 %v3260_v17, %v3190_v36 }
 0x243   :  { %1502 = vadd.xlane.f32.xlu1 %v1427_v15  ;;  %v1051_v22 = vpop.f32.mrb[23].mxu1  ;;  %v3351_v5 = vadd.f32 %v2553_v18, %v3190_v36  ;;  %4269 = vst [vmem:[#allocation14_spill] sm:$0xff] %v3357_v8 }
 0x244   :  { %1500 = vadd.xlane.f32.xlu0 %v1426_v16  ;;  %v3366_v52 = vadd.f32 %v1051_v22, %v3190_v36  ;;  %4271 = vst [vmem:[#allocation16_spill] sm:$0xff] %v3370_v12  ;;  %v1438_v16 = vmul.f32 %v3357_v8, %v3357_v8 }
 0x245   :  { %4268 = vst [vmem:[#allocation13_spill] sm:$0xff] %v3351_v5  ;;  %v1439_v13 = vmul.f32 %v3351_v5, %v3351_v5 }
 0x246   :  { %4270 = vst [vmem:[#allocation15_spill] sm:$0xff] %v3366_v52  ;;  %v1437_v17 = vmul.f32 %v3366_v52, %v3366_v52 }
 0x247   :  { %1498 = vadd.xlane.f32.xlu1 %v1425_v20  ;;  %v1436_v20 = vmul.f32 %v3370_v12, %v3370_v12 }
 0x248   :  { %1496 = vadd.xlane.f32.xlu0 %v1424_v23  ;;  %v3268_v21 = vpop.f32.mrb[24].mxu1 }
 0x249   :  { %v3273_v19 = vpop.f32.mrb[25].mxu1 }
 0x24a   :  { %v3278_v24 = vpop.f32.mrb[26].mxu1 }
 0x24b   :  { %1253 = vadd.xlane.f32.xlu1 %v3271_v25  ;;  %v3281_v27 = vpop.f32.mrb[27].mxu1 }
 0x24c   :  { %1251 = vadd.xlane.f32.xlu0 %v3276_v26 }
 0x24f   :  { %1249 = vadd.xlane.f32.xlu1 %v3285_v28 }
 0x250   :  { %1247 = vadd.xlane.f32.xlu0 %v3288_v30  ;;  %v3292_v29 = vpop.f32.mrb[28].mxu1 }
 0x251   :  { %v3296_v32 = vpop.f32.mrb[29].mxu1 }
 0x252   :  { %v3300_v34 = vpop.f32.mrb[30].mxu1 }
 0x253   :  { %1510 = vadd.xlane.f32.xlu1 %v1431_v31  ;;  %v3302_v37 = vpop.f32.mrb[31].mxu1  ;;  %v3394_v31 = vadd.f32 %v3278_v24, %v3190_v36  ;;  %v3414_v24 = vadd.f32 %v3273_v19, %v3190_v36 }
 0x254   :  { %1508 = vadd.xlane.f32.xlu0 %v1430_v33 }
 0x255   :  { %4272 = vst [vmem:[#allocation17_spill] sm:$0xff] %v3394_v31  ;;  %4275 = vst [vmem:[#allocation20_spill] sm:$0xff] %v3414_v24 }
 0x257   :  { %1506 = vadd.xlane.f32.xlu1 %v1429_v39  ;;  %v3400_v39 = vadd.f32 %v3268_v21, %v3190_v36 }
 0x258   :  { %1504 = vadd.xlane.f32.xlu0 %v1428_v42  ;;  %v3308_v44 = vpop.f32.mrb[32].mxu1 }
 0x259   :  { %v3313_v43 = vpop.f32.mrb[33].mxu1  ;;  %4273 = vst [vmem:[#allocation18_spill] sm:$0xff] %v3400_v39 }
 0x25a   :  { %v3318_v48 = vpop.f32.mrb[34].mxu1 }
 0x25b   :  { %1261 = vadd.xlane.f32.xlu1 %v3311_v41  ;;  %v3321_v51 = vpop.f32.mrb[35].mxu1 }
 0x25c   :  { %1259 = vadd.xlane.f32.xlu0 %v3316_v47 }
 0x25f   :  { %1257 = vadd.xlane.f32.xlu1 %v3325_v53 }
 0x260   :  { %1255 = vadd.xlane.f32.xlu0 %v3328_v58  ;;  %v3332_v54 = vpop.f32.mrb[36].mxu1 }
 0x261   :  { %v3336_v59 = vpop.f32.mrb[37].mxu1 }
 0x262   :  { %v3340_v61 = vpop.f32.mrb[38].mxu1 }
 0x263   :  { %1518 = vadd.xlane.f32.xlu1 %v1435_v50  ;;  %v3342_v63 = vpop.f32.mrb[39].mxu1 }
 0x264   :  { %1516 = vadd.xlane.f32.xlu0 %v1434_v60  ;;  %v3410_v60 = vadd.f32 %v3281_v27, %v3190_v36 }
 0x266   :  { %4274 = vst [vmem:[#allocation19_spill] sm:$0xff] %v3410_v60  ;;  %v1441_v19 = vmul.f32 %v3410_v60, %v3410_v60 }
 0x267   :  { %1514 = vadd.xlane.f32.xlu1 %v1433_v0  ;;  %v1443_v0 = vmul.f32 %v3394_v31, %v3394_v31 }
 0x268   :  { %1512 = vadd.xlane.f32.xlu0 %v1432_v1  ;;  %v3348_v3 = vpop.f32.mrb[40].mxu1 }
 0x269   :  { %v3353_v6 = vpop.f32.mrb[41].mxu1 }
 0x26a   :  { %v3359_v2 = vpop.f32.mrb[42].mxu1 }
 0x26b   :  { %1269 = vadd.xlane.f32.xlu1 %v3351_v5  ;;  %v3362_v7 = vpop.f32.mrb[43].mxu1 }
 0x26c   :  { %1267 = vadd.xlane.f32.xlu0 %v3357_v8 }
 0x26f   :  { %1265 = vadd.xlane.f32.xlu1 %v3366_v52 }
 0x270   :  { %1263 = vadd.xlane.f32.xlu0 %v3370_v12  ;;  %v3374_v14 = vpop.f32.mrb[44].mxu1 }
 0x271   :  { %v3378_v15 = vpop.f32.mrb[45].mxu1 }
 0x272   :  { %v3382_v18 = vpop.f32.mrb[46].mxu1 }
 0x273   :  { %1526 = vadd.xlane.f32.xlu1 %v1439_v13  ;;  %v3384_v22 = vpop.f32.mrb[47].mxu1  ;;  %v1442_v13 = vmul.f32 %v3400_v39, %v3400_v39 }
 0x274   :  { %1524 = vadd.xlane.f32.xlu0 %v1438_v16 }
 0x277   :  { %1522 = vadd.xlane.f32.xlu1 %v1437_v17  ;;  %v1440_v17 = vmul.f32 %v3414_v24, %v3414_v24 }
 0x278   :  { %1520 = vadd.xlane.f32.xlu0 %v1436_v20  ;;  %v3390_v23 = vpop.f32.mrb[48].mxu1 }
 0x279   :  { %v3396_v33 = vpop.f32.mrb[49].mxu1 }
 0x27a   :  { %v3402_v42 = vpop.f32.mrb[50].mxu1 }
 0x27b   :  { %1277 = vadd.xlane.f32.xlu1 %v3394_v31  ;;  %v3405_v50 = vpop.f32.mrb[51].mxu1  ;;  %v3438_v31 = vadd.f32 %v3300_v34, %v3190_v36  ;;  %v3458_v34 = vadd.f32 %v3296_v32, %v3190_v36 }
 0x27c   :  { %1275 = vadd.xlane.f32.xlu0 %v3400_v39 }
 0x27d   :  { %4276 = vst [vmem:[#allocation21_spill] sm:$0xff] %v3438_v31  ;;  %4279 = vst [vmem:[#allocation24_spill] sm:$0xff] %v3458_v34  ;;  %v1444_v8 = vmul.f32 %v3458_v34, %v3458_v34 }
 0x27f   :  { %1273 = vadd.xlane.f32.xlu1 %v3410_v60 }
 0x280   :  { %1271 = vadd.xlane.f32.xlu0 %v3414_v24  ;;  %v3418_v21 = vpop.f32.mrb[52].mxu1 }
 0x281   :  { %v3422_v1 = vpop.f32.mrb[53].mxu1 }
 0x282   :  { %v3426_v27 = vpop.f32.mrb[54].mxu1 }
 0x283   :  { %1534 = vadd.xlane.f32.xlu1 %v1443_v0  ;;  %v3428_v16 = vpop.f32.mrb[55].mxu1  ;;  %v3444_v0 = vadd.f32 %v3292_v29, %v3190_v36 }
 0x284   :  { %1532 = vadd.xlane.f32.xlu0 %v1442_v13 }
 0x285   :  { %4277 = vst [vmem:[#allocation22_spill] sm:$0xff] %v3444_v0  ;;  %v1446_v12 = vmul.f32 %v3444_v0, %v3444_v0 }
 0x287   :  { %1530 = vadd.xlane.f32.xlu1 %v1441_v19  ;;  %v3454_v19 = vadd.f32 %v3302_v37, %v3190_v36 }
 0x288   :  { %1528 = vadd.xlane.f32.xlu0 %v1440_v17  ;;  %v3434_v20 = vpop.f32.mrb[56].mxu1  ;;  %v1447_v17 = vmul.f32 %v3438_v31, %v3438_v31 }
 0x289   :  { %v3440_v39 = vpop.f32.mrb[57].mxu1  ;;  %4278 = vst [vmem:[#allocation23_spill] sm:$0xff] %v3454_v19  ;;  %v1445_v32 = vmul.f32 %v3454_v19, %v3454_v19 }
 0x28a   :  { %v3446_v13 = vpop.f32.mrb[58].mxu1 }
 0x28b   :  { %1285 = vadd.xlane.f32.xlu1 %v3438_v31  ;;  %v3449_v60 = vpop.f32.mrb[59].mxu1  ;;  %v3480_v31 = vadd.f32 %v3318_v48, %v3190_v36 }
 0x28c   :  { %1283 = vadd.xlane.f32.xlu0 %v3444_v0  ;;  %v3484_v0 = vadd.f32 %v3308_v44, %v3190_v36 }
 0x28d   :  { %4284 = vst [vmem:[#allocation29_spill] sm:$0xff] %v3480_v31  ;;  %v1451_v44 = vmul.f32 %v3480_v31, %v3480_v31 }
 0x28e   :  { %4285 = vst [vmem:[#allocation30_spill] sm:$0xff] %v3484_v0  ;;  %v1450_v48 = vmul.f32 %v3484_v0, %v3484_v0 }
 0x28f   :  { %1281 = vadd.xlane.f32.xlu1 %v3454_v19 }
 0x290   :  { %1279 = vadd.xlane.f32.xlu0 %v3458_v34  ;;  %v3462_v29 = vpop.f32.mrb[60].mxu1 }
 0x291   :  { %4280 = vst [vmem:[#allocation25_spill] sm:$0xff] %v3462_v29  ;;  %v3466_v24 = vpop.f32.mrb[61].mxu1 }
 0x292   :  { %4281 = vst [vmem:[#allocation26_spill] sm:$0xff] %v3466_v24  ;;  %v3470_v37 = vpop.f32.mrb[62].mxu1 }
 0x293   :  { %4282 = vst [vmem:[#allocation27_spill] sm:$0xff] %v3470_v37  ;;  %1542 = vadd.xlane.f32.xlu1 %v1447_v17  ;;  %v3472_v52 = vpop.f32.mrb[63].mxu1  ;;  %v3494_v17 = vadd.f32 %v3313_v43, %v3190_v36 }
 0x294   :  { %4283 = vst [vmem:[#allocation28_spill] sm:$0xff] %v3472_v52  ;;  %1540 = vadd.xlane.f32.xlu0 %v1446_v12  ;;  %v3490_v12 = vadd.f32 %v3321_v51, %v3190_v36 }
 0x295   :  { %4287 = vst [vmem:[#allocation32_spill] sm:$0xff] %v3494_v17 }
 0x296   :  { %4286 = vst [vmem:[#allocation31_spill] sm:$0xff] %v3490_v12  ;;  %v1449_v51 = vmul.f32 %v3490_v12, %v3490_v12 }
 0x297   :  { %1538 = vadd.xlane.f32.xlu1 %v1445_v32  ;;  %v3508_v32 = vadd.f32 %v3340_v61, %v3190_v36 }
 0x298   :  { %1536 = vadd.xlane.f32.xlu0 %v1444_v8  ;;  %v1448_v8 = vmul.f32 %v3494_v17, %v3494_v17 }
 0x299   :  { %4288 = vst [vmem:[#allocation33_spill] sm:$0xff] %v3508_v32  ;;  %v1455_v5 = vmul.f32 %v3508_v32, %v3508_v32 }
 0x29b   :  { %1293 = vadd.xlane.f32.xlu1 %v3480_v31  ;;  %v3512_v31 = vadd.f32 %v3332_v54, %v3190_v36 }
 0x29c   :  { %1291 = vadd.xlane.f32.xlu0 %v3484_v0 }
 0x29d   :  { %4289 = vst [vmem:[#allocation34_spill] sm:$0xff] %v3512_v31 }
 0x29f   :  { %1289 = vadd.xlane.f32.xlu1 %v3490_v12 }
 0x2a0   :  { %1287 = vadd.xlane.f32.xlu0 %v3494_v17  ;;  %v3526_v17 = vadd.f32 %v3336_v59, %v3190_v36 }
 0x2a2   :  { %4291 = vst [vmem:[#allocation36_spill] sm:$0xff] %v3526_v17 }
 0x2a3   :  { %1550 = vadd.xlane.f32.xlu1 %v1451_v44 }
 0x2a4   :  { %1548 = vadd.xlane.f32.xlu0 %v1450_v48 }
 0x2a7   :  { %1546 = vadd.xlane.f32.xlu1 %v1449_v51  ;;  %v3520_v51 = vadd.f32 %v3342_v63, %v3190_v36 }
 0x2a8   :  { %v1228_v43 = vpop.xlane.xlu1 %1227  ;;  %1544 = vadd.xlane.f32.xlu0 %v1448_v8 }
 0x2a9   :  { %v1224_v34 = vpop.xlane.xlu0 %1223  ;;  %v3514_v44 = vmul.f32 0.0078125, %v1228_v43  ;;  %4290 = vst [vmem:[#allocation35_spill] sm:$0xff] %v3520_v51 }
 0x2aa   :  { %v3536_v59 = vmul.f32 0.0078125, %v1224_v34  ;;  %v1453_v34 = vmul.f32 %v3520_v51, %v3520_v51 }
 0x2ab   :  { %1301 = vadd.xlane.f32.xlu1 %v3508_v32  ;;  %v1674_v54 = vmul.f32 %v3514_v44, %v3514_v44 }
 0x2ac   :  { %v1230_v48 = vpop.xlane.xlu1 %1229  ;;  %1299 = vadd.xlane.f32.xlu0 %v3512_v31 }
 0x2ad   :  { %v3522_v8 = vmul.f32 0.0078125, %v1230_v48  ;;  %v1485_v61 = vpop.xlane.xlu0 %1484 }
 0x2ae   :  { %v1610_v43 = vmul.f32 0.0078125, %v1485_v61  ;;  %v1454_v61 = vmul.f32 %v3512_v31, %v3512_v31 }
 0x2af   :  { %1297 = vadd.xlane.f32.xlu1 %v3520_v51  ;;  %v1675_v63 = vmul.f32 %v3522_v8, %v3522_v8 }
 0x2b0   :  { %v1738_v12 = vsub.f32 %v1610_v43, %v1674_v54  ;;  %v1487_v0 = vpop.xlane.xlu1 %1486  ;;  %1295 = vadd.xlane.f32.xlu0 %v3526_v17 }
 0x2b1   :  { %v1611_v48 = vmul.f32 0.0078125, %v1487_v0  ;;  %v1226_v19 = vpop.xlane.xlu0 %1225 }
 0x2b2   :  { %v1866_v24 = vadd.f32 1e-05, %v1738_v12  ;;  %v3538_v52 = vmul.f32 0.0078125, %v1226_v19  ;;  %v1672_v19 = vmul.f32 %v3536_v59, %v3536_v59 }
 0x2b3   :  { %v1739_v54 = vsub.f32 %v1611_v48, %v1675_v63  ;;  %1558 = vadd.xlane.f32.xlu1 %v1455_v5  ;;  %v1452_v63 = vmul.f32 %v3526_v17, %v3526_v17 }
 0x2b4   :  { %2746 = vrsqrt.f32 %v1866_v24  ;;  %v1673_v43 = vmul.f32 %v3538_v52, %v3538_v52  ;;  %v1483_v29 = vpop.xlane.xlu1 %1482  ;;  %1556 = vadd.xlane.f32.xlu0 %v1454_v61  ;;  %v2058_v61 = vsub.s32 2, %v3111_v49 }
 0x2b5   :  { %v1867_v0 = vadd.f32 1e-05, %v1739_v54  ;;  %v1609_v37 = vmul.f32 0.0078125, %v1483_v29  ;;  %v1481_v58 = vpop.xlane.xlu0 %1480  ;;  %v3553_v29 = vadd.f32 %v3359_v2, %v3190_v36  ;;  %v3567_v2 = vadd.f32 %v3362_v7, %v3190_v36 }
 0x2b6   :  { %v1608_v12 = vmul.f32 0.0078125, %v1481_v58  ;;  %v3557_v58 = vadd.f32 %v3348_v3, %v3190_v36  ;;  %v1802_v3 = vsub.f32 %v3193_v38, %v3514_v44  ;;  %v1803_v7 = vsub.f32 %v3201_v46, %v3522_v8 }
 0x2b7   :  { %2748 = vrsqrt.f32 %v1867_v0  ;;  %v1737_v5 = vsub.f32 %v1609_v37, %v1673_v43  ;;  %1554 = vadd.xlane.f32.xlu1 %v1453_v34  ;;  %4292 = vst [vmem:[#allocation37_spill] sm:$0xff] %v3553_v29  ;;  %v2126_v0 = vsub.s32 3, %v3111_v49  ;;  %v3563_v43 = vrot.slane %v3187_v35, %v2058_v61  ;;  %4294 = vst [vmem:[#allocation39_spill] sm:$0xff] %v3567_v2 }
 0x2b8   :  { %v1736_v24 = vsub.f32 %v1608_v12, %v1672_v19  ;;  %v1238_v48 = vpop.xlane.xlu1 %1237  ;;  %1552 = vadd.xlane.f32.xlu0 %v1452_v63  ;;  %4293 = vst [vmem:[#allocation38_spill] sm:$0xff] %v3557_v58 }
 0x2b9   :  { %v1865_v54 = vadd.f32 1e-05, %v1737_v5  ;;  %v1236_v51 = vpop.xlane.xlu0 %1235  ;;  %v3571_v34 = vmul.f32 0.0078125, %v1238_v48  ;;  %v3580_v63 = vrot.slane %v3187_v35, %v2126_v0 }
 0x2ba   :  { %v1864_v31 = vadd.f32 1e-05, %v1736_v24  ;;  %v3577_v12 = vmul.f32 0.0078125, %v1236_v51  ;;  %v1458_v51 = vmul.f32 %v3557_v58, %v3557_v58 }
 0x2bb   :  { %2750 = vrsqrt.f32 %v1865_v54  ;;  %1309 = vadd.xlane.f32.xlu1 %v3553_v29  ;;  %v1679_v48 = vmul.f32 %v3571_v34, %v3571_v34 }
 0x2bc   :  { %2752 = vrsqrt.f32 %v1864_v31  ;;  %v1234_v37 = vpop.xlane.xlu1 %1233  ;;  %1307 = vadd.xlane.f32.xlu0 %v3557_v58  ;;  %v3575_v31 = vadd.f32 %v3353_v6, %v3190_v36  ;;  %v1459_v6 = vmul.f32 %v3553_v29, %v3553_v29  ;;  %v1678_v0 = vmul.f32 %v3577_v12, %v3577_v12 }
 0x2bd   :  { %v1232_v49 = vpop.xlane.xlu0 %1231  ;;  %v3585_v38 = vmul.f32 0.0078125, %v1234_v37 }
 0x2be   :  { %v2747_v19 = vpop.eup %2746  ;;  %4295 = vst [vmem:[#allocation40_spill] sm:$0xff] %v3575_v31  ;;  %v3595_v61 = vmul.f32 0.0078125, %v1232_v49  ;;  %v1457_v49 = vmul.f32 %v3567_v2, %v3567_v2 }
 0x2bf   :  { %v1994_v5 = vmul.f32 %v2747_v19, %v1802_v3  ;;  %1305 = vadd.xlane.f32.xlu1 %v3567_v2  ;;  %v1456_v3 = vmul.f32 %v3575_v31, %v3575_v31  ;;  %v1800_v19 = vsub.f32 %v3196_v40, %v3536_v59  ;;  %v2875_v40 = vld [vmem:[#allocation2 + $0x10] sm:$0xff] }
 0x2c0   :  { %v1495_v44 = vpop.xlane.xlu1 %1494  ;;  %1303 = vadd.xlane.f32.xlu0 %v3575_v31 }
 0x2c1   :  { %v2749_v24 = vpop.eup %2748  ;;  %v2062_v35 = vmul.f32 %v3563_v43, %v1994_v5  ;;  %v1615_v46 = vmul.f32 0.0078125, %v1495_v44  ;;  %v1493_v8 = vpop.xlane.xlu0 %1492 }
 0x2c2   :  { %v1995_v54 = vmul.f32 %v2749_v24, %v1803_v7  ;;  %v1614_v37 = vmul.f32 0.0078125, %v1493_v8  ;;  %v1801_v7 = vsub.f32 %v3207_v45, %v3538_v52  ;;  %v1677_v24 = vmul.f32 %v3585_v38, %v3585_v38 }
 0x2c3   :  { %v2130_v5 = vadd.f32 %v3580_v63, %v2062_v35  ;;  %v1743_v58 = vsub.f32 %v1615_v46, %v1679_v48  ;;  %1566 = vadd.xlane.f32.xlu1 %v1459_v6  ;;  %v1676_v6 = vmul.f32 %v3595_v61, %v3595_v61 }
 0x2c4   :  { %v2063_v44 = vmul.f32 %v3563_v43, %v1995_v54  ;;  %v1742_v8 = vsub.f32 %v1614_v37, %v1678_v0  ;;  %v1491_v31 = vpop.xlane.xlu1 %1490  ;;  %1564 = vadd.xlane.f32.xlu0 %v1458_v51  ;;  %v2876_v51 = vld [vmem:[#allocation2 + $0x18] sm:$0xff] }
 0x2c5   :  { %v2751_v29 = vpop.eup %2750  ;;  %v2194_v59 = vadd.f32 %v2875_v40, %v2130_v5  ;;  %v1871_v35 = vadd.f32 1e-05, %v1743_v58  ;;  %v1613_v48 = vmul.f32 0.0078125, %v1491_v31  ;;  %v1489_v46 = vpop.xlane.xlu0 %1488  ;;  %v3617_v31 = vadd.f32 %v3382_v18, %v3190_v36 }
 0x2c6   :  { %v2753_v2 = vpop.eup %2752  ;;  %v2131_v54 = vadd.f32 %v3580_v63, %v2063_v44  ;;  %v1993_v17 = vmul.f32 %v2751_v29, %v1801_v7  ;;  %v1870_v45 = vadd.f32 1e-05, %v1742_v8  ;;  %v1612_v52 = vmul.f32 0.0078125, %v1489_v46 }
 0x2c7   :  { %2258 = vst [vmem:[#allocation8 + $0x10] sm:$0xff] %v2194_v59  ;;  %v1992_v32 = vmul.f32 %v2753_v2, %v1800_v19  ;;  %2754 = vrsqrt.f32 %v1871_v35  ;;  %v1741_v0 = vsub.f32 %v1613_v48, %v1677_v24  ;;  %1562 = vadd.xlane.f32.xlu1 %v1457_v49  ;;  %v3622_v2 = vadd.f32 %v3374_v14, %v3190_v36 }
 0x2c8   :  { %v2195_v37 = vadd.f32 %v2876_v51, %v2131_v54  ;;  %v2061_v5 = vmul.f32 %v3563_v43, %v1993_v17  ;;  %2756 = vrsqrt.f32 %v1870_v45  ;;  %v1740_v40 = vsub.f32 %v1612_v52, %v1676_v6  ;;  %v1246_v58 = vpop.xlane.xlu1 %1245  ;;  %1560 = vadd.xlane.f32.xlu0 %v1456_v3  ;;  %v2877_v3 = vld [vmem:[#allocation2 + $0x8] sm:$0xff] }
 0x2c9   :  { %v2060_v29 = vmul.f32 %v3563_v43, %v1992_v32  ;;  %v1869_v44 = vadd.f32 1e-05, %v1741_v0  ;;  %v1244_v7 = vpop.xlane.xlu0 %1243  ;;  %v2878_v32 = vld [vmem:[#allocation2] sm:$0xff]  ;;  %v3630_v14 = vadd.f32 %v3384_v22, %v3190_v36  ;;  %v3632_v59 = vmul.f32 0.0078125, %v1246_v58 }
 0x2ca   :  { %2259 = vst [vmem:[#allocation8 + $0x18] sm:$0xff] %v2195_v37  ;;  %v2129_v19 = vadd.f32 %v3580_v63, %v2061_v5  ;;  %v1868_v17 = vadd.f32 1e-05, %v1740_v40  ;;  %v3636_v35 = vadd.f32 %v3378_v15, %v3190_v36  ;;  %v3638_v48 = vmul.f32 0.0078125, %v1244_v7 }
 0x2cb   :  { %v2128_v49 = vadd.f32 %v3580_v63, %v2060_v29  ;;  %2758 = vrsqrt.f32 %v1869_v44  ;;  %1317 = vadd.xlane.f32.xlu1 %v3617_v31  ;;  %v1807_v46 = vsub.f32 %v3217_v55, %v3571_v34  ;;  %v1463_v45 = vmul.f32 %v3617_v31, %v3617_v31 }
 0x2cc   :  { %v2193_v18 = vadd.f32 %v2877_v3, %v2129_v19  ;;  %2760 = vrsqrt.f32 %v1868_v17  ;;  %v1242_v24 = vpop.xlane.xlu1 %1241  ;;  %1315 = vadd.xlane.f32.xlu0 %v3622_v2  ;;  %v1462_v15 = vmul.f32 %v3622_v2, %v3622_v2  ;;  %v1806_v0 = vsub.f32 %v3220_v56, %v3577_v12 }
 0x2cd   :  { %v2192_v8 = vadd.f32 %v2878_v32, %v2128_v49  ;;  %v1240_v6 = vpop.xlane.xlu0 %1239  ;;  %v3643_v54 = vmul.f32 0.0078125, %v1242_v24  ;;  %v1683_v51 = vmul.f32 %v3632_v59, %v3632_v59  ;;  %v1682_v58 = vmul.f32 %v3638_v48, %v3638_v48 }
 0x2ce   :  { %2257 = vst [vmem:[#allocation8 + $0x8] sm:$0xff] %v2193_v18  ;;  %v3654_v37 = vmul.f32 0.0078125, %v1240_v6  ;;  %v1460_v44 = vmul.f32 %v3636_v35, %v3636_v35  ;;  %v1805_v7 = vsub.f32 %v3225_v57, %v3585_v38  ;;  %v1461_v19 = vmul.f32 %v3630_v14, %v3630_v14 }
 0x2cf   :  { %2256 = vst [vmem:[#allocation8] sm:$0xff] %v2192_v8  ;;  %1313 = vadd.xlane.f32.xlu1 %v3630_v14  ;;  %v1804_v17 = vsub.f32 %v3228_v62, %v3595_v61  ;;  %v1681_v3 = vmul.f32 %v3643_v54, %v3643_v54 }
 0x2d0   :  { %v1503_v22 = vpop.xlane.xlu1 %1502  ;;  %1311 = vadd.xlane.f32.xlu0 %v3636_v35  ;;  %v1680_v38 = vmul.f32 %v3654_v37, %v3654_v37 }
 0x2d1   :  { %v2755_v52 = vpop.eup %2754  ;;  %v1619_v55 = vmul.f32 0.0078125, %v1503_v22  ;;  %v1501_v34 = vpop.xlane.xlu0 %1500 }
 0x2d2   :  { %v2757_v5 = vpop.eup %2756  ;;  %v1999_v40 = vmul.f32 %v2755_v52, %v1807_v46  ;;  %v1618_v29 = vmul.f32 0.0078125, %v1501_v34 }
 0x2d3   :  { %v1998_v56 = vmul.f32 %v2757_v5, %v1806_v0  ;;  %v1747_v12 = vsub.f32 %v1619_v55, %v1683_v51  ;;  %1574 = vadd.xlane.f32.xlu1 %v1463_v45  ;;  %v2879_v55 = vld [vmem:[#allocation2 + $0x38] sm:$0xff] }
 0x2d4   :  { %v2067_v49 = vmul.f32 %v3563_v43, %v1999_v40  ;;  %v1746_v18 = vsub.f32 %v1618_v29, %v1682_v58  ;;  %v1499_v24 = vpop.xlane.xlu1 %1498  ;;  %1572 = vadd.xlane.f32.xlu0 %v1462_v15  ;;  %v2880_v29 = vld [vmem:[#allocation2 + $0x30] sm:$0xff] }
 0x2d5   :  { %v2759_v32 = vpop.eup %2758  ;;  %v2066_v57 = vmul.f32 %v3563_v43, %v1998_v56  ;;  %v1875_v8 = vadd.f32 1e-05, %v1747_v12  ;;  %v1617_v6 = vmul.f32 0.0078125, %v1499_v24  ;;  %v1497_v46 = vpop.xlane.xlu0 %1496 }
 0x2d6   :  { %v2761_v22 = vpop.eup %2760  ;;  %v2135_v62 = vadd.f32 %v3580_v63, %v2067_v49  ;;  %v1997_v61 = vmul.f32 %v2759_v32, %v1805_v7  ;;  %v1874_v45 = vadd.f32 1e-05, %v1746_v18  ;;  %v1616_v52 = vmul.f32 0.0078125, %v1497_v46 }
 0x2d7   :  { %v2134_v0 = vadd.f32 %v3580_v63, %v2066_v57  ;;  %v1996_v51 = vmul.f32 %v2761_v22, %v1804_v17  ;;  %2762 = vrsqrt.f32 %v1875_v8  ;;  %v1745_v15 = vsub.f32 %v1617_v6, %v1681_v3  ;;  %1570 = vadd.xlane.f32.xlu1 %v1461_v19  ;;  %v2882_v57 = vld [vmem:[#allocation2 + $0x20] sm:$0xff] }
 0x2d8   :  { %v2199_v34 = vadd.f32 %v2879_v55, %v2135_v62  ;;  %v2065_v5 = vmul.f32 %v3563_v43, %v1997_v61  ;;  %2764 = vrsqrt.f32 %v1874_v45  ;;  %v1744_v40 = vsub.f32 %v1616_v52, %v1680_v38  ;;  %v1254_v58 = vpop.xlane.xlu1 %1253  ;;  %1568 = vadd.xlane.f32.xlu0 %v1460_v44 }
 0x2d9   :  { %v2198_v56 = vadd.f32 %v2880_v29, %v2134_v0  ;;  %v3677_v7 = vadd.f32 %v3402_v42, %v3190_v36  ;;  %v2064_v12 = vmul.f32 %v3563_v43, %v1996_v51  ;;  %v1873_v17 = vadd.f32 1e-05, %v1745_v15  ;;  %v1252_v49 = vpop.xlane.xlu0 %1251  ;;  %v2881_v42 = vld [vmem:[#allocation2 + $0x28] sm:$0xff] }
 0x2da   :  { %2263 = vst [vmem:[#allocation8 + $0x38] sm:$0xff] %v2199_v34  ;;  %v3682_v19 = vadd.f32 %v3390_v23, %v3190_v36  ;;  %v2133_v3 = vadd.f32 %v3580_v63, %v2065_v5  ;;  %v1872_v18 = vadd.f32 1e-05, %v1744_v40  ;;  %v3690_v23 = vadd.f32 %v3405_v50, %v3190_v36 }
 0x2db   :  { %2262 = vst [vmem:[#allocation8 + $0x30] sm:$0xff] %v2198_v56  ;;  %v2132_v44 = vadd.f32 %v3580_v63, %v2064_v12  ;;  %2766 = vrsqrt.f32 %v1873_v17  ;;  %1325 = vadd.xlane.f32.xlu1 %v3677_v7  ;;  %v3692_v8 = vmul.f32 0.0078125, %v1254_v58  ;;  %v3696_v46 = vadd.f32 %v3396_v33, %v3190_v36 }
 0x2dc   :  { %v2197_v24 = vadd.f32 %v2881_v42, %v2133_v3  ;;  %2768 = vrsqrt.f32 %v1872_v18  ;;  %v1250_v32 = vpop.xlane.xlu1 %1249  ;;  %1323 = vadd.xlane.f32.xlu0 %v3682_v19  ;;  %v3698_v22 = vmul.f32 0.0078125, %v1252_v49  ;;  %v1811_v62 = vsub.f32 %v3241_v9, %v3632_v59 }
 0x2dd   :  { %v2196_v38 = vadd.f32 %v2882_v57, %v2132_v44  ;;  %v1248_v6 = vpop.xlane.xlu0 %1247  ;;  %v3703_v61 = vmul.f32 0.0078125, %v1250_v32  ;;  %v1467_v45 = vmul.f32 %v3677_v7, %v3677_v7  ;;  %v1466_v33 = vmul.f32 %v3682_v19, %v3682_v19 }
 0x2de   :  { %2261 = vst [vmem:[#allocation8 + $0x28] sm:$0xff] %v2197_v24  ;;  %v1810_v0 = vsub.f32 %v3244_v4, %v3638_v48  ;;  %v1687_v51 = vmul.f32 %v3692_v8, %v3692_v8  ;;  %v3714_v15 = vmul.f32 0.0078125, %v1248_v6  ;;  %v1686_v5 = vmul.f32 %v3698_v22, %v3698_v22 }
 0x2df   :  { %2260 = vst [vmem:[#allocation8 + $0x20] sm:$0xff] %v2196_v38  ;;  %1321 = vadd.xlane.f32.xlu1 %v3690_v23  ;;  %v1464_v58 = vmul.f32 %v3696_v46, %v3696_v46  ;;  %v1809_v29 = vsub.f32 %v3249_v11, %v3643_v54  ;;  %v1465_v56 = vmul.f32 %v3690_v23, %v3690_v23 }
 0x2e0   :  { %v1511_v50 = vpop.xlane.xlu1 %1510  ;;  %1319 = vadd.xlane.f32.xlu0 %v3696_v46  ;;  %v1808_v12 = vsub.f32 %v3252_v10, %v3654_v37  ;;  %v1685_v49 = vmul.f32 %v3703_v61, %v3703_v61  ;;  %v1684_v54 = vmul.f32 %v3714_v15, %v3714_v15 }
 0x2e1   :  { %v2763_v52 = vpop.eup %2762  ;;  %v1623_v9 = vmul.f32 0.0078125, %v1511_v50  ;;  %v1509_v59 = vpop.xlane.xlu0 %1508 }
 0x2e2   :  { %v2765_v55 = vpop.eup %2764  ;;  %v2003_v34 = vmul.f32 %v2763_v52, %v1811_v62  ;;  %v1622_v40 = vmul.f32 0.0078125, %v1509_v59  ;;  %v2884_v59 = vld [vmem:[#allocation2 + $0x50] sm:$0xff] }
 0x2e3   :  { %v2002_v4 = vmul.f32 %v2765_v55, %v1810_v0  ;;  %v1751_v48 = vsub.f32 %v1623_v9, %v1687_v51  ;;  %1582 = vadd.xlane.f32.xlu1 %v1467_v45 }
 0x2e4   :  { %v2071_v17 = vmul.f32 %v3563_v43, %v2003_v34  ;;  %v1750_v3 = vsub.f32 %v1622_v40, %v1686_v5  ;;  %v1507_v18 = vpop.xlane.xlu1 %1506  ;;  %1580 = vadd.xlane.f32.xlu0 %v1466_v33  ;;  %v2883_v33 = vld [vmem:[#allocation2 + $0x58] sm:$0xff]  ;;  %v3737_v34 = vadd.f32 %v3426_v27, %v3190_v36  ;;  %v2885_v27 = vld [vmem:[#allocation2 + $0x48] sm:$0xff] }
 0x2e5   :  { %v2767_v44 = vpop.eup %2766  ;;  %v2070_v11 = vmul.f32 %v3563_v43, %v2002_v4  ;;  %v1879_v42 = vadd.f32 1e-05, %v1751_v48  ;;  %v1621_v24 = vmul.f32 0.0078125, %v1507_v18  ;;  %v1505_v32 = vpop.xlane.xlu0 %1504  ;;  %v3742_v4 = vadd.f32 %v3418_v21, %v3190_v36 }
 0x2e6   :  { %v2769_v57 = vpop.eup %2768  ;;  %v2139_v10 = vadd.f32 %v3580_v63, %v2071_v17  ;;  %v2001_v37 = vmul.f32 %v2767_v44, %v1809_v29  ;;  %v1878_v38 = vadd.f32 1e-05, %v1750_v3  ;;  %v1620_v6 = vmul.f32 0.0078125, %v1505_v32 }
 0x2e7   :  { %v2138_v62 = vadd.f32 %v3580_v63, %v2070_v11  ;;  %v2000_v50 = vmul.f32 %v2769_v57, %v1808_v12  ;;  %2770 = vrsqrt.f32 %v1879_v42  ;;  %v1749_v45 = vsub.f32 %v1621_v24, %v1685_v49  ;;  %1578 = vadd.xlane.f32.xlu1 %v1465_v56  ;;  %v2886_v49 = vld [vmem:[#allocation2 + $0x40] sm:$0xff] }
 0x2e8   :  { %v2203_v52 = vadd.f32 %v2883_v33, %v2139_v10  ;;  %v2069_v0 = vmul.f32 %v3563_v43, %v2001_v37  ;;  %2772 = vrsqrt.f32 %v1878_v38  ;;  %v1748_v51 = vsub.f32 %v1620_v6, %v1684_v54  ;;  %v1262_v9 = vpop.xlane.xlu1 %1261  ;;  %1576 = vadd.xlane.f32.xlu0 %v1464_v58 }
 0x2e9   :  { %v2202_v55 = vadd.f32 %v2884_v59, %v2138_v62  ;;  %v2068_v5 = vmul.f32 %v3563_v43, %v2000_v50  ;;  %v1877_v40 = vadd.f32 1e-05, %v1749_v45  ;;  %v1260_v29 = vpop.xlane.xlu0 %1259  ;;  %v3750_v21 = vadd.f32 %v3428_v16, %v3190_v36 }
 0x2ea   :  { %2267 = vst [vmem:[#allocation8 + $0x58] sm:$0xff] %v2203_v52  ;;  %v2137_v48 = vadd.f32 %v3580_v63, %v2069_v0  ;;  %v1876_v56 = vadd.f32 1e-05, %v1748_v51  ;;  %v3752_v18 = vmul.f32 0.0078125, %v1262_v9  ;;  %v3756_v11 = vadd.f32 %v3422_v1, %v3190_v36 }
 0x2eb   :  { %2266 = vst [vmem:[#allocation8 + $0x50] sm:$0xff] %v2202_v55  ;;  %v2136_v58 = vadd.f32 %v3580_v63, %v2068_v5  ;;  %2774 = vrsqrt.f32 %v1877_v40  ;;  %1333 = vadd.xlane.f32.xlu1 %v3737_v34  ;;  %v3758_v54 = vmul.f32 0.0078125, %v1260_v29  ;;  %v1815_v42 = vsub.f32 %v3271_v25, %v3692_v8 }
 0x2ec   :  { %v2201_v12 = vadd.f32 %v2885_v27, %v2137_v48  ;;  %2776 = vrsqrt.f32 %v1876_v56  ;;  %v1258_v17 = vpop.xlane.xlu1 %1257  ;;  %1331 = vadd.xlane.f32.xlu0 %v3742_v4  ;;  %v1471_v32 = vmul.f32 %v3737_v34, %v3737_v34  ;;  %v1470_v1 = vmul.f32 %v3742_v4, %v3742_v4 }
 0x2ed   :  { %v2200_v3 = vadd.f32 %v2886_v49, %v2136_v58  ;;  %v1256_v44 = vpop.xlane.xlu0 %1255  ;;  %v3763_v24 = vmul.f32 0.0078125, %v1258_v17  ;;  %v1814_v10 = vsub.f32 %v3276_v26, %v3698_v22  ;;  %v1691_v37 = vmul.f32 %v3752_v18, %v3752_v18 }
 0x2ee   :  { %2265 = vst [vmem:[#allocation8 + $0x48] sm:$0xff] %v2201_v12  ;;  %v3774_v38 = vmul.f32 0.0078125, %v1256_v44  ;;  %v1690_v50 = vmul.f32 %v3758_v54, %v3758_v54  ;;  %v1468_v33 = vmul.f32 %v3756_v11, %v3756_v11  ;;  %v1813_v52 = vsub.f32 %v3285_v28, %v3703_v61  ;;  %v2887_v44 = vld [vmem:[#allocation2 + $0x78] sm:$0xff] }
 0x2ef   :  { %2264 = vst [vmem:[#allocation8 + $0x40] sm:$0xff] %v2200_v3  ;;  %1329 = vadd.xlane.f32.xlu1 %v3750_v21  ;;  %v1469_v0 = vmul.f32 %v3750_v21, %v3750_v21  ;;  %v1812_v51 = vsub.f32 %v3288_v30, %v3714_v15  ;;  %v1689_v59 = vmul.f32 %v3763_v24, %v3763_v24 }
 0x2f0   :  { %v1519_v16 = vpop.xlane.xlu1 %1518  ;;  %1327 = vadd.xlane.f32.xlu0 %v3756_v11  ;;  %v1688_v61 = vmul.f32 %v3774_v38, %v3774_v38 }
 0x2f1   :  { %v2771_v57 = vpop.eup %2770  ;;  %v1627_v25 = vmul.f32 0.0078125, %v1519_v16  ;;  %v1517_v8 = vpop.xlane.xlu0 %1516 }
 0x2f2   :  { %v2773_v6 = vpop.eup %2772  ;;  %v2007_v62 = vmul.f32 %v2771_v57, %v1815_v42  ;;  %v1626_v45 = vmul.f32 0.0078125, %v1517_v8  ;;  %v2888_v57 = vld [vmem:[#allocation2 + $0x70] sm:$0xff] }
 0x2f3   :  { %v2006_v26 = vmul.f32 %v2773_v6, %v1814_v10  ;;  %v1755_v22 = vsub.f32 %v1627_v25, %v1691_v37  ;;  %1590 = vadd.xlane.f32.xlu1 %v1471_v32  ;;  %v3797_v37 = vadd.f32 %v3446_v13, %v3190_v36  ;;  %v2889_v13 = vld [vmem:[#allocation2 + $0x68] sm:$0xff] }
 0x2f4   :  { %v2075_v9 = vmul.f32 %v3563_v43, %v2007_v62  ;;  %v1754_v55 = vsub.f32 %v1626_v45, %v1690_v50  ;;  %v1515_v5 = vpop.xlane.xlu1 %1514  ;;  %1588 = vadd.xlane.f32.xlu0 %v1470_v1  ;;  %v3802_v62 = vadd.f32 %v3434_v20, %v3190_v36  ;;  %v3810_v20 = vadd.f32 %v3449_v60, %v3190_v36 }
 0x2f5   :  { %v2775_v40 = vpop.eup %2774  ;;  %v2074_v28 = vmul.f32 %v3563_v43, %v2006_v26  ;;  %v1883_v29 = vadd.f32 1e-05, %v1755_v22  ;;  %v1625_v48 = vmul.f32 0.0078125, %v1515_v5  ;;  %v1513_v56 = vpop.xlane.xlu0 %1512  ;;  %v2890_v22 = vld [vmem:[#allocation2 + $0x60] sm:$0xff]  ;;  %v1819_v5 = vsub.f32 %v3311_v41, %v3752_v18 }
 0x2f6   :  { %v2777_v58 = vpop.eup %2776  ;;  %v2143_v30 = vadd.f32 %v3580_v63, %v2075_v9  ;;  %v2005_v15 = vmul.f32 %v2775_v40, %v1813_v52  ;;  %v1882_v27 = vadd.f32 1e-05, %v1754_v55  ;;  %v1624_v12 = vmul.f32 0.0078125, %v1513_v56 }
 0x2f7   :  { %v2142_v17 = vadd.f32 %v3580_v63, %v2074_v28  ;;  %v2004_v49 = vmul.f32 %v2777_v58, %v1812_v51  ;;  %2778 = vrsqrt.f32 %v1883_v29  ;;  %v1753_v3 = vsub.f32 %v1625_v48, %v1689_v59  ;;  %1586 = vadd.xlane.f32.xlu1 %v1469_v0 }
 0x2f8   :  { %v2207_v42 = vadd.f32 %v2887_v44, %v2143_v30  ;;  %v2073_v16 = vmul.f32 %v3563_v43, %v2005_v15  ;;  %2780 = vrsqrt.f32 %v1882_v27  ;;  %v1752_v32 = vsub.f32 %v1624_v12, %v1688_v61  ;;  %v1270_v1 = vpop.xlane.xlu1 %1269  ;;  %1584 = vadd.xlane.f32.xlu0 %v1468_v33 }
 0x2f9   :  { %v2206_v10 = vadd.f32 %v2888_v57, %v2142_v17  ;;  %v2072_v25 = vmul.f32 %v3563_v43, %v2004_v49  ;;  %v1881_v8 = vadd.f32 1e-05, %v1753_v3  ;;  %v1268_v6 = vpop.xlane.xlu0 %1267  ;;  %v3812_v51 = vmul.f32 0.0078125, %v1270_v1  ;;  %v4296_v3 = vld [vmem:[#allocation12_spill] sm:$0xff] }
 0x2fa   :  { %2271 = vst [vmem:[#allocation8 + $0x78] sm:$0xff] %v2207_v42  ;;  %v2141_v50 = vadd.f32 %v3580_v63, %v2073_v16  ;;  %v1880_v45 = vadd.f32 1e-05, %v1752_v32  ;;  %v3816_v59 = vadd.f32 %v3440_v39, %v3190_v36  ;;  %v3818_v55 = vmul.f32 0.0078125, %v1268_v6 }
 0x2fb   :  { %2270 = vst [vmem:[#allocation8 + $0x70] sm:$0xff] %v2206_v10  ;;  %v2140_v33 = vadd.f32 %v3580_v63, %v2072_v25  ;;  %2782 = vrsqrt.f32 %v1881_v8  ;;  %1341 = vadd.xlane.f32.xlu1 %v3797_v37  ;;  %v1475_v28 = vmul.f32 %v3797_v37, %v3797_v37  ;;  %v1474_v39 = vmul.f32 %v3802_v62, %v3802_v62 }
 0x2fc   :  { %v2205_v52 = vadd.f32 %v2889_v13, %v2141_v50  ;;  %2784 = vrsqrt.f32 %v1880_v45  ;;  %v1266_v26 = vpop.xlane.xlu1 %1265  ;;  %1339 = vadd.xlane.f32.xlu0 %v3802_v62  ;;  %v1818_v29 = vsub.f32 %v3316_v47, %v3758_v54  ;;  %v1695_v48 = vmul.f32 %v3812_v51, %v3812_v51 }
 0x2fd   :  { %v2204_v0 = vadd.f32 %v2890_v22, %v2140_v33  ;;  %v1264_v9 = vpop.xlane.xlu0 %1263  ;;  %v3823_v40 = vmul.f32 0.0078125, %v1266_v26  ;;  %v1694_v15 = vmul.f32 %v3818_v55, %v3818_v55  ;;  %v1472_v12 = vmul.f32 %v3816_v59, %v3816_v59  ;;  %v2891_v22 = vld [vmem:[#allocation2 + $0x98] sm:$0xff] }
 0x2fe   :  { %2269 = vst [vmem:[#allocation8 + $0x68] sm:$0xff] %v2205_v52  ;;  %v3834_v56 = vmul.f32 0.0078125, %v1264_v9  ;;  %v1817_v17 = vsub.f32 %v3325_v53, %v3763_v24  ;;  %v1473_v49 = vmul.f32 %v3810_v20, %v3810_v20  ;;  %v1816_v44 = vsub.f32 %v4296_v3, %v3774_v38 }
 0x2ff   :  { %2268 = vst [vmem:[#allocation8 + $0x60] sm:$0xff] %v2204_v0  ;;  %1337 = vadd.xlane.f32.xlu1 %v3810_v20  ;;  %v1693_v16 = vmul.f32 %v3823_v40, %v3823_v40 }
 0x300   :  { %v1527_v60 = vpop.xlane.xlu1 %1526  ;;  %1335 = vadd.xlane.f32.xlu0 %v3816_v59  ;;  %v1692_v24 = vmul.f32 %v3834_v56, %v3834_v56 }
 0x301   :  { %v2779_v61 = vpop.eup %2778  ;;  %v1631_v41 = vmul.f32 0.0078125, %v1527_v60  ;;  %v1525_v18 = vpop.xlane.xlu0 %1524 }
 0x302   :  { %v2781_v58 = vpop.eup %2780  ;;  %v2011_v30 = vmul.f32 %v2779_v61, %v1819_v5  ;;  %v1630_v27 = vmul.f32 0.0078125, %v1525_v18  ;;  %v4297_v61 = vld [vmem:[#allocation27_spill] sm:$0xff] }
 0x303   :  { %v2010_v47 = vmul.f32 %v2781_v58, %v1818_v29  ;;  %v1759_v54 = vsub.f32 %v1631_v41, %v1695_v48  ;;  %1598 = vadd.xlane.f32.xlu1 %v1475_v28  ;;  %v2892_v28 = vld [vmem:[#allocation2 + $0x90] sm:$0xff]  ;;  %v3857_v29 = vadd.f32 %v4297_v61, %v3190_v36  ;;  %v4298_v58 = vld [vmem:[#allocation25_spill] sm:$0xff] }
 0x304   :  { %v2079_v42 = vmul.f32 %v3563_v43, %v2011_v30  ;;  %v1758_v32 = vsub.f32 %v1630_v27, %v1694_v15  ;;  %v1523_v1 = vpop.xlane.xlu1 %1522  ;;  %1596 = vadd.xlane.f32.xlu0 %v1474_v39  ;;  %v3862_v30 = vadd.f32 %v4298_v58, %v3190_v36 }
 0x305   :  { %v2783_v57 = vpop.eup %2782  ;;  %v2078_v53 = vmul.f32 %v3563_v43, %v2010_v47  ;;  %v1887_v10 = vadd.f32 1e-05, %v1759_v54  ;;  %v1629_v25 = vmul.f32 0.0078125, %v1523_v1  ;;  %v1521_v8 = vpop.xlane.xlu0 %1520  ;;  %v4299_v54 = vld [vmem:[#allocation28_spill] sm:$0xff]  ;;  %v4300_v1 = vld [vmem:[#allocation26_spill] sm:$0xff]  ;;  %v1479_v61 = vmul.f32 %v3857_v29, %v3857_v29 }
 0x306   :  { %v2785_v6 = vpop.eup %2784  ;;  %v2147_v38 = vadd.f32 %v3580_v63, %v2079_v42  ;;  %v2009_v50 = vmul.f32 %v2783_v57, %v1817_v17  ;;  %v1886_v45 = vadd.f32 1e-05, %v1758_v32  ;;  %v1628_v33 = vmul.f32 0.0078125, %v1521_v8  ;;  %v2893_v17 = vld [vmem:[#allocation2 + $0x88] sm:$0xff] }
 0x307   :  { %v2146_v13 = vadd.f32 %v3580_v63, %v2078_v53  ;;  %v2008_v52 = vmul.f32 %v2785_v6, %v1816_v44  ;;  %2786 = vrsqrt.f32 %v1887_v10  ;;  %v1757_v26 = vsub.f32 %v1629_v25, %v1693_v16  ;;  %1594 = vadd.xlane.f32.xlu1 %v1473_v49  ;;  %v2894_v44 = vld [vmem:[#allocation2 + $0x80] sm:$0xff] }
 0x308   :  { %v2211_v0 = vadd.f32 %v2891_v22, %v2147_v38  ;;  %v2077_v9 = vmul.f32 %v3563_v43, %v2009_v50  ;;  %2788 = vrsqrt.f32 %v1886_v45  ;;  %v1756_v5 = vsub.f32 %v1628_v33, %v1692_v24  ;;  %v1278_v60 = vpop.xlane.xlu1 %1277  ;;  %1592 = vadd.xlane.f32.xlu0 %v1472_v12  ;;  %v4301_v24 = vld [vmem:[#allocation13_spill] sm:$0xff]  ;;  %v4302_v50 = vld [vmem:[#allocation14_spill] sm:$0xff] }
 0x309   :  { %v2210_v39 = vadd.f32 %v2892_v28, %v2146_v13  ;;  %v2076_v48 = vmul.f32 %v3563_v43, %v2008_v52  ;;  %v1885_v41 = vadd.f32 1e-05, %v1757_v26  ;;  %v1276_v18 = vpop.xlane.xlu0 %1275  ;;  %v3869_v49 = vadd.f32 %v4299_v54, %v3190_v36 }
 0x30a   :  { %2275 = vst [vmem:[#allocation8 + $0x98] sm:$0xff] %v2211_v0  ;;  %v2145_v15 = vadd.f32 %v3580_v63, %v2077_v9  ;;  %v1884_v27 = vadd.f32 1e-05, %v1756_v5  ;;  %v3872_v16 = vmul.f32 0.0078125, %v1278_v60  ;;  %v3876_v57 = vadd.f32 %v4300_v1, %v3190_v36  ;;  %v4303_v60 = vld [vmem:[#allocation15_spill] sm:$0xff] }
 0x30b   :  { %2274 = vst [vmem:[#allocation8 + $0x90] sm:$0xff] %v2210_v39  ;;  %v2144_v12 = vadd.f32 %v3580_v63, %v2076_v48  ;;  %2790 = vrsqrt.f32 %v1885_v41  ;;  %1349 = vadd.xlane.f32.xlu1 %v3857_v29  ;;  %v3878_v53 = vmul.f32 0.0078125, %v1276_v18  ;;  %v1823_v10 = vsub.f32 %v4301_v24, %v3812_v51  ;;  %v4304_v48 = vld [vmem:[#allocation16_spill] sm:$0xff] }
 0x30c   :  { %v2209_v47 = vadd.f32 %v2893_v17, %v2145_v15  ;;  %2792 = vrsqrt.f32 %v1884_v27  ;;  %v1274_v3 = vpop.xlane.xlu1 %1273  ;;  %1347 = vadd.xlane.f32.xlu0 %v3862_v30  ;;  %v1477_v6 = vmul.f32 %v3869_v49, %v3869_v49  ;;  %v1478_v36 = vmul.f32 %v3862_v30, %v3862_v30 }
 0x30d   :  { %v2208_v42 = vadd.f32 %v2894_v44, %v2144_v12  ;;  %v1272_v32 = vpop.xlane.xlu0 %1271  ;;  %v3883_v25 = vmul.f32 0.0078125, %v1274_v3  ;;  %v1822_v45 = vsub.f32 %v4302_v50, %v3818_v55  ;;  %v1699_v33 = vmul.f32 %v3872_v16, %v3872_v16 }
 0x30e   :  { %2273 = vst [vmem:[#allocation8 + $0x88] sm:$0xff] %v2209_v47  ;;  %v3894_v13 = vmul.f32 0.0078125, %v1272_v32  ;;  %v1698_v0 = vmul.f32 %v3878_v53, %v3878_v53  ;;  %v1476_v5 = vmul.f32 %v3876_v57, %v3876_v57  ;;  %v1821_v28 = vsub.f32 %v4303_v60, %v3823_v40 }
 0x30f   :  { %2272 = vst [vmem:[#allocation8 + $0x80] sm:$0xff] %v2208_v42  ;;  %1345 = vadd.xlane.f32.xlu1 %v3869_v49  ;;  %v1820_v41 = vsub.f32 %v4304_v48, %v3834_v56  ;;  %v1697_v58 = vmul.f32 %v3883_v25, %v3883_v25 }
 0x310   :  { %v1535_v8 = vpop.xlane.xlu1 %1534  ;;  %1343 = vadd.xlane.f32.xlu0 %v3876_v57  ;;  %v1696_v17 = vmul.f32 %v3894_v13, %v3894_v13 }
 0x311   :  { %v2787_v38 = vpop.eup %2786  ;;  %v1635_v51 = vmul.f32 0.0078125, %v1535_v8  ;;  %v1533_v52 = vpop.xlane.xlu0 %1532 }
 0x312   :  { %v2789_v26 = vpop.eup %2788  ;;  %v2015_v22 = vmul.f32 %v2787_v38, %v1823_v10  ;;  %v1634_v9 = vmul.f32 0.0078125, %v1533_v52 }
 0x313   :  { %v2014_v55 = vmul.f32 %v2789_v26, %v1822_v45  ;;  %v1763_v39 = vsub.f32 %v1635_v51, %v1699_v33  ;;  %1602 = vadd.xlane.f32.xlu1 %v1477_v6  ;;  %v2895_v6 = vld [vmem:[#allocation2 + $0xb8] sm:$0xff]  ;;  %v2896_v51 = vld [vmem:[#allocation2 + $0xb0] sm:$0xff] }
 0x314   :  { %v2083_v18 = vmul.f32 %v3563_v43, %v2015_v22  ;;  %v1762_v15 = vsub.f32 %v1634_v9, %v1698_v0  ;;  %v1531_v27 = vpop.xlane.xlu1 %1530  ;;  %1600 = vadd.xlane.f32.xlu0 %v1476_v5 }
 0x315   :  { %v2791_v12 = vpop.eup %2790  ;;  %v2082_v40 = vmul.f32 %v3563_v43, %v2014_v55  ;;  %v1891_v47 = vadd.f32 1e-05, %v1763_v39  ;;  %v1633_v54 = vmul.f32 0.0078125, %v1531_v27  ;;  %v1529_v3 = vpop.xlane.xlu0 %1528 }
 0x316   :  { %v2793_v44 = vpop.eup %2792  ;;  %v2151_v56 = vadd.f32 %v3580_v63, %v2083_v18  ;;  %v2013_v42 = vmul.f32 %v2791_v12, %v1821_v28  ;;  %v1890_v32 = vadd.f32 1e-05, %v1762_v15  ;;  %v1632_v1 = vmul.f32 0.0078125, %v1529_v3  ;;  %v2897_v28 = vld [vmem:[#allocation2 + $0xa8] sm:$0xff] }
 0x317   :  { %v2150_v24 = vadd.f32 %v3580_v63, %v2082_v40  ;;  %v2012_v10 = vmul.f32 %v2793_v44, %v1820_v41  ;;  %2794 = vrsqrt.f32 %v1891_v47  ;;  %v1761_v8 = vsub.f32 %v1633_v54, %v1697_v58  ;;  %1606 = vadd.xlane.f32.xlu1 %v1479_v61  ;;  %v2898_v61 = vld [vmem:[#allocation2 + $0xa0] sm:$0xff]  ;;  %v4305_v58 = vld [vmem:[#allocation17_spill] sm:$0xff] }
 0x318   :  { %v2215_v38 = vadd.f32 %v2895_v6, %v2151_v56  ;;  %v2081_v50 = vmul.f32 %v3563_v43, %v2013_v42  ;;  %2796 = vrsqrt.f32 %v1890_v32  ;;  %v1760_v45 = vsub.f32 %v1632_v1, %v1696_v17  ;;  %v1286_v33 = vpop.xlane.xlu1 %1285  ;;  %1604 = vadd.xlane.f32.xlu0 %v1478_v36  ;;  %v4306_v17 = vld [vmem:[#allocation18_spill] sm:$0xff] }
 0x319   :  { %v2214_v52 = vadd.f32 %v2896_v51, %v2150_v24  ;;  %v2080_v26 = vmul.f32 %v3563_v43, %v2012_v10  ;;  %v1889_v22 = vadd.f32 1e-05, %v1761_v8  ;;  %v1284_v0 = vpop.xlane.xlu0 %1283  ;;  %v3918_v48 = vmul.f32 0.0078125, %v1286_v33  ;;  %v4307_v24 = vld [vmem:[#allocation19_spill] sm:$0xff] }
 0x31a   :  { %2279 = vst [vmem:[#allocation8 + $0xb8] sm:$0xff] %v2215_v38  ;;  %v2149_v9 = vadd.f32 %v3580_v63, %v2081_v50  ;;  %v1888_v5 = vadd.f32 1e-05, %v1760_v45  ;;  %v3920_v18 = vmul.f32 0.0078125, %v1284_v0  ;;  %v1827_v15 = vsub.f32 %v4305_v58, %v3872_v16 }
 0x31b   :  { %2278 = vst [vmem:[#allocation8 + $0xb0] sm:$0xff] %v2214_v52  ;;  %v2148_v60 = vadd.f32 %v3580_v63, %v2080_v26  ;;  %2798 = vrsqrt.f32 %v1889_v22  ;;  %v1826_v47 = vsub.f32 %v4306_v17, %v3878_v53  ;;  %v1703_v54 = vmul.f32 %v3918_v48, %v3918_v48  ;;  %v4308_v53 = vld [vmem:[#allocation20_spill] sm:$0xff]  ;;  %v2900_v17 = vld [vmem:[#allocation2 + $0xd0] sm:$0xff] }
 0x31c   :  { %v2213_v55 = vadd.f32 %v2897_v28, %v2149_v9  ;;  %2800 = vrsqrt.f32 %v1888_v5  ;;  %v1282_v39 = vpop.xlane.xlu1 %1281  ;;  %v1702_v1 = vmul.f32 %v3920_v18, %v3920_v18  ;;  %v1825_v10 = vsub.f32 %v4307_v24, %v3883_v25 }
 0x31d   :  { %v2212_v36 = vadd.f32 %v2898_v61, %v2148_v60  ;;  %v1280_v41 = vpop.xlane.xlu0 %1279  ;;  %v3924_v27 = vmul.f32 0.0078125, %v1282_v39  ;;  %v1824_v38 = vsub.f32 %v4308_v53, %v3894_v13 }
 0x31e   :  { %2277 = vst [vmem:[#allocation8 + $0xa8] sm:$0xff] %v2213_v55  ;;  %v3930_v3 = vmul.f32 0.0078125, %v1280_v41  ;;  %v2899_v41 = vld [vmem:[#allocation2 + $0xd8] sm:$0xff] }
 0x31f   :  { %2276 = vst [vmem:[#allocation8 + $0xa0] sm:$0xff] %v2212_v36  ;;  %v1701_v45 = vmul.f32 %v3924_v27, %v3924_v27 }
 0x320   :  { %v1543_v12 = vpop.xlane.xlu1 %1542  ;;  %v1700_v22 = vmul.f32 %v3930_v3, %v3930_v3 }
 0x321   :  { %v2795_v40 = vpop.eup %2794  ;;  %v1639_v44 = vmul.f32 0.0078125, %v1543_v12  ;;  %v1541_v56 = vpop.xlane.xlu0 %1540 }
 0x322   :  { %v2797_v42 = vpop.eup %2796  ;;  %v2019_v32 = vmul.f32 %v2795_v40, %v1827_v15  ;;  %v1638_v16 = vmul.f32 0.0078125, %v1541_v56 }
 0x323   :  { %v2018_v8 = vmul.f32 %v2797_v42, %v1826_v47  ;;  %v1767_v6 = vsub.f32 %v1639_v44, %v1703_v54 }
 0x324   :  { %v2087_v50 = vmul.f32 %v3563_v43, %v2019_v32  ;;  %v1766_v33 = vsub.f32 %v1638_v16, %v1702_v1  ;;  %v1539_v51 = vpop.xlane.xlu1 %1538  ;;  %v2901_v16 = vld [vmem:[#allocation2 + $0xc8] sm:$0xff] }
 0x325   :  { %v2799_v52 = vpop.eup %2798  ;;  %v2086_v26 = vmul.f32 %v3563_v43, %v2018_v8  ;;  %v1895_v0 = vadd.f32 1e-05, %v1767_v6  ;;  %v1637_v25 = vmul.f32 0.0078125, %v1539_v51  ;;  %v1537_v9 = vpop.xlane.xlu0 %1536  ;;  %v2902_v8 = vld [vmem:[#allocation2 + $0xc0] sm:$0xff] }
 0x326   :  { %v2801_v5 = vpop.eup %2800  ;;  %v2155_v60 = vadd.f32 %v3580_v63, %v2087_v50  ;;  %v2017_v13 = vmul.f32 %v2799_v52, %v1825_v10  ;;  %v1894_v28 = vadd.f32 1e-05, %v1766_v33  ;;  %v1636_v55 = vmul.f32 0.0078125, %v1537_v9 }
 0x327   :  { %v2154_v39 = vadd.f32 %v3580_v63, %v2086_v26  ;;  %v2016_v61 = vmul.f32 %v2801_v5, %v1824_v38  ;;  %2802 = vrsqrt.f32 %v1895_v0  ;;  %v1765_v36 = vsub.f32 %v1637_v25, %v1701_v45  ;;  %v4309_v45 = vld [vmem:[#allocation21_spill] sm:$0xff] }
 0x328   :  { %v2219_v58 = vadd.f32 %v2899_v41, %v2155_v60  ;;  %v2085_v15 = vmul.f32 %v3563_v43, %v2017_v13  ;;  %2804 = vrsqrt.f32 %v1894_v28  ;;  %v1764_v12 = vsub.f32 %v1636_v55, %v1700_v22  ;;  %v1294_v40 = vpop.xlane.xlu1 %1293  ;;  %v4310_v22 = vld [vmem:[#allocation22_spill] sm:$0xff] }
 0x329   :  { %v2218_v47 = vadd.f32 %v2900_v17, %v2154_v39  ;;  %v2084_v54 = vmul.f32 %v3563_v43, %v2016_v61  ;;  %v1893_v44 = vadd.f32 1e-05, %v1765_v36  ;;  %v1292_v56 = vpop.xlane.xlu0 %1291  ;;  %v3950_v53 = vmul.f32 0.0078125, %v1294_v40  ;;  %v4311_v39 = vld [vmem:[#allocation23_spill] sm:$0xff] }
 0x32a   :  { %2283 = vst [vmem:[#allocation8 + $0xd8] sm:$0xff] %v2219_v58  ;;  %v2153_v42 = vadd.f32 %v3580_v63, %v2085_v15  ;;  %v1892_v32 = vadd.f32 1e-05, %v1764_v12  ;;  %v3952_v50 = vmul.f32 0.0078125, %v1292_v56  ;;  %v1831_v33 = vsub.f32 %v4309_v45, %v3918_v48 }
 0x32b   :  { %2282 = vst [vmem:[#allocation8 + $0xd0] sm:$0xff] %v2218_v47  ;;  %v2152_v1 = vadd.f32 %v3580_v63, %v2084_v54  ;;  %2806 = vrsqrt.f32 %v1893_v44  ;;  %v1830_v0 = vsub.f32 %v4310_v22, %v3920_v18  ;;  %v1707_v25 = vmul.f32 %v3950_v53, %v3950_v53  ;;  %v4312_v18 = vld [vmem:[#allocation24_spill] sm:$0xff]  ;;  %v2904_v22 = vld [vmem:[#allocation2 + $0xf0] sm:$0xff] }
 0x32c   :  { %v2217_v24 = vadd.f32 %v2901_v16, %v2153_v42  ;;  %2808 = vrsqrt.f32 %v1892_v32  ;;  %v1290_v10 = vpop.xlane.xlu1 %1289  ;;  %v1706_v55 = vmul.f32 %v3952_v50, %v3952_v50  ;;  %v1829_v61 = vsub.f32 %v4311_v39, %v3924_v27 }
 0x32d   :  { %v2216_v6 = vadd.f32 %v2902_v8, %v2152_v1  ;;  %v1288_v38 = vpop.xlane.xlu0 %1287  ;;  %v3956_v51 = vmul.f32 0.0078125, %v1290_v10  ;;  %v1828_v58 = vsub.f32 %v4312_v18, %v3930_v3 }
 0x32e   :  { %2281 = vst [vmem:[#allocation8 + $0xc8] sm:$0xff] %v2217_v24  ;;  %v3962_v9 = vmul.f32 0.0078125, %v1288_v38  ;;  %v2903_v38 = vld [vmem:[#allocation2 + $0xf8] sm:$0xff] }
 0x32f   :  { %2280 = vst [vmem:[#allocation8 + $0xc0] sm:$0xff] %v2216_v6  ;;  %v1705_v12 = vmul.f32 %v3956_v51, %v3956_v51 }
 0x330   :  { %v1551_v52 = vpop.xlane.xlu1 %1550  ;;  %v1704_v44 = vmul.f32 %v3962_v9, %v3962_v9 }
 0x331   :  { %v2803_v26 = vpop.eup %2802  ;;  %v1643_v5 = vmul.f32 0.0078125, %v1551_v52  ;;  %v1549_v60 = vpop.xlane.xlu0 %1548 }
 0x332   :  { %v2805_v13 = vpop.eup %2804  ;;  %v2023_v28 = vmul.f32 %v2803_v26, %v1831_v33  ;;  %v1642_v48 = vmul.f32 0.0078125, %v1549_v60 }
 0x333   :  { %v2022_v36 = vmul.f32 %v2805_v13, %v1830_v0  ;;  %v1771_v41 = vsub.f32 %v1643_v5, %v1707_v25 }
 0x334   :  { %v2091_v15 = vmul.f32 %v3563_v43, %v2023_v28  ;;  %v1770_v40 = vsub.f32 %v1642_v48, %v1706_v55  ;;  %v1547_v17 = vpop.xlane.xlu1 %1546  ;;  %v2905_v48 = vld [vmem:[#allocation2 + $0xe8] sm:$0xff] }
 0x335   :  { %v2807_v47 = vpop.eup %2806  ;;  %v2090_v54 = vmul.f32 %v3563_v43, %v2022_v36  ;;  %v1899_v56 = vadd.f32 1e-05, %v1771_v41  ;;  %v1641_v27 = vmul.f32 0.0078125, %v1547_v17  ;;  %v1545_v42 = vpop.xlane.xlu0 %1544  ;;  %v2906_v36 = vld [vmem:[#allocation2 + $0xe0] sm:$0xff] }
 0x336   :  { %v2809_v32 = vpop.eup %2808  ;;  %v2159_v1 = vadd.f32 %v3580_v63, %v2091_v15  ;;  %v2021_v3 = vmul.f32 %v2807_v47, %v1829_v61  ;;  %v1898_v16 = vadd.f32 1e-05, %v1770_v40  ;;  %v1640_v24 = vmul.f32 0.0078125, %v1545_v42 }
 0x337   :  { %v2158_v10 = vadd.f32 %v3580_v63, %v2090_v54  ;;  %v2020_v8 = vmul.f32 %v2809_v32, %v1828_v58  ;;  %2810 = vrsqrt.f32 %v1899_v56  ;;  %v1769_v6 = vsub.f32 %v1641_v27, %v1705_v12  ;;  %v4313_v12 = vld [vmem:[#allocation29_spill] sm:$0xff] }
 0x338   :  { %v2223_v45 = vadd.f32 %v2903_v38, %v2159_v1  ;;  %v2089_v33 = vmul.f32 %v3563_v43, %v2021_v3  ;;  %2812 = vrsqrt.f32 %v1898_v16  ;;  %v1768_v52 = vsub.f32 %v1640_v24, %v1704_v44  ;;  %v1302_v26 = vpop.xlane.xlu1 %1301  ;;  %v4314_v44 = vld [vmem:[#allocation30_spill] sm:$0xff] }
 0x339   :  { %v2222_v0 = vadd.f32 %v2904_v22, %v2158_v10  ;;  %v2088_v25 = vmul.f32 %v3563_v43, %v2020_v8  ;;  %v1897_v5 = vadd.f32 1e-05, %v1769_v6  ;;  %v1300_v60 = vpop.xlane.xlu0 %1299  ;;  %v3982_v18 = vmul.f32 0.0078125, %v1302_v26  ;;  %v4315_v10 = vld [vmem:[#allocation31_spill] sm:$0xff] }
 0x33a   :  { %2287 = vst [vmem:[#allocation8 + $0xf8] sm:$0xff] %v2223_v45  ;;  %v2157_v13 = vadd.f32 %v3580_v63, %v2089_v33  ;;  %v1896_v28 = vadd.f32 1e-05, %v1768_v52  ;;  %v3984_v15 = vmul.f32 0.0078125, %v1300_v60  ;;  %v1835_v40 = vsub.f32 %v4313_v12, %v3950_v53 }
 0x33b   :  { %2286 = vst [vmem:[#allocation8 + $0xf0] sm:$0xff] %v2222_v0  ;;  %v2156_v55 = vadd.f32 %v3580_v63, %v2088_v25  ;;  %2814 = vrsqrt.f32 %v1897_v5  ;;  %v1834_v56 = vsub.f32 %v4314_v44, %v3952_v50  ;;  %v1711_v27 = vmul.f32 %v3982_v18, %v3982_v18  ;;  %v4316_v50 = vld [vmem:[#allocation32_spill] sm:$0xff]  ;;  %v2908_v44 = vld [vmem:[#allocation2 + $0x110] sm:$0xff] }
 0x33c   :  { %v2221_v39 = vadd.f32 %v2905_v48, %v2157_v13  ;;  %2816 = vrsqrt.f32 %v1896_v28  ;;  %v1298_v61 = vpop.xlane.xlu1 %1297  ;;  %v1710_v24 = vmul.f32 %v3984_v15, %v3984_v15  ;;  %v1833_v8 = vsub.f32 %v4315_v10, %v3956_v51 }
 0x33d   :  { %v2220_v41 = vadd.f32 %v2906_v36, %v2156_v55  ;;  %v1296_v58 = vpop.xlane.xlu0 %1295  ;;  %v3988_v17 = vmul.f32 0.0078125, %v1298_v61  ;;  %v1832_v45 = vsub.f32 %v4316_v50, %v3962_v9 }
 0x33e   :  { %2285 = vst [vmem:[#allocation8 + $0xe8] sm:$0xff] %v2221_v39  ;;  %v3994_v42 = vmul.f32 0.0078125, %v1296_v58  ;;  %v2907_v58 = vld [vmem:[#allocation2 + $0x118] sm:$0xff] }
 0x33f   :  { %2284 = vst [vmem:[#allocation8 + $0xe0] sm:$0xff] %v2220_v41  ;;  %v1709_v52 = vmul.f32 %v3988_v17, %v3988_v17 }
 0x340   :  { %v1559_v47 = vpop.xlane.xlu1 %1558  ;;  %v1708_v5 = vmul.f32 %v3994_v42, %v3994_v42 }
 0x341   :  { %v2811_v54 = vpop.eup %2810  ;;  %v1647_v32 = vmul.f32 0.0078125, %v1559_v47  ;;  %v1557_v1 = vpop.xlane.xlu0 %1556 }
 0x342   :  { %v2813_v3 = vpop.eup %2812  ;;  %v2027_v16 = vmul.f32 %v2811_v54, %v1835_v40  ;;  %v1646_v53 = vmul.f32 0.0078125, %v1557_v1 }
 0x343   :  { %v2026_v6 = vmul.f32 %v2813_v3, %v1834_v56  ;;  %v1775_v38 = vsub.f32 %v1647_v32, %v1711_v27 }
 0x344   :  { %v2095_v33 = vmul.f32 %v3563_v43, %v2027_v16  ;;  %v1774_v26 = vsub.f32 %v1646_v53, %v1710_v24  ;;  %v1555_v22 = vpop.xlane.xlu1 %1554  ;;  %v2909_v53 = vld [vmem:[#allocation2 + $0x108] sm:$0xff] }
 0x345   :  { %v2815_v0 = vpop.eup %2814  ;;  %v2094_v25 = vmul.f32 %v3563_v43, %v2026_v6  ;;  %v1903_v60 = vadd.f32 1e-05, %v1775_v38  ;;  %v1645_v51 = vmul.f32 0.0078125, %v1555_v22  ;;  %v1553_v13 = vpop.xlane.xlu0 %1552  ;;  %v2910_v6 = vld [vmem:[#allocation2 + $0x100] sm:$0xff] }
 0x346   :  { %v2817_v28 = vpop.eup %2816  ;;  %v2163_v55 = vadd.f32 %v3580_v63, %v2095_v33  ;;  %v2025_v9 = vmul.f32 %v2815_v0, %v1833_v8  ;;  %v1902_v48 = vadd.f32 1e-05, %v1774_v26  ;;  %v1644_v39 = vmul.f32 0.0078125, %v1553_v13 }
 0x347   :  { %v2162_v61 = vadd.f32 %v3580_v63, %v2094_v25  ;;  %v2024_v36 = vmul.f32 %v2817_v28, %v1832_v45  ;;  %2818 = vrsqrt.f32 %v1903_v60  ;;  %v1773_v41 = vsub.f32 %v1645_v51, %v1709_v52  ;;  %v4317_v52 = vld [vmem:[#allocation33_spill] sm:$0xff] }
 0x348   :  { %v2227_v12 = vadd.f32 %v2907_v58, %v2163_v55  ;;  %v2093_v40 = vmul.f32 %v3563_v43, %v2025_v9  ;;  %2820 = vrsqrt.f32 %v1902_v48  ;;  %v1772_v47 = vsub.f32 %v1644_v39, %v1708_v5  ;;  %v1310_v54 = vpop.xlane.xlu1 %1309  ;;  %v4318_v5 = vld [vmem:[#allocation34_spill] sm:$0xff] }
 0x349   :  { %v2226_v56 = vadd.f32 %v2908_v44, %v2162_v61  ;;  %v2092_v27 = vmul.f32 %v3563_v43, %v2024_v36  ;;  %v1901_v32 = vadd.f32 1e-05, %v1773_v41  ;;  %v1308_v1 = vpop.xlane.xlu0 %1307  ;;  %v4014_v50 = vmul.f32 0.0078125, %v1310_v54  ;;  %v4319_v61 = vld [vmem:[#allocation35_spill] sm:$0xff] }
 0x34a   :  { %2291 = vst [vmem:[#allocation8 + $0x118] sm:$0xff] %v2227_v12  ;;  %v2161_v3 = vadd.f32 %v3580_v63, %v2093_v40  ;;  %v1900_v16 = vadd.f32 1e-05, %v1772_v47  ;;  %v4016_v33 = vmul.f32 0.0078125, %v1308_v1  ;;  %v1839_v26 = vsub.f32 %v4317_v52, %v3982_v18 }
 0x34b   :  { %2290 = vst [vmem:[#allocation8 + $0x110] sm:$0xff] %v2226_v56  ;;  %v2160_v24 = vadd.f32 %v3580_v63, %v2092_v27  ;;  %2822 = vrsqrt.f32 %v1901_v32  ;;  %v1838_v60 = vsub.f32 %v4318_v5, %v3984_v15  ;;  %v1715_v51 = vmul.f32 %v4014_v50, %v4014_v50  ;;  %v4320_v15 = vld [vmem:[#allocation36_spill] sm:$0xff]  ;;  %v2912_v5 = vld [vmem:[#allocation2 + $0x130] sm:$0xff] }
 0x34c   :  { %v2225_v10 = vadd.f32 %v2909_v53, %v2161_v3  ;;  %2824 = vrsqrt.f32 %v1900_v16  ;;  %v1306_v8 = vpop.xlane.xlu1 %1305  ;;  %v1714_v39 = vmul.f32 %v4016_v33, %v4016_v33  ;;  %v1837_v36 = vsub.f32 %v4319_v61, %v3988_v17 }
 0x34d   :  { %v2224_v38 = vadd.f32 %v2910_v6, %v2160_v24  ;;  %v1304_v45 = vpop.xlane.xlu0 %1303  ;;  %v4020_v22 = vmul.f32 0.0078125, %v1306_v8  ;;  %v1836_v12 = vsub.f32 %v4320_v15, %v3994_v42 }
 0x34e   :  { %2289 = vst [vmem:[#allocation8 + $0x108] sm:$0xff] %v2225_v10  ;;  %v4026_v13 = vmul.f32 0.0078125, %v1304_v45  ;;  %v2911_v45 = vld [vmem:[#allocation2 + $0x138] sm:$0xff] }
 0x34f   :  { %2288 = vst [vmem:[#allocation8 + $0x100] sm:$0xff] %v2224_v38  ;;  %v1713_v47 = vmul.f32 %v4020_v22, %v4020_v22 }
 0x350   :  { %v1567_v0 = vpop.xlane.xlu1 %1566  ;;  %v1712_v32 = vmul.f32 %v4026_v13, %v4026_v13 }
 0x351   :  { %v2819_v25 = vpop.eup %2818  ;;  %v1651_v28 = vmul.f32 0.0078125, %v1567_v0  ;;  %v1565_v55 = vpop.xlane.xlu0 %1564 }
 0x352   :  { %v2821_v9 = vpop.eup %2820  ;;  %v2031_v48 = vmul.f32 %v2819_v25, %v1839_v26  ;;  %v1650_v18 = vmul.f32 0.0078125, %v1565_v55 }
 0x353   :  { %v2030_v41 = vmul.f32 %v2821_v9, %v1838_v60  ;;  %v1779_v58 = vsub.f32 %v1651_v28, %v1715_v51 }
 0x354   :  { %v2099_v40 = vmul.f32 %v3563_v43, %v2031_v48  ;;  %v1778_v54 = vsub.f32 %v1650_v18, %v1714_v39  ;;  %v1563_v44 = vpop.xlane.xlu1 %1562  ;;  %v2913_v18 = vld [vmem:[#allocation2 + $0x128] sm:$0xff] }
 0x355   :  { %v2823_v56 = vpop.eup %2822  ;;  %v2098_v27 = vmul.f32 %v3563_v43, %v2030_v41  ;;  %v1907_v1 = vadd.f32 1e-05, %v1779_v58  ;;  %v1649_v17 = vmul.f32 0.0078125, %v1563_v44  ;;  %v1561_v3 = vpop.xlane.xlu0 %1560  ;;  %v2914_v41 = vld [vmem:[#allocation2 + $0x120] sm:$0xff] }
 0x356   :  { %v2825_v16 = vpop.eup %2824  ;;  %v2167_v24 = vadd.f32 %v3580_v63, %v2099_v40  ;;  %v2029_v42 = vmul.f32 %v2823_v56, %v1837_v36  ;;  %v1906_v53 = vadd.f32 1e-05, %v1778_v54  ;;  %v1648_v10 = vmul.f32 0.0078125, %v1561_v3 }
 0x357   :  { %v2166_v8 = vadd.f32 %v3580_v63, %v2098_v27  ;;  %v2028_v6 = vmul.f32 %v2825_v16, %v1836_v12  ;;  %2826 = vrsqrt.f32 %v1907_v1  ;;  %v1777_v38 = vsub.f32 %v1649_v17, %v1713_v47  ;;  %v4321_v47 = vld [vmem:[#allocation37_spill] sm:$0xff] }
 0x358   :  { %v2231_v52 = vadd.f32 %v2911_v45, %v2167_v24  ;;  %v2097_v26 = vmul.f32 %v3563_v43, %v2029_v42  ;;  %2828 = vrsqrt.f32 %v1906_v53  ;;  %v1776_v0 = vsub.f32 %v1648_v10, %v1712_v32  ;;  %v1318_v25 = vpop.xlane.xlu1 %1317  ;;  %v4322_v32 = vld [vmem:[#allocation38_spill] sm:$0xff] }
 0x359   :  { %v2230_v60 = vadd.f32 %v2912_v5, %v2166_v8  ;;  %v2096_v51 = vmul.f32 %v3563_v43, %v2028_v6  ;;  %v1905_v28 = vadd.f32 1e-05, %v1777_v38  ;;  %v1316_v55 = vpop.xlane.xlu0 %1315  ;;  %v4046_v15 = vmul.f32 0.0078125, %v1318_v25  ;;  %v4323_v8 = vld [vmem:[#allocation39_spill] sm:$0xff] }
 0x35a   :  { %2295 = vst [vmem:[#allocation8 + $0x138] sm:$0xff] %v2231_v52  ;;  %v2165_v9 = vadd.f32 %v3580_v63, %v2097_v26  ;;  %v1904_v48 = vadd.f32 1e-05, %v1776_v0  ;;  %v4048_v40 = vmul.f32 0.0078125, %v1316_v55  ;;  %v1843_v54 = vsub.f32 %v4321_v47, %v4014_v50 }
 0x35b   :  { %2294 = vst [vmem:[#allocation8 + $0x130] sm:$0xff] %v2230_v60  ;;  %v2164_v39 = vadd.f32 %v3580_v63, %v2096_v51  ;;  %2830 = vrsqrt.f32 %v1905_v28  ;;  %v1842_v1 = vsub.f32 %v4322_v32, %v4016_v33  ;;  %v1719_v17 = vmul.f32 %v4046_v15, %v4046_v15  ;;  %v4324_v33 = vld [vmem:[#allocation40_spill] sm:$0xff]  ;;  %v2916_v32 = vld [vmem:[#allocation2 + $0x150] sm:$0xff] }
 0x35c   :  { %v2229_v61 = vadd.f32 %v2913_v18, %v2165_v9  ;;  %2832 = vrsqrt.f32 %v1904_v48  ;;  %v1314_v36 = vpop.xlane.xlu1 %1313  ;;  %v1718_v10 = vmul.f32 %v4048_v40, %v4048_v40  ;;  %v1841_v6 = vsub.f32 %v4323_v8, %v4020_v22 }
 0x35d   :  { %v2228_v58 = vadd.f32 %v2914_v41, %v2164_v39  ;;  %v1312_v12 = vpop.xlane.xlu0 %1311  ;;  %v4052_v44 = vmul.f32 0.0078125, %v1314_v36  ;;  %v1840_v52 = vsub.f32 %v4324_v33, %v4026_v13 }
 0x35e   :  { %2293 = vst [vmem:[#allocation8 + $0x128] sm:$0xff] %v2229_v61  ;;  %v4058_v3 = vmul.f32 0.0078125, %v1312_v12  ;;  %v2915_v12 = vld [vmem:[#allocation2 + $0x158] sm:$0xff] }
 0x35f   :  { %2292 = vst [vmem:[#allocation8 + $0x120] sm:$0xff] %v2228_v58  ;;  %v1717_v0 = vmul.f32 %v4052_v44, %v4052_v44 }
 0x360   :  { %v1575_v56 = vpop.xlane.xlu1 %1574  ;;  %v1716_v28 = vmul.f32 %v4058_v3, %v4058_v3 }
 0x361   :  { %v2827_v27 = vpop.eup %2826  ;;  %v1655_v16 = vmul.f32 0.0078125, %v1575_v56  ;;  %v1573_v24 = vpop.xlane.xlu0 %1572 }
 0x362   :  { %v2829_v42 = vpop.eup %2828  ;;  %v2035_v53 = vmul.f32 %v2827_v27, %v1843_v54  ;;  %v1654_v50 = vmul.f32 0.0078125, %v1573_v24 }
 0x363   :  { %v2034_v38 = vmul.f32 %v2829_v42, %v1842_v1  ;;  %v1783_v45 = vsub.f32 %v1655_v16, %v1719_v17 }
 0x364   :  { %v2103_v26 = vmul.f32 %v3563_v43, %v2035_v53  ;;  %v1782_v25 = vsub.f32 %v1654_v50, %v1718_v10  ;;  %v1571_v5 = vpop.xlane.xlu1 %1570  ;;  %v2917_v50 = vld [vmem:[#allocation2 + $0x148] sm:$0xff] }
 0x365   :  { %v2831_v60 = vpop.eup %2830  ;;  %v2102_v51 = vmul.f32 %v3563_v43, %v2034_v38  ;;  %v1911_v55 = vadd.f32 1e-05, %v1783_v45  ;;  %v1653_v22 = vmul.f32 0.0078125, %v1571_v5  ;;  %v1569_v9 = vpop.xlane.xlu0 %1568  ;;  %v2918_v38 = vld [vmem:[#allocation2 + $0x140] sm:$0xff] }
 0x366   :  { %v2833_v48 = vpop.eup %2832  ;;  %v2171_v39 = vadd.f32 %v3580_v63, %v2103_v26  ;;  %v2033_v13 = vmul.f32 %v2831_v60, %v1841_v6  ;;  %v1910_v18 = vadd.f32 1e-05, %v1782_v25  ;;  %v1652_v61 = vmul.f32 0.0078125, %v1569_v9 }
 0x367   :  { %v2170_v36 = vadd.f32 %v3580_v63, %v2102_v51  ;;  %v2032_v41 = vmul.f32 %v2833_v48, %v1840_v52  ;;  %2834 = vrsqrt.f32 %v1911_v55  ;;  %v1781_v58 = vsub.f32 %v1653_v22, %v1717_v0 }
 0x368   :  { %v2235_v47 = vadd.f32 %v2915_v12, %v2171_v39  ;;  %v2101_v54 = vmul.f32 %v3563_v43, %v2033_v13  ;;  %2836 = vrsqrt.f32 %v1910_v18  ;;  %v1780_v56 = vsub.f32 %v1652_v61, %v1716_v28  ;;  %v1326_v27 = vpop.xlane.xlu1 %1325 }
 0x369   :  { %v2234_v1 = vadd.f32 %v2916_v32, %v2170_v36  ;;  %v2100_v17 = vmul.f32 %v3563_v43, %v2032_v41  ;;  %v1909_v16 = vadd.f32 1e-05, %v1781_v58  ;;  %v1324_v24 = vpop.xlane.xlu0 %1323  ;;  %v4078_v33 = vmul.f32 0.0078125, %v1326_v27 }
 0x36a   :  { %2299 = vst [vmem:[#allocation8 + $0x158] sm:$0xff] %v2235_v47  ;;  %v2169_v42 = vadd.f32 %v3580_v63, %v2101_v54  ;;  %v1908_v53 = vadd.f32 1e-05, %v1780_v56  ;;  %v4080_v26 = vmul.f32 0.0078125, %v1324_v24  ;;  %v1847_v0 = vsub.f32 %v3617_v31, %v4046_v15 }
 0x36b   :  { %2298 = vst [vmem:[#allocation8 + $0x150] sm:$0xff] %v2234_v1  ;;  %v2168_v10 = vadd.f32 %v3580_v63, %v2100_v17  ;;  %2838 = vrsqrt.f32 %v1909_v16  ;;  %v1846_v51 = vsub.f32 %v3622_v2, %v4048_v40  ;;  %v1723_v28 = vmul.f32 %v4078_v33, %v4078_v33 }
 0x36c   :  { %v2233_v8 = vadd.f32 %v2917_v50, %v2169_v42  ;;  %2840 = vrsqrt.f32 %v1908_v53  ;;  %v1322_v6 = vpop.xlane.xlu1 %1321  ;;  %v1722_v13 = vmul.f32 %v4080_v26, %v4080_v26  ;;  %v1845_v15 = vsub.f32 %v3630_v14, %v4052_v44  ;;  %v2919_v42 = vld [vmem:[#allocation2 + $0x178] sm:$0xff] }
 0x36d   :  { %v2232_v45 = vadd.f32 %v2918_v38, %v2168_v10  ;;  %v1320_v52 = vpop.xlane.xlu0 %1319  ;;  %v4084_v25 = vmul.f32 0.0078125, %v1322_v6  ;;  %v1844_v2 = vsub.f32 %v3636_v35, %v4058_v3  ;;  %v2920_v6 = vld [vmem:[#allocation2 + $0x170] sm:$0xff] }
 0x36e   :  { %2297 = vst [vmem:[#allocation8 + $0x148] sm:$0xff] %v2233_v8  ;;  %v4090_v55 = vmul.f32 0.0078125, %v1320_v52 }
 0x36f   :  { %2296 = vst [vmem:[#allocation8 + $0x140] sm:$0xff] %v2232_v45  ;;  %v1721_v36 = vmul.f32 %v4084_v25, %v4084_v25 }
 0x370   :  { %v1583_v5 = vpop.xlane.xlu1 %1582  ;;  %v1720_v54 = vmul.f32 %v4090_v55, %v4090_v55 }
 0x371   :  { %v2835_v60 = vpop.eup %2834  ;;  %v1659_v22 = vmul.f32 0.0078125, %v1583_v5  ;;  %v1581_v9 = vpop.xlane.xlu0 %1580 }
 0x372   :  { %v2837_v48 = vpop.eup %2836  ;;  %v2039_v39 = vmul.f32 %v2835_v60, %v1847_v0  ;;  %v1658_v31 = vmul.f32 0.0078125, %v1581_v9 }
 0x373   :  { %v2038_v18 = vmul.f32 %v2837_v48, %v1846_v51  ;;  %v1787_v61 = vsub.f32 %v1659_v22, %v1723_v28  ;;  %v2921_v28 = vld [vmem:[#allocation2 + $0x168] sm:$0xff]  ;;  %v2922_v48 = vld [vmem:[#allocation2 + $0x160] sm:$0xff] }
 0x374   :  { %v2107_v40 = vmul.f32 %v3563_v43, %v2039_v39  ;;  %v1786_v41 = vsub.f32 %v1658_v31, %v1722_v13  ;;  %v1579_v58 = vpop.xlane.xlu1 %1578 }
 0x375   :  { %v2839_v12 = vpop.eup %2838  ;;  %v2106_v47 = vmul.f32 %v3563_v43, %v2038_v18  ;;  %v1915_v56 = vadd.f32 1e-05, %v1787_v61  ;;  %v1657_v14 = vmul.f32 0.0078125, %v1579_v58  ;;  %v1577_v44 = vpop.xlane.xlu0 %1576  ;;  %v1851_v18 = vsub.f32 %v3677_v7, %v4078_v33 }
 0x376   :  { %v2841_v27 = vpop.eup %2840  ;;  %v2175_v32 = vadd.f32 %v3580_v63, %v2107_v40  ;;  %v2037_v35 = vmul.f32 %v2839_v12, %v1845_v15  ;;  %v1914_v3 = vadd.f32 1e-05, %v1786_v41  ;;  %v1656_v1 = vmul.f32 0.0078125, %v1577_v44 }
 0x377   :  { %v2174_v17 = vadd.f32 %v3580_v63, %v2106_v47  ;;  %v2036_v16 = vmul.f32 %v2841_v27, %v1844_v2  ;;  %2842 = vrsqrt.f32 %v1915_v56  ;;  %v1785_v24 = vsub.f32 %v1657_v14, %v1721_v36 }
 0x378   :  { %v2239_v53 = vadd.f32 %v2919_v42, %v2175_v32  ;;  %v2105_v10 = vmul.f32 %v3563_v43, %v2037_v35  ;;  %2844 = vrsqrt.f32 %v1914_v3  ;;  %v1784_v50 = vsub.f32 %v1656_v1, %v1720_v54  ;;  %v1334_v8 = vpop.xlane.xlu1 %1333 }
 0x379   :  { %v2238_v38 = vadd.f32 %v2920_v6, %v2174_v17  ;;  %v2104_v45 = vmul.f32 %v3563_v43, %v2036_v16  ;;  %v1913_v52 = vadd.f32 1e-05, %v1785_v24  ;;  %v1332_v0 = vpop.xlane.xlu0 %1331  ;;  %v4110_v13 = vmul.f32 0.0078125, %v1334_v8 }
 0x37a   :  { %2303 = vst [vmem:[#allocation8 + $0x178] sm:$0xff] %v2239_v53  ;;  %v2173_v5 = vadd.f32 %v3580_v63, %v2105_v10  ;;  %v1912_v60 = vadd.f32 1e-05, %v1784_v50  ;;  %v4112_v15 = vmul.f32 0.0078125, %v1332_v0  ;;  %v1850_v36 = vsub.f32 %v3682_v19, %v4080_v26 }
 0x37b   :  { %2302 = vst [vmem:[#allocation8 + $0x170] sm:$0xff] %v2238_v38  ;;  %v2172_v51 = vadd.f32 %v3580_v63, %v2104_v45  ;;  %2846 = vrsqrt.f32 %v1913_v52  ;;  %v1727_v41 = vmul.f32 %v4110_v13, %v4110_v13  ;;  %v1849_v33 = vsub.f32 %v3690_v23, %v4084_v25  ;;  %v2923_v38 = vld [vmem:[#allocation2 + $0x198] sm:$0xff] }
 0x37c   :  { %v2237_v22 = vadd.f32 %v2921_v28, %v2173_v5  ;;  %2848 = vrsqrt.f32 %v1912_v60  ;;  %v1330_v9 = vpop.xlane.xlu1 %1329  ;;  %v1726_v14 = vmul.f32 %v4112_v15, %v4112_v15  ;;  %v1848_v19 = vsub.f32 %v3696_v46, %v4090_v55  ;;  %v2924_v60 = vld [vmem:[#allocation2 + $0x190] sm:$0xff] }
 0x37d   :  { %v2236_v39 = vadd.f32 %v2922_v48, %v2172_v51  ;;  %v1328_v31 = vpop.xlane.xlu0 %1327  ;;  %v4116_v61 = vmul.f32 0.0078125, %v1330_v9 }
 0x37e   :  { %2301 = vst [vmem:[#allocation8 + $0x168] sm:$0xff] %v2237_v22  ;;  %v4122_v58 = vmul.f32 0.0078125, %v1328_v31 }
 0x37f   :  { %2300 = vst [vmem:[#allocation8 + $0x160] sm:$0xff] %v2236_v39  ;;  %v1725_v32 = vmul.f32 %v4116_v61, %v4116_v61 }
 0x380   :  { %v1591_v2 = vpop.xlane.xlu1 %1590  ;;  %v1724_v16 = vmul.f32 %v4122_v58, %v4122_v58 }
 0x381   :  { %v2843_v40 = vpop.eup %2842  ;;  %v1663_v12 = vmul.f32 0.0078125, %v1591_v2  ;;  %v1589_v47 = vpop.xlane.xlu0 %1588 }
 0x382   :  { %v2845_v54 = vpop.eup %2844  ;;  %v2043_v56 = vmul.f32 %v2843_v40, %v1851_v18  ;;  %v1662_v7 = vmul.f32 0.0078125, %v1589_v47  ;;  %v2925_v18 = vld [vmem:[#allocation2 + $0x188] sm:$0xff] }
 0x383   :  { %v2042_v44 = vmul.f32 %v2845_v54, %v1850_v36  ;;  %v1791_v27 = vsub.f32 %v1663_v12, %v1727_v41  ;;  %v2926_v36 = vld [vmem:[#allocation2 + $0x180] sm:$0xff] }
 0x384   :  { %v2111_v26 = vmul.f32 %v3563_v43, %v2043_v56  ;;  %v1790_v35 = vsub.f32 %v1662_v7, %v1726_v14  ;;  %v1587_v3 = vpop.xlane.xlu1 %1586  ;;  %v1855_v56 = vsub.f32 %v3737_v34, %v4110_v13  ;;  %v1853_v13 = vsub.f32 %v3750_v21, %v4116_v61 }
 0x385   :  { %v2847_v1 = vpop.eup %2846  ;;  %v2110_v17 = vmul.f32 %v3563_v43, %v2042_v44  ;;  %v1919_v24 = vadd.f32 1e-05, %v1791_v27  ;;  %v1661_v23 = vmul.f32 0.0078125, %v1587_v3  ;;  %v1585_v25 = vpop.xlane.xlu0 %1584  ;;  %v1854_v44 = vsub.f32 %v3742_v4, %v4112_v15 }
 0x386   :  { %v2849_v42 = vpop.eup %2848  ;;  %v2179_v53 = vadd.f32 %v3580_v63, %v2111_v26  ;;  %v2041_v46 = vmul.f32 %v2847_v1, %v1849_v33  ;;  %v1918_v55 = vadd.f32 1e-05, %v1790_v35  ;;  %v1660_v10 = vmul.f32 0.0078125, %v1585_v25 }
 0x387   :  { %v2178_v50 = vadd.f32 %v3580_v63, %v2110_v17  ;;  %v2040_v8 = vmul.f32 %v2849_v42, %v1848_v19  ;;  %2850 = vrsqrt.f32 %v1919_v24  ;;  %v1789_v6 = vsub.f32 %v1661_v23, %v1725_v32 }
 0x388   :  { %v2243_v45 = vadd.f32 %v2923_v38, %v2179_v53  ;;  %v2109_v52 = vmul.f32 %v3563_v43, %v2041_v46  ;;  %2852 = vrsqrt.f32 %v1918_v55  ;;  %v1788_v0 = vsub.f32 %v1660_v10, %v1724_v16  ;;  %v1342_v5 = vpop.xlane.xlu1 %1341 }
 0x389   :  { %v2242_v51 = vadd.f32 %v2924_v60, %v2178_v50  ;;  %v2108_v28 = vmul.f32 %v3563_v43, %v2040_v8  ;;  %v1917_v22 = vadd.f32 1e-05, %v1789_v6  ;;  %v1340_v9 = vpop.xlane.xlu0 %1339  ;;  %v4142_v12 = vmul.f32 0.0078125, %v1342_v5 }
 0x38a   :  { %2307 = vst [vmem:[#allocation8 + $0x198] sm:$0xff] %v2243_v45  ;;  %v2177_v48 = vadd.f32 %v3580_v63, %v2109_v52  ;;  %v1916_v39 = vadd.f32 1e-05, %v1788_v0  ;;  %v4144_v54 = vmul.f32 0.0078125, %v1340_v9  ;;  %v1852_v4 = vsub.f32 %v3756_v11, %v4122_v58  ;;  %v2927_v52 = vld [vmem:[#allocation2 + $0x1b8] sm:$0xff] }
 0x38b   :  { %2306 = vst [vmem:[#allocation8 + $0x190] sm:$0xff] %v2242_v51  ;;  %v2176_v31 = vadd.f32 %v3580_v63, %v2108_v28  ;;  %2854 = vrsqrt.f32 %v1917_v22  ;;  %v1731_v27 = vmul.f32 %v4142_v12, %v4142_v12  ;;  %v2928_v28 = vld [vmem:[#allocation2 + $0x1b0] sm:$0xff] }
 0x38c   :  { %v2241_v2 = vadd.f32 %v2925_v18, %v2177_v48  ;;  %2856 = vrsqrt.f32 %v1916_v39  ;;  %v1338_v40 = vpop.xlane.xlu1 %1337  ;;  %v1730_v1 = vmul.f32 %v4144_v54, %v4144_v54 }
 0x38d   :  { %v2240_v41 = vadd.f32 %v2926_v36, %v2176_v31  ;;  %v1336_v47 = vpop.xlane.xlu0 %1335  ;;  %v4148_v14 = vmul.f32 0.0078125, %v1338_v40  ;;  %v2929_v40 = vld [vmem:[#allocation2 + $0x1a8] sm:$0xff] }
 0x38e   :  { %2305 = vst [vmem:[#allocation8 + $0x188] sm:$0xff] %v2241_v2  ;;  %v4154_v19 = vmul.f32 0.0078125, %v1336_v47  ;;  %v2930_v47 = vld [vmem:[#allocation2 + $0x1a0] sm:$0xff] }
 0x38f   :  { %2304 = vst [vmem:[#allocation8 + $0x180] sm:$0xff] %v2240_v41  ;;  %v1729_v24 = vmul.f32 %v4148_v14, %v4148_v14 }
 0x390   :  { %v1599_v7 = vpop.xlane.xlu1 %1598  ;;  %v1728_v46 = vmul.f32 %v4154_v19, %v4154_v19 }
 0x391   :  { %v2851_v33 = vpop.eup %2850  ;;  %v1667_v26 = vmul.f32 0.0078125, %v1599_v7  ;;  %v1597_v32 = vpop.xlane.xlu0 %1596 }
 0x392   :  { %v2853_v35 = vpop.eup %2852  ;;  %v2047_v3 = vmul.f32 %v2851_v33, %v1855_v56  ;;  %v1666_v34 = vmul.f32 0.0078125, %v1597_v32 }
 0x393   :  { %v2046_v17 = vmul.f32 %v2853_v35, %v1854_v44  ;;  %v1795_v16 = vsub.f32 %v1667_v26, %v1731_v27  ;;  %v1859_v27 = vsub.f32 %v3797_v37, %v4142_v12  ;;  %v1857_v12 = vsub.f32 %v3810_v20, %v4148_v14 }
 0x394   :  { %v2115_v15 = vmul.f32 %v3563_v43, %v2047_v3  ;;  %v1794_v23 = vsub.f32 %v1666_v34, %v1730_v1  ;;  %v1595_v25 = vpop.xlane.xlu1 %1594  ;;  %v1858_v3 = vsub.f32 %v3802_v62, %v4144_v54  ;;  %v1856_v62 = vsub.f32 %v3816_v59, %v4154_v19 }
 0x395   :  { %v2855_v42 = vpop.eup %2854  ;;  %v2114_v53 = vmul.f32 %v3563_v43, %v2046_v17  ;;  %v1923_v55 = vadd.f32 1e-05, %v1795_v16  ;;  %v1665_v21 = vmul.f32 0.0078125, %v1595_v25  ;;  %v1593_v61 = vpop.xlane.xlu0 %1592 }
 0x396   :  { %v2857_v10 = vpop.eup %2856  ;;  %v2183_v50 = vadd.f32 %v3580_v63, %v2115_v15  ;;  %v2045_v11 = vmul.f32 %v2855_v42, %v1853_v13  ;;  %v1922_v58 = vadd.f32 1e-05, %v1794_v23  ;;  %v1664_v8 = vmul.f32 0.0078125, %v1593_v61 }
 0x397   :  { %v2182_v6 = vadd.f32 %v3580_v63, %v2114_v53  ;;  %v2044_v38 = vmul.f32 %v2857_v10, %v1852_v4  ;;  %2858 = vrsqrt.f32 %v1923_v55  ;;  %v1793_v45 = vsub.f32 %v1665_v21, %v1729_v24 }
 0x398   :  { %v2247_v0 = vadd.f32 %v2927_v52, %v2183_v50  ;;  %v2113_v5 = vmul.f32 %v3563_v43, %v2045_v11  ;;  %2860 = vrsqrt.f32 %v1922_v58  ;;  %v1792_v60 = vsub.f32 %v1664_v8, %v1728_v46  ;;  %v1350_v51 = vpop.xlane.xlu1 %1349 }
 0x399   :  { %v2246_v22 = vadd.f32 %v2928_v28, %v2182_v6  ;;  %v2112_v9 = vmul.f32 %v3563_v43, %v2044_v38  ;;  %v1921_v48 = vadd.f32 1e-05, %v1793_v45  ;;  %v1348_v39 = vpop.xlane.xlu0 %1347  ;;  %v4180_v26 = vmul.f32 0.0078125, %v1350_v51  ;;  %v2931_v38 = vld [vmem:[#allocation2 + $0x1d8] sm:$0xff] }
 0x39a   :  { %2311 = vst [vmem:[#allocation8 + $0x1b8] sm:$0xff] %v2247_v0  ;;  %v2181_v31 = vadd.f32 %v3580_v63, %v2113_v5  ;;  %v1920_v18 = vadd.f32 1e-05, %v1792_v60  ;;  %v4184_v1 = vmul.f32 0.0078125, %v1348_v39  ;;  %v2932_v5 = vld [vmem:[#allocation2 + $0x1d0] sm:$0xff]  ;;  %v2933_v39 = vld [vmem:[#allocation2 + $0x1c8] sm:$0xff] }
 0x39b   :  { %2310 = vst [vmem:[#allocation8 + $0x1b0] sm:$0xff] %v2246_v22  ;;  %v2180_v2 = vadd.f32 %v3580_v63, %v2112_v9  ;;  %2862 = vrsqrt.f32 %v1921_v48  ;;  %v1735_v25 = vmul.f32 %v4180_v26, %v4180_v26 }
 0x39c   :  { %v2245_v36 = vadd.f32 %v2929_v40, %v2181_v31  ;;  %2864 = vrsqrt.f32 %v1920_v18  ;;  %v1346_v41 = vpop.xlane.xlu1 %1345  ;;  %v1734_v21 = vmul.f32 %v4184_v1, %v4184_v1  ;;  %v2934_v18 = vld [vmem:[#allocation2 + $0x1c0] sm:$0xff] }
 0x39d   :  { %v2244_v56 = vadd.f32 %v2930_v47, %v2180_v2  ;;  %v4174_v7 = vmul.f32 0.0078125, %v1346_v41  ;;  %v1344_v33 = vpop.xlane.xlu0 %1343 }
 0x39e   :  { %2309 = vst [vmem:[#allocation8 + $0x1a8] sm:$0xff] %v2245_v36  ;;  %v4176_v44 = vmul.f32 0.0078125, %v1344_v33 }
 0x39f   :  { %2308 = vst [vmem:[#allocation8 + $0x1a0] sm:$0xff] %v2244_v56  ;;  %v1733_v34 = vmul.f32 %v4174_v7, %v4174_v7  ;;  %v1861_v40 = vsub.f32 %v3869_v49, %v4174_v7 }
 0x3a0   :  { %v1603_v32 = vpop.xlane.xlu1 %1602  ;;  %v1732_v15 = vmul.f32 %v4176_v44, %v4176_v44  ;;  %v1860_v41 = vsub.f32 %v3876_v57, %v4176_v44 }
 0x3a1   :  { %v2859_v35 = vpop.eup %2858  ;;  %v1669_v13 = vmul.f32 0.0078125, %v1603_v32  ;;  %v1601_v17 = vpop.xlane.xlu0 %1600 }
 0x3a2   :  { %v2861_v16 = vpop.eup %2860  ;;  %v2051_v4 = vmul.f32 %v2859_v35, %v1859_v27  ;;  %v1668_v37 = vmul.f32 0.0078125, %v1601_v17  ;;  %v1863_v27 = vsub.f32 %v3857_v29, %v4180_v26  ;;  %v2935_v17 = vld [vmem:[#allocation2 + $0x1e8] sm:$0xff]  ;;  %v2936_v29 = vld [vmem:[#allocation2 + $0x1e0] sm:$0xff] }
 0x3a3   :  { %v2050_v24 = vmul.f32 %v2861_v16, %v1858_v3  ;;  %v1797_v23 = vsub.f32 %v1669_v13, %v1733_v34  ;;  %v1862_v3 = vsub.f32 %v3862_v30, %v4184_v1 }
 0x3a4   :  { %v2119_v54 = vmul.f32 %v3563_v43, %v2051_v4  ;;  %v1796_v42 = vsub.f32 %v1668_v37, %v1732_v15  ;;  %v1607_v53 = vpop.xlane.xlu1 %1606  ;;  %v2937_v37 = vld [vmem:[#allocation2 + $0x1f8] sm:$0xff] }
 0x3a5   :  { %v2863_v46 = vpop.eup %2862  ;;  %v2118_v55 = vmul.f32 %v3563_v43, %v2050_v24  ;;  %v1925_v61 = vadd.f32 1e-05, %v1797_v23  ;;  %v1671_v20 = vmul.f32 0.0078125, %v1607_v53  ;;  %v1605_v14 = vpop.xlane.xlu0 %1604  ;;  %v2938_v24 = vld [vmem:[#allocation2 + $0x1f0] sm:$0xff] }
 0x3a6   :  { %v2865_v10 = vpop.eup %2864  ;;  %v2187_v50 = vadd.f32 %v3580_v63, %v2119_v54  ;;  %v2049_v59 = vmul.f32 %v2863_v46, %v1857_v12  ;;  %v1924_v19 = vadd.f32 1e-05, %v1796_v42  ;;  %v1670_v11 = vmul.f32 0.0078125, %v1605_v14 }
 0x3a7   :  { %v2186_v58 = vadd.f32 %v3580_v63, %v2118_v55  ;;  %v2048_v8 = vmul.f32 %v2865_v10, %v1856_v62  ;;  %2866 = vrsqrt.f32 %v1925_v61  ;;  %v1799_v6 = vsub.f32 %v1671_v20, %v1735_v25 }
 0x3a8   :  { %v2251_v45 = vadd.f32 %v2931_v38, %v2187_v50  ;;  %v2117_v52 = vmul.f32 %v3563_v43, %v2049_v59  ;;  %2868 = vrsqrt.f32 %v1924_v19  ;;  %v1798_v0 = vsub.f32 %v1670_v11, %v1734_v21 }
 0x3a9   :  { %v2250_v60 = vadd.f32 %v2932_v5, %v2186_v58  ;;  %v2116_v51 = vmul.f32 %v3563_v43, %v2048_v8  ;;  %v1927_v28 = vadd.f32 1e-05, %v1799_v6 }
 0x3aa   :  { %2315 = vst [vmem:[#allocation8 + $0x1d8] sm:$0xff] %v2251_v45  ;;  %v2185_v22 = vadd.f32 %v3580_v63, %v2117_v52  ;;  %v1926_v9 = vadd.f32 1e-05, %v1798_v0 }
 0x3ab   :  { %2314 = vst [vmem:[#allocation8 + $0x1d0] sm:$0xff] %v2250_v60  ;;  %v2184_v48 = vadd.f32 %v3580_v63, %v2116_v51  ;;  %2870 = vrsqrt.f32 %v1927_v28 }
 0x3ac   :  { %v2249_v31 = vadd.f32 %v2933_v39, %v2185_v22  ;;  %2872 = vrsqrt.f32 %v1926_v9 }
 0x3ad   :  { %v2248_v2 = vadd.f32 %v2934_v18, %v2184_v48 }
 0x3ae   :  { %2313 = vst [vmem:[#allocation8 + $0x1c8] sm:$0xff] %v2249_v31 }
 0x3af   :  { %2312 = vst [vmem:[#allocation8 + $0x1c0] sm:$0xff] %v2248_v2 }
 0x3b1   :  { %v2867_v36 = vpop.eup %2866 }
 0x3b2   :  { %v2869_v47 = vpop.eup %2868  ;;  %v2053_v56 = vmul.f32 %v2867_v36, %v1861_v40 }
 0x3b3   :  { %v2052_v33 = vmul.f32 %v2869_v47, %v1860_v41 }
 0x3b4   :  { %v2121_v32 = vmul.f32 %v3563_v43, %v2053_v56 }
 0x3b5   :  { %v2871_v35 = vpop.eup %2870  ;;  %v2120_v34 = vmul.f32 %v3563_v43, %v2052_v33 }
 0x3b6   :  { %v2873_v13 = vpop.eup %2872  ;;  %v2189_v49 = vadd.f32 %v3580_v63, %v2121_v32  ;;  %v2055_v7 = vmul.f32 %v2871_v35, %v1863_v27 }
 0x3b7   :  { %v2188_v57 = vadd.f32 %v3580_v63, %v2120_v34  ;;  %v2054_v44 = vmul.f32 %v2873_v13, %v1862_v3 }
 0x3b8   :  { %v2253_v16 = vadd.f32 %v2935_v17, %v2189_v49  ;;  %v2123_v4 = vmul.f32 %v3563_v43, %v2055_v7 }
 0x3b9   :  { %v2252_v26 = vadd.f32 %v2936_v29, %v2188_v57  ;;  %v2122_v15 = vmul.f32 %v3563_v43, %v2054_v44 }
 0x3ba   :  { %2317 = vst [vmem:[#allocation8 + $0x1e8] sm:$0xff] %v2253_v16  ;;  %v2191_v30 = vadd.f32 %v3580_v63, %v2123_v4 }
 0x3bb   :  { %2316 = vst [vmem:[#allocation8 + $0x1e0] sm:$0xff] %v2252_v26  ;;  %v2190_v1 = vadd.f32 %v3580_v63, %v2122_v15 }
 0x3bc   :  { %v2255_v12 = vadd.f32 %v2937_v37, %v2191_v30 }
 0x3bd   :  { %v2254_v23 = vadd.f32 %v2938_v24, %v2190_v1 }
 0x3be   :  { %2319 = vst [vmem:[#allocation8 + $0x1f8] sm:$0xff] %v2255_v12 }
 0x3bf   :  { %2318 = vst [vmem:[#allocation8 + $0x1f0] sm:$0xff] %v2254_v23 }
 0x3c0   :  { %3016 = shalt.err (!%p3013_p0)
}
 0x3c1   :  { %s3017_s8 = scalar_lea.hbm %s4241_s4, 8192 }
 0x3c2   :  { %p3018_p1 = scmp.ne.s32.totalorder %s4241_s4, %s3017_s8  ;;  %p3021_p2 = scmp.lt.u32.totalorder %s3017_s8, %s4241_s4 }
 0x3c4   :  { %p3023_p3 = pnand %p3021_p2, %p3018_p1 }
 0x3c6   :  { %3026 = shalt.err (!%p3023_p3)
}
 0x3c7   :  { %2331 = dma.vmem_to_hbm [thread:$0]  %s2326_s30, 8192, %s4241_s4, [#allocation4], %s3037_s1, %s3037_s1, %s3038_s13  }
 0x3c8   :  { %3031 = dma.done.wait [#allocation4], 8192  }
 0x3c9   :  { %3032 = vsyncadd [#allocation4], 4294959104 }
 0x3ca   :  { %2335 = vsyncpa [#allocation3], 1 }
 0x3cb   :  { %2336 = vsyncpa [#allocation6], 1 }
 0x3cc   :  { %2337 = vsyncpa [#allocation4], 1 }

</bundles_post_ra>
